<compile_context>
chip_gen: v7x
topology: tpu7x:2x2x1
jax: 0.10.0
libtpu: 0.0.40
codegen_flags: <defaults>
</compile_context>

<pallas_src>
import math

import jax
import jax.numpy as jnp
import numpy as np
from jax import lax
from jax.experimental import pallas as pl
from jax.experimental.pallas import tpu as pltpu

LATENT_DIM = 32       # latent_dim
TIME_EMBED_DIM = 128  # time_embed_dim (unused in forward)
FFN_DIM = 256         # ffn_dim
NUM_HEAD = 4          # num_head
SE_DIM = 21           # se_dim == sequence length T (required by SELayer)
SE_R = 4              # se_r
BATCH = 2

_EPS = 1e-5                      # nn.LayerNorm default eps
_HI = lax.Precision.HIGHEST      # explicit per-dot precision


def _plain_recip(x):
    return 1.0 / x


def _erf(x, recip=_plain_recip):
    # Abramowitz & Stegun 7.1.26, |err| < 1.5e-7 -> keeps exact nn.GELU() (erf)
    # semantics without relying on an erf primitive lowering in Mosaic.
    s = jnp.where(x >= 0.0, 1.0, -1.0)
    ax = jnp.abs(x)
    t = recip(1.0 + 0.3275911 * ax)
    poly = t * (0.254829592 + t * (-0.284496736 + t * (1.421413741
               + t * (-1.453152027 + t * 1.061405429))))
    return s * (1.0 - poly * jnp.exp(-ax * ax))


def _gelu_exact(x, recip=_plain_recip):
    # matches torch.nn.GELU() default (erf-based)
    return 0.5 * x * (1.0 + _erf(x * (1.0 / math.sqrt(2.0)), recip))


def _layer_norm(x, gamma, beta):
    mu = jnp.mean(x, axis=-1, keepdims=True)
    var = jnp.mean(jnp.square(x - mu), axis=-1, keepdims=True)
    return (x - mu) * lax.rsqrt(var + _EPS) * gamma + beta


def _fast_recip(x):
    # EUP vrcp seed + one Newton-Raphson step -> ~f32-exact, off the VALU.
    r = pl.reciprocal(x, approx=True)
    return r * (2.0 - x * r)


def _align8(n):
    return ((n + 7) // 8) * 8


def init_params(key):
    ks = jax.random.split(key, 7)

    def unif(k, shape, fan_in):
        bound = 1.0 / math.sqrt(fan_in)
        return jax.random.uniform(k, shape, jnp.float32, -bound, bound)

    p = {}
    # SELayer excitation (bias=False)
    p["se_w1"] = unif(ks[0], (SE_DIM // SE_R, SE_DIM), SE_DIM)           # (5, 21)
    p["se_w2"] = unif(ks[1], (SE_DIM, SE_DIM // SE_R), SE_DIM // SE_R)   # (21, 5)
    # TemporalSelfAttention
    p["sa_gamma"] = jnp.ones((LATENT_DIM,), jnp.float32)
    p["sa_beta"] = jnp.zeros((LATENT_DIM,), jnp.float32)
    p["wq"] = unif(ks[2], (LATENT_DIM, LATENT_DIM), LATENT_DIM)
    p["wk"] = unif(ks[3], (LATENT_DIM, LATENT_DIM), LATENT_DIM)
    p["wv"] = unif(ks[4], (LATENT_DIM, LATENT_DIM), LATENT_DIM)
    # FFN
    p["ffn_gamma"] = jnp.ones((LATENT_DIM,), jnp.float32)
    p["ffn_beta"] = jnp.zeros((LATENT_DIM,), jnp.float32)
    p["w1"] = unif(ks[5], (FFN_DIM, LATENT_DIM), LATENT_DIM)
    p["b1"] = unif(ks[6], (FFN_DIM,), LATENT_DIM)
    p["w2"] = jnp.zeros((LATENT_DIM, FFN_DIM), jnp.float32)  # zero_module(linear2)
    p["b2"] = jnp.zeros((LATENT_DIM,), jnp.float32)          # zero_module(linear2)
    return p


@jax.jit
def decoder_layer(x, p):
    B, T, D = x.shape
    H = NUM_HEAD
    Dh = D // H
    HT = H * T
    BT = B * T
    BHT = B * HT
    FF = p["w1"].shape[0]            # ffn_dim
    SH = p["se_w1"].shape[0]         # se hidden = T // se_r
    assert p["se_w2"].shape[0] == T, "SELayer requires T == se_dim"
    f32 = jnp.float32

    # ---- projection slab: [ scaled Wq^T | Wk^T | Wv^T | pad to 128 | W1^T ] --
    QKV_W = ((3 * D + 127) // 128) * 128               # lane-dense qkv output
    wq_t = p["wq"].T * (1.0 / math.sqrt(Dh))           # fold attention scale into Wq
    qkv_t = jnp.concatenate([wq_t, p["wk"].T, p["wv"].T], axis=1)       # (D, 3D)
    qkv_t = jnp.pad(qkv_t, ((0, 0), (0, QKV_W - 3 * D)))
    w_in = jnp.concatenate([qkv_t, p["w1"].T], axis=1).astype(f32)      # (D, QKV_W+FF)

    w2_t = p["w2"].T.astype(jnp.bfloat16)                               # (FF, D)

    # ---- aux slab: LN params, biases, block-diag SE weights, attention
    #      helper constants.  Every region starts 8-row / tile aligned.
    LANES = ((max(FF, 5 * D, BHT, BT) + 127) // 128) * 128
    R_VEC = 0                                  # gamma/beta/b2 vectors
    R_B1 = 1                                   # b1
    R_SE1 = 8                                  # block-diag se_w1  (B*SH, B*T)
    R_SE2 = _align8(R_SE1 + B * SH)            # block-diag se_w2  (B*T, B*SH)
    R_QM = _align8(R_SE2 + BT)                 # query->kv batch mask (BT, BHT)
    R_M2 = _align8(R_QM + BT)                  # per-head K|V lane mask (BHT, 2D)
    R_RM = _align8(R_M2 + BHT)                 # K/V replication matrix (BHT, BT)
    R_BIG = _align8(R_RM + BHT)                # head-equality matrix (BHT, BHT)
    N_ROWS = _align8(R_BIG + BHT)

    # constant attention-structure masks (numpy -> folded at trace time)
    hr = (np.arange(BHT) % HT) // T                             # head of stacked row
    br = np.arange(BHT) // HT                                   # batch of stacked row
    mr = np.arange(BHT) % T                                     # key time of stacked row
    lane_head = (np.arange(2 * D) % D) // Dh
    mask2_np = (hr[:, None] == lane_head[None, :]).astype(np.float32)        # (BHT, 2D)
    rmat_np = ((br * T + mr)[:, None] == np.arange(BT)[None, :]).astype(np.float32)
    big_np = (hr[:, None] == hr[None, :]).astype(np.float32)                 # (BHT, BHT)
    bmask_np = (np.arange(BT)[:, None] // T ==
                np.arange(BHT)[None, :] // HT).astype(np.float32)            # (BT, BHT)

    se1_big = jnp.zeros((B * SH, BT), f32)          # block_diag(se_w1, ... x B)
    se2_big = jnp.zeros((BT, B * SH), f32)          # block_diag(se_w2, ... x B)
    for b in range(B):
        se1_big = se1_big.at[b * SH:(b + 1) * SH, b * T:(b + 1) * T].set(p["se_w1"])
        se2_big = se2_big.at[b * T:(b + 1) * T, b * SH:(b + 1) * SH].set(p["se_w2"])

    aux = jnp.zeros((N_ROWS, LANES), f32)
    aux = aux.at[R_VEC, 0 * D:1 * D].set(p["sa_gamma"])
    aux = aux.at[R_VEC, 1 * D:2 * D].set(p["sa_beta"])
    aux = aux.at[R_VEC, 2 * D:3 * D].set(p["ffn_gamma"])
    aux = aux.at[R_VEC, 3 * D:4 * D].set(p["ffn_beta"])
    aux = aux.at[R_VEC, 4 * D:5 * D].set(p["b2"])
    aux = aux.at[R_B1, 0:FF].set(p["b1"])
    aux = aux.at[R_SE1:R_SE1 + B * SH, 0:BT].set(se1_big)
    aux = aux.at[R_SE2:R_SE2 + BT, 0:B * SH].set(se2_big)
    aux = aux.at[R_QM:R_QM + BT, 0:BHT].set(bmask_np)
    aux = aux.at[R_M2:R_M2 + BHT, 0:2 * D].set(mask2_np)
    aux = aux.at[R_RM:R_RM + BHT, 0:BT].set(rmat_np)
    aux = aux.at[R_BIG:R_BIG + BHT, 0:BHT].set(big_np)

    def kernel(x_ref, w_in_ref, w2t_ref, aux_ref, o_ref):
        xv = x_ref[...]                                               # (B*T, D) f32

        # ---- SELayer:  x <- x * (1 + sigmoid(W2 relu(W1 mean_D(x)))) --------
        pooled = jnp.mean(xv, axis=1, keepdims=True)                  # (B*T, 1)
        se1 = aux_ref[R_SE1:R_SE1 + B * SH, 0:BT]
        se2 = aux_ref[R_SE2:R_SE2 + BT, 0:B * SH]
        z = jnp.maximum(jnp.dot(se1, pooled, precision=_HI,
                                preferred_element_type=jnp.float32), 0.0)
        gate = jax.nn.sigmoid(jnp.dot(se2, z, precision=_HI,
                                      preferred_element_type=jnp.float32))
        xv = xv * (1.0 + gate)

        # ---- TemporalSelfAttention (dropout = identity in eval mode) --------
        xn = _layer_norm(xv, aux_ref[R_VEC:R_VEC + 1, 0:D],
                         aux_ref[R_VEC:R_VEC + 1, D:2 * D])
        proj = jnp.dot(xn, w_in_ref[:, 0:QKV_W], precision=_HI,
                       preferred_element_type=jnp.float32)            # (B*T, 128)
        q = proj[:, 0:D]                    # attention scale already folded into Wq
        kv = proj[:, D:3 * D]                                         # (B*T, 2D)

        mask2 = aux_ref[R_M2:R_M2 + BHT, 0:2 * D]                     # (BHT, 2D)
        rmat = aux_ref[R_RM:R_RM + BHT, 0:BT]                         # (BHT, B*T)
        big = aux_ref[R_BIG:R_BIG + BHT, 0:BHT]                       # (BHT, BHT)
        bmask = aux_ref[R_QM:R_QM + BT, 0:BHT]                        # (B*T, BHT)

        # block-diagonally stacked K/V over (batch, head): row (b*HT + h*T + m)
        # keeps only head-h lanes of (k_{b,m} | v_{b,m})
        kv_stack = jnp.dot(rmat, kv, precision=_HI,
                           preferred_element_type=jnp.float32) * mask2
        ks = kv_stack[:, 0:D]                                         # (BHT, D)
        vs = kv_stack[:, D:2 * D]                                     # (BHT, D)

        s = lax.dot_general(q, ks, (((1,), (1,)), ((), ())),
                            precision=_HI,
                            preferred_element_type=jnp.float32)       # (B*T, BHT)
        # mask out cross-batch columns before the (per-row constant) max shift
        s = s * bmask + (bmask - 1.0) * 1e30
        s = s - jnp.max(s, axis=1, keepdims=True)
        e = jnp.exp(s) * bmask
        # per-(batch,head) row sums via the head-equality matrix; cross-batch
        # columns inherit the query batch's head sum so they stay finite.
        denom = jnp.dot(e, big, precision=_HI,
                        preferred_element_type=jnp.float32)           # (B*T, BHT)
        p_att = e * _fast_recip(denom)
        attn = jnp.dot(p_att, vs, precision=_HI,
                       preferred_element_type=jnp.float32)            # (B*T, D)
        xv = xv + attn

        # ---- FFN (bf16 MXU operands, f32 accumulation; linear2 zero-init) ---
        xn2 = _layer_norm(xv, aux_ref[R_VEC:R_VEC + 1, 2 * D:3 * D],
                          aux_ref[R_VEC:R_VEC + 1, 3 * D:4 * D])
        w1_bf = w_in_ref[:, QKV_W:QKV_W + FF].astype(jnp.bfloat16)
        hid = jnp.dot(xn2.astype(jnp.bfloat16), w1_bf,
                      preferred_element_type=jnp.float32) + aux_ref[R_B1:R_B1 + 1, 0:FF]
        hid = _gelu_exact(hid, recip=_fast_recip)
        y = jnp.dot(hid.astype(jnp.bfloat16), w2t_ref[...],
                    preferred_element_type=jnp.float32) + aux_ref[R_VEC:R_VEC + 1,
                                                                  4 * D:5 * D]
        o_ref[...] = (xv + y).astype(o_ref.dtype)

    # Whole problem (< 1 MB resident) fits VMEM -> single grid-less invocation
    # with whole-array blocks; no per-grid-step overhead, one contiguous
    # (B*T, D) output store and no VMEM scratch.
    out = pl.pallas_call(
        kernel,
        out_shape=jax.ShapeDtypeStruct((BT, D), x.dtype),
    )(x.reshape(BT, D), w_in, w2_t, aux)
    return out.reshape(B, T, D)


def reference(x, p):
    # Pure-JAX reference matching the PyTorch forward (eval mode), f32 matmuls.
    with jax.default_matmul_precision("highest"):
        pooled = jnp.mean(x, axis=-1)                                   # (B, T)
        z = jnp.maximum(pooled @ p["se_w1"].T, 0.0)
        gate = jax.nn.sigmoid(z @ p["se_w2"].T)                         # (B, T)
        x = x + x * gate[..., None]

        B, T, D = x.shape
        H, Dh = NUM_HEAD, D // NUM_HEAD
        xn = _layer_norm(x, p["sa_gamma"], p["sa_beta"])
        q = (xn @ p["wq"].T).reshape(B, T, H, Dh)
        k = (xn @ p["wk"].T).reshape(B, T, H, Dh)
        v = (xn @ p["wv"].T).reshape(B, T, H, Dh)
        att = jnp.einsum("bnhd,bmhd->bnmh", q, k) / math.sqrt(Dh)
        w = jax.nn.softmax(att, axis=2)
        x = x + jnp.einsum("bnmh,bmhd->bnhd", w, v).reshape(B, T, D)

        xn = _layer_norm(x, p["ffn_gamma"], p["ffn_beta"])
        hid = _gelu_exact(xn @ p["w1"].T + p["b1"])
        return x + (hid @ p["w2"].T + p["b2"])


if __name__ == "__main__":
    key = jax.random.PRNGKey(0)
    kx, kp, kw = jax.random.split(key, 3)
    x = jax.random.normal(kx, (BATCH, SE_DIM, LATENT_DIM), jnp.float32)
    params = init_params(kp)

    out = jax.block_until_ready(decoder_layer(x, params))
    ref = reference(x, params)
    np.testing.assert_allclose(np.asarray(out), np.asarray(ref),
                               rtol=5e-4, atol=5e-4)

    # Also exercise the FFN linear2 path (zero-initialized by zero_module in the
    # module, so the default-init check never touches it numerically).  The FFN
    # matmuls run with bf16 MXU operands, hence the looser tolerance here.
    kw1, kw2 = jax.random.split(kw)
    bound = 1.0 / math.sqrt(FFN_DIM)
    params_ffn = dict(params)
    params_ffn["w2"] = jax.random.uniform(kw1, (LATENT_DIM, FFN_DIM),
                                          jnp.float32, -bound, bound)
    params_ffn["b2"] = jax.random.uniform(kw2, (LATENT_DIM,),
                                          jnp.float32, -bound, bound)
    out2 = jax.block_until_ready(decoder_layer(x, params_ffn))
    ref2 = reference(x, params_ffn)
    np.testing.assert_allclose(np.asarray(out2), np.asarray(ref2),
                               rtol=2e-2, atol=2e-2)

    print("KERNEL_OK")
</pallas_src>

<mosaic_0001>
module attributes {stable_mosaic.version = 11 : i64} {
  func.func @kernel(%arg0: memref<42x32xf32, #tpu.memory_space<vmem>>, %arg1: memref<32x384xf32, #tpu.memory_space<vmem>>, %arg2: memref<256x32xbf16, #tpu.memory_space<vmem>>, %arg3: memref<624x256xf32, #tpu.memory_space<vmem>>, %arg4: memref<42x32xf32, #tpu.memory_space<vmem>>) attributes {dimension_semantics = [], scalar_prefetch = 0 : i64, scratch_operands = 0 : i64, tpu.core_type = #tpu.core_type<tc>} {
    %c0 = arith.constant 0 : index
    %c0_0 = arith.constant 0 : index
    %0 = vector.load %arg0[%c0, %c0_0] : memref<42x32xf32, #tpu.memory_space<vmem>>, vector<42x32xf32>
    %cst = arith.constant dense<0.000000e+00> : vector<42xf32>
    %1 = vector.multi_reduction <add>, %0, %cst [1] : vector<42x32xf32> to vector<42xf32>
    %2 = vector.shape_cast %1 : vector<42xf32> to vector<42x1xf32>
    %cst_1 = arith.constant 3.200000e+01 : f32
    %3 = vector.broadcast %cst_1 : f32 to vector<42x1xf32>
    %4 = arith.divf %2, %3 : vector<42x1xf32>
    %c8 = arith.constant 8 : index
    %c0_2 = arith.constant 0 : index
    %5 = vector.load %arg3[%c8, %c0_2] : memref<624x256xf32, #tpu.memory_space<vmem>>, vector<10x42xf32>
    %c24 = arith.constant 24 : index
    %c0_3 = arith.constant 0 : index
    %6 = vector.load %arg3[%c24, %c0_3] : memref<624x256xf32, #tpu.memory_space<vmem>>, vector<42x10xf32>
    %cst_4 = arith.constant dense<0.000000e+00> : vector<10x1xf32>
    %7 = tpu.matmul %5, %4, %cst_4 {dimension_numbers = #tpu.dot_dimension_numbers<[1], [0], [0], [1], [0, 0, 1, 1], [], []>, precision = #tpu.contract_precision<fp32>} : vector<10x42xf32>, vector<42x1xf32>, vector<10x1xf32> -> vector<10x1xf32>
    %cst_5 = arith.constant 0.000000e+00 : f32
    %8 = vector.broadcast %cst_5 : f32 to vector<10x1xf32>
    %9 = arith.maximumf %7, %8 : vector<10x1xf32>
    %cst_6 = arith.constant dense<0.000000e+00> : vector<42x1xf32>
    %10 = tpu.matmul %6, %9, %cst_6 {dimension_numbers = #tpu.dot_dimension_numbers<[1], [0], [0], [1], [0, 0, 1, 1], [], []>, precision = #tpu.contract_precision<fp32>} : vector<42x10xf32>, vector<10x1xf32>, vector<42x1xf32> -> vector<42x1xf32>
    %11 = arith.negf %10 : vector<42x1xf32>
    %12 = math.exp %11 : vector<42x1xf32>
    %cst_7 = arith.constant 1.000000e+00 : f32
    %13 = vector.broadcast %cst_7 : f32 to vector<42x1xf32>
    %14 = arith.addf %13, %12 : vector<42x1xf32>
    %15 = arith.divf %13, %14 : vector<42x1xf32>
    %cst_8 = arith.constant 1.000000e+00 : f32
    %16 = vector.broadcast %cst_8 : f32 to vector<42x1xf32>
    %17 = arith.addf %16, %15 : vector<42x1xf32>
    %18 = vector.broadcast %17 : vector<42x1xf32> to vector<42x32xf32>
    %19 = arith.mulf %0, %18 : vector<42x32xf32>
    %c0_9 = arith.constant 0 : index
    %c0_10 = arith.constant 0 : index
    %20 = vector.load %arg3[%c0_9, %c0_10] : memref<624x256xf32, #tpu.memory_space<vmem>>, vector<1x32xf32>
    %c0_11 = arith.constant 0 : index
    %c32 = arith.constant 32 : index
    %21 = vector.load %arg3[%c0_11, %c32] : memref<624x256xf32, #tpu.memory_space<vmem>>, vector<1x32xf32>
    %cst_12 = arith.constant dense<0.000000e+00> : vector<42xf32>
    %22 = vector.multi_reduction <add>, %19, %cst_12 [1] : vector<42x32xf32> to vector<42xf32>
    %23 = vector.shape_cast %22 : vector<42xf32> to vector<42x1xf32>
    %cst_13 = arith.constant 3.200000e+01 : f32
    %24 = vector.broadcast %cst_13 : f32 to vector<42x1xf32>
    %25 = arith.divf %23, %24 : vector<42x1xf32>
    %26 = vector.broadcast %25 : vector<42x1xf32> to vector<42x32xf32>
    %27 = arith.subf %19, %26 : vector<42x32xf32>
    %28 = arith.mulf %27, %27 : vector<42x32xf32>
    %cst_14 = arith.constant dense<0.000000e+00> : vector<42xf32>
    %29 = vector.multi_reduction <add>, %28, %cst_14 [1] : vector<42x32xf32> to vector<42xf32>
    %30 = vector.shape_cast %29 : vector<42xf32> to vector<42x1xf32>
    %cst_15 = arith.constant 3.200000e+01 : f32
    %31 = vector.broadcast %cst_15 : f32 to vector<42x1xf32>
    %32 = arith.divf %30, %31 : vector<42x1xf32>
    %33 = vector.broadcast %25 : vector<42x1xf32> to vector<42x32xf32>
    %34 = arith.subf %19, %33 : vector<42x32xf32>
    %cst_16 = arith.constant 9.99999974E-6 : f32
    %35 = vector.broadcast %cst_16 : f32 to vector<42x1xf32>
    %36 = arith.addf %32, %35 : vector<42x1xf32>
    %37 = math.rsqrt %36 : vector<42x1xf32>
    %38 = vector.broadcast %37 : vector<42x1xf32> to vector<42x32xf32>
    %39 = arith.mulf %34, %38 : vector<42x32xf32>
    %40 = vector.broadcast %20 : vector<1x32xf32> to vector<42x32xf32>
    %41 = arith.mulf %39, %40 : vector<42x32xf32>
    %42 = vector.broadcast %21 : vector<1x32xf32> to vector<42x32xf32>
    %43 = arith.addf %41, %42 : vector<42x32xf32>
    %c0_17 = arith.constant 0 : index
    %c0_18 = arith.constant 0 : index
    %44 = vector.load %arg1[%c0_17, %c0_18] : memref<32x384xf32, #tpu.memory_space<vmem>>, vector<32x128xf32>
    %cst_19 = arith.constant dense<0.000000e+00> : vector<42x128xf32>
    %45 = tpu.matmul %43, %44, %cst_19 {dimension_numbers = #tpu.dot_dimension_numbers<[1], [0], [0], [1], [0, 0, 1, 1], [], []>, precision = #tpu.contract_precision<fp32>} : vector<42x32xf32>, vector<32x128xf32>, vector<42x128xf32> -> vector<42x128xf32>
    %46 = vector.extract_strided_slice %45 {offsets = [0, 0], sizes = [42, 32], strides = [1, 1]} : vector<42x128xf32> to vector<42x32xf32>
    %47 = vector.extract_strided_slice %45 {offsets = [0, 32], sizes = [42, 64], strides = [1, 1]} : vector<42x128xf32> to vector<42x64xf32>
    %c120 = arith.constant 120 : index
    %c0_20 = arith.constant 0 : index
    %48 = vector.load %arg3[%c120, %c0_20] : memref<624x256xf32, #tpu.memory_space<vmem>>, vector<168x64xf32>
    %c288 = arith.constant 288 : index
    %c0_21 = arith.constant 0 : index
    %49 = vector.load %arg3[%c288, %c0_21] : memref<624x256xf32, #tpu.memory_space<vmem>>, vector<168x42xf32>
    %c456 = arith.constant 456 : index
    %c0_22 = arith.constant 0 : index
    %50 = vector.load %arg3[%c456, %c0_22] : memref<624x256xf32, #tpu.memory_space<vmem>>, vector<168x168xf32>
    %c72 = arith.constant 72 : index
    %c0_23 = arith.constant 0 : index
    %51 = vector.load %arg3[%c72, %c0_23] : memref<624x256xf32, #tpu.memory_space<vmem>>, vector<42x168xf32>
    %cst_24 = arith.constant dense<0.000000e+00> : vector<168x64xf32>
    %52 = tpu.matmul %49, %47, %cst_24 {dimension_numbers = #tpu.dot_dimension_numbers<[1], [0], [0], [1], [0, 0, 1, 1], [], []>, precision = #tpu.contract_precision<fp32>} : vector<168x42xf32>, vector<42x64xf32>, vector<168x64xf32> -> vector<168x64xf32>
    %53 = arith.mulf %52, %48 : vector<168x64xf32>
    %54 = vector.extract_strided_slice %53 {offsets = [0, 0], sizes = [168, 32], strides = [1, 1]} : vector<168x64xf32> to vector<168x32xf32>
    %55 = vector.extract_strided_slice %53 {offsets = [0, 32], sizes = [168, 32], strides = [1, 1]} : vector<168x64xf32> to vector<168x32xf32>
    %cst_25 = arith.constant dense<0.000000e+00> : vector<42x168xf32>
    %56 = tpu.matmul %46, %54, %cst_25 {dimension_numbers = #tpu.dot_dimension_numbers<[1], [1], [0], [0], [0, 0, 1, 0], [], []>, precision = #tpu.contract_precision<fp32>} : vector<42x32xf32>, vector<168x32xf32>, vector<42x168xf32> -> vector<42x168xf32>
    %57 = arith.mulf %56, %51 : vector<42x168xf32>
    %cst_26 = arith.constant 1.000000e+00 : f32
    %58 = vector.broadcast %cst_26 : f32 to vector<42x168xf32>
    %59 = arith.subf %51, %58 : vector<42x168xf32>
    %cst_27 = arith.constant 1.000000e+30 : f32
    %60 = vector.broadcast %cst_27 : f32 to vector<42x168xf32>
    %61 = arith.mulf %59, %60 : vector<42x168xf32>
    %62 = arith.addf %57, %61 : vector<42x168xf32>
    %cst_28 = arith.constant dense<0xFF800000> : vector<42xf32>
    %63 = vector.multi_reduction <maximumf>, %62, %cst_28 [1] : vector<42x168xf32> to vector<42xf32>
    %64 = vector.shape_cast %63 : vector<42xf32> to vector<42x1xf32>
    %65 = vector.broadcast %64 : vector<42x1xf32> to vector<42x168xf32>
    %66 = arith.subf %62, %65 : vector<42x168xf32>
    %67 = math.exp %66 : vector<42x168xf32>
    %68 = arith.mulf %67, %51 : vector<42x168xf32>
    %cst_29 = arith.constant dense<0.000000e+00> : vector<42x168xf32>
    %69 = tpu.matmul %68, %50, %cst_29 {dimension_numbers = #tpu.dot_dimension_numbers<[1], [0], [0], [1], [0, 0, 1, 1], [], []>, precision = #tpu.contract_precision<fp32>} : vector<42x168xf32>, vector<168x168xf32>, vector<42x168xf32> -> vector<42x168xf32>
    %70 = tpu.reciprocal %69 {approx = true} : vector<42x168xf32> -> vector<42x168xf32>
    %71 = arith.mulf %69, %70 : vector<42x168xf32>
    %cst_30 = arith.constant 2.000000e+00 : f32
    %72 = vector.broadcast %cst_30 : f32 to vector<42x168xf32>
    %73 = arith.subf %72, %71 : vector<42x168xf32>
    %74 = arith.mulf %70, %73 : vector<42x168xf32>
    %75 = arith.mulf %68, %74 : vector<42x168xf32>
    %cst_31 = arith.constant dense<0.000000e+00> : vector<42x32xf32>
    %76 = tpu.matmul %75, %55, %cst_31 {dimension_numbers = #tpu.dot_dimension_numbers<[1], [0], [0], [1], [0, 0, 1, 1], [], []>, precision = #tpu.contract_precision<fp32>} : vector<42x168xf32>, vector<168x32xf32>, vector<42x32xf32> -> vector<42x32xf32>
    %77 = arith.addf %19, %76 : vector<42x32xf32>
    %c0_32 = arith.constant 0 : index
    %c64 = arith.constant 64 : index
    %78 = vector.load %arg3[%c0_32, %c64] : memref<624x256xf32, #tpu.memory_space<vmem>>, vector<1x32xf32>
    %c0_33 = arith.constant 0 : index
    %c96 = arith.constant 96 : index
    %79 = vector.load %arg3[%c0_33, %c96] : memref<624x256xf32, #tpu.memory_space<vmem>>, vector<1x32xf32>
    %cst_34 = arith.constant dense<0.000000e+00> : vector<42xf32>
    %80 = vector.multi_reduction <add>, %77, %cst_34 [1] : vector<42x32xf32> to vector<42xf32>
    %81 = vector.shape_cast %80 : vector<42xf32> to vector<42x1xf32>
    %cst_35 = arith.constant 3.200000e+01 : f32
    %82 = vector.broadcast %cst_35 : f32 to vector<42x1xf32>
    %83 = arith.divf %81, %82 : vector<42x1xf32>
    %84 = vector.broadcast %83 : vector<42x1xf32> to vector<42x32xf32>
    %85 = arith.subf %77, %84 : vector<42x32xf32>
    %86 = arith.mulf %85, %85 : vector<42x32xf32>
    %cst_36 = arith.constant dense<0.000000e+00> : vector<42xf32>
    %87 = vector.multi_reduction <add>, %86, %cst_36 [1] : vector<42x32xf32> to vector<42xf32>
    %88 = vector.shape_cast %87 : vector<42xf32> to vector<42x1xf32>
    %cst_37 = arith.constant 3.200000e+01 : f32
    %89 = vector.broadcast %cst_37 : f32 to vector<42x1xf32>
    %90 = arith.divf %88, %89 : vector<42x1xf32>
    %91 = vector.broadcast %83 : vector<42x1xf32> to vector<42x32xf32>
    %92 = arith.subf %77, %91 : vector<42x32xf32>
    %cst_38 = arith.constant 9.99999974E-6 : f32
    %93 = vector.broadcast %cst_38 : f32 to vector<42x1xf32>
    %94 = arith.addf %90, %93 : vector<42x1xf32>
    %95 = math.rsqrt %94 : vector<42x1xf32>
    %96 = vector.broadcast %95 : vector<42x1xf32> to vector<42x32xf32>
    %97 = arith.mulf %92, %96 : vector<42x32xf32>
    %98 = vector.broadcast %78 : vector<1x32xf32> to vector<42x32xf32>
    %99 = arith.mulf %97, %98 : vector<42x32xf32>
    %100 = vector.broadcast %79 : vector<1x32xf32> to vector<42x32xf32>
    %101 = arith.addf %99, %100 : vector<42x32xf32>
    %c0_39 = arith.constant 0 : index
    %c128 = arith.constant 128 : index
    %102 = vector.load %arg1[%c0_39, %c128] : memref<32x384xf32, #tpu.memory_space<vmem>>, vector<32x256xf32>
    %103 = arith.truncf %102 : vector<32x256xf32> to vector<32x256xbf16>
    %104 = arith.truncf %101 : vector<42x32xf32> to vector<42x32xbf16>
    %cst_40 = arith.constant dense<0.000000e+00> : vector<42x256xf32>
    %105 = tpu.matmul %104, %103, %cst_40 {dimension_numbers = #tpu.dot_dimension_numbers<[1], [0], [0], [1], [0, 0, 1, 1], [], []>} : vector<42x32xbf16>, vector<32x256xbf16>, vector<42x256xf32> -> vector<42x256xf32>
    %c1 = arith.constant 1 : index
    %c0_41 = arith.constant 0 : index
    %106 = vector.load %arg3[%c1, %c0_41] : memref<624x256xf32, #tpu.memory_space<vmem>>, vector<1x256xf32>
    %107 = vector.broadcast %106 : vector<1x256xf32> to vector<42x256xf32>
    %108 = arith.addf %105, %107 : vector<42x256xf32>
    %cst_42 = arith.constant 5.000000e-01 : f32
    %109 = vector.broadcast %cst_42 : f32 to vector<42x256xf32>
    %110 = arith.mulf %109, %108 : vector<42x256xf32>
    %cst_43 = arith.constant 0.707106769 : f32
    %111 = vector.broadcast %cst_43 : f32 to vector<42x256xf32>
    %112 = arith.mulf %108, %111 : vector<42x256xf32>
    %cst_44 = arith.constant 0.000000e+00 : f32
    %113 = vector.broadcast %cst_44 : f32 to vector<42x256xf32>
    %114 = arith.cmpf oge, %112, %113 : vector<42x256xf32>
    %cst_45 = arith.constant 1.000000e+00 : f32
    %cst_46 = arith.constant -1.000000e+00 : f32
    %115 = vector.broadcast %cst_45 : f32 to vector<42x256xf32>
    %116 = vector.broadcast %cst_46 : f32 to vector<42x256xf32>
    %117 = arith.select %114, %115, %116 : vector<42x256xi1>, vector<42x256xf32>
    %118 = math.absf %112 : vector<42x256xf32>
    %cst_47 = arith.constant 0.327591091 : f32
    %119 = vector.broadcast %cst_47 : f32 to vector<42x256xf32>
    %120 = arith.mulf %119, %118 : vector<42x256xf32>
    %cst_48 = arith.constant 1.000000e+00 : f32
    %121 = vector.broadcast %cst_48 : f32 to vector<42x256xf32>
    %122 = arith.addf %121, %120 : vector<42x256xf32>
    %123 = tpu.reciprocal %122 {approx = true} : vector<42x256xf32> -> vector<42x256xf32>
    %124 = arith.mulf %122, %123 : vector<42x256xf32>
    %cst_49 = arith.constant 2.000000e+00 : f32
    %125 = vector.broadcast %cst_49 : f32 to vector<42x256xf32>
    %126 = arith.subf %125, %124 : vector<42x256xf32>
    %127 = arith.mulf %123, %126 : vector<42x256xf32>
    %cst_50 = arith.constant 1.06140542 : f32
    %128 = vector.broadcast %cst_50 : f32 to vector<42x256xf32>
    %129 = arith.mulf %127, %128 : vector<42x256xf32>
    %cst_51 = arith.constant -1.45315206 : f32
    %130 = vector.broadcast %cst_51 : f32 to vector<42x256xf32>
    %131 = arith.addf %130, %129 : vector<42x256xf32>
    %132 = arith.mulf %127, %131 : vector<42x256xf32>
    %cst_52 = arith.constant 1.42141378 : f32
    %133 = vector.broadcast %cst_52 : f32 to vector<42x256xf32>
    %134 = arith.addf %133, %132 : vector<42x256xf32>
    %135 = arith.mulf %127, %134 : vector<42x256xf32>
    %cst_53 = arith.constant -0.284496725 : f32
    %136 = vector.broadcast %cst_53 : f32 to vector<42x256xf32>
    %137 = arith.addf %136, %135 : vector<42x256xf32>
    %138 = arith.mulf %127, %137 : vector<42x256xf32>
    %cst_54 = arith.constant 0.254829586 : f32
    %139 = vector.broadcast %cst_54 : f32 to vector<42x256xf32>
    %140 = arith.addf %139, %138 : vector<42x256xf32>
    %141 = arith.mulf %127, %140 : vector<42x256xf32>
    %cst_55 = arith.constant 0.000000e+00 : f32
    %142 = vector.broadcast %cst_55 : f32 to vector<42x256xf32>
    %143 = arith.subf %142, %118 : vector<42x256xf32>
    %144 = arith.mulf %143, %118 : vector<42x256xf32>
    %145 = math.exp %144 : vector<42x256xf32>
    %146 = arith.mulf %141, %145 : vector<42x256xf32>
    %cst_56 = arith.constant 1.000000e+00 : f32
    %147 = vector.broadcast %cst_56 : f32 to vector<42x256xf32>
    %148 = arith.subf %147, %146 : vector<42x256xf32>
    %149 = arith.mulf %117, %148 : vector<42x256xf32>
    %cst_57 = arith.constant 1.000000e+00 : f32
    %150 = vector.broadcast %cst_57 : f32 to vector<42x256xf32>
    %151 = arith.addf %150, %149 : vector<42x256xf32>
    %152 = arith.mulf %110, %151 : vector<42x256xf32>
    %153 = arith.truncf %152 : vector<42x256xf32> to vector<42x256xbf16>
    %c0_58 = arith.constant 0 : index
    %c0_59 = arith.constant 0 : index
    %154 = vector.load %arg2[%c0_58, %c0_59] : memref<256x32xbf16, #tpu.memory_space<vmem>>, vector<256x32xbf16>
    %cst_60 = arith.constant dense<0.000000e+00> : vector<42x32xf32>
    %155 = tpu.matmul %153, %154, %cst_60 {dimension_numbers = #tpu.dot_dimension_numbers<[1], [0], [0], [1], [0, 0, 1, 1], [], []>} : vector<42x256xbf16>, vector<256x32xbf16>, vector<42x32xf32> -> vector<42x32xf32>
    %c0_61 = arith.constant 0 : index
    %c128_62 = arith.constant 128 : index
    %156 = vector.load %arg3[%c0_61, %c128_62] : memref<624x256xf32, #tpu.memory_space<vmem>>, vector<1x32xf32>
    %157 = vector.broadcast %156 : vector<1x32xf32> to vector<42x32xf32>
    %158 = arith.addf %155, %157 : vector<42x32xf32>
    %159 = arith.addf %77, %158 : vector<42x32xf32>
    %c0_63 = arith.constant 0 : index
    %c0_64 = arith.constant 0 : index
    %160 = vector.load %arg4[%c0_63, %c0_64] : memref<42x32xf32, #tpu.memory_space<vmem>>, vector<42x32xf32>
    tpu.vector_store %arg4[%c0_63, %c0_64], %159 {strides = array<i32>} : memref<42x32xf32, #tpu.memory_space<vmem>>, vector<42x32xf32>,
    return
  }
}

</mosaic_0001>

<bundles_post_ra>
// kernel: decoder_layer.1
= control target key start
LH: loop header
LB: loop body
LE: loop exit
PB: predicated region body
PF: predicated region fallthrough
CT: control target
= control target key end

     0   :  { %vm24_vm0 = vcmask 261120   ;;  %vm40_vm1 = vcmask 254976   ;;  %vm59_vm2 = vcmask 343040   ;;  %vm66_vm3 = vcmask 1041408   ;;  %s10653_s18 = smov 96   ;;  %s10657_s29 = smov 32   ;;  %s14751_s0 = inlined_call_operand.vmem [shape: f32[42,32], index: 0, kind: input, shape index: {}]   ;;  %s14752_s3 = inlined_call_operand.vmem [shape: f32[624,256], index: 3, kind: input, shape index: {}]   ;;  %s14753_s1 = inlined_call_operand.vmem [shape: f32[32,384], index: 1, kind: input, shape index: {}]   ;;  %s14754_s2 = inlined_call_operand.vmem [shape: bf16[256,32], index: 2, kind: input, shape index: {}]   ;;  %s14755_s4 = inlined_call_operand.vmem [shape: f32[42,32], index: 4, kind: output, shape index: {}]  }
   0x1   :  { %v10688_v0 = vld [vmem:[%s14751_s0 + $0x10] sm:$0xff]  ;;  %v10693_v1 = vld [vmem:[%s14751_s0] sm:$0xff]  ;;  %v10698_v2 = vld [vmem:[%s14751_s0 + $0x18] sm:$0xff]  ;;  %vm626_vm4 = vcmask 80896   ;;  %vm10655_vm5 = vmmov 0   ;;  %vm4873_vm6 = vcmask 326656  }
   0x2   :  { %v31_v3 = vsel %vm24_vm0, %v10688_v0, 0.0  ;;  %v25_v4 = vsel %vm24_vm0, %v10693_v1, 0.0  ;;  %v10707_v5 = vld [vmem:[%s14751_s0 + $0x8] sm:$0xff]  ;;  %v34_v6 = vsel %vm24_vm0, %v10698_v2, 0.0  ;;  %v10716_v8 = vld [vmem:[%s14751_s0 + $0x20] sm:$0xff]  ;;  %v51_v12 = vld [vmem:[%s14752_s3 + $0x10] sm:$0xff] }
   0x3   :  { %32 = vadd.xlane.f32.xlu1 %v31_v3  ;;  %26 = vadd.xlane.f32.xlu0 %v25_v4  ;;  %v28_v7 = vsel %vm24_vm0, %v10707_v5, 0.0  ;;  %v10721_v9 = vld [vmem:[%s14751_s0 + $0x28] sm:$0x3]  ;;  %v37_v10 = vsel %vm24_vm0, %v10716_v8, 0.0  ;;  %v61_v13 = vsel %vm59_vm2, %v51_v12, 0  ;;  %vm4895_vm7 = vcmask 320512  }
   0x4   :  { %v41_v11 = vsel %vm40_vm1, %v10721_v9, 0.0  ;;  %v10731_v14 = vand.u32 4294901760, %v61_v13  ;;  %v52_v19 = vld [vmem:[%s14752_s3 + $0x20] sm:$0x3]  ;;  %s10658_s30 = smov 64  }
   0x5   :  { %v64_v20 = vsel %vm59_vm2, %v52_v19, 0 }
   0x6   :  { %v10734_v15 = vsub.f32 %v61_v13, %v10731_v14  ;;  %v10744_v25 = vand.u32 4294901760, %v64_v20 }
   0x7   :  { %35 = vadd.xlane.f32.xlu1 %v34_v6  ;;  %29 = vadd.xlane.f32.xlu0 %v28_v7 }
   0x8   :  { %v143_v16 = vand.u32 4294901760, %v10734_v15  ;;  %v10749_v33 = vsub.f32 %v64_v20, %v10744_v25 }
   0xa   :  { %v144_v17 = vsub.f32 %v10734_v15, %v143_v16  ;;  %v153_v45 = vand.u32 4294901760, %v10749_v33 }
   0xb   :  { %38 = vadd.xlane.f32.xlu1 %v37_v10  ;;  %42 = vadd.xlane.f32.xlu0 %v41_v11 }
   0xc   :  { %v145_v18 = vand.u32 4294901760, %v144_v17  ;;  %v154_v56 = vsub.f32 %v10749_v33, %v153_v45 }
   0xe   :  { %8574 = vmatprep.mubr.f32.mxu0 %v145_v18  ;;  %v155_v4 = vand.u32 4294901760, %v154_v56 }
  0x90   :  { %v33_v21 = vpop.xlane.xlu1 %32  ;;  %v27_v22 = vpop.xlane.xlu0 %26 }
  0x91   :  { %v47_v23 = vmul.f32 0.03125, %v33_v21  ;;  %v45_v24 = vmul.f32 0.03125, %v27_v22 }
  0x93   :  { %v71_v26 = vand.u32 4294901760, %v45_v24  ;;  %v77_v27 = vand.u32 4294901760, %v47_v23 }
  0x94   :  { %v36_v28 = vpop.xlane.xlu1 %35  ;;  %v30_v29 = vpop.xlane.xlu0 %29 }
  0x95   :  { %v10746_v30 = vsub.f32 %v45_v24, %v71_v26  ;;  %v48_v31 = vmul.f32 0.03125, %v36_v28  ;;  %v46_v32 = vmul.f32 0.03125, %v30_v29  ;;  %v10751_v36 = vsub.f32 %v47_v23, %v77_v27 }
  0x97   :  { %v80_v34 = vand.u32 4294901760, %v48_v31  ;;  %v74_v35 = vand.u32 4294901760, %v46_v32  ;;  %v164_v39 = vand.u32 4294901760, %v10746_v30  ;;  %v178_v51 = vand.u32 4294901760, %v10751_v36 }
  0x98   :  { %v39_v37 = vpop.xlane.xlu1 %38  ;;  %v43_v38 = vpop.xlane.xlu0 %42 }
  0x99   :  { %v10754_v40 = vsub.f32 %v48_v31, %v80_v34  ;;  %v10756_v41 = vpack.c.bf16 %v74_v35, %v71_v26  ;;  %v10758_v42 = vsub.f32 %v46_v32, %v74_v35  ;;  %v49_v43 = vmul.f32 0.03125, %v39_v37  ;;  %v55_v31 = vld [vmem:[%s14752_s3 + $0x50] sm:$0xff] }
  0x9a   :  { %v50_v44 = vmul.f32 0.03125, %v43_v38  ;;  %v10761_v46 = vpack.c.bf16 %v80_v34, %v77_v27  ;;  %v165_v53 = vsub.f32 %v10746_v30, %v164_v39  ;;  %v179_v3 = vsub.f32 %v10751_v36, %v178_v51  ;;  %v56_v34 = vld [vmem:[%s14752_s3 + $0x60] sm:$0xff] }
  0x9b   :  { %v185_v47 = vand.u32 4294901760, %v10754_v40  ;;  %v171_v48 = vand.u32 4294901760, %v10758_v42  ;;  %9283 = vmatprep.subr.bf16.mxu0 %v10756_v41  ;;  %v83_v49 = vand.u32 4294901760, %v49_v43  ;;  %v9306_v20 = vpack.c.bf16 %v10758_v42, %v10746_v30  ;;  %v54_v30 = vld [vmem:[%s14752_s3 + $0x40] sm:$0xff] }
  0x9c   :  { %v68_v50 = vsel %vm66_vm3, %v50_v44, 0  ;;  %9285 = vmatpush3.bf16.msra.mxu0 %v10756_v41  ;;  %v166_v63 = vand.u32 4294901760, %v165_v53  ;;  %v180_v12 = vand.u32 4294901760, %v179_v3  ;;  %v9310_v21 = vpack.c.bf16 %v10754_v40, %v10751_v36  ;;  %v57_v36 = vld [vmem:[%s14752_s3 + $0x70] sm:$0xff] }
  0x9d   :  { %v86_v52 = vand.u32 4294901760, %v68_v50  ;;  %9287 = vmatprep.subr.bf16.mxu0 %v10761_v46  ;;  %v172_v54 = vsub.f32 %v10758_v42, %v171_v48  ;;  %v191_v55 = vsub.f32 %v49_v43, %v83_v49  ;;  %v186_v60 = vsub.f32 %v10754_v40, %v185_v47  ;;  %v58_v40 = vld [vmem:[%s14752_s3 + $0x80] sm:$0x3] }
  0x9e   :  { %v9330_v23 = vpack.c.bf16 %v171_v48, %v164_v39  ;;  %v9334_v24 = vpack.c.bf16 %v185_v47, %v178_v51  ;;  %v631_v32 = vsel %vm626_vm4, %v54_v30, 0  ;;  %v637_v39 = vsel %vm626_vm4, %v56_v34, 0 }
  0x9f   :  { %v10777_v57 = vpack.c.bf16 %v86_v52, %v83_v49  ;;  %v198_v58 = vsub.f32 %v68_v50, %v86_v52  ;;  %v173_v59 = vand.u32 4294901760, %v172_v54  ;;  %v192_v61 = vand.u32 4294901760, %v191_v55 }
  0xa0   :  { %9289 = vmatpush3.bf16.msra.mxu0 %v10761_v46  ;;  %v187_v7 = vand.u32 4294901760, %v186_v60  ;;  %v10843_v35 = vand.u32 4294901760, %v631_v32  ;;  %v640_v42 = vsel %vm626_vm4, %v57_v36, 0  ;;  %v10862_v48 = vand.u32 4294901760, %v637_v39 }
  0xa1   :  { %v199_v62 = vand.u32 4294901760, %v198_v58  ;;  %9291 = vmatprep.subr.bf16.mxu0 %v10777_v57  ;;  %v9294_v6 = vpack.c.bf16 %v173_v59, %v166_v63  ;;  %v193_v10 = vsub.f32 %v191_v55, %v192_v61  ;;  %v9314_v22 = vpack.c.bf16 %v198_v58, %v191_v55 }
  0xa2   :  { %v9298_v13 = vpack.c.bf16 %v187_v7, %v180_v12  ;;  %v10849_v37 = vsub.f32 %v631_v32, %v10843_v35  ;;  %v643_v49 = vsel %vm626_vm4, %v58_v40, 0  ;;  %v10866_v51 = vand.u32 4294901760, %v640_v42 }
  0xa3   :  { %v200_v11 = vsub.f32 %v198_v58, %v199_v62  ;;  %v194_v17 = vand.u32 4294901760, %v193_v10  ;;  %v746_v56 = vsub.f32 %v637_v39, %v10862_v48 }
  0xa4   :  { %9293 = vmatpush3.bf16.msra.mxu0 %v10777_v57  ;;  %v756_v58 = vsub.f32 %v640_v42, %v10866_v51 }
  0xa5   :  { %9295 = vmatprep.subr.bf16.mxu0 %v9294_v6  ;;  %v201_v18 = vand.u32 4294901760, %v200_v11  ;;  %v747_v63 = vand.u32 4294901760, %v746_v56 }
  0xa7   :  { %8575 = vmatmul.mubr.f32.vlgmr.msra.gmra.mrb[0].mxu0 %v155_v4  ;;  %v9302_v19 = vpack.c.bf16 %v201_v18, %v194_v17  ;;  %v757_v4 = vand.u32 4294901760, %v756_v58  ;;  %v748_v12 = vsub.f32 %v746_v56, %v747_v63 }
  0xa8   :  { %9297 = vmatpush3.bf16.msra.mxu0 %v9294_v6  ;;  %8589 = vmatprep.mubr.f32.mxu0 %v10731_v14 }
  0xa9   :  { %9299 = vmatprep.subr.bf16.mxu0 %v9298_v13  ;;  %v758_v17 = vsub.f32 %v756_v58, %v757_v4 }
  0xac   :  { %9301 = vmatpush3.bf16.msra.mxu0 %v9298_v13 }
  0xad   :  { %9303 = vmatprep.subr.bf16.mxu0 %v9302_v19 }
  0xb0   :  { %9305 = vmatpush3.bf16.msra.mxu0 %v9302_v19 }
  0xb1   :  { %9307 = vmatprep.subr.bf16.mxu0 %v9306_v20 }
  0xb3   :  { %8590 = vmatmul.mubr.f32.vlgmr.msra.gmra.mrb[0].mxu0 %v10744_v25 }
  0xb4   :  { %9309 = vmatpush3.bf16.msra.mxu0 %v9306_v20  ;;  %8604 = vmatprep.mubr.f32.mxu0 %v10734_v15  ;;  %v9338_v15 = vpack.c.bf16 %v199_v62, %v192_v61 }
  0xb5   :  { %9311 = vmatprep.subr.bf16.mxu0 %v9310_v21 }
  0xb8   :  { %9313 = vmatpush3.bf16.msra.mxu0 %v9310_v21 }
  0xb9   :  { %9315 = vmatprep.subr.bf16.mxu0 %v9314_v22 }
  0xbc   :  { %9317 = vmatpush3.bf16.msra.mxu0 %v9314_v22 }
  0xbd   :  { %9319 = vmatprep.subr.bf16.mxu0 %v10756_v41 }
  0xbf   :  { %8605 = vmatmul.mubr.f32.vlgmr.msra.gmra.mrb[0].mxu0 %v10749_v33  ;;  %v634_v33 = vsel %vm626_vm4, %v55_v31, 0 }
  0xc0   :  { %9321 = vmatpush3.bf16.msra.mxu0 %v10756_v41  ;;  %8619 = vmatprep.mubr.f32.mxu0 %v143_v16  ;;  %v53_v16 = vld [vmem:[%s14752_s3 + $0x30] sm:$0xff]  ;;  %v10851_v38 = vand.u32 4294901760, %v634_v33 }
  0xc1   :  { %9323 = vmatprep.subr.bf16.mxu0 %v10761_v46  ;;  %v628_v26 = vsel %vm626_vm4, %v53_v16, 0  ;;  %v759_v16 = vand.u32 4294901760, %v758_v17 }
  0xc2   :  { %v10822_v27 = vand.u32 4294901760, %v628_v26 }
  0xc4   :  { %9325 = vmatpush3.bf16.msra.mxu0 %v10761_v46  ;;  %8669 = vmatprep.mubr.f32.mxu1 %v10822_v27 }
  0xc5   :  { %9327 = vmatprep.subr.bf16.mxu0 %v10777_v57 }
  0xc8   :  { %9329 = vmatpush3.bf16.msra.mxu0 %v10777_v57 }
  0xc9   :  { %9331 = vmatprep.subr.bf16.mxu0 %v9330_v23 }
  0xcb   :  { %8620 = vmatmul.mubr.f32.vlgmr.msra.gmra.mrb[0].mxu0 %v153_v45  ;;  %v10859_v45 = vsub.f32 %v634_v33, %v10851_v38 }
  0xcc   :  { %9333 = vmatpush3.bf16.msra.mxu0 %v9330_v23  ;;  %8634 = vmatprep.mubr.f32.mxu0 %v10731_v14 }
  0xcd   :  { %9335 = vmatprep.subr.bf16.mxu0 %v9334_v24  ;;  %v737_v52 = vand.u32 4294901760, %v10859_v45 }
  0xcf   :  { %v738_v59 = vsub.f32 %v10859_v45, %v737_v52 }
  0xd0   :  { %9337 = vmatpush3.bf16.msra.mxu0 %v9334_v24  ;;  %v749_v24 = vand.u32 4294901760, %v748_v12 }
  0xd1   :  { %9339 = vmatprep.subr.bf16.mxu0 %v9338_v15  ;;  %v739_v13 = vand.u32 4294901760, %v738_v59 }
  0xd4   :  { %9341 = vmatpush3.bf16.msra.mxu0 %v9338_v15 }
  0xd5   :  { %9343 = vmatprep.subr.bf16.mxu0 %v10756_v41 }
  0xd7   :  { %8635 = vmatmul.mubr.f32.vlgmr.msra.gmra.mrb[0].mxu0 %v10744_v25 }
  0xd8   :  { %9345 = vmatpush3.bf16.msra.mxu0 %v10756_v41  ;;  %8649 = vmatprep.mubr.f32.mxu0 %v10731_v14  ;;  %v10826_v14 = vsub.f32 %v628_v26, %v10822_v27 }
  0xd9   :  { %9347 = vmatprep.subr.bf16.mxu0 %v10761_v46 }
  0xda   :  { %v717_v28 = vand.u32 4294901760, %v10826_v14 }
  0xdc   :  { %9349 = vmatpush3.bf16.msra.mxu0 %v10761_v46  ;;  %v727_v46 = vand.u32 4294901760, %v10849_v37 }
  0xdd   :  { %9351 = vmatprep.subr.bf16.mxu0 %v10777_v57 }
  0xde   :  { %v728_v53 = vsub.f32 %v10849_v37, %v727_v46 }
  0xe0   :  { %9353 = vmatpush3.bf16.msra.mxu0 %v10777_v57  ;;  %v10873_v57 = vand.u32 4294901760, %v643_v49  ;;  %v729_v6 = vand.u32 4294901760, %v728_v53 }
  0xe2   :  { %v766_v3 = vsub.f32 %v643_v49, %v10873_v57 }
  0xe3   :  { %8650 = vmatmul.mubr.f32.vlgmr.msra.gmra.mrb[0].mxu0 %v10744_v25  ;;  %v718_v25 = vsub.f32 %v10826_v14, %v717_v28 }
  0xe4   :  { %v767_v21 = vand.u32 4294901760, %v766_v3 }
  0xe5   :  { %v719_v29 = vand.u32 4294901760, %v718_v25 }
  0xe6   :  { %v768_v15 = vsub.f32 %v766_v3, %v767_v21 }
  0xe7   :  { %8656 = vmatprep.mubr.f32.mxu0 %v719_v29 }
  0xe8   :  { %v769_v25 = vand.u32 4294901760, %v768_v15 }
 0x1b6   :  { %v8651_v41 = vpop.f32.mrb[0].mxu0 }
 0x1b7   :  { %v625_v43 = vmax.f32 %v8651_v41, 0.0  ;;  %v614_v44 = vpop.f32.mrb[1].mxu0 }
 0x1b8   :  { %v624_v47 = vmax.f32 %v614_v44, 0.0 }
 0x1b9   :  { %v646_v50 = vsel %vm66_vm3, %v625_v43, 0 }
 0x1ba   :  { %v652_v54 = vand.u32 4294901760, %v646_v50  ;;  %v649_v55 = vand.u32 4294901760, %v624_v47 }
 0x1bc   :  { %v784_v60 = vsub.f32 %v646_v50, %v652_v54  ;;  %v9354_v61 = vpack.c.bf16 %v652_v54, %v649_v55  ;;  %v777_v62 = vsub.f32 %v624_v47, %v649_v55 }
 0x1be   :  { %9355 = vmatprep.subr.bf16.mxu0 %v9354_v61  ;;  %v778_v7 = vand.u32 4294901760, %v777_v62  ;;  %v785_v10 = vand.u32 4294901760, %v784_v60  ;;  %v9362_v11 = vpack.c.bf16 %v784_v60, %v777_v62 }
 0x1bf   :  { %9357 = vmatpush3.bf16.msra.mxu0 %v9354_v61 }
 0x1c0   :  { %v779_v18 = vsub.f32 %v777_v62, %v778_v7  ;;  %v786_v19 = vsub.f32 %v784_v60, %v785_v10  ;;  %v9370_v20 = vpack.c.bf16 %v785_v10, %v778_v7 }
 0x1c2   :  { %v780_v22 = vand.u32 4294901760, %v779_v18  ;;  %v787_v23 = vand.u32 4294901760, %v786_v19  ;;  %8657 = vmatmul.mubr.f32.vlgmr.msra.gmra.mrb[2].mxu0 %v729_v6 }
 0x1c3   :  { %8659 = vmatprep.mubr.f32.mxu0 %v739_v13 }
 0x1c4   :  { %v9358_v26 = vpack.c.bf16 %v787_v23, %v780_v22 }
 0x1c6   :  { %9359 = vmatprep.subr.bf16.mxu1 %v9358_v26  ;;  %8660 = vmatmul.mubr.f32.gmra.mrb[4].mxu0 %v749_v24 }
 0x1c7   :  { %9361 = vmatpush3.bf16.msra.mxu1 %v9358_v26  ;;  %8662 = vmatprep.mubr.f32.mxu0 %v759_v16 }
 0x1c8   :  { %9363 = vmatprep.subr.bf16.mxu1 %v9362_v11 }
 0x1ca   :  { %8670 = vmatmul.mubr.f32.vlgmr.msra.gmra.mrb[0].mxu1 %v10843_v35  ;;  %8663 = vmatmul.mubr.f32.gmra.mrb[6].mxu0 %v769_v25 }
 0x1cb   :  { %9365 = vmatpush3.bf16.msra.mxu1 %v9362_v11  ;;  %8672 = vmatprep.mubr.f32.mxu1 %v10851_v38 }
 0x1cc   :  { %9367 = vmatprep.subr.bf16.mxu1 %v9354_v61 }
 0x1ce   :  { %8673 = vmatmul.mubr.f32.gmra.mrb[2].mxu1 %v10862_v48 }
 0x1cf   :  { %8675 = vmatprep.mubr.f32.mxu1 %v10866_v51 }
 0x1d2   :  { %8676 = vmatmul.mubr.f32.gmra.mrb[4].mxu1 %v10873_v57 }
 0x1d3   :  { %8682 = vmatprep.mubr.f32.mxu1 %v10826_v14  ;;  %v14756_v14 = vmov 0  }
 0x1d4   :  { %10489 = vset.pattern.permute.xlu1 %v14756_v14  ;;  %10488 = vset.pattern.permute.xlu0 %v14756_v14 }
 0x1d6   :  { %8683 = vmatmul.mubr.f32.vlgmr.msra.gmra.mrb[0].mxu1 %v10849_v37 }
 0x1d7   :  { %9369 = vmatpush3.bf16.msra.mxu1 %v9354_v61  ;;  %8685 = vmatprep.mubr.f32.mxu1 %v10859_v45 }
 0x1d8   :  { %9371 = vmatprep.subr.bf16.mxu1 %v9370_v20 }
 0x1da   :  { %8686 = vmatmul.mubr.f32.gmra.mrb[2].mxu1 %v746_v56 }
 0x1db   :  { %8688 = vmatprep.mubr.f32.mxu1 %v756_v58 }
 0x1de   :  { %8689 = vmatmul.mubr.f32.gmra.mrb[4].mxu1 %v766_v3 }
 0x1df   :  { %8695 = vmatprep.mubr.f32.mxu1 %v717_v28 }
 0x1e2   :  { %8696 = vmatmul.mubr.f32.vlgmr.msra.gmra.mrb[0].mxu1 %v727_v46 }
 0x1e3   :  { %9373 = vmatpush3.bf16.msra.mxu1 %v9370_v20  ;;  %8698 = vmatprep.mubr.f32.mxu1 %v737_v52 }
 0x1e4   :  { %9375 = vmatprep.subr.bf16.mxu1 %v9354_v61 }
 0x1e6   :  { %8699 = vmatmul.mubr.f32.gmra.mrb[2].mxu1 %v747_v63 }
 0x1e7   :  { %8701 = vmatprep.mubr.f32.mxu1 %v757_v4 }
 0x1ea   :  { %8702 = vmatmul.mubr.f32.gmra.mrb[4].mxu1 %v767_v21 }
 0x1eb   :  { %8708 = vmatprep.mubr.f32.mxu1 %v10822_v27 }
 0x1ee   :  { %8709 = vmatmul.mubr.f32.vlgmr.msra.gmra.mrb[0].mxu1 %v10843_v35 }
 0x1ef   :  { %9377 = vmatpush3.bf16.msra.mxu1 %v9354_v61  ;;  %8711 = vmatprep.mubr.f32.mxu1 %v10851_v38 }
 0x1f2   :  { %8712 = vmatmul.mubr.f32.gmra.mrb[2].mxu1 %v10862_v48 }
 0x1f3   :  { %8714 = vmatprep.mubr.f32.mxu1 %v10866_v51 }
 0x1f6   :  { %8715 = vmatmul.mubr.f32.gmra.mrb[4].mxu1 %v10873_v57 }
 0x1f7   :  { %8721 = vmatprep.mubr.f32.mxu1 %v10822_v27 }
 0x1fa   :  { %8722 = vmatmul.mubr.f32.vlgmr.msra.gmra.mrb[0].mxu1 %v10843_v35 }
 0x1fb   :  { %8724 = vmatprep.mubr.f32.mxu1 %v10851_v38 }
 0x1fe   :  { %8725 = vmatmul.mubr.f32.gmra.mrb[2].mxu1 %v10862_v48 }
 0x1ff   :  { %8727 = vmatprep.mubr.f32.mxu1 %v10866_v51 }
 0x202   :  { %8728 = vmatmul.mubr.f32.gmra.mrb[4].mxu1 %v10873_v57 }
 0x295   :  { %v8658_v28 = vpop.f32.mrb[2].mxu0 }
 0x296   :  { %v721_v29 = vpop.f32.mrb[3].mxu0 }
 0x299   :  { %v8661_v30 = vpop.f32.mrb[4].mxu0 }
 0x29a   :  { %v741_v31 = vpop.f32.mrb[5].mxu0 }
 0x29d   :  { %v8664_v27 = vpop.f32.mrb[6].mxu0 }
 0x29e   :  { %v761_v32 = vpop.f32.mrb[7].mxu0 }
 0x2cd   :  { %v8723_v33 = vpop.f32.mrb[0].mxu1 }
 0x2ce   :  { %v10080_v34 = vadd.f32 %v8723_v33, %v8658_v28  ;;  %v1288_v35 = vpop.f32.mrb[1].mxu1 }
 0x2cf   :  { %v10081_v36 = vadd.f32 %v1288_v35, %v721_v29 }
 0x2d0   :  { %v8173_v37 = vmul.f32 -1.442695, %v10080_v34 }
 0x2d1   :  { %v8172_v38 = vmul.f32 -1.442695, %v10081_v36  ;;  %v8726_v39 = vpop.f32.mrb[2].mxu1 }
 0x2d2   :  { %10506 = vpow2.f32 %v8173_v37  ;;  %v10082_v40 = vadd.f32 %v8726_v39, %v8661_v30  ;;  %v1300_v41 = vpop.f32.mrb[3].mxu1 }
 0x2d3   :  { %10508 = vpow2.f32 %v8172_v38  ;;  %v10083_v42 = vadd.f32 %v1300_v41, %v741_v31 }
 0x2d4   :  { %v8175_v43 = vmul.f32 -1.442695, %v10082_v40 }
 0x2d5   :  { %v8174_v44 = vmul.f32 -1.442695, %v10083_v42  ;;  %v8729_v45 = vpop.f32.mrb[4].mxu1 }
 0x2d6   :  { %10510 = vpow2.f32 %v8175_v43  ;;  %v10084_v46 = vadd.f32 %v8729_v45, %v8664_v27  ;;  %v1312_v47 = vpop.f32.mrb[5].mxu1 }
 0x2d7   :  { %10512 = vpow2.f32 %v8174_v44  ;;  %v10085_v48 = vadd.f32 %v1312_v47, %v761_v32 }
 0x2d8   :  { %v8177_v49 = vmul.f32 -1.442695, %v10084_v46 }
 0x2d9   :  { %v8176_v50 = vmul.f32 -1.442695, %v10085_v48 }
 0x2db   :  { %10514 = vpow2.f32 %v8176_v50 }
 0x2dc   :  { %v10507_v51 = vpop.eup %10506  ;;  %10516 = vpow2.f32 %v8177_v49 }
 0x2dd   :  { %v10509_v52 = vpop.eup %10508  ;;  %v1341_v53 = vadd.f32 1.0, %v10507_v51 }
 0x2de   :  { %v1340_v54 = vadd.f32 1.0, %v10509_v52 }
 0x2df   :  { %10518 = vrcp.f32 %v1341_v53 }
 0x2e0   :  { %v10511_v55 = vpop.eup %10510  ;;  %10520 = vrcp.f32 %v1340_v54 }
 0x2e1   :  { %v10513_v56 = vpop.eup %10512  ;;  %v1343_v57 = vadd.f32 1.0, %v10511_v55 }
 0x2e2   :  { %v1342_v58 = vadd.f32 1.0, %v10513_v56 }
 0x2e3   :  { %10522 = vrcp.f32 %v1343_v57 }
 0x2e4   :  { %10524 = vrcp.f32 %v1342_v58 }
 0x2e5   :  { %v10515_v59 = vpop.eup %10514 }
 0x2e6   :  { %v10517_v60 = vpop.eup %10516  ;;  %v1344_v61 = vadd.f32 1.0, %v10515_v59 }
 0x2e7   :  { %v1345_v63 = vadd.f32 1.0, %v10517_v60  ;;  %v10973_v60 = vld [vmem:[%s14752_s3] ss:$0 sm:$0xff] }
 0x2e8   :  { %10526 = vrcp.f32 %v1344_v61  ;;  %v1495_v61 = vld [vmem:[%s14753_s1] sm:$0xff] }
 0x2e9   :  { %v10519_v62 = vpop.eup %10518  ;;  %10528 = vrcp.f32 %v1345_v63  ;;  %v1518_v63 = vand.u32 4294901760, %v1495_v61 }
 0x2ea   :  { %v10521_v3 = vpop.eup %10520  ;;  %v1359_v4 = vadd.f32 1.0, %v10519_v62  ;;  %v1496_v62 = vld [vmem:[%s14753_s1 + $0x18] sm:$0xff] }
 0x2eb   :  { %v1358_v6 = vadd.f32 1.0, %v10521_v3  ;;  %v1521_v3 = vand.u32 4294901760, %v1496_v62 }
 0x2ec   :  { %1371 = vperm.xlu1 %10489, %v1359_v4  }
 0x2ed   :  { %v10523_v7 = vpop.eup %10522  ;;  %1366 = vperm.xlu0 %10488, %v1358_v6   ;;  %v10983_v4 = vpack.c.bf16 %v1521_v3, %v1518_v63  ;;  %v1497_v6 = vld [vmem:[%s14753_s1 + $0x30] sm:$0xff] }
 0x2ee   :  { %v1361_v10 = vadd.f32 1.0, %v10523_v7  ;;  %v10525_v11 = vpop.eup %10524  ;;  %v1498_v7 = vld [vmem:[%s14753_s1 + $0x48] sm:$0xff] }
 0x2ef   :  { %v1360_v12 = vadd.f32 1.0, %v10525_v11  ;;  %9379 = vmatprep.subr.bf16.mxu1 %v10983_v4  ;;  %v1527_v11 = vand.u32 4294901760, %v1498_v7 }
 0x2f0   :  { %1381 = vperm.xlu1 %10489, %v1361_v10   ;;  %v1524_v10 = vand.u32 4294901760, %v1497_v6  ;;  %9381 = vmatpush3.bf16.msra.mxu1 %v10983_v4 }
 0x2f2   :  { %v10527_v13 = vpop.eup %10526 }
 0x2f3   :  { %v1362_v17 = vadd.f32 1.0, %v10527_v13  ;;  %v10529_v18 = vpop.eup %10528  ;;  %v1648_v13 = vsub.f32 %v1495_v61, %v1518_v63 }
 0x2f4   :  { %1376 = vperm.xlu1 %10489, %v1360_v12   ;;  %v1363_v19 = vadd.f32 1.0, %v10529_v18  ;;  %v10993_v12 = vpack.c.bf16 %v1527_v11, %v1524_v10 }
 0x2f5   :  { %v1649_v18 = vand.u32 4294901760, %v1648_v13 }
 0x2f6   :  { %9383 = vmatprep.subr.bf16.mxu1 %v10993_v12 }
 0x2f7   :  { %9385 = vmatpush3.bf16.msra.mxu1 %v10993_v12 }
 0x2f8   :  { %1386 = vperm.xlu1 %10489, %v1362_v17   ;;  %v1655_v17 = vsub.f32 %v1496_v62, %v1521_v3 }
 0x2fc   :  { %1391 = vperm.xlu1 %10489, %v1363_v19   ;;  %v1656_v19 = vand.u32 4294901760, %v1655_v17 }
 0x36b   :  { %v1372_v20 = vpop.permute.xlu1 %1371 }
 0x36c   :  { %v10905_v21 = vmul.f32 %v1372_v20, %v10707_v5  ;;  %v1367_v22 = vpop.permute.xlu0 %1366  ;;  %v1650_v20 = vsub.f32 %v1648_v13, %v1649_v18 }
 0x36d   :  { %v10908_v23 = vmul.f32 %v1367_v22, %v10693_v1  ;;  %v1657_v22 = vsub.f32 %v1655_v17, %v1656_v19 }
 0x36e   :  { %15120 = vst [vmem:[#allocation2_spill] sm:$0xff] %v10905_v21  ;;  %v1404_v24 = vsel %vm24_vm0, %v10905_v21, 0.0 }
 0x36f   :  { %15121 = vst [vmem:[#allocation3_spill] sm:$0xff] %v10908_v23  ;;  %1405 = vadd.xlane.f32.xlu0 %v1404_v24  ;;  %v1382_v15 = vpop.permute.xlu1 %1381  ;;  %v1401_v16 = vsel %vm24_vm0, %v10908_v23, 0.0  ;;  %v1662_v24 = vsub.f32 %v1497_v6, %v1524_v10 }
 0x370   :  { %1402 = vadd.xlane.f32.xlu1 %v1401_v16  ;;  %v10918_v5 = vmul.f32 %v1382_v15, %v10698_v2  ;;  %v1669_v15 = vsub.f32 %v1498_v7, %v1527_v11  ;;  %v1651_v16 = vand.u32 4294901760, %v1650_v20 }
 0x372   :  { %15123 = vst [vmem:[#allocation5_spill] sm:$0xff] %v10918_v5  ;;  %v1410_v30 = vsel %vm24_vm0, %v10918_v5, 0.0 }
 0x373   :  { %v1377_v26 = vpop.permute.xlu1 %1376 }
 0x374   :  { %v10915_v25 = vmul.f32 %v1377_v26, %v10688_v0  ;;  %v1658_v26 = vand.u32 4294901760, %v1657_v22 }
 0x376   :  { %15122 = vst [vmem:[#allocation4_spill] sm:$0xff] %v10915_v25  ;;  %v1407_v1 = vsel %vm24_vm0, %v10915_v25, 0.0 }
 0x377   :  { %1408 = vadd.xlane.f32.xlu1 %v1407_v1  ;;  %v1387_v28 = vpop.permute.xlu1 %1386  ;;  %v1663_v1 = vand.u32 4294901760, %v1662_v24 }
 0x378   :  { %v10923_v29 = vmul.f32 %v1387_v28, %v10716_v8  ;;  %v1670_v28 = vand.u32 4294901760, %v1669_v15 }
 0x37a   :  { %15124 = vst [vmem:[#allocation6_spill] sm:$0xff] %v10923_v29  ;;  %v1413_v31 = vsel %vm24_vm0, %v10923_v29, 0.0 }
 0x37b   :  { %1411 = vadd.xlane.f32.xlu1 %v1410_v30  ;;  %1414 = vadd.xlane.f32.xlu0 %v1413_v31  ;;  %v1392_v0 = vpop.permute.xlu1 %1391  ;;  %v10997_v30 = vpack.c.bf16 %v1658_v26, %v1651_v16  ;;  %v1664_v31 = vsub.f32 %v1662_v24, %v1663_v1 }
 0x37c   :  { %v10930_v2 = vmul.f32 %v1392_v0, %v10721_v9  ;;  %v1671_v0 = vsub.f32 %v1669_v15, %v1670_v28 }
 0x37d   :  { %9387 = vmatprep.subr.bf16.mxu1 %v10997_v30 }
 0x37e   :  { %15125 = vst [vmem:[#allocation7_spill] sm:$0xff] %v10930_v2  ;;  %v1416_v27 = vsel %vm40_vm1, %v10930_v2, 0.0 }
 0x37f   :  { %1417 = vadd.xlane.f32.xlu1 %v1416_v27  ;;  %v1665_v27 = vand.u32 4294901760, %v1664_v31 }
 0x3fc   :  { %v1406_v32 = vpop.xlane.xlu0 %1405 }
 0x3fd   :  { %v1420_v33 = vmul.f32 0.03125, %v1406_v32  ;;  %v1403_v8 = vpop.xlane.xlu1 %1402  ;;  %v1672_v32 = vand.u32 4294901760, %v1671_v0 }
 0x3fe   :  { %v1419_v34 = vmul.f32 0.03125, %v1403_v8  ;;  %v11002_v8 = vpack.c.bf16 %v1655_v17, %v1648_v13 }
 0x3ff   :  { %v10935_v35 = vsub.f32 %v10905_v21, %v1420_v33  ;;  %v11000_v33 = vpack.c.bf16 %v1672_v32, %v1665_v27  ;;  %v2256_v21 = vld [vmem:[%s14752_s3 + $0x360] sm:$0xff] }
 0x400   :  { %v10938_v36 = vsub.f32 %v10908_v23, %v1419_v34  ;;  %v11004_v34 = vpack.c.bf16 %v1669_v15, %v1662_v24 }
 0x401   :  { %v1432_v37 = vmul.f32 %v10935_v35, %v10935_v35 }
 0x402   :  { %v1431_v9 = vmul.f32 %v10938_v36, %v10938_v36 }
 0x403   :  { %v1440_v38 = vsel %vm24_vm0, %v1432_v37, 0.0  ;;  %v11006_v37 = vpack.c.bf16 %v1656_v19, %v1649_v18 }
 0x404   :  { %1441 = vadd.xlane.f32.xlu1 %v1440_v38  ;;  %v1409_v39 = vpop.xlane.xlu1 %1408  ;;  %v1437_v40 = vsel %vm24_vm0, %v1431_v9, 0.0  ;;  %v11008_v9 = vpack.c.bf16 %v1670_v28, %v1663_v1 }
 0x405   :  { %v1421_v41 = vmul.f32 0.03125, %v1409_v39  ;;  %1438 = vadd.xlane.f32.xlu0 %v1437_v40 }
 0x407   :  { %v10947_v42 = vsub.f32 %v10915_v25, %v1421_v41 }
 0x408   :  { %v1415_v43 = vpop.xlane.xlu0 %1414  ;;  %v1412_v44 = vpop.xlane.xlu1 %1411 }
 0x409   :  { %v1423_v45 = vmul.f32 0.03125, %v1415_v43  ;;  %v1422_v46 = vmul.f32 0.03125, %v1412_v44  ;;  %v1433_v47 = vmul.f32 %v10947_v42, %v10947_v42 }
 0x40b   :  { %v10952_v48 = vsub.f32 %v10923_v29, %v1423_v45  ;;  %v10955_v49 = vsub.f32 %v10918_v5, %v1422_v46  ;;  %v1443_v50 = vsel %vm24_vm0, %v1433_v47, 0.0 }
 0x40c   :  { %1444 = vadd.xlane.f32.xlu0 %v1443_v50  ;;  %v1418_v51 = vpop.xlane.xlu1 %1417 }
 0x40d   :  { %v1424_v52 = vmul.f32 0.03125, %v1418_v51  ;;  %v1435_v53 = vmul.f32 %v10952_v48, %v10952_v48  ;;  %v1434_v54 = vmul.f32 %v10955_v49, %v10955_v49 }
 0x40f   :  { %v10963_v55 = vsub.f32 %v10930_v2, %v1424_v52  ;;  %v1449_v56 = vsel %vm24_vm0, %v1435_v53, 0.0  ;;  %v1446_v57 = vsel %vm24_vm0, %v1434_v54, 0.0  ;;  %v2254_v2 = vld [vmem:[%s14752_s3 + $0x340] sm:$0xff] }
 0x410   :  { %1450 = vadd.xlane.f32.xlu0 %v1449_v56  ;;  %1447 = vadd.xlane.f32.xlu1 %v1446_v57 }
 0x411   :  { %v1436_v58 = vmul.f32 %v10963_v55, %v10963_v55 }
 0x413   :  { %v1452_v59 = vsel %vm40_vm1, %v1436_v58, 0.0 }
 0x414   :  { %1453 = vadd.xlane.f32.xlu1 %v1452_v59 }
 0x426   :  { %1486 = vrot.lane.b32.xlu0 %v10973_v60, %s10653_s18 }
 0x491   :  { %v1442_v38 = vpop.xlane.xlu1 %1441 }
 0x492   :  { %v1456_v39 = vmul.f32 0.03125, %v1442_v38  ;;  %v1439_v40 = vpop.xlane.xlu0 %1438 }
 0x493   :  { %v1455_v41 = vmul.f32 0.03125, %v1439_v40 }
 0x494   :  { %v1462_v43 = vadd.f32 1e-05, %v1456_v39 }
 0x495   :  { %v1461_v44 = vadd.f32 1e-05, %v1455_v41 }
 0x496   :  { %10530 = vrsqrt.f32 %v1462_v43 }
 0x497   :  { %10532 = vrsqrt.f32 %v1461_v44 }
 0x499   :  { %v1445_v45 = vpop.xlane.xlu0 %1444 }
 0x49a   :  { %v1457_v46 = vmul.f32 0.03125, %v1445_v45 }
 0x49c   :  { %v1463_v47 = vadd.f32 1e-05, %v1457_v46 }
 0x49d   :  { %v1451_v50 = vpop.xlane.xlu0 %1450  ;;  %v1448_v51 = vpop.xlane.xlu1 %1447 }
 0x49e   :  { %10534 = vrsqrt.f32 %v1463_v47  ;;  %v1459_v52 = vmul.f32 0.03125, %v1451_v50  ;;  %v1458_v53 = vmul.f32 0.03125, %v1448_v51 }
 0x4a0   :  { %v10531_v54 = vpop.eup %10530  ;;  %v1465_v56 = vadd.f32 1e-05, %v1459_v52  ;;  %v1464_v57 = vadd.f32 1e-05, %v1458_v53 }
 0x4a1   :  { %v10533_v58 = vpop.eup %10532  ;;  %v1474_v59 = vmul.f32 %v10531_v54, %v10935_v35  ;;  %v1454_v61 = vpop.xlane.xlu1 %1453 }
 0x4a2   :  { %v1473_v62 = vmul.f32 %v10533_v58, %v10938_v36  ;;  %10536 = vrsqrt.f32 %v1465_v56  ;;  %v1460_v63 = vmul.f32 0.03125, %v1454_v61  ;;  %v1487_v3 = vpop.permute.xlu0 %1486 }
 0x4a3   :  { %10538 = vrsqrt.f32 %v1464_v57  ;;  %v1480_v6 = vmul.f32 %v1474_v59, %v10973_v60 }
 0x4a4   :  { %v1466_v7 = vadd.f32 1e-05, %v1460_v63  ;;  %v1479_v10 = vmul.f32 %v1473_v62, %v10973_v60 }
 0x4a5   :  { %v1490_v11 = vadd.f32 %v1487_v3, %v1480_v6 }
 0x4a6   :  { %10540 = vrsqrt.f32 %v1466_v7  ;;  %v1489_v13 = vadd.f32 %v1487_v3, %v1479_v10 }
 0x4a7   :  { %v1503_v17 = vsel %vm24_vm0, %v1490_v11, 0 }
 0x4a8   :  { %v10535_v18 = vpop.eup %10534  ;;  %v11015_v19 = vand.u32 4294901760, %v1503_v17  ;;  %v1500_v35 = vsel %vm24_vm0, %v1489_v13, 0 }
 0x4a9   :  { %v1475_v36 = vmul.f32 %v10535_v18, %v10947_v42  ;;  %v11019_v20 = vand.u32 4294901760, %v1500_v35 }
 0x4aa   :  { %v11022_v22 = vsub.f32 %v1503_v17, %v11015_v19 }
 0x4ab   :  { %v1481_v24 = vmul.f32 %v1475_v36, %v10973_v60  ;;  %v11026_v15 = vsub.f32 %v1500_v35, %v11019_v20  ;;  %v2238_v35 = vld [vmem:[%s14752_s3 + $0x240] sm:$0xff] }
 0x4ac   :  { %v10537_v16 = vpop.eup %10536  ;;  %v1598_v26 = vand.u32 4294901760, %v11022_v22  ;;  %v2337_v36 = vsel %vm59_vm2, %v2238_v35, 0  ;;  %v2243_v35 = vld [vmem:[%s14752_s3 + $0x290] sm:$0xff] }
 0x4ad   :  { %v10539_v1 = vpop.eup %10538  ;;  %v1477_v28 = vmul.f32 %v10537_v16, %v10952_v48  ;;  %v1491_v31 = vadd.f32 %v1487_v3, %v1481_v24  ;;  %v1588_v0 = vand.u32 4294901760, %v11026_v15 }
 0x4ae   :  { %v1476_v42 = vmul.f32 %v10539_v1, %v10955_v49  ;;  %v1599_v27 = vsub.f32 %v11022_v22, %v1598_v26 }
 0x4af   :  { %v1483_v32 = vmul.f32 %v1477_v28, %v10973_v60  ;;  %v1589_v38 = vsub.f32 %v11026_v15, %v1588_v0  ;;  %v1506_v39 = vsel %vm24_vm0, %v1491_v31, 0 }
 0x4b0   :  { %v10541_v40 = vpop.eup %10540  ;;  %v1482_v48 = vmul.f32 %v1476_v42, %v10973_v60  ;;  %v11041_v41 = vand.u32 4294901760, %v1506_v39  ;;  %v1600_v46 = vand.u32 4294901760, %v1599_v27 }
 0x4b1   :  { %v1478_v43 = vmul.f32 %v10541_v40, %v10963_v55  ;;  %v1493_v49 = vadd.f32 %v1487_v3, %v1483_v32  ;;  %v1590_v44 = vand.u32 4294901760, %v1589_v38  ;;  %v2241_v38 = vld [vmem:[%s14752_s3 + $0x270] sm:$0xff] }
 0x4b2   :  { %v1492_v45 = vadd.f32 %v1487_v3, %v1482_v48  ;;  %v1607_v47 = vsub.f32 %v1506_v39, %v11041_v41 }
 0x4b3   :  { %v1484_v50 = vmul.f32 %v1478_v43, %v10973_v60  ;;  %8738 = vmatprep.mubr.f32.mxu1 %v1590_v44  ;;  %v1512_v51 = vsel %vm24_vm0, %v1493_v49, 0 }
 0x4b4   :  { %8739 = vmatmul.mubr.f32.vlgmr.msra.gmra.mrb[6].mxu1 %v1600_v46  ;;  %v1608_v52 = vand.u32 4294901760, %v1607_v47  ;;  %v1509_v53 = vsel %vm24_vm0, %v1492_v45, 0  ;;  %v11048_v54 = vand.u32 4294901760, %v1512_v51  ;;  %v2346_v46 = vsel %vm59_vm2, %v2241_v38, 0 }
 0x4b5   :  { %v1494_v56 = vadd.f32 %v1487_v3, %v1484_v50  ;;  %9389 = vmatpush3.bf16.msra.mxu1 %v10997_v30  ;;  %v11051_v55 = vand.u32 4294901760, %v1509_v53 }
 0x4b6   :  { %v1609_v57 = vsub.f32 %v1607_v47, %v1608_v52  ;;  %v1627_v58 = vsub.f32 %v1512_v51, %v11048_v54  ;;  %9391 = vmatprep.subr.bf16.mxu1 %v11000_v33 }
 0x4b7   :  { %v1617_v60 = vsub.f32 %v1509_v53, %v11051_v55  ;;  %v1515_v59 = vsel %vm24_vm0, %v1494_v56, 0 }
 0x4b8   :  { %v1610_v61 = vand.u32 4294901760, %v1609_v57  ;;  %v1628_v62 = vand.u32 4294901760, %v1627_v58  ;;  %v1636_v63 = vand.u32 4294901760, %v1515_v59 }
 0x4b9   :  { %v1618_v6 = vand.u32 4294901760, %v1617_v60  ;;  %9393 = vmatpush3.bf16.msra.mxu1 %v11000_v33 }
 0x4ba   :  { %8741 = vmatprep.mubr.f32.mxu1 %v1610_v61  ;;  %v1629_v3 = vsub.f32 %v1627_v58, %v1628_v62  ;;  %v1637_v30 = vsub.f32 %v1515_v59, %v1636_v63  ;;  %9395 = vmatprep.subr.bf16.mxu1 %v11002_v8  ;;  %v2242_v61 = vld [vmem:[%s14752_s3 + $0x280] sm:$0xff] }
 0x4bb   :  { %v1619_v7 = vsub.f32 %v1617_v60, %v1618_v6 }
 0x4bc   :  { %v1630_v10 = vand.u32 4294901760, %v1629_v3  ;;  %v1638_v11 = vand.u32 4294901760, %v1637_v30 }
 0x4bd   :  { %v1620_v13 = vand.u32 4294901760, %v1619_v7 }
 0x4be   :  { %v1639_v17 = vsub.f32 %v1637_v30, %v1638_v11 }
 0x4bf   :  { %8742 = vmatmul.mubr.f32.gmra.mrb[8].mxu1 %v1620_v13 }
 0x4c0   :  { %8744 = vmatprep.mubr.f32.mxu1 %v1630_v10  ;;  %v1640_v18 = vand.u32 4294901760, %v1639_v17 }
 0x4c3   :  { %8745 = vmatmul.mubr.f32.gmra.mrb[10].mxu1 %v1640_v18  ;;  %v2349_v18 = vsel %vm59_vm2, %v2242_v61, 0 }
 0x4c4   :  { %8755 = vmatprep.mubr.f32.mxu1 %v11019_v20  ;;  %v11214_v38 = vand.u32 4294901760, %v2349_v18 }
 0x4c7   :  { %8756 = vmatmul.mubr.f32.vlgmr.msra.gmra.mrb[6].mxu1 %v11015_v19 }
 0x4c8   :  { %8758 = vmatprep.mubr.f32.mxu1 %v11041_v41  ;;  %9397 = vmatpush3.bf16.msra.mxu1 %v11002_v8 }
 0x4c9   :  { %9399 = vmatprep.subr.bf16.mxu1 %v11004_v34 }
 0x4cb   :  { %8759 = vmatmul.mubr.f32.gmra.mrb[8].mxu1 %v11051_v55 }
 0x4cc   :  { %8761 = vmatprep.mubr.f32.mxu1 %v11048_v54  ;;  %9401 = vmatpush3.bf16.msra.mxu1 %v11004_v34 }
 0x4cd   :  { %9403 = vmatprep.subr.bf16.mxu1 %v10983_v4 }
 0x4cf   :  { %8762 = vmatmul.mubr.f32.gmra.mrb[10].mxu1 %v1636_v63 }
 0x4d0   :  { %8772 = vmatprep.mubr.f32.mxu1 %v11026_v15 }
 0x4d3   :  { %8773 = vmatmul.mubr.f32.vlgmr.msra.gmra.mrb[6].mxu1 %v11022_v22  ;;  %v11131_v22 = vand.u32 4294901760, %v2337_v36 }
 0x4d4   :  { %8775 = vmatprep.mubr.f32.mxu1 %v1607_v47  ;;  %9405 = vmatpush3.bf16.msra.mxu1 %v10983_v4 }
 0x4d5   :  { %9407 = vmatprep.subr.bf16.mxu1 %v10993_v12  ;;  %v11138_v1 = vsub.f32 %v2337_v36, %v11131_v22 }
 0x4d7   :  { %8776 = vmatmul.mubr.f32.gmra.mrb[8].mxu1 %v1617_v60  ;;  %v14766_v40 = vand.u32 4294901760, %v11138_v1 }
 0x4d8   :  { %8778 = vmatprep.mubr.f32.mxu1 %v1627_v58  ;;  %9409 = vmatpush3.bf16.msra.mxu1 %v10993_v12 }
 0x4d9   :  { %9411 = vmatprep.subr.bf16.mxu1 %v11006_v37  ;;  %v2475_v56 = vsub.f32 %v11138_v1, %v14766_v40 }
 0x4db   :  { %8779 = vmatmul.mubr.f32.gmra.mrb[10].mxu1 %v1637_v30  ;;  %v2476_v36 = vand.u32 4294901760, %v2475_v56 }
 0x4dc   :  { %8789 = vmatprep.mubr.f32.mxu1 %v1588_v0 }
 0x4df   :  { %8790 = vmatmul.mubr.f32.vlgmr.msra.gmra.mrb[6].mxu1 %v1598_v26  ;;  %v2240_v26 = vld [vmem:[%s14752_s3 + $0x260] sm:$0xff] }
 0x4e0   :  { %8792 = vmatprep.mubr.f32.mxu1 %v1608_v52  ;;  %9413 = vmatpush3.bf16.msra.mxu1 %v11006_v37  ;;  %v14774_v37 = vmov 0.0   ;;  %v2343_v42 = vsel %vm59_vm2, %v2240_v26, 0 }
 0x4e1   :  { %9415 = vmatprep.subr.bf16.mxu1 %v11008_v9  ;;  %8844 = vmatprep.mubr.msk.f32.mxu0 %vm10655_vm5, %v14774_v37  ;;  %v11156_v49 = vand.u32 4294901760, %v2343_v42 }
 0x4e3   :  { %8793 = vmatmul.mubr.f32.gmra.mrb[8].mxu1 %v1618_v6  ;;  %v11177_v59 = vsub.f32 %v2343_v42, %v11156_v49  ;;  %v11183_v6 = vand.u32 4294901760, %v2346_v46 }
 0x4e4   :  { %8795 = vmatprep.mubr.f32.mxu1 %v1628_v62  ;;  %9417 = vmatpush3.bf16.msra.mxu1 %v11008_v9 }
 0x4e5   :  { %9419 = vmatprep.subr.bf16.mxu1 %v10983_v4 }
 0x4e7   :  { %8796 = vmatmul.mubr.f32.gmra.mrb[10].mxu1 %v1638_v11 }
 0x4e8   :  { %8806 = vmatprep.mubr.f32.mxu1 %v11019_v20 }
 0x4eb   :  { %8807 = vmatmul.mubr.f32.vlgmr.msra.gmra.mrb[6].mxu1 %v11015_v19 }
 0x4ec   :  { %8809 = vmatprep.mubr.f32.mxu1 %v11041_v41  ;;  %9421 = vmatpush3.bf16.msra.mxu1 %v10983_v4  ;;  %v14768_v4 = vmov 0.0|0.0  }
 0x4ed   :  { %9423 = vmatprep.subr.bf16.mxu1 %v10993_v12  ;;  %9426 = vmatprep.subr.bf16.mxu0 %v14768_v4 }
 0x4ef   :  { %8810 = vmatmul.mubr.f32.gmra.mrb[8].mxu1 %v11051_v55 }
 0x4f0   :  { %8812 = vmatprep.mubr.f32.mxu1 %v11048_v54  ;;  %9425 = vmatpush3.bf16.msra.mxu1 %v10993_v12 }
 0x4f1   :  { %9480 = vmatprep.subr.bf16.mxu1 %v14768_v4 }
 0x4f3   :  { %8813 = vmatmul.mubr.f32.gmra.mrb[10].mxu1 %v1636_v63 }
 0x4f4   :  { %8823 = vmatprep.mubr.f32.mxu1 %v11019_v20  ;;  %v2239_v20 = vld [vmem:[%s14752_s3 + $0x250] sm:$0xff] }
 0x4f5   :  { %v2340_v24 = vsel %vm59_vm2, %v2239_v20, 0 }
 0x4f6   :  { %v11140_v28 = vand.u32 4294901760, %v2340_v24 }
 0x4f7   :  { %8824 = vmatmul.mubr.f32.vlgmr.msra.gmra.mrb[6].mxu1 %v11015_v19 }
 0x4f8   :  { %8826 = vmatprep.mubr.f32.mxu1 %v11041_v41  ;;  %v11150_v48 = vsub.f32 %v2340_v24, %v11140_v28  ;;  %v14762_v24 = vand.u32 4294901760, %v11177_v59 }
 0x4fb   :  { %8827 = vmatmul.mubr.f32.gmra.mrb[8].mxu1 %v11051_v55  ;;  %v14764_v55 = vand.u32 4294901760, %v11150_v48 }
 0x4fc   :  { %8829 = vmatprep.mubr.f32.mxu1 %v11048_v54 }
 0x4fd   :  { %v2485_v20 = vsub.f32 %v11150_v48, %v14764_v55 }
 0x4ff   :  { %8830 = vmatmul.mubr.f32.gmra.mrb[10].mxu1 %v1636_v63 }
 0x500   :  { %3953 = vmatprep.mubr.f32.mxu1 %v14774_v37 }
 0x5ca   :  { %v11097_v33 = vpop.f32.mrb[6].mxu1 }
 0x5cb   :  { %15126 = vst [vmem:[#allocation8_spill] sm:$0xff] %v11097_v33  ;;  %2321 = vrot.lane.b32.xlu1 %v11097_v33, %s10653_s18  ;;  %v11101_v12 = vpop.f32.mrb[7].mxu1 }
 0x5cc   :  { %15127 = vst [vmem:[#allocation9_spill] sm:$0xff] %v11101_v12 }
 0x5ce   :  { %v11103_v8 = vpop.f32.mrb[8].mxu1 }
 0x5cf   :  { %15128 = vst [vmem:[#allocation10_spill] sm:$0xff] %v11103_v8  ;;  %2319 = vrot.lane.b32.xlu1 %v11101_v12, %s10653_s18  ;;  %v11107_v34 = vpop.f32.mrb[9].mxu1 }
 0x5d0   :  { %15129 = vst [vmem:[#allocation11_spill] sm:$0xff] %v11107_v34  ;;  %2323 = vrot.lane.b32.xlu0 %v11107_v34, %s10653_s18 }
 0x5d2   :  { %v11114_v9 = vpop.f32.mrb[10].mxu1 }
 0x5d3   :  { %15130 = vst [vmem:[#allocation12_spill] sm:$0xff] %v11114_v9  ;;  %2325 = vrot.lane.b32.xlu1 %v11103_v8, %s10653_s18  ;;  %v11118_v19 = vpop.f32.mrb[11].mxu1 }
 0x5d4   :  { %15131 = vst [vmem:[#allocation13_spill] sm:$0xff] %v11118_v19  ;;  %2329 = vrot.lane.b32.xlu0 %v11114_v9, %s10653_s18 }
 0x5d7   :  { %2327 = vrot.lane.b32.xlu1 %v11118_v19, %s10653_s18 }
 0x63d   :  { %v2322_v15 = vpop.permute.xlu1 %2321 }
 0x63e   :  { %v2405_v16 = vand.u32 4294901760, %v2322_v15 }
 0x640   :  { %v11142_v31 = vsub.f32 %v2322_v15, %v2405_v16 }
 0x641   :  { %v2320_v0 = vpop.permute.xlu1 %2319 }
 0x642   :  { %v2402_v27 = vand.u32 4294901760, %v2320_v0  ;;  %v2324_v32 = vpop.permute.xlu0 %2323  ;;  %v2692_v44 = vand.u32 4294901760, %v11142_v31 }
 0x643   :  { %v2408_v39 = vand.u32 4294901760, %v2324_v32 }
 0x644   :  { %v11152_v41 = vpack.c.bf16 %v2405_v16, %v2402_v27  ;;  %v11154_v43 = vsub.f32 %v2320_v0, %v2402_v27  ;;  %v2693_v30 = vsub.f32 %v11142_v31, %v2692_v44 }
 0x645   :  { %v2326_v45 = vpop.permute.xlu1 %2325  ;;  %v11163_v51 = vsub.f32 %v2324_v32, %v2408_v39  ;;  %v11212_v32 = vsub.f32 %v2346_v46, %v11183_v6  ;;  %v2244_v46 = vld [vmem:[%s14752_s3 + $0x2a0] sm:$0xff] }
 0x646   :  { %v2685_v47 = vand.u32 4294901760, %v11154_v43  ;;  %v2411_v52 = vand.u32 4294901760, %v2326_v45  ;;  %9428 = vmatpush3.bf16.msra.mxu0 %v11152_v41  ;;  %v2330_v53 = vpop.permute.xlu0 %2329  ;;  %v2694_v27 = vand.u32 4294901760, %v2693_v30  ;;  %v11235_v30 = vsub.f32 %v2349_v18, %v11214_v38 }
 0x647   :  { %v2399_v54 = vsel %vm66_vm3, %v2330_v53, 0  ;;  %9429 = vmatprep.subr.bf16.mxu0 %v14768_v4  ;;  %v2699_v7 = vand.u32 4294901760, %v11163_v51  ;;  %v2486_v53 = vand.u32 4294901760, %v2485_v20 }
 0x648   :  { %v11172_v57 = vpack.c.bf16 %v2411_v52, %v2408_v39  ;;  %v11174_v58 = vsub.f32 %v2326_v45, %v2411_v52  ;;  %v2417_v60 = vand.u32 4294901760, %v2399_v54  ;;  %v2686_v62 = vsub.f32 %v11154_v43, %v2685_v47 }
 0x649   :  { %v2328_v63 = vpop.permute.xlu1 %2327  ;;  %v11185_v3 = vpack.c.bf16 %v2692_v44, %v2685_v47  ;;  %v2352_v39 = vsel %vm59_vm2, %v2243_v35, 0  ;;  %v2700_v44 = vsub.f32 %v11163_v51, %v2699_v7 }
 0x64a   :  { %v2706_v10 = vand.u32 4294901760, %v11174_v58  ;;  %9431 = vmatpush3.bf16.msra.mxu0 %v11172_v57  ;;  %v11193_v13 = vsub.f32 %v2399_v54, %v2417_v60  ;;  %v2414_v17 = vand.u32 4294901760, %v2328_v63  ;;  %v2687_v16 = vand.u32 4294901760, %v2686_v62 }
 0x64b   :  { %9432 = vmatprep.subr.bf16.mxu0 %v14768_v4  ;;  %v2495_v54 = vsub.f32 %v11177_v59, %v14762_v24 }
 0x64c   :  { %v11204_v15 = vpack.c.bf16 %v2706_v10, %v2699_v7  ;;  %v2707_v26 = vsub.f32 %v11174_v58, %v2706_v10  ;;  %v11207_v0 = vpack.c.bf16 %v2417_v60, %v2414_v17  ;;  %v11209_v42 = vsub.f32 %v2328_v63, %v2414_v17 }
 0x64d   :  { %v2720_v45 = vand.u32 4294901760, %v11193_v13  ;;  %v9436_v61 = vpack.c.bf16 %v2694_v27, %v2687_v16  ;;  %v14761_v63 = vand.u32 4294901760, %v11212_v32  ;;  %v11237_v7 = vand.u32 4294901760, %v2352_v39 }
 0x64e   :  { %v2713_v47 = vand.u32 4294901760, %v11209_v42  ;;  %9434 = vmatpush3.bf16.msra.mxu0 %v11207_v0  ;;  %v2708_v56 = vand.u32 4294901760, %v2707_v26  ;;  %v2355_v10 = vsel %vm59_vm2, %v2244_v46, 0  ;;  %v2701_v17 = vand.u32 4294901760, %v2700_v44 }
 0x64f   :  { %9435 = vmatprep.subr.bf16.mxu0 %v14768_v4  ;;  %v2721_v35 = vsub.f32 %v11193_v13, %v2720_v45  ;;  %v2496_v16 = vand.u32 4294901760, %v2495_v54  ;;  %v11247_v26 = vand.u32 4294901760, %v2355_v10  ;;  %v2505_v27 = vsub.f32 %v11212_v32, %v14761_v63 }
 0x650   :  { %v2714_v60 = vsub.f32 %v11209_v42, %v2713_v47  ;;  %v11231_v62 = vpack.c.bf16 %v2720_v45, %v2713_v47  ;;  %v9439_v18 = vpack.c.bf16 %v2708_v56, %v2701_v17  ;;  %v14759_v44 = vand.u32 4294901760, %v11235_v30 }
 0x651   :  { %8845 = vmatmul.mubr.f32.vlgmr.msra.gmra.mrb[8].mxu0 %v2476_v36  ;;  %v2245_v36 = vld [vmem:[%s14752_s3 + $0x2b0] sm:$0xff]  ;;  %v11254_v45 = vsub.f32 %v2352_v39, %v11237_v7  ;;  %v2722_v46 = vand.u32 4294901760, %v2721_v35  ;;  %v11264_v56 = vsub.f32 %v2355_v10, %v11247_v26  ;;  %v2506_v39 = vand.u32 4294901760, %v2505_v27 }
 0x652   :  { %9437 = vmatpush3.bf16.msra.mxu0 %v9436_v61  ;;  %8847 = vmatprep.mubr.msk.f32.mxu0 %vm10655_vm5, %v14774_v37  ;;  %v2715_v20 = vand.u32 4294901760, %v2714_v60  ;;  %v2358_v47 = vsel %vm59_vm2, %v2245_v36, 0  ;;  %v2515_v61 = vsub.f32 %v11235_v30, %v14759_v44  ;;  %v2247_v10 = vld [vmem:[%s14752_s3 + $0x2d0] sm:$0xff] }
 0x653   :  { %9438 = vmatprep.subr.bf16.mxu0 %v14768_v4  ;;  %v11266_v60 = vand.u32 4294901760, %v2358_v47  ;;  %v14758_v17 = vand.u32 4294901760, %v11254_v45  ;;  %v14760_v36 = vand.u32 4294901760, %v11264_v56 }
 0x654   :  { %v9442_v54 = vpack.c.bf16 %v2722_v46, %v2715_v20  ;;  %v2364_v46 = vsel %vm59_vm2, %v2247_v10, 0 }
 0x655   :  { %8848 = vmatmul.mubr.f32.gmra.mrb[10].mxu0 %v2486_v53  ;;  %v2246_v53 = vld [vmem:[%s14752_s3 + $0x2c0] sm:$0xff]  ;;  %v11281_v20 = vsub.f32 %v2358_v47, %v11266_v60  ;;  %v2535_v47 = vsub.f32 %v11264_v56, %v14760_v36  ;;  %v11301_v14 = vand.u32 4294901760, %v2364_v46 }
 0x656   :  { %9440 = vmatpush3.bf16.msra.mxu0 %v9439_v18  ;;  %8850 = vmatprep.mubr.msk.f32.mxu0 %vm10655_vm5, %v14774_v37  ;;  %v2361_v35 = vsel %vm59_vm2, %v2246_v53, 0  ;;  %v2516_v18 = vand.u32 4294901760, %v2515_v61  ;;  %v2248_v53 = vld [vmem:[%s14752_s3 + $0x2e0] sm:$0xff] }
 0x657   :  { %9441 = vmatprep.subr.bf16.mxu0 %v14768_v4  ;;  %v11286_v27 = vand.u32 4294901760, %v2361_v35  ;;  %v2367_v10 = vsel %vm59_vm2, %v2248_v53, 0  ;;  %v2536_v44 = vand.u32 4294901760, %v2535_v47  ;;  %v2250_v53 = vld [vmem:[%s14752_s3 + $0x300] sm:$0xff] }
 0x658   :  { %v11316_v36 = vand.u32 4294901760, %v2367_v10 }
 0x659   :  { %8851 = vmatmul.mubr.f32.gmra.mrb[12].mxu0 %v2496_v16  ;;  %v2525_v16 = vsub.f32 %v11254_v45, %v14758_v17  ;;  %v11299_v61 = vsub.f32 %v2361_v35, %v11286_v27  ;;  %v2249_v17 = vld [vmem:[%s14752_s3 + $0x2f0] sm:$0xff] }
 0x65a   :  { %9443 = vmatpush3.bf16.msra.mxu0 %v9442_v54  ;;  %8853 = vmatprep.mubr.msk.f32.mxu0 %vm10655_vm5, %v14774_v37  ;;  %v14763_v54 = vand.u32 4294901760, %v11281_v20  ;;  %v2370_v63 = vsel %vm59_vm2, %v2249_v17, 0  ;;  %v2373_v17 = vsel %vm59_vm2, %v2250_v53, 0 }
 0x65b   :  { %9444 = vmatprep.subr.bf16.mxu0 %v14768_v4  ;;  %v14765_v35 = vand.u32 4294901760, %v11299_v61  ;;  %v11324_v24 = vand.u32 4294901760, %v2370_v63  ;;  %v11342_v55 = vand.u32 4294901760, %v2373_v17  ;;  %v2253_v4 = vld [vmem:[%s14752_s3 + $0x330] sm:$0xff] }
 0x65d   :  { %8854 = vmatmul.mubr.f32.gmra.mrb[14].mxu0 %v2506_v39  ;;  %v2526_v39 = vand.u32 4294901760, %v2525_v16  ;;  %v11314_v16 = vsub.f32 %v2364_v46, %v11301_v14  ;;  %v2555_v46 = vsub.f32 %v11299_v61, %v14765_v35 }
 0x65e   :  { %8856 = vmatprep.mubr.msk.f32.mxu0 %vm10655_vm5, %v14774_v37 }
 0x65f   :  { %v2556_v35 = vand.u32 4294901760, %v2555_v46 }
 0x661   :  { %8857 = vmatmul.mubr.f32.gmra.mrb[16].mxu0 %v2516_v18  ;;  %v2545_v18 = vsub.f32 %v11281_v20, %v14763_v54  ;;  %v11331_v54 = vsub.f32 %v2367_v10, %v11316_v36 }
 0x662   :  { %8859 = vmatprep.mubr.msk.f32.mxu0 %vm10655_vm5, %v14774_v37 }
 0x663   :  { %v2546_v47 = vand.u32 4294901760, %v2545_v18  ;;  %v2251_v18 = vld [vmem:[%s14752_s3 + $0x310] sm:$0xff]  ;;  %v14770_v53 = vand.u32 4294901760, %v11331_v54 }
 0x664   :  { %v2376_v40 = vsel %vm59_vm2, %v2251_v18, 0 }
 0x665   :  { %8860 = vmatmul.mubr.f32.gmra.mrb[18].mxu0 %v2526_v39  ;;  %v14767_v39 = vand.u32 4294901760, %v11314_v16  ;;  %v11361_v11 = vand.u32 4294901760, %v2376_v40 }
 0x666   :  { %8862 = vmatprep.mubr.msk.f32.mxu0 %vm10655_vm5, %v14774_v37 }
 0x667   :  { %v2565_v10 = vsub.f32 %v11314_v16, %v14767_v39  ;;  %v2575_v39 = vsub.f32 %v11331_v54, %v14770_v53  ;;  %v11374_v53 = vsub.f32 %v2376_v40, %v11361_v11 }
 0x669   :  { %8863 = vmatmul.mubr.f32.gmra.mrb[20].mxu0 %v2536_v44  ;;  %v11340_v44 = vsub.f32 %v2370_v63, %v11324_v24  ;;  %v2252_v63 = vld [vmem:[%s14752_s3 + $0x320] sm:$0xff]  ;;  %v2566_v46 = vand.u32 4294901760, %v2565_v10  ;;  %v2576_v10 = vand.u32 4294901760, %v2575_v39  ;;  %v14780_v40 = vand.u32 4294901760, %v11374_v53 }
 0x66a   :  { %8865 = vmatprep.mubr.msk.f32.mxu0 %vm10655_vm5, %v14774_v37  ;;  %v2379_v18 = vsel %vm59_vm2, %v2252_v63, 0  ;;  %v2382_v63 = vsel %vm59_vm2, %v2253_v4, 0  ;;  %v15132_v4 = vmov 0.0  }
 0x66b   :  { %v14773_v52 = vand.u32 4294901760, %v11340_v44  ;;  %v11376_v50 = vand.u32 4294901760, %v2379_v18 }
 0x66d   :  { %8866 = vmatmul.mubr.f32.gmra.mrb[22].mxu0 %v2546_v47  ;;  %v11356_v47 = vsub.f32 %v2373_v17, %v11342_v55  ;;  %v11389_v39 = vsub.f32 %v2379_v18, %v11376_v50  ;;  %v2605_v18 = vsub.f32 %v11374_v53, %v14780_v40 }
 0x66e   :  { %8868 = vmatprep.mubr.msk.f32.mxu0 %vm10655_vm5, %v14774_v37 }
 0x66f   :  { %v14777_v17 = vand.u32 4294901760, %v11356_v47 }
 0x671   :  { %8869 = vmatmul.mubr.f32.gmra.mrb[24].mxu0 %v2556_v35  ;;  %v2585_v35 = vsub.f32 %v11340_v44, %v14773_v52  ;;  %v11391_v52 = vand.u32 4294901760, %v2382_v63 }
 0x672   :  { %8871 = vmatprep.mubr.msk.f32.mxu0 %vm10655_vm5, %v14774_v37 }
 0x673   :  { %v2586_v29 = vand.u32 4294901760, %v2585_v35  ;;  %v2255_v35 = vld [vmem:[%s14752_s3 + $0x350] sm:$0xff]  ;;  %v11406_v25 = vsub.f32 %v2382_v63, %v11391_v52 }
 0x675   :  { %8872 = vmatmul.mubr.f32.gmra.mrb[26].mxu0 %v2566_v46  ;;  %v2595_v46 = vsub.f32 %v11356_v47, %v14777_v17  ;;  %v14782_v17 = vand.u32 4294901760, %v11389_v39  ;;  %v14785_v63 = vand.u32 4294901760, %v11406_v25 }
 0x676   :  { %8874 = vmatprep.mubr.msk.f32.mxu0 %vm10655_vm5, %v14774_v37  ;;  %v2385_v37 = vsel %vm59_vm2, %v2254_v2, 0  ;;  %v2388_v2 = vsel %vm59_vm2, %v2255_v35, 0  ;;  %v2391_v35 = vsel %vm59_vm2, %v2256_v21, 0 }
 0x677   :  { %v11399_v5 = vand.u32 4294901760, %v2385_v37  ;;  %v2615_v40 = vsub.f32 %v11389_v39, %v14782_v17  ;;  %v11421_v23 = vand.u32 4294901760, %v2388_v2  ;;  %v2625_v17 = vsub.f32 %v11406_v25, %v14785_v63 }
 0x678   :  { %v11436_v19 = vand.u32 4294901760, %v2391_v35 }
 0x679   :  { %8875 = vmatmul.mubr.f32.gmra.mrb[28].mxu0 %v2576_v10  ;;  %v2596_v10 = vand.u32 4294901760, %v2595_v46  ;;  %v2606_v46 = vand.u32 4294901760, %v2605_v18  ;;  %v2616_v18 = vand.u32 4294901760, %v2615_v40  ;;  %v11434_v9 = vsub.f32 %v2388_v2, %v11421_v23 }
 0x67a   :  { %8877 = vmatprep.mubr.msk.f32.mxu0 %vm10655_vm5, %v15132_v4  ;;  %v2626_v63 = vand.u32 4294901760, %v2625_v17  ;;  %v11449_v8 = vsub.f32 %v2391_v35, %v11436_v19 }
 0x67b   :  { %v14790_v2 = vand.u32 4294901760, %v11434_v9 }
 0x67c   :  { %v2654_v17 = vand.u32 4294901760, %v11449_v8 }
 0x67d   :  { %8878 = vmatmul.mubr.f32.gmra.mrb[30].mxu0 %v2586_v29  ;;  %v11415_v29 = vsub.f32 %v2385_v37, %v11399_v5  ;;  %v2257_v37 = vld [vmem:[%s14752_s3 + $0x370] sm:$0xff] }
 0x67e   :  { %8880 = vmatprep.mubr.msk.f32.mxu0 %vm10655_vm5, %v15132_v4  ;;  %v2394_v21 = vsel %vm59_vm2, %v2257_v37, 0 }
 0x67f   :  { %v15133_v40 = vand.u32 4294901760, %v11415_v29  ;;  %v11451_v34 = vand.u32 4294901760, %v2394_v21 }
 0x681   :  { %8881 = vmatmul.mubr.f32.gmra.mrb[32].mxu0 %v2596_v10  ;;  %v2258_v10 = vld [vmem:[%s14752_s3 + $0x380] sm:$0xff] }
 0x682   :  { %8883 = vmatprep.mubr.msk.f32.mxu0 %vm10655_vm5, %v15132_v4  ;;  %v2397_v37 = vsel %vm59_vm2, %v2258_v10, 0 }
 0x683   :  { %v11463_v35 = vand.u32 4294901760, %v2397_v37 }
 0x685   :  { %8884 = vmatmul.mubr.f32.gmra.mrb[34].mxu0 %v2606_v46  ;;  %v2635_v46 = vsub.f32 %v11415_v29, %v15133_v40  ;;  %v2645_v40 = vsub.f32 %v11434_v9, %v14790_v2 }
 0x686   :  { %8886 = vmatprep.mubr.msk.f32.mxu0 %vm10655_vm5, %v15132_v4 }
 0x687   :  { %v2636_v33 = vand.u32 4294901760, %v2635_v46  ;;  %v2646_v12 = vand.u32 4294901760, %v2645_v40  ;;  %v11472_v46 = vsub.f32 %v2397_v37, %v11463_v35 }
 0x689   :  { %8887 = vmatmul.mubr.f32.gmra.mrb[36].mxu0 %v2616_v18  ;;  %v11461_v18 = vsub.f32 %v2394_v21, %v11451_v34 }
 0x68a   :  { %8889 = vmatprep.mubr.msk.f32.mxu0 %vm10655_vm5, %v15132_v4 }
 0x68b   :  { %v2664_v10 = vand.u32 4294901760, %v11461_v18 }
 0x68d   :  { %8890 = vmatmul.mubr.f32.gmra.mrb[38].mxu0 %v2626_v63  ;;  %v2655_v63 = vsub.f32 %v11449_v8, %v2654_v17  ;;  %v2665_v2 = vsub.f32 %v11461_v18, %v2664_v10 }
 0x68e   :  { %8892 = vmatprep.mubr.msk.f32.mxu0 %vm10655_vm5, %v15132_v4 }
 0x68f   :  { %v2656_v21 = vand.u32 4294901760, %v2655_v63  ;;  %v2666_v40 = vand.u32 4294901760, %v2665_v2  ;;  %v15134_v2 = vpack.c.bf16 %v11142_v31, %v11154_v43  ;;  %v15135_v63 = vmov 0.0|0.0  }
 0x690   :  { %v15137_v31 = vpack.c.bf16 %v11193_v13, %v11209_v42  ;;  %v15138_v43 = vand.u32 4294901760, %v11138_v1  ;;  %v15145_v13 = vand.u32 4294901760, %v11281_v20  ;;  %v15147_v42 = vand.u32 4294901760, %v11314_v16 }
 0x691   :  { %8893 = vmatmul.mubr.f32.gmra.mrb[40].mxu0 %v2636_v33  ;;  %v2674_v33 = vand.u32 4294901760, %v11472_v46 }
 0x692   :  { %8895 = vmatprep.mubr.msk.f32.mxu0 %vm10655_vm5, %v15132_v4 }
 0x693   :  { %v2675_v37 = vsub.f32 %v11472_v46, %v2674_v33 }
 0x695   :  { %8896 = vmatmul.mubr.f32.gmra.mrb[42].mxu0 %v2646_v12  ;;  %v2676_v12 = vand.u32 4294901760, %v2675_v37 }
 0x696   :  { %8898 = vmatprep.mubr.msk.f32.mxu0 %vm10655_vm5, %v15132_v4 }
 0x699   :  { %8899 = vmatmul.mubr.f32.gmra.mrb[44].mxu0 %v2656_v21  ;;  %v15136_v21 = vpack.c.bf16 %v11174_v58, %v11163_v51  ;;  %v15139_v51 = vand.u32 4294901760, %v11150_v48  ;;  %v15142_v58 = vand.u32 4294901760, %v11235_v30 }
 0x69a   :  { %8901 = vmatprep.mubr.msk.f32.mxu0 %vm10655_vm5, %v15132_v4 }
 0x69d   :  { %8902 = vmatmul.mubr.f32.gmra.mrb[46].mxu0 %v2666_v40 }
 0x69e   :  { %8904 = vmatprep.mubr.msk.f32.mxu0 %vm10655_vm5, %v15132_v4 }
 0x6a1   :  { %8905 = vmatmul.mubr.f32.gmra.mrb[48].mxu0 %v2676_v12 }
 0x6a2   :  { %8919 = vmatprep.mubr.msk.f32.mxu0 %vm10655_vm5, %v15132_v4 }
 0x6a5   :  { %8920 = vmatmul.mubr.f32.vlgmr.msra.gmra.mrb[8].mxu0 %v11131_v22 }
 0x6a6   :  { %9446 = vmatpush3.bf16.msra.mxu0 %v15134_v2  ;;  %8922 = vmatprep.mubr.msk.f32.mxu0 %vm10655_vm5, %v15132_v4 }
 0x6a7   :  { %9447 = vmatprep.subr.bf16.mxu0 %v15135_v63 }
 0x6a9   :  { %8923 = vmatmul.mubr.f32.gmra.mrb[10].mxu0 %v11140_v28 }
 0x6aa   :  { %9449 = vmatpush3.bf16.msra.mxu0 %v15136_v21  ;;  %8925 = vmatprep.mubr.msk.f32.mxu0 %vm10655_vm5, %v15132_v4 }
 0x6ab   :  { %9450 = vmatprep.subr.bf16.mxu0 %v15135_v63 }
 0x6ad   :  { %8926 = vmatmul.mubr.f32.gmra.mrb[12].mxu0 %v11156_v49 }
 0x6ae   :  { %9452 = vmatpush3.bf16.msra.mxu0 %v15137_v31  ;;  %8928 = vmatprep.mubr.msk.f32.mxu0 %vm10655_vm5, %v15132_v4  ;;  %v2222_v31 = vld [vmem:[%s14752_s3 + $0x140] sm:$0xff] }
 0x6af   :  { %9453 = vmatprep.subr.bf16.mxu0 %v15135_v63 }
 0x6b1   :  { %8929 = vmatmul.mubr.f32.gmra.mrb[14].mxu0 %v11183_v6 }
 0x6b2   :  { %8931 = vmatprep.mubr.msk.f32.mxu0 %vm10655_vm5, %v15132_v4 }
 0x6b5   :  { %8932 = vmatmul.mubr.f32.gmra.mrb[16].mxu0 %v11214_v38 }
 0x6b6   :  { %8934 = vmatprep.mubr.msk.f32.mxu0 %vm10655_vm5, %v15132_v4 }
 0x6b9   :  { %8935 = vmatmul.mubr.f32.gmra.mrb[18].mxu0 %v11237_v7 }
 0x6ba   :  { %8937 = vmatprep.mubr.msk.f32.mxu0 %vm10655_vm5, %v15132_v4 }
 0x6bd   :  { %8938 = vmatmul.mubr.f32.gmra.mrb[20].mxu0 %v11247_v26 }
 0x6be   :  { %8940 = vmatprep.mubr.msk.f32.mxu0 %vm10655_vm5, %v15132_v4 }
 0x6c1   :  { %8941 = vmatmul.mubr.f32.gmra.mrb[22].mxu0 %v11266_v60 }
 0x6c2   :  { %8943 = vmatprep.mubr.msk.f32.mxu0 %vm10655_vm5, %v15132_v4 }
 0x6c5   :  { %8944 = vmatmul.mubr.f32.gmra.mrb[24].mxu0 %v11286_v27 }
 0x6c6   :  { %8946 = vmatprep.mubr.msk.f32.mxu0 %vm10655_vm5, %v15132_v4 }
 0x6c9   :  { %8947 = vmatmul.mubr.f32.gmra.mrb[26].mxu0 %v11301_v14 }
 0x6ca   :  { %8949 = vmatprep.mubr.msk.f32.mxu0 %vm10655_vm5, %v15132_v4 }
 0x6cd   :  { %8950 = vmatmul.mubr.f32.gmra.mrb[28].mxu0 %v11316_v36 }
 0x6ce   :  { %8952 = vmatprep.mubr.msk.f32.mxu0 %vm10655_vm5, %v15132_v4 }
 0x6d1   :  { %8953 = vmatmul.mubr.f32.gmra.mrb[30].mxu0 %v11324_v24 }
 0x6d2   :  { %8955 = vmatprep.mubr.msk.f32.mxu0 %vm10655_vm5, %v15132_v4 }
 0x6d5   :  { %8956 = vmatmul.mubr.f32.gmra.mrb[32].mxu0 %v11342_v55 }
 0x6d6   :  { %8958 = vmatprep.mubr.msk.f32.mxu0 %vm10655_vm5, %v15132_v4 }
 0x6d9   :  { %8959 = vmatmul.mubr.f32.gmra.mrb[34].mxu0 %v11361_v11 }
 0x6da   :  { %8961 = vmatprep.mubr.msk.f32.mxu0 %vm10655_vm5, %v15132_v4 }
 0x6dd   :  { %8962 = vmatmul.mubr.f32.gmra.mrb[36].mxu0 %v11376_v50 }
 0x6de   :  { %8964 = vmatprep.mubr.msk.f32.mxu0 %vm10655_vm5, %v15132_v4 }
 0x6e1   :  { %8965 = vmatmul.mubr.f32.gmra.mrb[38].mxu0 %v11391_v52 }
 0x6e2   :  { %8967 = vmatprep.mubr.msk.f32.mxu0 %vm10655_vm5, %v15132_v4 }
 0x6e5   :  { %8968 = vmatmul.mubr.f32.gmra.mrb[40].mxu0 %v11399_v5 }
 0x6e6   :  { %8970 = vmatprep.mubr.msk.f32.mxu0 %vm10655_vm5, %v15132_v4 }
 0x6e9   :  { %8971 = vmatmul.mubr.f32.gmra.mrb[42].mxu0 %v11421_v23 }
 0x6ea   :  { %8973 = vmatprep.mubr.msk.f32.mxu0 %vm10655_vm5, %v15132_v4 }
 0x6ed   :  { %8974 = vmatmul.mubr.f32.gmra.mrb[44].mxu0 %v11436_v19 }
 0x6ee   :  { %8976 = vmatprep.mubr.msk.f32.mxu0 %vm10655_vm5, %v15132_v4 }
 0x6f1   :  { %8977 = vmatmul.mubr.f32.gmra.mrb[46].mxu0 %v11451_v34 }
 0x6f2   :  { %8979 = vmatprep.mubr.msk.f32.mxu0 %vm10655_vm5, %v15132_v4 }
 0x6f5   :  { %8980 = vmatmul.mubr.f32.gmra.mrb[48].mxu0 %v11463_v35 }
 0x6f6   :  { %8994 = vmatprep.mubr.msk.f32.mxu0 %vm10655_vm5, %v15132_v4 }
 0x6f9   :  { %8995 = vmatmul.mubr.f32.vlgmr.msra.gmra.mrb[8].mxu0 %v11138_v1  ;;  %v15140_v1 = vand.u32 4294901760, %v11177_v59 }
 0x6fa   :  { %9455 = vmatpush3.bf16.msra.mxu0 %v11152_v41  ;;  %8997 = vmatprep.mubr.msk.f32.mxu0 %vm10655_vm5, %v15132_v4 }
 0x6fb   :  { %9456 = vmatprep.subr.bf16.mxu0 %v15135_v63 }
 0x6fd   :  { %8998 = vmatmul.mubr.f32.gmra.mrb[10].mxu0 %v11150_v48  ;;  %v15141_v48 = vand.u32 4294901760, %v11212_v32 }
 0x6fe   :  { %9458 = vmatpush3.bf16.msra.mxu0 %v11172_v57  ;;  %9000 = vmatprep.mubr.msk.f32.mxu0 %vm10655_vm5, %v15132_v4 }
 0x6ff   :  { %9459 = vmatprep.subr.bf16.mxu0 %v15135_v63 }
 0x701   :  { %9001 = vmatmul.mubr.f32.gmra.mrb[12].mxu0 %v11177_v59  ;;  %v15143_v59 = vand.u32 4294901760, %v11254_v45 }
 0x702   :  { %9461 = vmatpush3.bf16.msra.mxu0 %v11207_v0  ;;  %9003 = vmatprep.mubr.msk.f32.mxu0 %vm10655_vm5, %v15132_v4 }
 0x703   :  { %9462 = vmatprep.subr.bf16.mxu0 %v15135_v63 }
 0x705   :  { %9004 = vmatmul.mubr.f32.gmra.mrb[14].mxu0 %v11212_v32  ;;  %v15148_v32 = vand.u32 4294901760, %v11331_v54 }
 0x706   :  { %9006 = vmatprep.mubr.msk.f32.mxu0 %vm10655_vm5, %v15132_v4 }
 0x709   :  { %9007 = vmatmul.mubr.f32.gmra.mrb[16].mxu0 %v11235_v30  ;;  %v15150_v30 = vand.u32 4294901760, %v11356_v47 }
 0x70a   :  { %9009 = vmatprep.mubr.msk.f32.mxu0 %vm10655_vm5, %v15132_v4 }
 0x70d   :  { %9010 = vmatmul.mubr.f32.gmra.mrb[18].mxu0 %v11254_v45  ;;  %v15151_v45 = vand.u32 4294901760, %v11374_v53 }
 0x70e   :  { %9012 = vmatprep.mubr.msk.f32.mxu0 %vm10655_vm5, %v15132_v4 }
 0x711   :  { %9013 = vmatmul.mubr.f32.gmra.mrb[20].mxu0 %v11264_v56 }
 0x712   :  { %9015 = vmatprep.mubr.msk.f32.mxu0 %vm10655_vm5, %v15132_v4 }
 0x715   :  { %9016 = vmatmul.mubr.f32.gmra.mrb[22].mxu0 %v11281_v20  ;;  %v15153_v20 = vand.u32 4294901760, %v11406_v25 }
 0x716   :  { %9018 = vmatprep.mubr.msk.f32.mxu0 %vm10655_vm5, %v15132_v4 }
 0x719   :  { %9019 = vmatmul.mubr.f32.gmra.mrb[24].mxu0 %v11299_v61 }
 0x71a   :  { %9021 = vmatprep.mubr.msk.f32.mxu0 %vm10655_vm5, %v15132_v4 }
 0x71d   :  { %9022 = vmatmul.mubr.f32.gmra.mrb[26].mxu0 %v11314_v16 }
 0x71e   :  { %9024 = vmatprep.mubr.msk.f32.mxu0 %vm10655_vm5, %v15132_v4 }
 0x721   :  { %9025 = vmatmul.mubr.f32.gmra.mrb[28].mxu0 %v11331_v54  ;;  %v15154_v54 = vand.u32 4294901760, %v11415_v29 }
 0x722   :  { %9027 = vmatprep.mubr.msk.f32.mxu0 %vm10655_vm5, %v15132_v4 }
 0x725   :  { %9028 = vmatmul.mubr.f32.gmra.mrb[30].mxu0 %v11340_v44 }
 0x726   :  { %9030 = vmatprep.mubr.msk.f32.mxu0 %vm10655_vm5, %v15132_v4 }
 0x729   :  { %9031 = vmatmul.mubr.f32.gmra.mrb[32].mxu0 %v11356_v47 }
 0x72a   :  { %9033 = vmatprep.mubr.msk.f32.mxu0 %vm10655_vm5, %v15132_v4 }
 0x72d   :  { %9034 = vmatmul.mubr.f32.gmra.mrb[34].mxu0 %v11374_v53 }
 0x72e   :  { %9036 = vmatprep.mubr.msk.f32.mxu0 %vm10655_vm5, %v15132_v4 }
 0x731   :  { %9037 = vmatmul.mubr.f32.gmra.mrb[36].mxu0 %v11389_v39 }
 0x732   :  { %9039 = vmatprep.mubr.msk.f32.mxu0 %vm10655_vm5, %v15132_v4 }
 0x735   :  { %9040 = vmatmul.mubr.f32.gmra.mrb[38].mxu0 %v11406_v25 }
 0x736   :  { %9042 = vmatprep.mubr.msk.f32.mxu0 %vm10655_vm5, %v15132_v4 }
 0x739   :  { %9043 = vmatmul.mubr.f32.gmra.mrb[40].mxu0 %v11415_v29  ;;  %v2221_v29 = vld [vmem:[%s14752_s3 + $0x130] sm:$0xff] }
 0x73a   :  { %9045 = vmatprep.mubr.msk.f32.mxu0 %vm10655_vm5, %v15132_v4 }
 0x73d   :  { %9046 = vmatmul.mubr.f32.gmra.mrb[42].mxu0 %v11434_v9 }
 0x73e   :  { %9048 = vmatprep.mubr.msk.f32.mxu0 %vm10655_vm5, %v15132_v4 }
 0x741   :  { %9049 = vmatmul.mubr.f32.gmra.mrb[44].mxu0 %v11449_v8  ;;  %v2218_v8 = vld [vmem:[%s14752_s3 + $0x100] sm:$0xff] }
 0x742   :  { %9051 = vmatprep.mubr.msk.f32.mxu0 %vm10655_vm5, %v15132_v4 }
 0x745   :  { %9052 = vmatmul.mubr.f32.gmra.mrb[46].mxu0 %v11461_v18 }
 0x746   :  { %9054 = vmatprep.mubr.msk.f32.mxu0 %vm10655_vm5, %v15132_v4 }
 0x749   :  { %9055 = vmatmul.mubr.f32.gmra.mrb[48].mxu0 %v11472_v46 }
 0x74a   :  { %9069 = vmatprep.mubr.msk.f32.mxu0 %vm10655_vm5, %v15132_v4 }
 0x74d   :  { %9070 = vmatmul.mubr.f32.vlgmr.msra.gmra.mrb[8].mxu0 %v15138_v43 }
 0x74e   :  { %9464 = vmatpush3.bf16.msra.mxu0 %v11185_v3  ;;  %9072 = vmatprep.mubr.msk.f32.mxu0 %vm10655_vm5, %v15132_v4  ;;  %v15144_v3 = vand.u32 4294901760, %v11264_v56  ;;  %v15152_v56 = vand.u32 4294901760, %v11389_v39 }
 0x74f   :  { %9465 = vmatprep.subr.bf16.mxu0 %v15135_v63 }
 0x751   :  { %9073 = vmatmul.mubr.f32.gmra.mrb[10].mxu0 %v15139_v51 }
 0x752   :  { %9467 = vmatpush3.bf16.msra.mxu0 %v11204_v15  ;;  %9075 = vmatprep.mubr.msk.f32.mxu0 %vm10655_vm5, %v15132_v4  ;;  %v15146_v15 = vand.u32 4294901760, %v11299_v61  ;;  %v15155_v61 = vand.u32 4294901760, %v11434_v9 }
 0x753   :  { %9468 = vmatprep.subr.bf16.mxu0 %v15135_v63 }
 0x755   :  { %9076 = vmatmul.mubr.f32.gmra.mrb[12].mxu0 %v15140_v1 }
 0x756   :  { %9470 = vmatpush3.bf16.msra.mxu0 %v11231_v62  ;;  %9078 = vmatprep.mubr.msk.f32.mxu0 %vm10655_vm5, %v15132_v4  ;;  %v15149_v62 = vand.u32 4294901760, %v11340_v44 }
 0x757   :  { %9471 = vmatprep.subr.bf16.mxu0 %v15135_v63 }
 0x759   :  { %9079 = vmatmul.mubr.f32.gmra.mrb[14].mxu0 %v15141_v48 }
 0x75a   :  { %9081 = vmatprep.mubr.msk.f32.mxu0 %vm10655_vm5, %v15132_v4 }
 0x75d   :  { %9082 = vmatmul.mubr.f32.gmra.mrb[16].mxu0 %v15142_v58 }
 0x75e   :  { %9084 = vmatprep.mubr.msk.f32.mxu0 %vm10655_vm5, %v15132_v4 }
 0x761   :  { %9085 = vmatmul.mubr.f32.gmra.mrb[18].mxu0 %v15143_v59 }
 0x762   :  { %9087 = vmatprep.mubr.msk.f32.mxu0 %vm10655_vm5, %v15132_v4 }
 0x765   :  { %9088 = vmatmul.mubr.f32.gmra.mrb[20].mxu0 %v15144_v3 }
 0x766   :  { %9090 = vmatprep.mubr.msk.f32.mxu0 %vm10655_vm5, %v15132_v4 }
 0x769   :  { %9091 = vmatmul.mubr.f32.gmra.mrb[22].mxu0 %v15145_v13 }
 0x76a   :  { %9093 = vmatprep.mubr.msk.f32.mxu0 %vm10655_vm5, %v15132_v4 }
 0x76d   :  { %9094 = vmatmul.mubr.f32.gmra.mrb[24].mxu0 %v15146_v15 }
 0x76e   :  { %9096 = vmatprep.mubr.msk.f32.mxu0 %vm10655_vm5, %v15132_v4 }
 0x771   :  { %9097 = vmatmul.mubr.f32.gmra.mrb[26].mxu0 %v15147_v42 }
 0x772   :  { %9099 = vmatprep.mubr.msk.f32.mxu0 %vm10655_vm5, %v15132_v4 }
 0x775   :  { %9100 = vmatmul.mubr.f32.gmra.mrb[28].mxu0 %v15148_v32 }
 0x776   :  { %9102 = vmatprep.mubr.msk.f32.mxu0 %vm10655_vm5, %v15132_v4 }
 0x779   :  { %9103 = vmatmul.mubr.f32.gmra.mrb[30].mxu0 %v15149_v62  ;;  %v2223_v62 = vld [vmem:[%s14752_s3 + $0x150] sm:$0xff] }
 0x77a   :  { %9105 = vmatprep.mubr.msk.f32.mxu0 %vm10655_vm5, %v15132_v4 }
 0x77d   :  { %9106 = vmatmul.mubr.f32.gmra.mrb[32].mxu0 %v15150_v30 }
 0x77e   :  { %9108 = vmatprep.mubr.msk.f32.mxu0 %vm10655_vm5, %v15132_v4 }
 0x781   :  { %9109 = vmatmul.mubr.f32.gmra.mrb[34].mxu0 %v15151_v45 }
 0x782   :  { %9111 = vmatprep.mubr.msk.f32.mxu0 %vm10655_vm5, %v15132_v4 }
 0x785   :  { %9112 = vmatmul.mubr.f32.gmra.mrb[36].mxu0 %v15152_v56 }
 0x786   :  { %9114 = vmatprep.mubr.msk.f32.mxu0 %vm10655_vm5, %v15132_v4 }
 0x789   :  { %9115 = vmatmul.mubr.f32.gmra.mrb[38].mxu0 %v15153_v20 }
 0x78a   :  { %9117 = vmatprep.mubr.msk.f32.mxu0 %vm10655_vm5, %v15132_v4 }
 0x78d   :  { %9118 = vmatmul.mubr.f32.gmra.mrb[40].mxu0 %v15154_v54 }
 0x78e   :  { %9120 = vmatprep.mubr.msk.f32.mxu0 %vm10655_vm5, %v15132_v4 }
 0x791   :  { %9121 = vmatmul.mubr.f32.gmra.mrb[42].mxu0 %v15155_v61 }
 0x792   :  { %9123 = vmatprep.mubr.msk.f32.mxu0 %vm10655_vm5, %v15132_v4 }
 0x795   :  { %9124 = vmatmul.mubr.f32.gmra.mrb[44].mxu0 %v2654_v17 }
 0x796   :  { %9126 = vmatprep.mubr.msk.f32.mxu0 %vm10655_vm5, %v15132_v4 }
 0x799   :  { %9127 = vmatmul.mubr.f32.gmra.mrb[46].mxu0 %v2664_v10 }
 0x79a   :  { %9129 = vmatprep.mubr.msk.f32.mxu0 %vm10655_vm5, %v15132_v4 }
 0x79d   :  { %9130 = vmatmul.mubr.f32.gmra.mrb[48].mxu0 %v2674_v33 }
 0x79e   :  { %9144 = vmatprep.mubr.msk.f32.mxu0 %vm10655_vm5, %v15132_v4 }
 0x7a1   :  { %9145 = vmatmul.mubr.f32.vlgmr.msra.gmra.mrb[8].mxu0 %v11131_v22 }
 0x7a2   :  { %9473 = vmatpush3.bf16.msra.mxu0 %v11152_v41  ;;  %9147 = vmatprep.mubr.msk.f32.mxu0 %vm10655_vm5, %v15132_v4 }
 0x7a3   :  { %9474 = vmatprep.subr.bf16.mxu0 %v15135_v63 }
 0x7a5   :  { %9148 = vmatmul.mubr.f32.gmra.mrb[10].mxu0 %v11140_v28 }
 0x7a6   :  { %9476 = vmatpush3.bf16.msra.mxu0 %v11172_v57  ;;  %9150 = vmatprep.mubr.msk.f32.mxu0 %vm10655_vm5, %v15132_v4 }
 0x7a7   :  { %9477 = vmatprep.subr.bf16.mxu0 %v15135_v63 }
 0x7a9   :  { %9151 = vmatmul.mubr.f32.gmra.mrb[12].mxu0 %v11156_v49 }
 0x7aa   :  { %9479 = vmatpush3.bf16.msra.mxu0 %v11207_v0  ;;  %9153 = vmatprep.mubr.msk.f32.mxu0 %vm10655_vm5, %v15132_v4 }
 0x7ad   :  { %9154 = vmatmul.mubr.f32.gmra.mrb[14].mxu0 %v11183_v6 }
 0x7ae   :  { %9156 = vmatprep.mubr.msk.f32.mxu0 %vm10655_vm5, %v15132_v4 }
 0x7b1   :  { %9157 = vmatmul.mubr.f32.gmra.mrb[16].mxu0 %v11214_v38 }
 0x7b2   :  { %9159 = vmatprep.mubr.msk.f32.mxu0 %vm10655_vm5, %v15132_v4 }
 0x7b5   :  { %9160 = vmatmul.mubr.f32.gmra.mrb[18].mxu0 %v11237_v7 }
 0x7b6   :  { %9162 = vmatprep.mubr.msk.f32.mxu0 %vm10655_vm5, %v15132_v4 }
 0x7b9   :  { %9163 = vmatmul.mubr.f32.gmra.mrb[20].mxu0 %v11247_v26 }
 0x7ba   :  { %9165 = vmatprep.mubr.msk.f32.mxu0 %vm10655_vm5, %v15132_v4 }
 0x7bd   :  { %9166 = vmatmul.mubr.f32.gmra.mrb[22].mxu0 %v11266_v60 }
 0x7be   :  { %9168 = vmatprep.mubr.msk.f32.mxu0 %vm10655_vm5, %v15132_v4 }
 0x7c1   :  { %9169 = vmatmul.mubr.f32.gmra.mrb[24].mxu0 %v11286_v27 }
 0x7c2   :  { %9171 = vmatprep.mubr.msk.f32.mxu0 %vm10655_vm5, %v15132_v4 }
 0x7c5   :  { %9172 = vmatmul.mubr.f32.gmra.mrb[26].mxu0 %v11301_v14 }
 0x7c6   :  { %9174 = vmatprep.mubr.msk.f32.mxu0 %vm10655_vm5, %v15132_v4 }
 0x7c9   :  { %9175 = vmatmul.mubr.f32.gmra.mrb[28].mxu0 %v11316_v36 }
 0x7ca   :  { %9177 = vmatprep.mubr.msk.f32.mxu0 %vm10655_vm5, %v15132_v4 }
 0x7cd   :  { %9178 = vmatmul.mubr.f32.gmra.mrb[30].mxu0 %v11324_v24 }
 0x7ce   :  { %9180 = vmatprep.mubr.msk.f32.mxu0 %vm10655_vm5, %v15132_v4 }
 0x7d1   :  { %9181 = vmatmul.mubr.f32.gmra.mrb[32].mxu0 %v11342_v55 }
 0x7d2   :  { %9183 = vmatprep.mubr.msk.f32.mxu0 %vm10655_vm5, %v15132_v4 }
 0x7d5   :  { %9184 = vmatmul.mubr.f32.gmra.mrb[34].mxu0 %v11361_v11 }
 0x7d6   :  { %9186 = vmatprep.mubr.msk.f32.mxu0 %vm10655_vm5, %v15132_v4 }
 0x7d9   :  { %9187 = vmatmul.mubr.f32.gmra.mrb[36].mxu0 %v11376_v50 }
 0x7da   :  { %9189 = vmatprep.mubr.msk.f32.mxu0 %vm10655_vm5, %v15132_v4 }
 0x7dd   :  { %9190 = vmatmul.mubr.f32.gmra.mrb[38].mxu0 %v11391_v52 }
 0x7de   :  { %9192 = vmatprep.mubr.msk.f32.mxu0 %vm10655_vm5, %v15132_v4 }
 0x7e1   :  { %9193 = vmatmul.mubr.f32.gmra.mrb[40].mxu0 %v11399_v5 }
 0x7e2   :  { %9195 = vmatprep.mubr.msk.f32.mxu0 %vm10655_vm5, %v15132_v4 }
 0x7e5   :  { %9196 = vmatmul.mubr.f32.gmra.mrb[42].mxu0 %v11421_v23 }
 0x7e6   :  { %9198 = vmatprep.mubr.msk.f32.mxu0 %vm10655_vm5, %v15132_v4 }
 0x7e9   :  { %9199 = vmatmul.mubr.f32.gmra.mrb[44].mxu0 %v11436_v19 }
 0x7ea   :  { %9201 = vmatprep.mubr.msk.f32.mxu0 %vm10655_vm5, %v15132_v4 }
 0x7ed   :  { %9202 = vmatmul.mubr.f32.gmra.mrb[46].mxu0 %v11451_v34 }
 0x7ee   :  { %9204 = vmatprep.mubr.msk.f32.mxu0 %vm10655_vm5, %v15132_v4 }
 0x7f1   :  { %9205 = vmatmul.mubr.f32.gmra.mrb[48].mxu0 %v11463_v35 }
 0x7f2   :  { %9219 = vmatprep.mubr.msk.f32.mxu0 %vm10655_vm5, %v15132_v4 }
 0x7f5   :  { %9220 = vmatmul.mubr.f32.vlgmr.msra.gmra.mrb[8].mxu0 %v11131_v22 }
 0x7f6   :  { %9222 = vmatprep.mubr.msk.f32.mxu0 %vm10655_vm5, %v15132_v4 }
 0x7f9   :  { %9223 = vmatmul.mubr.f32.gmra.mrb[10].mxu0 %v11140_v28 }
 0x7fa   :  { %9225 = vmatprep.mubr.msk.f32.mxu0 %vm10655_vm5, %v15132_v4 }
 0x7fd   :  { %9226 = vmatmul.mubr.f32.gmra.mrb[12].mxu0 %v11156_v49  ;;  %v2219_v49 = vld [vmem:[%s14752_s3 + $0x110] sm:$0xff] }
 0x7fe   :  { %9228 = vmatprep.mubr.msk.f32.mxu0 %vm10655_vm5, %v15132_v4 }
 0x801   :  { %9229 = vmatmul.mubr.f32.gmra.mrb[14].mxu0 %v11183_v6 }
 0x802   :  { %9231 = vmatprep.mubr.msk.f32.mxu0 %vm10655_vm5, %v15132_v4 }
 0x805   :  { %9232 = vmatmul.mubr.f32.gmra.mrb[16].mxu0 %v11214_v38 }
 0x806   :  { %9234 = vmatprep.mubr.msk.f32.mxu0 %vm10655_vm5, %v15132_v4 }
 0x809   :  { %9235 = vmatmul.mubr.f32.gmra.mrb[18].mxu0 %v11237_v7 }
 0x80a   :  { %9237 = vmatprep.mubr.msk.f32.mxu0 %vm10655_vm5, %v15132_v4 }
 0x80d   :  { %9238 = vmatmul.mubr.f32.gmra.mrb[20].mxu0 %v11247_v26 }
 0x80e   :  { %9240 = vmatprep.mubr.msk.f32.mxu0 %vm10655_vm5, %v15132_v4 }
 0x811   :  { %9241 = vmatmul.mubr.f32.gmra.mrb[22].mxu0 %v11266_v60 }
 0x812   :  { %9243 = vmatprep.mubr.msk.f32.mxu0 %vm10655_vm5, %v15132_v4 }
 0x815   :  { %9244 = vmatmul.mubr.f32.gmra.mrb[24].mxu0 %v11286_v27 }
 0x816   :  { %9246 = vmatprep.mubr.msk.f32.mxu0 %vm10655_vm5, %v15132_v4 }
 0x819   :  { %9247 = vmatmul.mubr.f32.gmra.mrb[26].mxu0 %v11301_v14  ;;  %v2217_v14 = vld [vmem:[%s14752_s3 + $0xf0] sm:$0xff] }
 0x81a   :  { %9249 = vmatprep.mubr.msk.f32.mxu0 %vm10655_vm5, %v15132_v4 }
 0x81d   :  { %9250 = vmatmul.mubr.f32.gmra.mrb[28].mxu0 %v11316_v36 }
 0x81e   :  { %9252 = vmatprep.mubr.msk.f32.mxu0 %vm10655_vm5, %v15132_v4 }
 0x821   :  { %9253 = vmatmul.mubr.f32.gmra.mrb[30].mxu0 %v11324_v24 }
 0x822   :  { %9255 = vmatprep.mubr.msk.f32.mxu0 %vm10655_vm5, %v15132_v4 }
 0x825   :  { %9256 = vmatmul.mubr.f32.gmra.mrb[32].mxu0 %v11342_v55 }
 0x826   :  { %9258 = vmatprep.mubr.msk.f32.mxu0 %vm10655_vm5, %v15132_v4 }
 0x829   :  { %9259 = vmatmul.mubr.f32.gmra.mrb[34].mxu0 %v11361_v11 }
 0x82a   :  { %9261 = vmatprep.mubr.msk.f32.mxu0 %vm10655_vm5, %v15132_v4 }
 0x82d   :  { %9262 = vmatmul.mubr.f32.gmra.mrb[36].mxu0 %v11376_v50 }
 0x82e   :  { %9264 = vmatprep.mubr.msk.f32.mxu0 %vm10655_vm5, %v15132_v4 }
 0x831   :  { %9265 = vmatmul.mubr.f32.gmra.mrb[38].mxu0 %v11391_v52  ;;  %v2220_v52 = vld [vmem:[%s14752_s3 + $0x120] sm:$0xff] }
 0x832   :  { %9267 = vmatprep.mubr.msk.f32.mxu0 %vm10655_vm5, %v15132_v4 }
 0x835   :  { %9268 = vmatmul.mubr.f32.gmra.mrb[40].mxu0 %v11399_v5 }
 0x836   :  { %9270 = vmatprep.mubr.msk.f32.mxu0 %vm10655_vm5, %v15132_v4 }
 0x839   :  { %9271 = vmatmul.mubr.f32.gmra.mrb[42].mxu0 %v11421_v23 }
 0x83a   :  { %9273 = vmatprep.mubr.msk.f32.mxu0 %vm10655_vm5, %v15132_v4 }
 0x83d   :  { %9274 = vmatmul.mubr.f32.gmra.mrb[44].mxu0 %v11436_v19 }
 0x83e   :  { %9276 = vmatprep.mubr.msk.f32.mxu0 %vm10655_vm5, %v15132_v4 }
 0x841   :  { %9277 = vmatmul.mubr.f32.gmra.mrb[46].mxu0 %v11451_v34 }
 0x842   :  { %9279 = vmatprep.mubr.msk.f32.mxu0 %vm10655_vm5, %v15132_v4 }
 0x845   :  { %9280 = vmatmul.mubr.f32.gmra.mrb[48].mxu0 %v11463_v35 }
 0x8c8   :  { %v3648_v23 = vpop.f32.mrb[8].mxu0 }
 0x8c9   :  { %v11857_v25 = vmul.f32 %v3648_v23, %v2217_v14  ;;  %v9221_v5 = vpop.f32.mrb[9].mxu0 }
 0x8cb   :  { %15156 = vst [vmem:[#allocation14_spill] sm:$0xff] %v11857_v25  ;;  %v3806_v34 = vsel %vm24_vm0, %v11857_v25, 0 }
 0x8cc   :  { %v3869_v9 = vand.u32 4294901760, %v3806_v34  ;;  %v3654_v19 = vpop.f32.mrb[10].mxu0 }
 0x8cd   :  { %v11864_v22 = vmul.f32 %v3654_v19, %v2218_v8  ;;  %v9224_v28 = vpop.f32.mrb[11].mxu0 }
 0x8ce   :  { %v11866_v41 = vsub.f32 %v3806_v34, %v3869_v9 }
 0x8cf   :  { %15157 = vst [vmem:[#allocation15_spill] sm:$0xff] %v11864_v22  ;;  %v3809_v50 = vsel %vm24_vm0, %v11864_v22, 0 }
 0x8d0   :  { %v4023_v55 = vand.u32 4294901760, %v11866_v41  ;;  %v3872_v57 = vand.u32 4294901760, %v3809_v50  ;;  %v3660_v6 = vpop.f32.mrb[12].mxu0 }
 0x8d1   :  { %v11874_v11 = vmul.f32 %v3660_v6, %v2219_v49  ;;  %v9227_v24 = vpop.f32.mrb[13].mxu0 }
 0x8d2   :  { %v11876_v0 = vpack.c.bf16 %v3872_v57, %v3869_v9  ;;  %v11878_v38 = vsub.f32 %v3809_v50, %v3872_v57  ;;  %v4024_v26 = vsub.f32 %v11866_v41, %v4023_v55  ;;  %v2224_v9 = vld [vmem:[%s14752_s3 + $0x160] sm:$0xff] }
 0x8d3   :  { %15158 = vst [vmem:[#allocation16_spill] sm:$0xff] %v11874_v11  ;;  %v3812_v7 = vsel %vm24_vm0, %v11874_v11, 0 }
 0x8d4   :  { %v4030_v60 = vand.u32 4294901760, %v11878_v38  ;;  %v3875_v36 = vand.u32 4294901760, %v3812_v7  ;;  %v3666_v27 = vpop.f32.mrb[14].mxu0  ;;  %9482 = vmatpush1.bf16.xpose.msra.mxu1 %v11876_v0  ;;  %v4025_v35 = vand.u32 4294901760, %v4024_v26 }
 0x8d5   :  { %v11890_v44 = vmul.f32 %v3666_v27, %v2220_v52  ;;  %v9230_v53 = vpop.f32.mrb[15].mxu0  ;;  %9483 = vmatprep.subr.bf16.mxu1 %v15135_v63 }
 0x8d6   :  { %v4031_v47 = vsub.f32 %v11878_v38, %v4030_v60  ;;  %v11894_v39 = vsub.f32 %v3812_v7, %v3875_v36  ;;  %v11899_v17 = vpack.c.bf16 %v4030_v60, %v4023_v55  ;;  %v2225_v60 = vld [vmem:[%s14752_s3 + $0x170] sm:$0xff] }
 0x8d7   :  { %15159 = vst [vmem:[#allocation17_spill] sm:$0xff] %v11890_v44  ;;  %v3815_v18 = vsel %vm24_vm0, %v11890_v44, 0 }
 0x8d8   :  { %15160 = vst [vmem:[#allocation18_spill] sm:$0xff] %v11899_v17  ;;  %v4032_v10 = vand.u32 4294901760, %v4031_v47  ;;  %v4037_v46 = vand.u32 4294901760, %v11894_v39  ;;  %v3878_v33 = vand.u32 4294901760, %v3815_v18  ;;  %v3672_v40 = vpop.f32.mrb[16].mxu0 }
 0x8d9   :  { %v11904_v37 = vmul.f32 %v3672_v40, %v2221_v29  ;;  %v9233_v12 = vpop.f32.mrb[17].mxu0 }
 0x8da   :  { %v11906_v2 = vpack.c.bf16 %v3878_v33, %v3875_v36  ;;  %v11908_v21 = vsub.f32 %v3815_v18, %v3878_v33  ;;  %v11913_v43 = vpack.c.bf16 %v4032_v10, %v4025_v35  ;;  %v4038_v1 = vsub.f32 %v11894_v39, %v4037_v46  ;;  %v2226_v12 = vld [vmem:[%s14752_s3 + $0x180] sm:$0xff] }
 0x8db   :  { %15161 = vst [vmem:[#allocation19_spill] sm:$0xff] %v11904_v37  ;;  %v3818_v51 = vsel %vm24_vm0, %v11904_v37, 0 }
 0x8dc   :  { %v4044_v48 = vand.u32 4294901760, %v11908_v21  ;;  %v3881_v58 = vand.u32 4294901760, %v3818_v51  ;;  %v3678_v59 = vpop.f32.mrb[18].mxu0  ;;  %9485 = vmatpush1.bf16.xpose.msra.mxu1 %v11906_v2  ;;  %v4039_v56 = vand.u32 4294901760, %v4038_v1 }
 0x8dd   :  { %v11922_v13 = vmul.f32 %v3678_v59, %v2222_v31  ;;  %v9236_v15 = vpop.f32.mrb[19].mxu0  ;;  %9486 = vmatprep.subr.bf16.mxu1 %v15135_v63 }
 0x8de   :  { %v4045_v42 = vsub.f32 %v11908_v21, %v4044_v48  ;;  %v11926_v32 = vsub.f32 %v3818_v51, %v3881_v58  ;;  %v11931_v30 = vpack.c.bf16 %v4044_v48, %v4037_v46 }
 0x8df   :  { %15162 = vst [vmem:[#allocation20_spill] sm:$0xff] %v11922_v13  ;;  %v3821_v45 = vsel %vm24_vm0, %v11922_v13, 0 }
 0x8e0   :  { %15163 = vst [vmem:[#allocation21_spill] sm:$0xff] %v11931_v30  ;;  %v4046_v20 = vand.u32 4294901760, %v4045_v42  ;;  %v4051_v54 = vand.u32 4294901760, %v11926_v32  ;;  %v3884_v61 = vand.u32 4294901760, %v3821_v45  ;;  %v3684_v14 = vpop.f32.mrb[20].mxu0  ;;  %v15191_v30 = vld [vmem:[#allocation13_spill] sm:$0xff] }
 0x8e1   :  { %v11936_v23 = vmul.f32 %v3684_v14, %v2223_v62  ;;  %v9239_v5 = vpop.f32.mrb[21].mxu0 }
 0x8e2   :  { %v11938_v8 = vpack.c.bf16 %v3884_v61, %v3881_v58  ;;  %v11940_v34 = vsub.f32 %v3821_v45, %v3884_v61  ;;  %v11945_v19 = vpack.c.bf16 %v4046_v20, %v4039_v56  ;;  %v4052_v49 = vsub.f32 %v11926_v32, %v4051_v54  ;;  %v2227_v20 = vld [vmem:[%s14752_s3 + $0x190] sm:$0xff] }
 0x8e3   :  { %15164 = vst [vmem:[#allocation22_spill] sm:$0xff] %v11936_v23  ;;  %v3824_v28 = vsel %vm24_vm0, %v11936_v23, 0 }
 0x8e4   :  { %v4058_v50 = vand.u32 4294901760, %v11940_v34  ;;  %v3887_v55 = vand.u32 4294901760, %v3824_v28  ;;  %v3690_v57 = vpop.f32.mrb[22].mxu0  ;;  %9488 = vmatpush1.bf16.xpose.msra.mxu1 %v11938_v8  ;;  %v4053_v53 = vand.u32 4294901760, %v4052_v49 }
 0x8e5   :  { %v11954_v24 = vmul.f32 %v3690_v57, %v2224_v9  ;;  %v9242_v52 = vpop.f32.mrb[23].mxu0  ;;  %9489 = vmatprep.subr.bf16.mxu1 %v15135_v63 }
 0x8e6   :  { %v4059_v7 = vsub.f32 %v11940_v34, %v4058_v50  ;;  %v11958_v26 = vsub.f32 %v3824_v28, %v3887_v55  ;;  %v11963_v36 = vpack.c.bf16 %v4058_v50, %v4051_v54 }
 0x8e7   :  { %15165 = vst [vmem:[#allocation23_spill] sm:$0xff] %v11954_v24  ;;  %v3827_v27 = vsel %vm24_vm0, %v11954_v24, 0 }
 0x8e8   :  { %15166 = vst [vmem:[#allocation24_spill] sm:$0xff] %v11963_v36  ;;  %v4060_v47 = vand.u32 4294901760, %v4059_v7  ;;  %v4065_v29 = vand.u32 4294901760, %v11958_v26  ;;  %v3890_v18 = vand.u32 4294901760, %v3827_v27  ;;  %v3696_v35 = vpop.f32.mrb[24].mxu0  ;;  %v2228_v7 = vld [vmem:[%s14752_s3 + $0x1a0] sm:$0xff] }
 0x8e9   :  { %v11968_v10 = vmul.f32 %v3696_v35, %v2225_v60  ;;  %v9245_v46 = vpop.f32.mrb[25].mxu0 }
 0x8ea   :  { %v11970_v33 = vpack.c.bf16 %v3890_v18, %v3887_v55  ;;  %v11972_v40 = vsub.f32 %v3827_v27, %v3890_v18  ;;  %v11977_v31 = vpack.c.bf16 %v4060_v47, %v4053_v53  ;;  %v4066_v1 = vsub.f32 %v11958_v26, %v4065_v29 }
 0x8eb   :  { %15167 = vst [vmem:[#allocation25_spill] sm:$0xff] %v11968_v10  ;;  %v3830_v51 = vsel %vm24_vm0, %v11968_v10, 0 }
 0x8ec   :  { %v4072_v48 = vand.u32 4294901760, %v11972_v40  ;;  %v3893_v58 = vand.u32 4294901760, %v3830_v51  ;;  %v3702_v59 = vpop.f32.mrb[26].mxu0  ;;  %9491 = vmatpush1.bf16.xpose.msra.mxu1 %v11970_v33  ;;  %v4067_v14 = vand.u32 4294901760, %v4066_v1 }
 0x8ed   :  { %v11986_v42 = vmul.f32 %v3702_v59, %v2226_v12  ;;  %v9248_v62 = vpop.f32.mrb[27].mxu0  ;;  %9492 = vmatprep.subr.bf16.mxu1 %v15135_v63 }
 0x8ee   :  { %v4073_v45 = vsub.f32 %v11972_v40, %v4072_v48  ;;  %v11990_v56 = vsub.f32 %v3830_v51, %v3893_v58  ;;  %v11995_v54 = vpack.c.bf16 %v4072_v48, %v4065_v29  ;;  %v2229_v48 = vld [vmem:[%s14752_s3 + $0x1b0] sm:$0xff] }
 0x8ef   :  { %15168 = vst [vmem:[#allocation26_spill] sm:$0xff] %v11986_v42  ;;  %v3833_v61 = vsel %vm24_vm0, %v11986_v42, 0 }
 0x8f0   :  { %15169 = vst [vmem:[#allocation27_spill] sm:$0xff] %v11995_v54  ;;  %v4074_v5 = vand.u32 4294901760, %v4073_v45  ;;  %v4079_v9 = vand.u32 4294901760, %v11990_v56  ;;  %v3896_v28 = vand.u32 4294901760, %v3833_v61  ;;  %v3708_v49 = vpop.f32.mrb[28].mxu0 }
 0x8f1   :  { %v12000_v50 = vmul.f32 %v3708_v49, %v2227_v20  ;;  %v9251_v55 = vpop.f32.mrb[29].mxu0 }
 0x8f2   :  { %v12002_v57 = vpack.c.bf16 %v3896_v28, %v3893_v58  ;;  %v12004_v52 = vsub.f32 %v3833_v61, %v3896_v28  ;;  %v12009_v60 = vpack.c.bf16 %v4074_v5, %v4067_v14  ;;  %v4080_v53 = vsub.f32 %v11990_v56, %v4079_v9 }
 0x8f3   :  { %15170 = vst [vmem:[#allocation28_spill] sm:$0xff] %v12000_v50  ;;  %v3836_v27 = vsel %vm24_vm0, %v12000_v50, 0 }
 0x8f4   :  { %v4086_v47 = vand.u32 4294901760, %v12004_v52  ;;  %v3899_v29 = vand.u32 4294901760, %v3836_v27  ;;  %v3714_v18 = vpop.f32.mrb[30].mxu0  ;;  %9494 = vmatpush1.bf16.xpose.msra.mxu1 %v12002_v57  ;;  %v4081_v62 = vand.u32 4294901760, %v4080_v53 }
 0x8f5   :  { %v12018_v46 = vmul.f32 %v3714_v18, %v2228_v7  ;;  %v9254_v12 = vpop.f32.mrb[31].mxu0  ;;  %9495 = vmatprep.subr.bf16.mxu1 %v15135_v63 }
 0x8f6   :  { %v4087_v51 = vsub.f32 %v12004_v52, %v4086_v47  ;;  %v12022_v1 = vsub.f32 %v3836_v27, %v3899_v29  ;;  %v12027_v58 = vpack.c.bf16 %v4086_v47, %v4079_v9  ;;  %v2230_v9 = vld [vmem:[%s14752_s3 + $0x1c0] sm:$0xff] }
 0x8f7   :  { %15171 = vst [vmem:[#allocation29_spill] sm:$0xff] %v12018_v46  ;;  %v3839_v59 = vsel %vm24_vm0, %v12018_v46, 0 }
 0x8f8   :  { %15172 = vst [vmem:[#allocation30_spill] sm:$0xff] %v12027_v58  ;;  %v4088_v45 = vand.u32 4294901760, %v4087_v51  ;;  %v4093_v20 = vand.u32 4294901760, %v12022_v1  ;;  %v3902_v61 = vand.u32 4294901760, %v3839_v59  ;;  %v3720_v14 = vpop.f32.mrb[32].mxu0 }
 0x8f9   :  { %v12032_v5 = vmul.f32 %v3720_v14, %v2229_v48  ;;  %v9257_v28 = vpop.f32.mrb[33].mxu0 }
 0x8fa   :  { %v12034_v49 = vpack.c.bf16 %v3902_v61, %v3899_v29  ;;  %v12036_v55 = vsub.f32 %v3839_v59, %v3902_v61  ;;  %v12041_v7 = vpack.c.bf16 %v4088_v45, %v4081_v62  ;;  %v4094_v53 = vsub.f32 %v12022_v1, %v4093_v20  ;;  %v2231_v45 = vld [vmem:[%s14752_s3 + $0x1d0] sm:$0xff] }
 0x8fb   :  { %15173 = vst [vmem:[#allocation31_spill] sm:$0xff] %v12032_v5  ;;  %v3842_v27 = vsel %vm24_vm0, %v12032_v5, 0 }
 0x8fc   :  { %v4100_v47 = vand.u32 4294901760, %v12036_v55  ;;  %v3905_v18 = vand.u32 4294901760, %v3842_v27  ;;  %v3726_v12 = vpop.f32.mrb[34].mxu0  ;;  %9497 = vmatpush1.bf16.xpose.msra.mxu1 %v12034_v49  ;;  %v4095_v28 = vand.u32 4294901760, %v4094_v53 }
 0x8fd   :  { %v12050_v51 = vmul.f32 %v3726_v12, %v2230_v9  ;;  %v9260_v48 = vpop.f32.mrb[35].mxu0  ;;  %9498 = vmatprep.subr.bf16.mxu1 %v15135_v63 }
 0x8fe   :  { %v4101_v59 = vsub.f32 %v12036_v55, %v4100_v47  ;;  %v12054_v62 = vsub.f32 %v3842_v27, %v3905_v18  ;;  %v12059_v61 = vpack.c.bf16 %v4100_v47, %v4093_v20  ;;  %v2232_v20 = vld [vmem:[%s14752_s3 + $0x1e0] sm:$0xff] }
 0x8ff   :  { %15174 = vst [vmem:[#allocation32_spill] sm:$0xff] %v12050_v51  ;;  %v3845_v14 = vsel %vm24_vm0, %v12050_v51, 0 }
 0x900   :  { %15175 = vst [vmem:[#allocation33_spill] sm:$0xff] %v12059_v61  ;;  %v4102_v29 = vand.u32 4294901760, %v4101_v59  ;;  %v4107_v9 = vand.u32 4294901760, %v12054_v62  ;;  %v3908_v12 = vand.u32 4294901760, %v3845_v14  ;;  %v3732_v48 = vpop.f32.mrb[36].mxu0 }
 0x901   :  { %v12064_v35 = vmul.f32 %v3732_v48, %v2231_v45  ;;  %v9263_v15 = vpop.f32.mrb[37].mxu0 }
 0x902   :  { %v12066_v27 = vpack.c.bf16 %v3908_v12, %v3905_v18  ;;  %v12068_v6 = vsub.f32 %v3845_v14, %v3908_v12  ;;  %v12073_v47 = vpack.c.bf16 %v4102_v29, %v4095_v28  ;;  %v4108_v59 = vsub.f32 %v12054_v62, %v4107_v9  ;;  %v2233_v12 = vld [vmem:[%s14752_s3 + $0x1f0] sm:$0xff] }
 0x903   :  { %15176 = vst [vmem:[#allocation34_spill] sm:$0xff] %v12064_v35  ;;  %v3848_v53 = vsel %vm24_vm0, %v12064_v35, 0 }
 0x904   :  { %v4114_v3 = vand.u32 4294901760, %v12068_v6  ;;  %v3911_v45 = vand.u32 4294901760, %v3848_v53  ;;  %v3738_v48 = vpop.f32.mrb[38].mxu0  ;;  %9500 = vmatpush1.bf16.xpose.msra.mxu1 %v12066_v27  ;;  %v4109_v5 = vand.u32 4294901760, %v4108_v59 }
 0x905   :  { %v12082_v18 = vmul.f32 %v3738_v48, %v2232_v20  ;;  %v9266_v14 = vpop.f32.mrb[39].mxu0  ;;  %9501 = vmatprep.subr.bf16.mxu1 %v15135_v63 }
 0x906   :  { %v4115_v29 = vsub.f32 %v12068_v6, %v4114_v3  ;;  %v12086_v28 = vsub.f32 %v3848_v53, %v3911_v45  ;;  %v12091_v16 = vpack.c.bf16 %v4114_v3, %v4107_v9  ;;  %v2234_v3 = vld [vmem:[%s14752_s3 + $0x200] sm:$0xff] }
 0x907   :  { %15177 = vst [vmem:[#allocation35_spill] sm:$0xff] %v12082_v18  ;;  %v3851_v35 = vsel %vm24_vm0, %v12082_v18, 0 }
 0x908   :  { %15178 = vst [vmem:[#allocation36_spill] sm:$0xff] %v12091_v16  ;;  %v4116_v15 = vand.u32 4294901760, %v4115_v29  ;;  %v4121_v20 = vand.u32 4294901760, %v12086_v28  ;;  %v3914_v48 = vand.u32 4294901760, %v3851_v35  ;;  %v3744_v14 = vpop.f32.mrb[40].mxu0 }
 0x909   :  { %v12096_v51 = vmul.f32 %v3744_v14, %v2233_v12  ;;  %v9269_v50 = vpop.f32.mrb[41].mxu0 }
 0x90a   :  { %v12098_v53 = vpack.c.bf16 %v3914_v48, %v3911_v45  ;;  %v12100_v46 = vsub.f32 %v3851_v35, %v3914_v48  ;;  %v12105_v9 = vpack.c.bf16 %v4116_v15, %v4109_v5  ;;  %v4122_v29 = vsub.f32 %v12086_v28, %v4121_v20  ;;  %v2235_v48 = vld [vmem:[%s14752_s3 + $0x210] sm:$0xff] }
 0x90b   :  { %15179 = vst [vmem:[#allocation37_spill] sm:$0xff] %v12096_v51  ;;  %v3854_v59 = vsel %vm24_vm0, %v12096_v51, 0 }
 0x90c   :  { %v4128_v18 = vand.u32 4294901760, %v12100_v46  ;;  %v3917_v12 = vand.u32 4294901760, %v3854_v59  ;;  %v3750_v14 = vpop.f32.mrb[42].mxu0  ;;  %9503 = vmatpush1.bf16.xpose.msra.mxu1 %v12098_v53  ;;  %v4123_v42 = vand.u32 4294901760, %v4122_v29 }
 0x90d   :  { %v12114_v35 = vmul.f32 %v3750_v14, %v2234_v3  ;;  %v9272_v45 = vpop.f32.mrb[43].mxu0  ;;  %9504 = vmatprep.subr.bf16.mxu1 %v15135_v63 }
 0x90e   :  { %v4129_v5 = vsub.f32 %v12100_v46, %v4128_v18  ;;  %v12118_v15 = vsub.f32 %v3854_v59, %v3917_v12  ;;  %v12123_v51 = vpack.c.bf16 %v4128_v18, %v4121_v20  ;;  %v15183_v59 = vld [vmem:[#allocation9_spill] sm:$0xff]  ;;  %v2236_v18 = vld [vmem:[%s14752_s3 + $0x220] sm:$0xff] }
 0x90f   :  { %15180 = vst [vmem:[#allocation38_spill] sm:$0xff] %v12114_v35  ;;  %v3857_v10 = vsel %vm24_vm0, %v12114_v35, 0  ;;  %v3793_v37 = vsel %vm24_vm0, %v15183_v59, 0 }
 0x910   :  { %15181 = vst [vmem:[#allocation39_spill] sm:$0xff] %v12123_v51  ;;  %v4130_v50 = vand.u32 4294901760, %v4129_v5  ;;  %v4135_v3 = vand.u32 4294901760, %v12118_v15  ;;  %v3920_v14 = vand.u32 4294901760, %v3857_v10  ;;  %v3756_v45 = vpop.f32.mrb[44].mxu0 }
 0x911   :  { %v12128_v23 = vmul.f32 %v3756_v45, %v2235_v48  ;;  %v9275_v24 = vpop.f32.mrb[45].mxu0 }
 0x912   :  { %v12132_v13 = vpack.c.bf16 %v3920_v14, %v3917_v12  ;;  %v12134_v22 = vsub.f32 %v3857_v10, %v3920_v14  ;;  %v12139_v20 = vpack.c.bf16 %v4130_v50, %v4123_v42  ;;  %v4136_v5 = vsub.f32 %v12118_v15, %v4135_v3  ;;  %v15185_v50 = vld [vmem:[#allocation8_spill] sm:$0xff] }
 0x913   :  { %15182 = vst [vmem:[#allocation40_spill] sm:$0xff] %v12128_v23  ;;  %v3860_v29 = vsel %vm24_vm0, %v12128_v23, 0  ;;  %v12148_v12 = vand.u32 4294901760, %v3793_v37  ;;  %v3795_v59 = vsel %vm24_vm0, %v15185_v50, 0 }
 0x914   :  { %v4142_v24 = vand.u32 4294901760, %v12134_v22  ;;  %v3923_v48 = vand.u32 4294901760, %v3860_v29  ;;  %v3762_v45 = vpop.f32.mrb[46].mxu0  ;;  %9506 = vmatpush1.bf16.xpose.msra.mxu1 %v12132_v13  ;;  %v4137_v10 = vand.u32 4294901760, %v4136_v5  ;;  %v12166_v50 = vand.u32 4294901760, %v3795_v59 }
 0x915   :  { %v12150_v14 = vmul.f32 %v3762_v45, %v2236_v18  ;;  %v9278_v42 = vpop.f32.mrb[47].mxu0  ;;  %9507 = vmatprep.subr.bf16.mxu1 %v15135_v63 }
 0x916   :  { %v4143_v23 = vsub.f32 %v12134_v22, %v4142_v24  ;;  %v12156_v35 = vsub.f32 %v3860_v29, %v3923_v48  ;;  %v12158_v44 = vpack.c.bf16 %v4142_v24, %v4135_v3  ;;  %v2237_v42 = vld [vmem:[%s14752_s3 + $0x230] sm:$0xff]  ;;  %v12169_v29 = vsub.f32 %v3793_v37, %v12148_v12  ;;  %v15187_v24 = vld [vmem:[#allocation11_spill] sm:$0xff] }
 0x917   :  { %15184 = vst [vmem:[#allocation9_spill] sm:$0xff] %v12150_v14  ;;  %v3863_v11 = vsel %vm24_vm0, %v12150_v14, 0 }
 0x918   :  { %15186 = vst [vmem:[#allocation8_spill] sm:$0xff] %v12158_v44  ;;  %v4144_v25 = vand.u32 4294901760, %v4143_v23  ;;  %v4149_v18 = vand.u32 4294901760, %v12156_v35  ;;  %v3926_v45 = vand.u32 4294901760, %v3863_v11  ;;  %v3768_v51 = vpop.f32.mrb[48].mxu0  ;;  %v3797_v44 = vsel %vm24_vm0, %v15187_v24, 0 }
 0x919   :  { %v9281_v3 = vpop.f32.mrb[49].mxu0  ;;  %v12179_v16 = vmul.f32 %v3768_v51, %v2237_v42 }
 0x91a   :  { %v12173_v14 = vpack.c.bf16 %v3926_v45, %v3923_v48  ;;  %v12175_v23 = vsub.f32 %v3863_v11, %v3926_v45  ;;  %v12177_v5 = vpack.c.bf16 %v4144_v25, %v4137_v10  ;;  %v4150_v61 = vsub.f32 %v12156_v35, %v4149_v18  ;;  %v15189_v11 = vld [vmem:[#allocation10_spill] sm:$0xff] }
 0x91b   :  { %15188 = vst [vmem:[#allocation11_spill] sm:$0xff] %v12179_v16  ;;  %v12187_v3 = vsub.f32 %v3795_v59, %v12166_v50  ;;  %v14812_v48 = vand.u32 4294901760, %v12169_v29  ;;  %v3799_v25 = vsel %vm24_vm0, %v15189_v11, 0  ;;  %v12192_v10 = vand.u32 4294901760, %v3797_v44 }
 0x91c   :  { %v4156_v58 = vand.u32 4294901760, %v12175_v23  ;;  %9509 = vmatpush1.bf16.xpose.msra.mxu1 %v12173_v14  ;;  %v12200_v42 = vsel %vm24_vm0, %v12179_v16, 0  ;;  %v12202_v24 = vand.u32 4294901760, %v3799_v25  ;;  %v4151_v59 = vand.u32 4294901760, %v4150_v61  ;;  %v15192_v61 = vld [vmem:[#allocation12_spill] sm:$0xff] }
 0x91d   :  { %3928 = vmatprep.subr.mxu1 %v15132_v4  ;;  %v3957_v11 = vsub.f32 %v12169_v29, %v14812_v48  ;;  %v12208_v54 = vsub.f32 %v3797_v44, %v12192_v10  ;;  %v3967_v36 = vand.u32 4294901760, %v12187_v3 }
 0x91e   :  { %v4157_v51 = vsub.f32 %v12175_v23, %v4156_v58  ;;  %v12196_v45 = vpack.c.bf16 %v4156_v58, %v4149_v18  ;;  %v3801_v58 = vsel %vm24_vm0, %v15191_v30, 0  ;;  %v12214_v18 = vand.u32 4294901760, %v12200_v42 }
 0x91f   :  { %v3958_v48 = vand.u32 4294901760, %v3957_v11  ;;  %v12222_v44 = vand.u32 4294901760, %v3801_v58  ;;  %v3968_v30 = vsub.f32 %v12187_v3, %v3967_v36  ;;  %v14813_v17 = vand.u32 4294901760, %v12208_v54 }
 0x920   :  { %15190 = vst [vmem:[#allocation10_spill] sm:$0xff] %v12196_v45  ;;  %v4158_v37 = vand.u32 4294901760, %v4157_v51  ;;  %v12217_v45 = vsub.f32 %v3799_v25, %v12202_v24  ;;  %v3803_v51 = vsel %vm24_vm0, %v15192_v61, 0 }
 0x921   :  { %v12234_v25 = vsub.f32 %v3801_v58, %v12222_v44  ;;  %v3979_v11 = vsub.f32 %v12208_v54, %v14813_v17 }
 0x922   :  { %v9538_v16 = vpack.c.bf16 %v4158_v37, %v4151_v59  ;;  %v12229_v37 = vand.u32 4294901760, %v3803_v51  ;;  %v3969_v59 = vand.u32 4294901760, %v3968_v30  ;;  %v3989_v61 = vand.u32 4294901760, %v12217_v45 }
 0x923   :  { %v4000_v30 = vand.u32 4294901760, %v12234_v25 }
 0x924   :  { %3930 = vmatpush1.xpose.msra.mxu1 %v12214_v18  ;;  %v3990_v58 = vsub.f32 %v12217_v45, %v3989_v61 }
 0x925   :  { %9510 = vmatprep.subr.bf16.mxu1 %v15135_v63 }
 0x926   :  { %v3991_v17 = vand.u32 4294901760, %v3990_v58 }
 0x927   :  { %3959 = vmatmul.mubr.f32.vlgmr.msra.gmra.mrb[12].mxu1 %v3958_v48  ;;  %v12243_v48 = vsub.f32 %v3803_v51, %v12229_v37 }
 0x928   :  { %9512 = vmatpush1.bf16.xpose.msra.mxu1 %v11913_v43  ;;  %3964 = vmatprep.mubr.f32.mxu1 %v15132_v4  ;;  %v3980_v43 = vand.u32 4294901760, %v3979_v11 }
 0x929   :  { %9513 = vmatprep.subr.bf16.mxu1 %v15135_v63  ;;  %v4011_v51 = vand.u32 4294901760, %v12243_v48 }
 0x92b   :  { %3970 = vmatmul.mubr.f32.gmra.mrb[14].mxu1 %v3969_v59  ;;  %v4001_v59 = vsub.f32 %v12234_v25, %v4000_v30 }
 0x92c   :  { %3975 = vmatprep.mubr.f32.mxu1 %v15132_v4 }
 0x92d   :  { %v4002_v11 = vand.u32 4294901760, %v4001_v59  ;;  %v2274_v59 = vld [vmem:[%s14752_s3 + $0x408] sm:$0xff] }
 0x92f   :  { %3981 = vmatmul.mubr.f32.gmra.mrb[16].mxu1 %v3980_v43  ;;  %v4012_v43 = vsub.f32 %v12243_v48, %v4011_v51 }
 0x930   :  { %9515 = vmatpush1.bf16.xpose.msra.mxu1 %v11945_v19  ;;  %3986 = vmatprep.mubr.f32.mxu1 %v15132_v4 }
 0x931   :  { %9516 = vmatprep.subr.bf16.mxu1 %v15135_v63  ;;  %v4013_v19 = vand.u32 4294901760, %v4012_v43 }
 0x933   :  { %3992 = vmatmul.mubr.f32.gmra.mrb[18].mxu1 %v3991_v17  ;;  %v12278_v17 = vsub.f32 %v12200_v42, %v12214_v18  ;;  %v2269_v42 = vld [vmem:[%s14752_s3 + $0x3e0] sm:$0xff] }
 0x934   :  { %3997 = vmatprep.mubr.f32.mxu1 %v15132_v4  ;;  %v4988_v43 = vand.u32 4294901760, %v2269_v42 }
 0x937   :  { %4003 = vmatmul.mubr.f32.gmra.mrb[20].mxu1 %v4002_v11 }
 0x938   :  { %9518 = vmatpush1.bf16.xpose.msra.mxu1 %v11977_v31  ;;  %4008 = vmatprep.mubr.f32.mxu1 %v15132_v4  ;;  %v4163_v31 = vand.u32 4294901760, %v12278_v17 }
 0x939   :  { %9519 = vmatprep.subr.bf16.mxu1 %v15135_v63 }
 0x93b   :  { %4014 = vmatmul.mubr.f32.gmra.mrb[22].mxu1 %v4013_v19 }
 0x93c   :  { %4189 = vmatprep.mubr.f32.mxu1 %v15132_v4 }
 0x940   :  { %9521 = vmatpush1.bf16.xpose.msra.mxu1 %v12009_v60  ;;  %v4164_v60 = vsub.f32 %v12278_v17, %v4163_v31 }
 0x941   :  { %9522 = vmatprep.subr.bf16.mxu1 %v15135_v63 }
 0x948   :  { %9524 = vmatpush1.bf16.xpose.msra.mxu1 %v12041_v7  ;;  %v4165_v7 = vand.u32 4294901760, %v4164_v60 }
 0x949   :  { %9525 = vmatprep.subr.bf16.mxu1 %v15135_v63 }
 0x950   :  { %9527 = vmatpush1.bf16.xpose.msra.mxu1 %v12073_v47  ;;  %v15193_v47 = vpack.c.bf16 %v11878_v38, %v11866_v41  ;;  %v15195_v41 = vpack.c.bf16 %v11940_v34, %v11926_v32  ;;  %v15196_v38 = vpack.c.bf16 %v11972_v40, %v11958_v26  ;;  %v15199_v32 = vpack.c.bf16 %v12068_v6, %v12054_v62  ;;  %v15204_v6 = vld [vmem:[#allocation18_spill] sm:$0xff]  ;;  %v15212_v62 = vld [vmem:[#allocation39_spill] sm:$0xff] }
 0x951   :  { %9528 = vmatprep.subr.bf16.mxu1 %v15135_v63  ;;  %v15200_v34 = vpack.c.bf16 %v12100_v46, %v12086_v28  ;;  %v15201_v26 = vpack.c.bf16 %v12134_v22, %v12118_v15  ;;  %v15202_v40 = vpack.c.bf16 %v12175_v23, %v12156_v35  ;;  %v15203_v22 = vand.u32 4294901760, %v12169_v29  ;;  %v15209_v46 = vld [vmem:[#allocation30_spill] sm:$0xff]  ;;  %v15213_v28 = vld [vmem:[#allocation8_spill] sm:$0xff] }
 0x958   :  { %9530 = vmatpush1.bf16.xpose.msra.mxu1 %v12105_v9  ;;  %v15214_v9 = vld [vmem:[#allocation10_spill] sm:$0xff] }
 0x959   :  { %9531 = vmatprep.subr.bf16.mxu1 %v15135_v63 }
 0x960   :  { %9533 = vmatpush1.bf16.xpose.msra.mxu1 %v12139_v20 }
 0x961   :  { %9534 = vmatprep.subr.bf16.mxu1 %v15135_v63 }
 0x968   :  { %9536 = vmatpush1.bf16.xpose.msra.mxu1 %v12177_v5 }
 0x969   :  { %9537 = vmatprep.subr.bf16.mxu1 %v15135_v63 }
 0x970   :  { %9539 = vmatpush1.bf16.xpose.msra.mxu1 %v9538_v16  ;;  %v15194_v16 = vpack.c.bf16 %v11908_v21, %v11894_v39  ;;  %v15197_v39 = vpack.c.bf16 %v12004_v52, %v11990_v56  ;;  %v15198_v21 = vpack.c.bf16 %v12036_v55, %v12022_v1  ;;  %v15205_v56 = vand.u32 4294901760, %v12208_v54  ;;  %v15206_v52 = vld [vmem:[#allocation21_spill] sm:$0xff]  ;;  %v15211_v55 = vld [vmem:[#allocation36_spill] sm:$0xff] }
 0x971   :  { %4160 = vmatprep.subr.mxu1 %v15132_v4  ;;  %v15210_v1 = vld [vmem:[#allocation33_spill] sm:$0xff] }
 0x978   :  { %4166 = vmatpush1.xpose.msra.mxu1 %v4165_v7 }
 0x979   :  { %9540 = vmatprep.subr.bf16.mxu1 %v15135_v63 }
 0x97b   :  { %4191 = vmatmul.mubr.f32.vlgmr.msra.gmra.mrb[12].mxu1 %v12148_v12 }
 0x97c   :  { %9542 = vmatpush1.bf16.xpose.msra.mxu1 %v15193_v47  ;;  %4196 = vmatprep.mubr.f32.mxu1 %v15132_v4 }
 0x97d   :  { %9543 = vmatprep.subr.bf16.mxu1 %v15135_v63 }
 0x97f   :  { %4198 = vmatmul.mubr.f32.gmra.mrb[14].mxu1 %v12166_v50 }
 0x980   :  { %4203 = vmatprep.mubr.f32.mxu1 %v15132_v4 }
 0x983   :  { %4205 = vmatmul.mubr.f32.gmra.mrb[16].mxu1 %v12192_v10 }
 0x984   :  { %9545 = vmatpush1.bf16.xpose.msra.mxu1 %v15194_v16  ;;  %4210 = vmatprep.mubr.f32.mxu1 %v15132_v4 }
 0x985   :  { %9546 = vmatprep.subr.bf16.mxu1 %v15135_v63 }
 0x987   :  { %4212 = vmatmul.mubr.f32.gmra.mrb[18].mxu1 %v12202_v24 }
 0x988   :  { %4217 = vmatprep.mubr.f32.mxu1 %v15132_v4 }
 0x98b   :  { %4219 = vmatmul.mubr.f32.gmra.mrb[20].mxu1 %v12222_v44 }
 0x98c   :  { %9548 = vmatpush1.bf16.xpose.msra.mxu1 %v15195_v41  ;;  %4224 = vmatprep.mubr.f32.mxu1 %v15132_v4  ;;  %v2276_v41 = vld [vmem:[%s14752_s3 + $0x418] sm:$0xff] }
 0x98d   :  { %9549 = vmatprep.subr.bf16.mxu1 %v15135_v63 }
 0x98f   :  { %4226 = vmatmul.mubr.f32.gmra.mrb[22].mxu1 %v12229_v37 }
 0x990   :  { %4338 = vmatprep.mubr.f32.mxu1 %v15132_v4 }
 0x994   :  { %9551 = vmatpush1.bf16.xpose.msra.mxu1 %v15196_v38  ;;  %v2278_v38 = vld [vmem:[%s14752_s3 + $0x428] sm:$0xff] }
 0x995   :  { %9552 = vmatprep.subr.bf16.mxu1 %v15135_v63 }
 0x99c   :  { %9554 = vmatpush1.bf16.xpose.msra.mxu1 %v15197_v39  ;;  %v2275_v39 = vld [vmem:[%s14752_s3 + $0x410] sm:$0xff] }
 0x99d   :  { %9555 = vmatprep.subr.bf16.mxu1 %v15135_v63 }
 0x9a4   :  { %9557 = vmatpush1.bf16.xpose.msra.mxu1 %v15198_v21 }
 0x9a5   :  { %9558 = vmatprep.subr.bf16.mxu1 %v15135_v63 }
 0x9ac   :  { %9560 = vmatpush1.bf16.xpose.msra.mxu1 %v15199_v32 }
 0x9ad   :  { %9561 = vmatprep.subr.bf16.mxu1 %v15135_v63 }
 0x9b4   :  { %9563 = vmatpush1.bf16.xpose.msra.mxu1 %v15200_v34 }
 0x9b5   :  { %9564 = vmatprep.subr.bf16.mxu1 %v15135_v63 }
 0x9bc   :  { %9566 = vmatpush1.bf16.xpose.msra.mxu1 %v15201_v26 }
 0x9bd   :  { %9567 = vmatprep.subr.bf16.mxu1 %v15135_v63 }
 0x9c4   :  { %9569 = vmatpush1.bf16.xpose.msra.mxu1 %v15202_v40  ;;  %v2277_v40 = vld [vmem:[%s14752_s3 + $0x420] sm:$0xff] }
 0x9c5   :  { %4312 = vmatprep.subr.mxu1 %v15132_v4 }
 0x9cc   :  { %4315 = vmatpush1.xpose.msra.mxu1 %v12278_v17  ;;  %v2271_v17 = vld [vmem:[%s14752_s3 + $0x3f0] sm:$0xff] }
 0x9cd   :  { %9570 = vmatprep.subr.bf16.mxu1 %v15135_v63 }
 0x9cf   :  { %4341 = vmatmul.mubr.f32.vlgmr.msra.gmra.mrb[12].mxu1 %v12169_v29 }
 0x9d0   :  { %9572 = vmatpush1.bf16.xpose.msra.mxu1 %v11876_v0  ;;  %4346 = vmatprep.mubr.f32.mxu1 %v15132_v4 }
 0x9d1   :  { %9573 = vmatprep.subr.bf16.mxu1 %v15135_v63 }
 0x9d3   :  { %4349 = vmatmul.mubr.f32.gmra.mrb[14].mxu1 %v12187_v3 }
 0x9d4   :  { %4354 = vmatprep.mubr.f32.mxu1 %v15132_v4 }
 0x9d7   :  { %4357 = vmatmul.mubr.f32.gmra.mrb[16].mxu1 %v12208_v54  ;;  %v15208_v54 = vld [vmem:[#allocation27_spill] sm:$0xff] }
 0x9d8   :  { %9575 = vmatpush1.bf16.xpose.msra.mxu1 %v11906_v2  ;;  %4362 = vmatprep.mubr.f32.mxu1 %v15132_v4 }
 0x9d9   :  { %9576 = vmatprep.subr.bf16.mxu1 %v15135_v63 }
 0x9db   :  { %4365 = vmatmul.mubr.f32.gmra.mrb[18].mxu1 %v12217_v45  ;;  %v2267_v45 = vld [vmem:[%s14752_s3 + $0x3d0] sm:$0xff] }
 0x9dc   :  { %4370 = vmatprep.mubr.f32.mxu1 %v15132_v4  ;;  %v4984_v11 = vand.u32 4294901760, %v2267_v45 }
 0x9de   :  { %v12550_v34 = vpack.c.bf16 %v4988_v43, %v4984_v11  ;;  %v12552_v26 = vsub.f32 %v2267_v45, %v4984_v11 }
 0x9df   :  { %4373 = vmatmul.mubr.f32.gmra.mrb[20].mxu1 %v12234_v25  ;;  %v2272_v25 = vld [vmem:[%s14752_s3 + $0x3f8] sm:$0xff] }
 0x9e0   :  { %9578 = vmatpush1.bf16.xpose.msra.mxu1 %v11938_v8  ;;  %4378 = vmatprep.mubr.f32.mxu1 %v15132_v4  ;;  %v4990_v19 = vand.u32 4294901760, %v2272_v25  ;;  %15226 = vst [vmem:[#allocation10_spill] sm:$0xff] %v12550_v34  ;;  %15227 = vst [vmem:[#allocation41_spill] sm:$0xff] %v12552_v26 }
 0x9e1   :  { %9579 = vmatprep.subr.bf16.mxu1 %v15135_v63 }
 0x9e3   :  { %4381 = vmatmul.mubr.f32.gmra.mrb[22].mxu1 %v12243_v48 }
 0x9e4   :  { %4472 = vmatprep.mubr.f32.mxu1 %v15132_v4 }
 0x9e8   :  { %9581 = vmatpush1.bf16.xpose.msra.mxu1 %v11970_v33 }
 0x9e9   :  { %9582 = vmatprep.subr.bf16.mxu1 %v15135_v63 }
 0x9f0   :  { %9584 = vmatpush1.bf16.xpose.msra.mxu1 %v12002_v57 }
 0x9f1   :  { %9585 = vmatprep.subr.bf16.mxu1 %v15135_v63 }
 0x9f8   :  { %9587 = vmatpush1.bf16.xpose.msra.mxu1 %v12034_v49 }
 0x9f9   :  { %9588 = vmatprep.subr.bf16.mxu1 %v15135_v63 }
 0xa00   :  { %9590 = vmatpush1.bf16.xpose.msra.mxu1 %v12066_v27 }
 0xa01   :  { %9591 = vmatprep.subr.bf16.mxu1 %v15135_v63 }
 0xa08   :  { %9593 = vmatpush1.bf16.xpose.msra.mxu1 %v12098_v53 }
 0xa09   :  { %9594 = vmatprep.subr.bf16.mxu1 %v15135_v63 }
 0xa10   :  { %9596 = vmatpush1.bf16.xpose.msra.mxu1 %v12132_v13 }
 0xa11   :  { %9597 = vmatprep.subr.bf16.mxu1 %v15135_v63 }
 0xa18   :  { %9599 = vmatpush1.bf16.xpose.msra.mxu1 %v12173_v14 }
 0xa19   :  { %4447 = vmatprep.subr.mxu1 %v15132_v4 }
 0xa20   :  { %4449 = vmatpush1.xpose.msra.mxu1 %v12214_v18 }
 0xa21   :  { %9600 = vmatprep.subr.bf16.mxu1 %v15135_v63 }
 0xa23   :  { %4476 = vmatmul.mubr.f32.vlgmr.msra.gmra.mrb[12].mxu1 %v15203_v22  ;;  %v12557_v22 = vsub.f32 %v2269_v42, %v4988_v43  ;;  %v2288_v43 = vld [vmem:[%s14752_s3 + $0x478] sm:$0xff] }
 0xa24   :  { %9602 = vmatpush1.bf16.xpose.msra.mxu1 %v15204_v6  ;;  %4481 = vmatprep.mubr.f32.mxu1 %v15132_v4  ;;  %v4994_v6 = vand.u32 4294901760, %v2274_v59 }
 0xa25   :  { %9603 = vmatprep.subr.bf16.mxu1 %v15135_v63  ;;  %15228 = vst [vmem:[#allocation42_spill] sm:$0xff] %v12557_v22 }
 0xa27   :  { %4485 = vmatmul.mubr.f32.gmra.mrb[14].mxu1 %v3967_v36  ;;  %v15207_v36 = vld [vmem:[#allocation24_spill] sm:$0xff] }
 0xa28   :  { %4490 = vmatprep.mubr.f32.mxu1 %v15132_v4 }
 0xa2b   :  { %4494 = vmatmul.mubr.f32.gmra.mrb[16].mxu1 %v15205_v56  ;;  %v12559_v56 = vsub.f32 %v2272_v25, %v4990_v19 }
 0xa2c   :  { %9605 = vmatpush1.bf16.xpose.msra.mxu1 %v15206_v52  ;;  %4499 = vmatprep.mubr.f32.mxu1 %v15132_v4  ;;  %v4992_v52 = vand.u32 4294901760, %v2271_v17 }
 0xa2d   :  { %9606 = vmatprep.subr.bf16.mxu1 %v15135_v63  ;;  %15229 = vst [vmem:[#allocation43_spill] sm:$0xff] %v12559_v56 }
 0xa2f   :  { %4503 = vmatmul.mubr.f32.gmra.mrb[18].mxu1 %v3989_v61 }
 0xa30   :  { %4508 = vmatprep.mubr.f32.mxu1 %v15132_v4 }
 0xa33   :  { %4512 = vmatmul.mubr.f32.gmra.mrb[20].mxu1 %v4000_v30 }
 0xa34   :  { %9608 = vmatpush1.bf16.xpose.msra.mxu1 %v15207_v36  ;;  %4517 = vmatprep.mubr.f32.mxu1 %v15132_v4 }
 0xa35   :  { %9609 = vmatprep.subr.bf16.mxu1 %v15135_v63 }
 0xa37   :  { %4521 = vmatmul.mubr.f32.gmra.mrb[22].mxu1 %v4011_v51 }
 0xa38   :  { %4654 = vmatprep.mubr.f32.mxu1 %v15132_v4 }
 0xa3c   :  { %9611 = vmatpush1.bf16.xpose.msra.mxu1 %v15208_v54  ;;  %v4998_v54 = vand.u32 4294901760, %v2276_v41 }
 0xa3d   :  { %9612 = vmatprep.subr.bf16.mxu1 %v15135_v63 }
 0xa44   :  { %9614 = vmatpush1.bf16.xpose.msra.mxu1 %v15209_v46  ;;  %v5002_v46 = vand.u32 4294901760, %v2278_v38 }
 0xa45   :  { %9615 = vmatprep.subr.bf16.mxu1 %v15135_v63 }
 0xa4c   :  { %9617 = vmatpush1.bf16.xpose.msra.mxu1 %v15210_v1  ;;  %v5000_v1 = vand.u32 4294901760, %v2275_v39 }
 0xa4d   :  { %9618 = vmatprep.subr.bf16.mxu1 %v15135_v63 }
 0xa54   :  { %9620 = vmatpush1.bf16.xpose.msra.mxu1 %v15211_v55  ;;  %v12563_v55 = vpack.c.bf16 %v4994_v6, %v4990_v19  ;;  %v2290_v19 = vld [vmem:[%s14752_s3 + $0x488] sm:$0xff] }
 0xa55   :  { %9621 = vmatprep.subr.bf16.mxu1 %v15135_v63 }
 0xa56   :  { %15230 = vst [vmem:[#allocation44_spill] sm:$0xff] %v12563_v55 }
 0xa5c   :  { %9623 = vmatpush1.bf16.xpose.msra.mxu1 %v15212_v62  ;;  %v12565_v62 = vsub.f32 %v2274_v59, %v4994_v6 }
 0xa5d   :  { %9624 = vmatprep.subr.bf16.mxu1 %v15135_v63 }
 0xa5e   :  { %15231 = vst [vmem:[#allocation45_spill] sm:$0xff] %v12565_v62 }
 0xa64   :  { %9626 = vmatpush1.bf16.xpose.msra.mxu1 %v15213_v28  ;;  %v12567_v28 = vsub.f32 %v2271_v17, %v4992_v52 }
 0xa65   :  { %9627 = vmatprep.subr.bf16.mxu1 %v15135_v63 }
 0xa66   :  { %15232 = vst [vmem:[#allocation46_spill] sm:$0xff] %v12567_v28 }
 0xa6c   :  { %9629 = vmatpush1.bf16.xpose.msra.mxu1 %v15214_v9  ;;  %v5004_v9 = vand.u32 4294901760, %v2277_v40 }
 0xa6d   :  { %4627 = vmatprep.subr.mxu1 %v15132_v4 }
 0xa74   :  { %4631 = vmatpush1.xpose.msra.mxu1 %v4163_v31  ;;  %v2273_v31 = vld [vmem:[%s14752_s3 + $0x400] sm:$0xff] }
 0xa75   :  { %9630 = vmatprep.subr.bf16.mxu1 %v15135_v63  ;;  %v4996_v36 = vand.u32 4294901760, %v2273_v31 }
 0xa77   :  { %4656 = vmatmul.mubr.f32.vlgmr.msra.gmra.mrb[12].mxu1 %v12148_v12 }
 0xa78   :  { %9632 = vmatpush1.bf16.xpose.msra.mxu1 %v11876_v0  ;;  %4661 = vmatprep.mubr.f32.mxu1 %v15132_v4  ;;  %v2260_v0 = vld [vmem:[%s14752_s3 + $0x398] sm:$0xff] }
 0xa79   :  { %9633 = vmatprep.subr.bf16.mxu1 %v15135_v63 }
 0xa7b   :  { %4663 = vmatmul.mubr.f32.gmra.mrb[14].mxu1 %v12166_v50 }
 0xa7c   :  { %4668 = vmatprep.mubr.f32.mxu1 %v15132_v4 }
 0xa7f   :  { %4670 = vmatmul.mubr.f32.gmra.mrb[16].mxu1 %v12192_v10 }
 0xa80   :  { %9635 = vmatpush1.bf16.xpose.msra.mxu1 %v11906_v2  ;;  %4675 = vmatprep.mubr.f32.mxu1 %v15132_v4  ;;  %v2262_v2 = vld [vmem:[%s14752_s3 + $0x3a8] sm:$0xff] }
 0xa81   :  { %9636 = vmatprep.subr.bf16.mxu1 %v15135_v63 }
 0xa83   :  { %4677 = vmatmul.mubr.f32.gmra.mrb[18].mxu1 %v12202_v24 }
 0xa84   :  { %4682 = vmatprep.mubr.f32.mxu1 %v15132_v4 }
 0xa87   :  { %4684 = vmatmul.mubr.f32.gmra.mrb[20].mxu1 %v12222_v44 }
 0xa88   :  { %9638 = vmatpush1.bf16.xpose.msra.mxu1 %v11938_v8  ;;  %4689 = vmatprep.mubr.f32.mxu1 %v15132_v4  ;;  %v4966_v8 = vand.u32 4294901760, %v2260_v0 }
 0xa89   :  { %9639 = vmatprep.subr.bf16.mxu1 %v15135_v63 }
 0xa8a   :  { %v12489_v23 = vsub.f32 %v2260_v0, %v4966_v8  ;;  %v2280_v0 = vld [vmem:[%s14752_s3 + $0x438] sm:$0xff] }
 0xa8b   :  { %4691 = vmatmul.mubr.f32.gmra.mrb[22].mxu1 %v12229_v37 }
 0xa8c   :  { %4782 = vmatprep.mubr.f32.mxu1 %v15132_v4 }
 0xa90   :  { %9641 = vmatpush1.bf16.xpose.msra.mxu1 %v11970_v33  ;;  %v4970_v33 = vand.u32 4294901760, %v2262_v2 }
 0xa91   :  { %9642 = vmatprep.subr.bf16.mxu1 %v15135_v63 }
 0xa92   :  { %v12487_v29 = vpack.c.bf16 %v4970_v33, %v4966_v8  ;;  %v12491_v5 = vsub.f32 %v2262_v2, %v4970_v33  ;;  %v2282_v2 = vld [vmem:[%s14752_s3 + $0x448] sm:$0xff]  ;;  %v12578_v8 = vsub.f32 %v2273_v31, %v4996_v36  ;;  %v12580_v33 = vsub.f32 %v2276_v41, %v4998_v54 }
 0xa93   :  { %v5010_v45 = vand.u32 4294901760, %v2282_v2 }
 0xa94   :  { %15215 = vst [vmem:[#allocation13_spill] sm:$0xff] %v12487_v29  ;;  %9661 = vmatprep.subr.bf16.mxu0 %v12487_v29  ;;  %15233 = vst [vmem:[#allocation47_spill] sm:$0xff] %v12578_v8 }
 0xa95   :  { %15234 = vst [vmem:[#allocation48_spill] sm:$0xff] %v12580_v33  ;;  %v12611_v59 = vsub.f32 %v2282_v2, %v5010_v45 }
 0xa97   :  { %15241 = vst [vmem:[#allocation55_spill] sm:$0xff] %v12611_v59 }
 0xa98   :  { %9644 = vmatpush1.bf16.xpose.msra.mxu1 %v12002_v57  ;;  %v2261_v57 = vld [vmem:[%s14752_s3 + $0x3a0] sm:$0xff] }
 0xa99   :  { %9645 = vmatprep.subr.bf16.mxu1 %v15135_v63  ;;  %v4972_v35 = vand.u32 4294901760, %v2261_v57 }
 0xaa0   :  { %9647 = vmatpush1.bf16.xpose.msra.mxu1 %v12034_v49 }
 0xaa1   :  { %9648 = vmatprep.subr.bf16.mxu1 %v15135_v63 }
 0xaa8   :  { %9650 = vmatpush1.bf16.xpose.msra.mxu1 %v12066_v27  ;;  %v2264_v27 = vld [vmem:[%s14752_s3 + $0x3b8] sm:$0xff] }
 0xaa9   :  { %9651 = vmatprep.subr.bf16.mxu1 %v15135_v63  ;;  %v4974_v15 = vand.u32 4294901760, %v2264_v27 }
 0xab0   :  { %9653 = vmatpush1.bf16.xpose.msra.mxu1 %v12098_v53  ;;  %v2266_v53 = vld [vmem:[%s14752_s3 + $0x3c8] sm:$0xff] }
 0xab1   :  { %9654 = vmatprep.subr.bf16.mxu1 %v15135_v63  ;;  %v4978_v20 = vand.u32 4294901760, %v2266_v53 }
 0xab3   :  { %v12516_v61 = vsub.f32 %v2266_v53, %v4978_v20  ;;  %v12591_v53 = vsub.f32 %v2278_v38, %v5002_v46  ;;  %v12626_v38 = vpack.c.bf16 %v5004_v9, %v5000_v1 }
 0xab5   :  { %15219 = vst [vmem:[#allocation24_spill] sm:$0xff] %v12516_v61  ;;  %15235 = vst [vmem:[#allocation49_spill] sm:$0xff] %v12591_v53 }
 0xab6   :  { %15245 = vst [vmem:[#allocation59_spill] sm:$0xff] %v12626_v38 }
 0xab8   :  { %9656 = vmatpush1.bf16.xpose.msra.mxu1 %v12132_v13  ;;  %v2259_v13 = vld [vmem:[%s14752_s3 + $0x390] sm:$0xff] }
 0xab9   :  { %9657 = vmatprep.subr.bf16.mxu1 %v15135_v63  ;;  %v4968_v49 = vand.u32 4294901760, %v2259_v13 }
 0xabb   :  { %v12493_v3 = vsub.f32 %v2259_v13, %v4968_v49  ;;  %v2279_v13 = vld [vmem:[%s14752_s3 + $0x430] sm:$0xff] }
 0xabc   :  { %v5008_v42 = vand.u32 4294901760, %v2279_v13 }
 0xabe   :  { %v12619_v17 = vsub.f32 %v2279_v13, %v5008_v42 }
 0xac0   :  { %9659 = vmatpush1.bf16.xpose.msra.mxu1 %v12173_v14  ;;  %v2265_v14 = vld [vmem:[%s14752_s3 + $0x3c0] sm:$0xff]  ;;  %15242 = vst [vmem:[#allocation56_spill] sm:$0xff] %v12619_v17 }
 0xac1   :  { %4757 = vmatprep.subr.mxu1 %v15132_v4  ;;  %v4980_v58 = vand.u32 4294901760, %v2265_v14 }
 0xac3   :  { %v12533_v47 = vsub.f32 %v2265_v14, %v4980_v58  ;;  %v12604_v14 = vpack.c.bf16 %v4996_v36, %v4992_v52  ;;  %v5022_v36 = vand.u32 4294901760, %v2288_v43 }
 0xac5   :  { %15222 = vst [vmem:[#allocation33_spill] sm:$0xff] %v12533_v47  ;;  %15238 = vst [vmem:[#allocation52_spill] sm:$0xff] %v12604_v14 }
 0xac8   :  { %4759 = vmatpush1.xpose.msra.mxu1 %v12214_v18  ;;  %v12506_v18 = vsub.f32 %v2261_v57, %v4972_v35  ;;  %v2281_v57 = vld [vmem:[%s14752_s3 + $0x440] sm:$0xff] }
 0xac9   :  { %9900 = vmatprep.subr.bf16.mxu1 %v15135_v63  ;;  %v5012_v25 = vand.u32 4294901760, %v2281_v57 }
 0xacb   :  { %4784 = vmatmul.mubr.f32.vlgmr.msra.gmra.mrb[12].mxu1 %v12148_v12  ;;  %v2263_v12 = vld [vmem:[%s14752_s3 + $0x3b0] sm:$0xff]  ;;  %v12621_v31 = vsub.f32 %v2281_v57, %v5012_v25  ;;  %v12658_v57 = vld [vmem:[%s14752_s3 + $0x98] sm:$0xff] }
 0xacc   :  { %4789 = vmatprep.mubr.f32.mxu1 %v15132_v4  ;;  %v4976_v48 = vand.u32 4294901760, %v2263_v12  ;;  %15256 = vst [vmem:[#allocation70_spill] sm:$0xff] %v12658_v57 }
 0xacd   :  { %15243 = vst [vmem:[#allocation57_spill] sm:$0xff] %v12621_v31 }
 0xace   :  { %v12529_v60 = vpack.c.bf16 %v4980_v58, %v4976_v48  ;;  %v12531_v7 = vsub.f32 %v2263_v12, %v4976_v48  ;;  %v2285_v12 = vld [vmem:[%s14752_s3 + $0x460] sm:$0xff] }
 0xacf   :  { %4791 = vmatmul.mubr.f32.gmra.mrb[14].mxu1 %v12166_v50  ;;  %v2268_v50 = vld [vmem:[%s14752_s3 + $0x3d8] sm:$0xff]  ;;  %v5020_v11 = vand.u32 4294901760, %v2285_v12 }
 0xad0   :  { %4796 = vmatprep.mubr.f32.mxu1 %v15132_v4  ;;  %v4982_v30 = vand.u32 4294901760, %v2268_v50  ;;  %15220 = vst [vmem:[#allocation27_spill] sm:$0xff] %v12529_v60  ;;  %15221 = vst [vmem:[#allocation30_spill] sm:$0xff] %v12531_v7 }
 0xad1   :  { %v12632_v6 = vsub.f32 %v2285_v12, %v5020_v11  ;;  %v12670_v12 = vld [vmem:[%s14752_s3 + $0xa8] sm:$0xff] }
 0xad2   :  { %v12535_v16 = vsub.f32 %v2268_v50, %v4982_v30  ;;  %v12606_v50 = vpack.c.bf16 %v5002_v46, %v4998_v54  ;;  %v5026_v54 = vand.u32 4294901760, %v2290_v19  ;;  %v12637_v46 = vsub.f32 %v2288_v43, %v5022_v36  ;;  %15258 = vst [vmem:[#allocation72_spill] sm:$0xff] %v12670_v12  ;;  %v12683_v43 = vld [vmem:[%s14752_s3 + $0xb8] sm:$0xff] }
 0xad3   :  { %4798 = vmatmul.mubr.f32.gmra.mrb[16].mxu1 %v12192_v10  ;;  %v2270_v10 = vld [vmem:[%s14752_s3 + $0x3e8] sm:$0xff]  ;;  %15248 = vst [vmem:[#allocation62_spill] sm:$0xff] %v12632_v6  ;;  %15260 = vst [vmem:[#allocation74_spill] sm:$0xff] %v12683_v43 }
 0xad4   :  { %4803 = vmatprep.mubr.f32.mxu1 %v15132_v4  ;;  %v4986_v51 = vand.u32 4294901760, %v2270_v10  ;;  %15223 = vst [vmem:[#allocation36_spill] sm:$0xff] %v12535_v16  ;;  %15239 = vst [vmem:[#allocation53_spill] sm:$0xff] %v12606_v50  ;;  %v12651_v13 = vpack.c.bf16 %v5026_v54, %v5022_v36  ;;  %v12689_v36 = vld [vmem:[%s14752_s3 + $0xb0] sm:$0xff] }
 0xad5   :  { %15250 = vst [vmem:[#allocation64_spill] sm:$0xff] %v12637_v46  ;;  %15261 = vst [vmem:[#allocation75_spill] sm:$0xff] %v12689_v36 }
 0xad6   :  { %v12546_v21 = vpack.c.bf16 %v4986_v51, %v4982_v30  ;;  %v12548_v32 = vsub.f32 %v2270_v10, %v4986_v51  ;;  %v5006_v10 = vand.u32 4294901760, %v2280_v0  ;;  %15255 = vst [vmem:[#allocation69_spill] sm:$0xff] %v12651_v13 }
 0xad7   :  { %4805 = vmatmul.mubr.f32.gmra.mrb[18].mxu1 %v12202_v24  ;;  %v12504_v24 = vpack.c.bf16 %v4972_v35, %v4968_v49  ;;  %v2284_v49 = vld [vmem:[%s14752_s3 + $0x458] sm:$0xff]  ;;  %v12593_v35 = vsub.f32 %v2275_v39, %v5000_v1  ;;  %v12642_v1 = vpack.c.bf16 %v5012_v25, %v5008_v42  ;;  %v8181_v25 = vadd.f32 -1.0, %v12670_v12 }
 0xad8   :  { %4810 = vmatprep.mubr.f32.mxu1 %v15132_v4  ;;  %15224 = vst [vmem:[#allocation39_spill] sm:$0xff] %v12546_v21  ;;  %15225 = vst [vmem:[#allocation8_spill] sm:$0xff] %v12548_v32  ;;  %v5014_v48 = vand.u32 4294901760, %v2284_v49  ;;  %v12609_v30 = vsub.f32 %v2280_v0, %v5006_v10  ;;  %v12635_v52 = vpack.c.bf16 %v5010_v45, %v5006_v10  ;;  %v12675_v10 = vld [vmem:[%s14752_s3 + $0xa0] sm:$0xff] }
 0xad9   :  { %15216 = vst [vmem:[#allocation12_spill] sm:$0xff] %v12504_v24  ;;  %9663 = vmatpush1.bf16.msra.mxu0 %v12504_v24  ;;  %15236 = vst [vmem:[#allocation50_spill] sm:$0xff] %v12593_v35  ;;  %v12639_v0 = vsub.f32 %v2290_v19, %v5026_v54 }
 0xada   :  { %15240 = vst [vmem:[#allocation54_spill] sm:$0xff] %v12609_v30  ;;  %v12623_v41 = vsub.f32 %v2284_v49, %v5014_v48  ;;  %15249 = vst [vmem:[#allocation63_spill] sm:$0xff] %v12635_v52  ;;  %v12663_v49 = vld [vmem:[%s14752_s3 + $0x90] sm:$0xff] }
 0xadb   :  { %4812 = vmatmul.mubr.f32.gmra.mrb[20].mxu1 %v12222_v44  ;;  %v12508_v44 = vpack.c.bf16 %v4978_v20, %v4974_v15  ;;  %v2283_v20 = vld [vmem:[%s14752_s3 + $0x450] sm:$0xff]  ;;  %15251 = vst [vmem:[#allocation65_spill] sm:$0xff] %v12639_v0  ;;  %15252 = vst [vmem:[#allocation66_spill] sm:$0xff] %v12642_v1 }
 0xadc   :  { %4817 = vmatprep.mubr.f32.mxu1 %v15132_v4  ;;  %v5016_v51 = vand.u32 4294901760, %v2283_v20  ;;  %15244 = vst [vmem:[#allocation58_spill] sm:$0xff] %v12623_v41  ;;  %15257 = vst [vmem:[#allocation71_spill] sm:$0xff] %v12663_v49 }
 0xadd   :  { %15217 = vst [vmem:[#allocation18_spill] sm:$0xff] %v12508_v44  ;;  %9665 = vmatprep.subr.bf16.mxu0 %v12508_v44  ;;  %15259 = vst [vmem:[#allocation73_spill] sm:$0xff] %v12675_v10 }
 0xade   :  { %9667 = vmatpush1.bf16.msra.mxu0 %v12529_v60  ;;  %v12648_v2 = vpack.c.bf16 %v5020_v11, %v5016_v51  ;;  %v8180_v11 = vadd.f32 -1.0, %v12675_v10 }
 0xadf   :  { %4819 = vmatmul.mubr.f32.gmra.mrb[22].mxu1 %v12229_v37  ;;  %v12510_v37 = vsub.f32 %v2264_v27, %v4974_v15  ;;  %9669 = vmatprep.subr.bf16.mxu0 %v12546_v21  ;;  %v2286_v27 = vld [vmem:[%s14752_s3 + $0x468] sm:$0xff]  ;;  %v12595_v15 = vsub.f32 %v2277_v40, %v5004_v9  ;;  %v12630_v40 = vsub.f32 %v2283_v20, %v5016_v51  ;;  %v8178_v20 = vadd.f32 -1.0, %v12663_v49  ;;  %v12722_v21 = vld [vmem:[%s14752_s3 + $0xd8] sm:$0xff] }
 0xae0   :  { %v5018_v58 = vand.u32 4294901760, %v2286_v27  ;;  %15254 = vst [vmem:[#allocation68_spill] sm:$0xff] %v12648_v2  ;;  %15264 = vst [vmem:[#allocation78_spill] sm:$0xff] %v12722_v21 }
 0xae1   :  { %15218 = vst [vmem:[#allocation21_spill] sm:$0xff] %v12510_v37  ;;  %15237 = vst [vmem:[#allocation51_spill] sm:$0xff] %v12595_v15 }
 0xae2   :  { %9671 = vmatpush1.bf16.msra.mxu0 %v12550_v34  ;;  %v12628_v39 = vsub.f32 %v2286_v27, %v5018_v58  ;;  %15247 = vst [vmem:[#allocation61_spill] sm:$0xff] %v12630_v40  ;;  %v12645_v9 = vpack.c.bf16 %v5018_v58, %v5014_v48  ;;  %v8179_v27 = vadd.f32 -1.0, %v12658_v57  ;;  %v4849_v58 = vmul.f32 1e+30, %v8178_v20 }
 0xae3   :  { %9673 = vmatprep.subr.bf16.mxu0 %v12563_v55  ;;  %v4852_v20 = vmul.f32 1e+30, %v8181_v25 }
 0xae4   :  { %15246 = vst [vmem:[#allocation60_spill] sm:$0xff] %v12628_v39  ;;  %15253 = vst [vmem:[#allocation67_spill] sm:$0xff] %v12645_v9  ;;  %v4850_v42 = vmul.f32 1e+30, %v8179_v27 }
 0xae6   :  { %9675 = vmatpush1.bf16.msra.mxu0 %v12604_v14 }
 0xae7   :  { %9677 = vmatprep.subr.bf16.mxu0 %v12606_v50 }
 0xaea   :  { %9679 = vmatpush1.bf16.msra.mxu0 %v12626_v38 }
 0xaeb   :  { %9681 = vmatprep.subr.bf16.mxu0 %v12635_v52  ;;  %v12701_v52 = vld [vmem:[%s14752_s3 + $0xc8] sm:$0xff] }
 0xaec   :  { %15262 = vst [vmem:[#allocation76_spill] sm:$0xff] %v12701_v52  ;;  %v8185_v38 = vadd.f32 -1.0, %v12701_v52 }
 0xaee   :  { %9683 = vmatpush1.bf16.msra.mxu0 %v12642_v1 }
 0xaef   :  { %9685 = vmatprep.subr.bf16.mxu0 %v12645_v9  ;;  %v4851_v9 = vmul.f32 1e+30, %v8180_v11 }
 0xaf2   :  { %9687 = vmatpush1.bf16.msra.mxu0 %v12648_v2 }
 0xaf3   :  { %9689 = vmatprep.subr.bf16.mxu0 %v12651_v13 }
 0xb9e   :  { %v4785_v45 = vpop.f32.mrb[12].mxu1 }
 0xb9f   :  { %v4825_v48 = vmul.f32 %v4785_v45, %v12663_v49  ;;  %v4787_v51 = vpop.f32.mrb[13].mxu1  ;;  %v8183_v45 = vadd.f32 -1.0, %v12683_v43 }
 0xba0   :  { %v4826_v19 = vmul.f32 %v4787_v51, %v12658_v57  ;;  %v8182_v51 = vadd.f32 -1.0, %v12689_v36 }
 0xba1   :  { %v12694_v13 = vadd.f32 %v4849_v58, %v4825_v48  ;;  %v12709_v48 = vld [vmem:[%s14752_s3 + $0xc0] sm:$0xff] }
 0xba2   :  { %v12691_v54 = vadd.f32 %v4850_v42, %v4826_v19  ;;  %v4792_v27 = vpop.f32.mrb[14].mxu1  ;;  %15263 = vst [vmem:[#allocation77_spill] sm:$0xff] %v12709_v48  ;;  %v4853_v14 = vmul.f32 1e+30, %v8182_v51  ;;  %v8184_v34 = vadd.f32 -1.0, %v12709_v48 }
 0xba3   :  { %v4827_v2 = vmul.f32 %v4792_v27, %v12675_v10  ;;  %v4794_v1 = vpop.f32.mrb[15].mxu1  ;;  %v4854_v27 = vmul.f32 1e+30, %v8183_v45 }
 0xba4   :  { %v4828_v42 = vmul.f32 %v4794_v1, %v12670_v12  ;;  %v4874_v25 = vsel %vm4873_vm6, %v12691_v54, -inf  ;;  %v4855_v44 = vmul.f32 1e+30, %v8184_v34 }
 0xba5   :  { %v4875_v58 = vmax.f32 %v12694_v13, %v4874_v25  ;;  %v12715_v50 = vadd.f32 %v4851_v9, %v4827_v2  ;;  %v12730_v9 = vld [vmem:[%s14752_s3 + $0xd0] sm:$0xff]  ;;  %v4856_v25 = vmul.f32 1e+30, %v8185_v38 }
 0xba6   :  { %v12712_v11 = vadd.f32 %v4852_v20, %v4828_v42  ;;  %v4799_v19 = vpop.f32.mrb[16].mxu1  ;;  %15265 = vst [vmem:[#allocation79_spill] sm:$0xff] %v12730_v9  ;;  %v8186_v29 = vadd.f32 -1.0, %v12730_v9 }
 0xba7   :  { %v4829_v1 = vmul.f32 %v4799_v19, %v12689_v36  ;;  %4876 = vmax.xlane.f32.xlu0 %v4875_v58  ;;  %v4801_v55 = vpop.f32.mrb[17].mxu1  ;;  %v8187_v58 = vadd.f32 -1.0, %v12722_v21 }
 0xba8   :  { %v4830_v20 = vmul.f32 %v4801_v55, %v12683_v43  ;;  %v4878_v45 = vsel %vm4873_vm6, %v12712_v11, -inf  ;;  %v2311_v55 = vld [vmem:[%s14752_s3 + $0xe0] sm:$0x3]  ;;  %v4857_v63 = vmul.f32 1e+30, %v8186_v29 }
 0xba9   :  { %v4879_v2 = vmax.f32 %v12715_v50, %v4878_v45  ;;  %v12739_v19 = vadd.f32 %v4853_v14, %v4829_v1  ;;  %v8188_v1 = vadd.f32 -1.0, %v2311_v55 }
 0xbaa   :  { %v12733_v51 = vadd.f32 %v4854_v27, %v4830_v20  ;;  %v4806_v42 = vpop.f32.mrb[18].mxu1  ;;  %v12746_v27 = vld [vmem:[%s14752_s3 + $0xe8] sm:$0x3] }
 0xbab   :  { %v4831_v60 = vmul.f32 %v4806_v42, %v12709_v48  ;;  %4880 = vmax.xlane.f32.xlu1 %v4879_v2  ;;  %v4808_v24 = vpop.f32.mrb[19].mxu1  ;;  %15266 = vst [vmem:[#allocation80_spill] sm:$0xff] %v12746_v27  ;;  %v4858_v2 = vmul.f32 1e+30, %v8187_v58  ;;  %v8189_v42 = vadd.f32 -1.0, %v12746_v27 }
 0xbac   :  { %v4832_v38 = vmul.f32 %v4808_v24, %v12701_v52  ;;  %v4882_v20 = vsel %vm4873_vm6, %v12733_v51, -inf }
 0xbad   :  { %v4883_v14 = vmax.f32 %v12739_v19, %v4882_v20  ;;  %v12755_v4 = vadd.f32 %v4855_v44, %v4831_v60  ;;  %v4859_v20 = vmul.f32 1e+30, %v8188_v1  ;;  %v4860_v36 = vmul.f32 1e+30, %v8189_v42 }
 0xbae   :  { %v12752_v45 = vadd.f32 %v4856_v25, %v4832_v38  ;;  %v4813_v34 = vpop.f32.mrb[20].mxu1 }
 0xbaf   :  { %v4833_v48 = vmul.f32 %v4813_v34, %v12730_v9  ;;  %4884 = vmax.xlane.f32.xlu0 %v4883_v14  ;;  %v4815_v43 = vpop.f32.mrb[21].mxu1  ;;  %v2287_v34 = vld [vmem:[%s14752_s3 + $0x470] sm:$0xff] }
 0xbb0   :  { %15267 = vst [vmem:[#allocation81_spill] sm:$0xff] %v12752_v45  ;;  %v4834_v24 = vmul.f32 %v4815_v43, %v12722_v21  ;;  %v4886_v52 = vsel %vm4873_vm6, %v12752_v45, -inf  ;;  %v5024_v42 = vand.u32 4294901760, %v2287_v34 }
 0xbb1   :  { %v4887_v25 = vmax.f32 %v12755_v4, %v4886_v52  ;;  %v12764_v12 = vadd.f32 %v4857_v63, %v4833_v48 }
 0xbb2   :  { %v12762_v38 = vadd.f32 %v4858_v2, %v4834_v24  ;;  %v4820_v58 = vpop.f32.mrb[22].mxu1  ;;  %v2289_v2 = vld [vmem:[%s14752_s3 + $0x480] sm:$0xff] }
 0xbb3   :  { %15269 = vst [vmem:[#allocation83_spill] sm:$0xff] %v12764_v12  ;;  %v4835_v44 = vmul.f32 %v4820_v58, %v2311_v55  ;;  %4888 = vmax.xlane.f32.xlu0 %v4887_v25  ;;  %v4822_v60 = vpop.f32.mrb[23].mxu1  ;;  %v5028_v24 = vand.u32 4294901760, %v2289_v2  ;;  %v2294_v25 = vld [vmem:[%s14752_s3 + $0x4a8] sm:$0xff]  ;;  %v12791_v58 = vsub.f32 %v2287_v34, %v5024_v42 }
 0xbb4   :  { %15268 = vst [vmem:[#allocation82_spill] sm:$0xff] %v12762_v38  ;;  %v4836_v29 = vmul.f32 %v4822_v60, %v12746_v27  ;;  %v4890_v43 = vsel %vm4873_vm6, %v12762_v38, -inf  ;;  %v2298_v34 = vld [vmem:[%s14752_s3 + $0x4c8] sm:$0xff]  ;;  %v15275_v27 = vld [vmem:[#allocation14_spill] sm:$0xff] }
 0xbb5   :  { %v12769_v14 = vadd.f32 %v4859_v20, %v4835_v44  ;;  %v4891_v1 = vmax.f32 %v12764_v12, %v4890_v43  ;;  %v2292_v20 = vld [vmem:[%s14752_s3 + $0x498] sm:$0xff]  ;;  %15273 = vst [vmem:[#allocation87_spill] sm:$0xff] %v12791_v58  ;;  %v12793_v44 = vsub.f32 %v2289_v2, %v5028_v24  ;;  %v2291_v43 = vld [vmem:[%s14752_s3 + $0x490] sm:$0xff] }
 0xbb6   :  { %v12772_v52 = vadd.f32 %v4860_v36, %v4836_v29  ;;  %v12783_v36 = vpack.c.bf16 %v5028_v24, %v5024_v42  ;;  %v5030_v60 = vand.u32 4294901760, %v2292_v20  ;;  %v5034_v29 = vand.u32 4294901760, %v2294_v25  ;;  %v2295_v42 = vld [vmem:[%s14752_s3 + $0x4b0] sm:$0xff]  ;;  %v2297_v24 = vld [vmem:[%s14752_s3 + $0x4c0] sm:$0xff] }
 0xbb7   :  { %15270 = vst [vmem:[#allocation84_spill] sm:$0xff] %v12769_v14  ;;  %4892 = vmax.xlane.f32.xlu1 %v4891_v1  ;;  %v4894_v63 = vsel %vm66_vm3, %v12769_v14, -inf  ;;  %15274 = vst [vmem:[#allocation88_spill] sm:$0xff] %v12793_v44  ;;  %v2293_v1 = vld [vmem:[%s14752_s3 + $0x4a0] sm:$0xff]  ;;  %v5040_v49 = vand.u32 4294901760, %v2295_v42 }
 0xbb8   :  { %15271 = vst [vmem:[#allocation85_spill] sm:$0xff] %v12772_v52  ;;  %v4896_v48 = vsel %vm4895_vm7, %v12772_v52, -inf  ;;  %15272 = vst [vmem:[#allocation86_spill] sm:$0xff] %v12783_v36  ;;  %9691 = vmatpush1.bf16.msra.mxu0 %v12783_v36  ;;  %v12816_v9 = vpack.c.bf16 %v5034_v29, %v5030_v60  ;;  %v12818_v36 = vsub.f32 %v2292_v20, %v5030_v60  ;;  %v5042_v52 = vand.u32 4294901760, %v2298_v34 }
 0xbb9   :  { %v4897_v55 = vmax.f32 %v4894_v63, %v4896_v48  ;;  %v2296_v63 = vld [vmem:[%s14752_s3 + $0x4b8] sm:$0xff]  ;;  %v5032_v48 = vand.u32 4294901760, %v2291_v43  ;;  %v12820_v21 = vsub.f32 %v2294_v25, %v5034_v29  ;;  %v5044_v20 = vand.u32 4294901760, %v2297_v24  ;;  %v15285_v25 = vld [vmem:[#allocation16_spill] sm:$0xff] }
 0xbba   :  { %v5038_v2 = vand.u32 4294901760, %v2296_v63  ;;  %15276 = vst [vmem:[#allocation14_spill] sm:$0xff] %v12816_v9  ;;  %15277 = vst [vmem:[#allocation89_spill] sm:$0xff] %v12818_v36  ;;  %9693 = vmatprep.subr.bf16.mxu0 %v12816_v9  ;;  %v12841_v29 = vsub.f32 %v2295_v42, %v5040_v49 }
 0xbbb   :  { %4898 = vmax.xlane.f32.xlu0 %v4897_v55  ;;  %v5036_v55 = vand.u32 4294901760, %v2293_v1  ;;  %15278 = vst [vmem:[#allocation90_spill] sm:$0xff] %v12820_v21  ;;  %v12824_v10 = vsub.f32 %v2291_v43, %v5032_v48  ;;  %v12839_v60 = vpack.c.bf16 %v5044_v20, %v5040_v49  ;;  %v12843_v43 = vsub.f32 %v2297_v24, %v5044_v20  ;;  %v12856_v49 = vld [vmem:[%s14752_s3 + $0x4d8] sm:$0xff] }
 0xbbc   :  { %v12828_v57 = vsub.f32 %v2296_v63, %v5038_v2  ;;  %v12831_v12 = vpack.c.bf16 %v5042_v52, %v5038_v2  ;;  %15287 = vst [vmem:[#allocation97_spill] sm:$0xff] %v12841_v29  ;;  %v14866_v63 = vand.u32 4294901760, %v12493_v3  ;;  %15289 = vst [vmem:[#allocation99_spill] sm:$0xff] %v12856_v49  ;;  %v15290_v24 = vld [vmem:[#allocation17_spill] sm:$0xff]  ;;  %v12870_v20 = vand.u32 4294901760, %v12856_v49 }
 0xbbd   :  { %v12822_v14 = vpack.c.bf16 %v5036_v55, %v5032_v48  ;;  %15280 = vst [vmem:[#allocation92_spill] sm:$0xff] %v12824_v10  ;;  %v12826_v38 = vsub.f32 %v2293_v1, %v5036_v55  ;;  %15286 = vst [vmem:[#allocation16_spill] sm:$0xff] %v12839_v60  ;;  %v14865_v1 = vand.u32 4294901760, %v12489_v23  ;;  %v14869_v48 = vand.u32 4294901760, %v12506_v18 }
 0xbbe   :  { %15282 = vst [vmem:[#allocation94_spill] sm:$0xff] %v12828_v57  ;;  %15283 = vst [vmem:[#allocation95_spill] sm:$0xff] %v12831_v12  ;;  %v5178_v2 = vsub.f32 %v12493_v3, %v14866_v63  ;;  %v14884_v63 = vand.u32 4294901760, %v12516_v61 }
 0xbbf   :  { %15279 = vst [vmem:[#allocation91_spill] sm:$0xff] %v12822_v14  ;;  %15281 = vst [vmem:[#allocation93_spill] sm:$0xff] %v12826_v38  ;;  %9695 = vmatpush1.bf16.msra.mxu0 %v12822_v14  ;;  %v5172_v55 = vsub.f32 %v12489_v23, %v14865_v1  ;;  %v5190_v42 = vsub.f32 %v12506_v18, %v14869_v48  ;;  %v14878_v1 = vand.u32 4294901760, %v12510_v37 }
 0xbc0   :  { %9697 = vmatprep.subr.bf16.mxu0 %v12831_v12  ;;  %15288 = vst [vmem:[#allocation98_spill] sm:$0xff] %v12843_v43  ;;  %15291 = vst [vmem:[#allocation17_spill] sm:$0xff] %v12870_v20  ;;  %v5179_v12 = vand.u32 4294901760, %v5178_v2 }
 0xbc1   :  { %v5191_v14 = vand.u32 4294901760, %v5190_v42  ;;  %v5196_v9 = vsub.f32 %v12510_v37, %v14878_v1  ;;  %v15297_v42 = vld [vmem:[#allocation19_spill] sm:$0xff]  ;;  %v14883_v1 = vand.u32 4294901760, %v12531_v7 }
 0xbc3   :  { %9699 = vmatpush1.bf16.msra.mxu0 %v12839_v60  ;;  %v15293_v60 = vld [vmem:[#allocation15_spill] sm:$0xff] }
 0xbc4   :  { %5047 = vmatprep.subr.mxu0 %v12870_v20  ;;  %v14882_v20 = vand.u32 4294901760, %v12533_v47 }
 0xbc8   :  { %6334 = vrot.lane.b32.xlu1 %v15275_v27, %s10653_s18  ;;  %v12833_v27 = vsub.f32 %v2298_v34, %v5042_v52  ;;  %v14864_v52 = vand.u32 4294901760, %v12491_v5 }
 0xbca   :  { %15284 = vst [vmem:[#allocation96_spill] sm:$0xff] %v12833_v27  ;;  %v5184_v34 = vsub.f32 %v12491_v5, %v14864_v52  ;;  %v5173_v52 = vand.u32 4294901760, %v5172_v55  ;;  %v5208_v55 = vsub.f32 %v12516_v61, %v14884_v63 }
 0xbcc   :  { %6338 = vrot.lane.b32.xlu1 %v15285_v25, %s10653_s18  ;;  %v12875_v25 = vld [vmem:[%s14752_s3 + $0x4d0] sm:$0xff]  ;;  %v5209_v2 = vand.u32 4294901760, %v5208_v55  ;;  %v14885_v55 = vand.u32 4294901760, %v12535_v16 }
 0xbcd   :  { %15292 = vst [vmem:[#allocation100_spill] sm:$0xff] %v12875_v25  ;;  %v12882_v48 = vand.u32 4294901760, %v12875_v25  ;;  %v15296_v25 = vld [vmem:[#allocation20_spill] sm:$0xff] }
 0xbcf   :  { %15294 = vst [vmem:[#allocation15_spill] sm:$0xff] %v12882_v48  ;;  %5049 = vmatpush1.msra.mxu0 %v12882_v48 }
 0xbd0   :  { %6340 = vrot.lane.b32.xlu1 %v15290_v24, %s10653_s18  ;;  %v5185_v24 = vand.u32 4294901760, %v5184_v34  ;;  %v5197_v34 = vand.u32 4294901760, %v5196_v9  ;;  %v15299_v9 = vld [vmem:[#allocation23_spill] sm:$0xff] }
 0xbd1   :  { %6336 = vrot.lane.b32.xlu0 %v15293_v60, %s10653_s18  ;;  %v12892_v60 = vpack.c.bf16 %v5191_v14, %v5179_v12  ;;  %v5202_v12 = vsub.f32 %v12531_v7, %v14883_v1  ;;  %v5214_v14 = vsub.f32 %v12533_v47, %v14882_v20  ;;  %v14890_v20 = vand.u32 4294901760, %v12557_v22 }
 0xbd2   :  { %v9700_v49 = vpack.c.bf16 %v5185_v24, %v5173_v52  ;;  %v12900_v45 = vpack.c.bf16 %v5209_v2, %v5197_v34  ;;  %v15300_v52 = vld [vmem:[#allocation22_spill] sm:$0xff]  ;;  %v14888_v34 = vand.u32 4294901760, %v12548_v32 }
 0xbd3   :  { %15295 = vst [vmem:[#allocation101_spill] sm:$0xff] %v12892_v60  ;;  %v15302_v2 = vld [vmem:[#allocation26_spill] sm:$0xff] }
 0xbd4   :  { %6344 = vrot.lane.b32.xlu1 %v15296_v25, %s10653_s18  ;;  %9701 = vmatprep.subr.bf16.mxu0 %v9700_v49  ;;  %15298 = vst [vmem:[#allocation20_spill] sm:$0xff] %v12900_v45  ;;  %v5203_v49 = vand.u32 4294901760, %v5202_v12  ;;  %v5215_v25 = vand.u32 4294901760, %v5214_v14  ;;  %v5220_v12 = vsub.f32 %v12535_v16, %v14885_v55  ;;  %v5232_v14 = vsub.f32 %v12548_v32, %v14888_v34  ;;  %v15305_v55 = vld [vmem:[#allocation28_spill] sm:$0xff] }
 0xbd5   :  { %6342 = vrot.lane.b32.xlu0 %v15297_v42, %s10653_s18  ;;  %v14889_v42 = vand.u32 4294901760, %v12552_v26 }
 0xbd6   :  { %v12912_v24 = vpack.c.bf16 %v5215_v25, %v5203_v49  ;;  %v5238_v49 = vsub.f32 %v12557_v22, %v14890_v20  ;;  %v5221_v25 = vand.u32 4294901760, %v5220_v12  ;;  %v15308_v20 = vld [vmem:[#allocation32_spill] sm:$0xff]  ;;  %v15309_v12 = vld [vmem:[#allocation31_spill] sm:$0xff] }
 0xbd8   :  { %6348 = vrot.lane.b32.xlu1 %v15299_v9, %s10653_s18  ;;  %15301 = vst [vmem:[#allocation19_spill] sm:$0xff] %v12912_v24  ;;  %v15303_v9 = vld [vmem:[#allocation25_spill] sm:$0xff]  ;;  %v5239_v63 = vand.u32 4294901760, %v5238_v49  ;;  %v14891_v24 = vand.u32 4294901760, %v12565_v62  ;;  %v14893_v49 = vand.u32 4294901760, %v12578_v8 }
 0xbd9   :  { %6346 = vrot.lane.b32.xlu0 %v15300_v52, %s10653_s18  ;;  %v5226_v52 = vsub.f32 %v12552_v26, %v14889_v42  ;;  %v14892_v42 = vand.u32 4294901760, %v12559_v56 }
 0xbdb   :  { %v5227_v1 = vand.u32 4294901760, %v5226_v52  ;;  %v14894_v52 = vand.u32 4294901760, %v12567_v28 }
 0xbdc   :  { %6352 = vrot.lane.b32.xlu1 %v15302_v2, %s10653_s18  ;;  %v5233_v2 = vand.u32 4294901760, %v5232_v14  ;;  %v5244_v14 = vsub.f32 %v12559_v56, %v14892_v42 }
 0xbdd   :  { %6350 = vrot.lane.b32.xlu0 %v15303_v9, %s10653_s18  ;;  %v15304_v9 = vld [vmem:[#allocation29_spill] sm:$0xff]  ;;  %v12940_v34 = vpack.c.bf16 %v5239_v63, %v5227_v1 }
 0xbde   :  { %v12938_v48 = vpack.c.bf16 %v5233_v2, %v5221_v25  ;;  %v5245_v1 = vand.u32 4294901760, %v5244_v14  ;;  %v15310_v25 = vld [vmem:[#allocation35_spill] sm:$0xff]  ;;  %v14895_v14 = vand.u32 4294901760, %v12580_v33 }
 0xbdf   :  { %15307 = vst [vmem:[#allocation22_spill] sm:$0xff] %v12940_v34 }
 0xbe0   :  { %6356 = vrot.lane.b32.xlu1 %v15304_v9, %s10653_s18  ;;  %15306 = vst [vmem:[#allocation23_spill] sm:$0xff] %v12938_v48  ;;  %v5250_v9 = vsub.f32 %v12567_v28, %v14894_v52  ;;  %v15314_v52 = vld [vmem:[#allocation37_spill] sm:$0xff]  ;;  %v15378_v28 = vld [vmem:[#allocation76_spill] sm:$0xff] }
 0xbe1   :  { %6354 = vrot.lane.b32.xlu0 %v15305_v55, %s10653_s18  ;;  %v5256_v55 = vsub.f32 %v12565_v62, %v14891_v24 }
 0xbe2   :  { %v5251_v24 = vand.u32 4294901760, %v5250_v9 }
 0xbe3   :  { %v5257_v63 = vand.u32 4294901760, %v5256_v55  ;;  %v14896_v55 = vand.u32 4294901760, %v12591_v53 }
 0xbe4   :  { %6360 = vrot.lane.b32.xlu1 %v15308_v20, %s10653_s18  ;;  %v15311_v20 = vld [vmem:[#allocation34_spill] sm:$0xff] }
 0xbe5   :  { %6358 = vrot.lane.b32.xlu0 %v15309_v12, %s10653_s18  ;;  %v12960_v2 = vpack.c.bf16 %v5257_v63, %v5245_v1  ;;  %v5262_v12 = vsub.f32 %v12578_v8, %v14893_v49  ;;  %v5268_v1 = vsub.f32 %v12580_v33, %v14895_v14  ;;  %v5280_v63 = vsub.f32 %v12591_v53, %v14896_v55  ;;  %v15316_v55 = vld [vmem:[#allocation9_spill] sm:$0xff] }
 0xbe6   :  { %v14899_v49 = vand.u32 4294901760, %v12595_v15 }
 0xbe7   :  { %15312 = vst [vmem:[#allocation26_spill] sm:$0xff] %v12960_v2  ;;  %v5263_v42 = vand.u32 4294901760, %v5262_v12  ;;  %v5269_v12 = vand.u32 4294901760, %v5268_v1  ;;  %v5281_v2 = vand.u32 4294901760, %v5280_v63  ;;  %v14898_v1 = vand.u32 4294901760, %v12611_v59 }
 0xbe8   :  { %6364 = vrot.lane.b32.xlu1 %v15310_v25, %s10653_s18  ;;  %v15313_v25 = vld [vmem:[#allocation38_spill] sm:$0xff]  ;;  %v5286_v14 = vsub.f32 %v12595_v15, %v14899_v49 }
 0xbe9   :  { %6362 = vrot.lane.b32.xlu0 %v15311_v20, %s10653_s18  ;;  %v14900_v20 = vand.u32 4294901760, %v12593_v35  ;;  %v12982_v9 = vpack.c.bf16 %v5263_v42, %v5251_v24  ;;  %v12992_v34 = vpack.c.bf16 %v5281_v2, %v5269_v12  ;;  %v15318_v24 = vld [vmem:[#allocation40_spill] sm:$0xff]  ;;  %v5304_v2 = vsub.f32 %v12611_v59, %v14898_v1  ;;  %v15320_v12 = vld [vmem:[#allocation11_spill] sm:$0xff] }
 0xbea   :  { %v5287_v45 = vand.u32 4294901760, %v5286_v14  ;;  %v14901_v14 = vand.u32 4294901760, %v12621_v31  ;;  %v14904_v1 = vand.u32 4294901760, %v12628_v39  ;;  %v15363_v59 = vld [vmem:[#allocation20_spill] sm:$0xff] }
 0xbeb   :  { %15315 = vst [vmem:[#allocation25_spill] sm:$0xff] %v12982_v9  ;;  %15317 = vst [vmem:[#allocation29_spill] sm:$0xff] %v12992_v34  ;;  %v14908_v34 = vand.u32 4294901760, %v12639_v0 }
 0xbec   :  { %6368 = vrot.lane.b32.xlu1 %v15313_v25, %s10653_s18  ;;  %v5274_v25 = vsub.f32 %v12593_v35, %v14900_v20  ;;  %v15371_v35 = vld [vmem:[#allocation23_spill] sm:$0xff] }
 0xbed   :  { %6366 = vrot.lane.b32.xlu0 %v15314_v52, %s10653_s18  ;;  %v14897_v52 = vand.u32 4294901760, %v12609_v30 }
 0xbee   :  { %v5275_v48 = vand.u32 4294901760, %v5274_v25 }
 0xbef   :  { %v5292_v63 = vsub.f32 %v12609_v30, %v14897_v52  ;;  %v14903_v52 = vand.u32 4294901760, %v12623_v41 }
 0xbf0   :  { %6372 = vrot.lane.b32.xlu1 %v15316_v55, %s10653_s18  ;;  %v12996_v42 = vpack.c.bf16 %v5287_v45, %v5275_v48  ;;  %v14902_v55 = vand.u32 4294901760, %v12619_v17  ;;  %v5305_v48 = vand.u32 4294901760, %v5304_v2  ;;  %v5328_v2 = vsub.f32 %v12628_v39, %v14904_v1 }
 0xbf1   :  { %6370 = vrot.lane.b32.xlu0 %v15318_v24, %s10653_s18  ;;  %v5293_v45 = vand.u32 4294901760, %v5292_v63  ;;  %v5310_v24 = vsub.f32 %v12621_v31, %v14901_v14  ;;  %v5316_v63 = vsub.f32 %v12623_v41, %v14903_v52  ;;  %v14905_v14 = vand.u32 4294901760, %v12632_v6 }
 0xbf2   :  { %15319 = vst [vmem:[#allocation28_spill] sm:$0xff] %v12996_v42  ;;  %v5298_v25 = vsub.f32 %v12619_v17, %v14902_v55  ;;  %v14907_v52 = vand.u32 4294901760, %v12637_v46  ;;  %v14909_v1 = vand.u32 4294901760, %v12791_v58  ;;  %v15388_v26 = vld [vmem:[#allocation29_spill] sm:$0xff] }
 0xbf3   :  { %v13018_v49 = vpack.c.bf16 %v5305_v48, %v5293_v45  ;;  %v5311_v42 = vand.u32 4294901760, %v5310_v24  ;;  %v5317_v48 = vand.u32 4294901760, %v5316_v63  ;;  %v5334_v24 = vsub.f32 %v12632_v6, %v14905_v14 }
 0xbf4   :  { %v5299_v20 = vand.u32 4294901760, %v5298_v25  ;;  %v5329_v25 = vand.u32 4294901760, %v5328_v2  ;;  %v5340_v63 = vsub.f32 %v12637_v46, %v14907_v52  ;;  %v5352_v2 = vsub.f32 %v12639_v0, %v14908_v34 }
 0xbf5   :  { %6374 = vrot.lane.b32.xlu0 %v15320_v12, %s10653_s18  ;;  %15321 = vst [vmem:[#allocation32_spill] sm:$0xff] %v13018_v49  ;;  %v14906_v12 = vand.u32 4294901760, %v12630_v40  ;;  %v14913_v34 = vand.u32 4294901760, %v12824_v10 }
 0xbf6   :  { %v13028_v55 = vpack.c.bf16 %v5311_v42, %v5299_v20  ;;  %v14910_v20 = vand.u32 4294901760, %v12793_v44  ;;  %v13040_v42 = vpack.c.bf16 %v5329_v25, %v5317_v48  ;;  %v5341_v48 = vand.u32 4294901760, %v5340_v63 }
 0xbf7   :  { %v5322_v45 = vsub.f32 %v12630_v40, %v14906_v12  ;;  %v14911_v25 = vand.u32 4294901760, %v12818_v36  ;;  %v5353_v52 = vand.u32 4294901760, %v5352_v2  ;;  %v14916_v2 = vand.u32 4294901760, %v12833_v27 }
 0xbf8   :  { %15322 = vst [vmem:[#allocation31_spill] sm:$0xff] %v13028_v55  ;;  %15323 = vst [vmem:[#allocation35_spill] sm:$0xff] %v13040_v42  ;;  %v5335_v55 = vand.u32 4294901760, %v5334_v24  ;;  %v5358_v14 = vsub.f32 %v12793_v44, %v14910_v20  ;;  %v14912_v24 = vand.u32 4294901760, %v12820_v21 }
 0xbf9   :  { %v5323_v49 = vand.u32 4294901760, %v5322_v45  ;;  %v5346_v45 = vsub.f32 %v12791_v58, %v14909_v1  ;;  %v5364_v1 = vsub.f32 %v12818_v36, %v14911_v25  ;;  %v13067_v63 = vpack.c.bf16 %v5353_v52, %v5341_v48 }
 0xbfa   :  { %v5359_v9 = vand.u32 4294901760, %v5358_v14  ;;  %v5376_v20 = vsub.f32 %v12820_v21, %v14912_v24  ;;  %v5370_v14 = vsub.f32 %v12824_v10, %v14913_v34  ;;  %v14918_v48 = vand.u32 4294901760, %v12843_v43 }
 0xbfb   :  { %v13054_v12 = vpack.c.bf16 %v5335_v55, %v5323_v49  ;;  %v5347_v42 = vand.u32 4294901760, %v5346_v45  ;;  %v14914_v49 = vand.u32 4294901760, %v12826_v38  ;;  %v14915_v55 = vand.u32 4294901760, %v12828_v57 }
 0xbfc   :  { %v5365_v45 = vand.u32 4294901760, %v5364_v1  ;;  %v5377_v25 = vand.u32 4294901760, %v5376_v20  ;;  %v5371_v52 = vand.u32 4294901760, %v5370_v14  ;;  %v5406_v14 = vsub.f32 %v12843_v43, %v14918_v48 }
 0xbfd   :  { %15324 = vst [vmem:[#allocation34_spill] sm:$0xff] %v13054_v12  ;;  %v13069_v12 = vpack.c.bf16 %v5359_v9, %v5347_v42  ;;  %v5382_v24 = vsub.f32 %v12826_v38, %v14914_v49  ;;  %v5388_v60 = vsub.f32 %v12828_v57, %v14915_v55  ;;  %v5400_v9 = vsub.f32 %v12833_v27, %v14916_v2 }
 0xbfe   :  { %v14917_v42 = vand.u32 4294901760, %v12841_v29  ;;  %v13086_v34 = vpack.c.bf16 %v5377_v25, %v5365_v45 }
 0xbff   :  { %15325 = vst [vmem:[#allocation38_spill] sm:$0xff] %v13069_v12  ;;  %v5383_v1 = vand.u32 4294901760, %v5382_v24  ;;  %v5389_v20 = vand.u32 4294901760, %v5388_v60  ;;  %v5401_v12 = vand.u32 4294901760, %v5400_v9  ;;  %v5407_v24 = vand.u32 4294901760, %v5406_v14  ;;  %v15409_v32 = vld [vmem:[#allocation31_spill] sm:$0xff] }
 0xc00   :  { %v5394_v49 = vsub.f32 %v12841_v29, %v14917_v42 }
 0xc01   :  { %v13094_v55 = vpack.c.bf16 %v5383_v1, %v5371_v52  ;;  %v13100_v45 = vpack.c.bf16 %v5401_v12, %v5389_v20 }
 0xc02   :  { %v5395_v60 = vand.u32 4294901760, %v5394_v49 }
 0xc04   :  { %v13108_v1 = vpack.c.bf16 %v5407_v24, %v5395_v60 }
 0xc34   :  { %v4877_v48 = vpop.xlane.xlu0 %4876 }
 0xc35   :  { %v4900_v12 = vsub.f32 %v12694_v13, %v4877_v48  ;;  %v4901_v49 = vsub.f32 %v12691_v54, %v4877_v48 }
 0xc37   :  { %v4912_v42 = vmul.f32 1.442695, %v4900_v12  ;;  %v4914_v9 = vmul.f32 1.442695, %v4901_v49  ;;  %v15326_v12 = vld [vmem:[#allocation81_spill] sm:$0xff] }
 0xc38   :  { %v4881_v20 = vpop.xlane.xlu1 %4880 }
 0xc39   :  { %10542 = vpow2.f32 %v4912_v42  ;;  %v4902_v14 = vsub.f32 %v12715_v50, %v4881_v20  ;;  %v4903_v25 = vsub.f32 %v12712_v11, %v4881_v20 }
 0xc3a   :  { %10544 = vpow2.f32 %v4914_v9  ;;  %v15327_v9 = vld [vmem:[#allocation71_spill] sm:$0xff] }
 0xc3b   :  { %v4916_v52 = vmul.f32 1.442695, %v4902_v14  ;;  %v4918_v2 = vmul.f32 1.442695, %v4903_v25 }
 0xc3c   :  { %v4885_v60 = vpop.xlane.xlu0 %4884 }
 0xc3d   :  { %10546 = vpow2.f32 %v4916_v52  ;;  %v4904_v24 = vsub.f32 %v12739_v19, %v4885_v60  ;;  %v4905_v29 = vsub.f32 %v12733_v51, %v4885_v60  ;;  %v15329_v19 = vld [vmem:[#allocation83_spill] sm:$0xff]  ;;  %v15330_v51 = vld [vmem:[#allocation70_spill] sm:$0xff] }
 0xc3e   :  { %10548 = vpow2.f32 %v4918_v2 }
 0xc3f   :  { %v4920_v13 = vmul.f32 1.442695, %v4904_v24  ;;  %v4922_v54 = vmul.f32 1.442695, %v4905_v29  ;;  %v15333_v24 = vld [vmem:[#allocation82_spill] sm:$0xff] }
 0xc40   :  { %v4889_v48 = vpop.xlane.xlu0 %4888 }
 0xc41   :  { %10550 = vpow2.f32 %v4920_v13  ;;  %v4906_v42 = vsub.f32 %v12755_v4, %v4889_v48  ;;  %v4907_v50 = vsub.f32 %v15326_v12, %v4889_v48 }
 0xc42   :  { %10552 = vpow2.f32 %v4922_v54 }
 0xc43   :  { %v10543_v49 = vpop.eup %10542  ;;  %v4924_v52 = vmul.f32 1.442695, %v4906_v42  ;;  %v4926_v60 = vmul.f32 1.442695, %v4907_v50 }
 0xc44   :  { %v10545_v11 = vpop.eup %10544  ;;  %v13149_v20 = vmul.f32 %v10543_v49, %v15327_v9  ;;  %v4893_v25 = vpop.xlane.xlu1 %4892 }
 0xc45   :  { %v4908_v14 = vsub.f32 %v15329_v19, %v4893_v25  ;;  %v13153_v2 = vmul.f32 %v10545_v11, %v15330_v51  ;;  %v4909_v13 = vsub.f32 %v15333_v24, %v4893_v25  ;;  %v15335_v19 = vld [vmem:[#allocation73_spill] sm:$0xff]  ;;  %10554 = vpow2.f32 %v4924_v52  ;;  %v15338_v24 = vld [vmem:[#allocation72_spill] sm:$0xff] }
 0xc46   :  { %15328 = vst [vmem:[#allocation37_spill] sm:$0xff] %v13149_v20  ;;  %v13156_v29 = vand.u32 4294901760, %v13149_v20  ;;  %10556 = vpow2.f32 %v4926_v60 }
 0xc47   :  { %15331 = vst [vmem:[#allocation9_spill] sm:$0xff] %v13153_v2  ;;  %v10547_v4 = vpop.eup %10546  ;;  %v4928_v48 = vmul.f32 1.442695, %v4908_v14  ;;  %v4949_v12 = vsel %vm4873_vm6, %v13153_v2, 0  ;;  %v4930_v57 = vmul.f32 1.442695, %v4909_v13 }
 0xc48   :  { %15332 = vst [vmem:[#allocation40_spill] sm:$0xff] %v13156_v29  ;;  %v10549_v49 = vpop.eup %10548  ;;  %v6335_v54 = vpop.permute.xlu1 %6334  ;;  %v13163_v42 = vand.u32 4294901760, %v4949_v12  ;;  %v13167_v11 = vsub.f32 %v13149_v20, %v13156_v29  ;;  %v13170_v51 = vmul.f32 %v10547_v4, %v15335_v19  ;;  %v15342_v13 = vld [vmem:[#allocation84_spill] sm:$0xff]  ;;  %v15343_v4 = vld [vmem:[#allocation85_spill] sm:$0xff] }
 0xc49   :  { %v13161_v9 = vpop.xlane.xlu0 %4898  ;;  %v6416_v50 = vand.u32 4294901760, %v6335_v54  ;;  %v13177_v2 = vmul.f32 %v10549_v49, %v15338_v24  ;;  %10558 = vpow2.f32 %v4928_v48 }
 0xc4a   :  { %15334 = vst [vmem:[#allocation11_spill] sm:$0xff] %v13167_v11  ;;  %15336 = vst [vmem:[#allocation81_spill] sm:$0xff] %v13170_v51  ;;  %v13173_v25 = vsub.f32 %v4949_v12, %v13163_v42  ;;  %v14935_v14 = vand.u32 4294901760, %v13167_v11  ;;  %v13188_v12 = vand.u32 4294901760, %v13170_v51  ;;  %v4910_v48 = vsub.f32 %v15342_v13, %v13161_v9 }
 0xc4b   :  { %15339 = vst [vmem:[#allocation83_spill] sm:$0xff] %v13177_v2  ;;  %v10551_v43 = vpop.eup %10550  ;;  %v13179_v27 = vsub.f32 %v6335_v54, %v6416_v50  ;;  %v4952_v60 = vsel %vm4873_vm6, %v13177_v2, 0  ;;  %v15346_v2 = vld [vmem:[#allocation75_spill] sm:$0xff]  ;;  %10560 = vpow2.f32 %v4930_v57 }
 0xc4c   :  { %15337 = vst [vmem:[#allocation71_spill] sm:$0xff] %v13173_v25  ;;  %v6339_v20 = vpop.permute.xlu1 %6338  ;;  %v5081_v52 = vsub.f32 %v13167_v11, %v14935_v14  ;;  %15341 = vst [vmem:[#allocation82_spill] sm:$0xff] %v13188_v12  ;;  %v10553_v24 = vpop.eup %10552  ;;  %v15344_v36 = vand.u32 4294901760, %v13173_v25  ;;  %v13198_v11 = vand.u32 4294901760, %v4952_v60  ;;  %v13201_v21 = vmul.f32 %v10551_v43, %v15346_v2 }
 0xc4d   :  { %15340 = vst [vmem:[#allocation70_spill] sm:$0xff] %v13179_v27  ;;  %v6337_v10 = vpop.permute.xlu0 %6336  ;;  %v14953_v49 = vand.u32 4294901760, %v13179_v27  ;;  %v6422_v54 = vand.u32 4294901760, %v6339_v20  ;;  %v13219_v43 = vsub.f32 %v13170_v51, %v13188_v12  ;;  %v4932_v57 = vmul.f32 1.442695, %v4910_v48  ;;  %v15416_v12 = vld [vmem:[#allocation15_spill] sm:$0xff] }
 0xc4e   :  { %v6419_v19 = vand.u32 4294901760, %v6337_v10  ;;  %v5075_v14 = vsub.f32 %v13173_v25, %v15344_v36  ;;  %15345 = vst [vmem:[#allocation73_spill] sm:$0xff] %v13198_v11  ;;  %15347 = vst [vmem:[#allocation72_spill] sm:$0xff] %v13201_v21  ;;  %v5082_v36 = vand.u32 4294901760, %v5081_v52  ;;  %v13215_v6 = vsub.f32 %v4952_v60, %v13198_v11 }
 0xc4f   :  { %v13206_v58 = vsub.f32 %v13179_v27, %v14953_v49  ;;  %v13208_v13 = vsub.f32 %v6339_v20, %v6422_v54  ;;  %15352 = vst [vmem:[#allocation103_spill] sm:$0xff] %v13219_v43  ;;  %v15355_v60 = vmov 0.0|0.0   ;;  %v13231_v51 = vpop.eup %10554  ;;  %10562 = vpow2.f32 %v4932_v57 }
 0xc50   :  { %v13210_v44 = vpack.c.bf16 %v6419_v19, %v6416_v50  ;;  %v13212_v46 = vsub.f32 %v6337_v10, %v6419_v19  ;;  %v6341_v38 = vpop.permute.xlu1 %6340  ;;  %v5076_v40 = vand.u32 4294901760, %v5075_v14  ;;  %15351 = vst [vmem:[#allocation102_spill] sm:$0xff] %v13215_v6  ;;  %v15353_v10 = vld [vmem:[#allocation74_spill] sm:$0xff] }
 0xc51   :  { %15348 = vst [vmem:[#allocation84_spill] sm:$0xff] %v13208_v13  ;;  %v6343_v0 = vpop.permute.xlu0 %6342  ;;  %v14959_v2 = vand.u32 4294901760, %v13208_v13  ;;  %v13227_v19 = vmul.f32 %v10553_v24, %v15353_v10  ;;  %v6425_v14 = vand.u32 4294901760, %v6341_v38  ;;  %v10557_v10 = vpop.eup %10556 }
 0xc52   :  { %15349 = vst [vmem:[#allocation85_spill] sm:$0xff] %v13210_v44  ;;  %15350 = vst [vmem:[#allocation75_spill] sm:$0xff] %v13212_v46  ;;  %9902 = vmatpush1.bf16.msra.mxu1 %v13210_v44  ;;  %v6428_v52 = vand.u32 4294901760, %v6343_v0  ;;  %5077 = vmatprep.mubr.f32.mxu0 %v5076_v40  ;;  %v15356_v50 = vand.u32 4294901760, %v13212_v46  ;;  %v13245_v40 = vand.u32 4294901760, %v13201_v21 }
 0xc53   :  { %15354 = vst [vmem:[#allocation74_spill] sm:$0xff] %v13227_v19  ;;  %9903 = vmatprep.subr.bf16.mxu1 %v15355_v60  ;;  %v13236_v20 = vsub.f32 %v13208_v13, %v14959_v2  ;;  %5083 = vmatmul.mubr.f32.vlgmr.msra.gmra.mrb[50].mxu0 %v5082_v36  ;;  %v13247_v49 = vpack.c.bf16 %v6425_v14, %v6422_v54  ;;  %v15361_v2 = vld [vmem:[#allocation101_spill] sm:$0xff]  ;;  %v13257_v17 = vpop.eup %10558 }
 0xc54   :  { %v13241_v24 = vsub.f32 %v13212_v46, %v15356_v50  ;;  %15357 = vst [vmem:[#allocation104_spill] sm:$0xff] %v13245_v40  ;;  %v13249_v44 = vsub.f32 %v6341_v38, %v6425_v14  ;;  %v13251_v41 = vsub.f32 %v6343_v0, %v6428_v52  ;;  %9703 = vmatpush1.bf16.msra.mxu0 %v15361_v2  ;;  %v6345_v39 = vpop.permute.xlu1 %6344  ;;  %v15362_v50 = vand.u32 4294901760, %v13215_v6 }
 0xc55   :  { %15358 = vst [vmem:[#allocation105_spill] sm:$0xff] %v13247_v49  ;;  %v6347_v25 = vpop.permute.xlu0 %6346  ;;  %v6431_v31 = vand.u32 4294901760, %v6345_v39  ;;  %9705 = vmatprep.subr.bf16.mxu0 %v15363_v59  ;;  %v4955_v38 = vsel %vm4873_vm6, %v13227_v19, 0  ;;  %v15367_v59 = vand.u32 4294901760, %v13219_v43 }
 0xc56   :  { %15359 = vst [vmem:[#allocation106_spill] sm:$0xff] %v13249_v44  ;;  %15360 = vst [vmem:[#allocation107_spill] sm:$0xff] %v13251_v41  ;;  %v5091_v36 = vsub.f32 %v13215_v6, %v15362_v50  ;;  %v6434_v30 = vand.u32 4294901760, %v6347_v25  ;;  %v14977_v0 = vand.u32 4294901760, %v13249_v44  ;;  %v14980_v2 = vand.u32 4294901760, %v13251_v41  ;;  %9905 = vmatpush1.bf16.msra.mxu1 %v13247_v49 }
 0xc57   :  { %v13267_v50 = vpack.c.bf16 %v6431_v31, %v6428_v52  ;;  %v13269_v48 = vsub.f32 %v6345_v39, %v6431_v31  ;;  %v5097_v19 = vsub.f32 %v13219_v43, %v15367_v59  ;;  %9906 = vmatprep.subr.bf16.mxu1 %v15355_v60  ;;  %v15368_v31 = vld [vmem:[#allocation19_spill] sm:$0xff]  ;;  %v13292_v59 = vsub.f32 %v13201_v21, %v13245_v40  ;;  %v15401_v40 = vld [vmem:[#allocation32_spill] sm:$0xff] }
 0xc58   :  { %v5092_v14 = vand.u32 4294901760, %v5091_v36  ;;  %v13271_v6 = vsub.f32 %v6347_v25, %v6434_v30  ;;  %v13280_v54 = vsub.f32 %v13249_v44, %v14977_v0  ;;  %v13285_v52 = vsub.f32 %v13251_v41, %v14980_v2  ;;  %9707 = vmatpush1.bf16.msra.mxu0 %v15368_v31  ;;  %v6349_v39 = vpop.permute.xlu1 %6348 }
 0xc59   :  { %15364 = vst [vmem:[#allocation101_spill] sm:$0xff] %v13267_v50  ;;  %15365 = vst [vmem:[#allocation20_spill] sm:$0xff] %v13269_v48  ;;  %v6351_v25 = vpop.permute.xlu0 %6350  ;;  %v13288_v36 = vand.u32 4294901760, %v4955_v38  ;;  %v14988_v49 = vand.u32 4294901760, %v13269_v48  ;;  %v5098_v2 = vand.u32 4294901760, %v5097_v19  ;;  %9709 = vmatprep.subr.bf16.mxu0 %v15371_v35  ;;  %v6437_v15 = vand.u32 4294901760, %v6349_v39 }
 0xc5a   :  { %15366 = vst [vmem:[#allocation108_spill] sm:$0xff] %v13271_v6  ;;  %5093 = vmatprep.mubr.f32.mxu0 %v5092_v14  ;;  %15370 = vst [vmem:[#allocation109_spill] sm:$0xff] %v13292_v59  ;;  %v14993_v43 = vand.u32 4294901760, %v13271_v6  ;;  %v15372_v14 = vsub.f32 %v15343_v4, %v13161_v9  ;;  %v6440_v33 = vand.u32 4294901760, %v6351_v25  ;;  %9908 = vmatpush1.bf16.msra.mxu1 %v13267_v50  ;;  %v14998_v9 = vand.u32 4294901760, %v13292_v59  ;;  %v10561_v4 = vpop.eup %10560  ;;  %v15377_v50 = vld [vmem:[#allocation22_spill] sm:$0xff] }
 0xc5b   :  { %15369 = vst [vmem:[#allocation19_spill] sm:$0xff] %v13288_v36  ;;  %v13306_v21 = vsub.f32 %v13269_v48, %v14988_v49  ;;  %5099 = vmatmul.mubr.f32.gmra.mrb[52].mxu0 %v5098_v2  ;;  %v13314_v35 = vsub.f32 %v4955_v38, %v13288_v36  ;;  %9909 = vmatprep.subr.bf16.mxu1 %v15355_v60 }
 0xc5c   :  { %v4934_v31 = vmul.f32 1.442695, %v15372_v14  ;;  %v13311_v0 = vsub.f32 %v13271_v6, %v14993_v43  ;;  %v13318_v19 = vpack.c.bf16 %v6437_v15, %v6434_v30  ;;  %v13320_v14 = vsub.f32 %v6349_v39, %v6437_v15  ;;  %9711 = vmatpush1.bf16.msra.mxu0 %v15377_v50  ;;  %v6353_v53 = vpop.permute.xlu1 %6352  ;;  %v15380_v30 = vld [vmem:[#allocation26_spill] sm:$0xff] }
 0xc5d   :  { %15373 = vst [vmem:[#allocation23_spill] sm:$0xff] %v13314_v35  ;;  %v13322_v49 = vsub.f32 %v6351_v25, %v6440_v33  ;;  %v6355_v43 = vpop.permute.xlu0 %6354  ;;  %v13326_v2 = vmul.f32 %v10557_v10, %v15378_v28  ;;  %v14999_v38 = vand.u32 4294901760, %v13314_v35  ;;  %v5113_v8 = vsub.f32 %v13292_v59, %v14998_v9  ;;  %9713 = vmatprep.subr.bf16.mxu0 %v15380_v30 }
 0xc5e   :  { %15374 = vst [vmem:[#allocation110_spill] sm:$0xff] %v13318_v19  ;;  %15375 = vst [vmem:[#allocation111_spill] sm:$0xff] %v13320_v14  ;;  %v15009_v15 = vand.u32 4294901760, %v13320_v14  ;;  %v6443_v25 = vand.u32 4294901760, %v6353_v53  ;;  %9911 = vmatpush1.bf16.msra.mxu1 %v13318_v19  ;;  %10564 = vpow2.f32 %v4934_v31  ;;  %v6446_v57 = vand.u32 4294901760, %v6355_v43 }
 0xc5f   :  { %15376 = vst [vmem:[#allocation112_spill] sm:$0xff] %v13322_v49  ;;  %15379 = vst [vmem:[#allocation22_spill] sm:$0xff] %v13326_v2  ;;  %v15014_v50 = vand.u32 4294901760, %v13322_v49  ;;  %v5107_v28 = vsub.f32 %v13314_v35, %v14999_v38  ;;  %v4958_v10 = vsel %vm4873_vm6, %v13326_v2, 0  ;;  %9912 = vmatprep.subr.bf16.mxu1 %v15355_v60  ;;  %v15383_v38 = vld [vmem:[#allocation25_spill] sm:$0xff] }
 0xc60   :  { %v13347_v30 = vsub.f32 %v13320_v14, %v15009_v15  ;;  %v13354_v31 = vpack.c.bf16 %v6443_v25, %v6440_v33  ;;  %v13356_v9 = vsub.f32 %v6353_v53, %v6443_v25  ;;  %9715 = vmatpush1.bf16.msra.mxu0 %v15383_v38  ;;  %v6357_v19 = vpop.permute.xlu1 %6356  ;;  %v13359_v35 = vsub.f32 %v6355_v43, %v6446_v57  ;;  %v15386_v15 = vld [vmem:[#allocation77_spill] sm:$0xff] }
 0xc61   :  { %v13352_v39 = vsub.f32 %v13322_v49, %v15014_v50  ;;  %v6359_v2 = vpop.permute.xlu0 %6358  ;;  %v5108_v59 = vand.u32 4294901760, %v5107_v28  ;;  %v13361_v56 = vand.u32 4294901760, %v4958_v10  ;;  %v13365_v62 = vmul.f32 %v13231_v51, %v15386_v15  ;;  %9717 = vmatprep.subr.bf16.mxu0 %v15388_v26  ;;  %v15391_v15 = vld [vmem:[#allocation78_spill] sm:$0xff]  ;;  %v15393_v28 = vld [vmem:[#allocation79_spill] sm:$0xff] }
 0xc62   :  { %15381 = vst [vmem:[#allocation76_spill] sm:$0xff] %v13354_v31  ;;  %15382 = vst [vmem:[#allocation26_spill] sm:$0xff] %v13356_v9  ;;  %v5114_v50 = vand.u32 4294901760, %v5113_v8  ;;  %v15019_v33 = vand.u32 4294901760, %v13356_v9  ;;  %9914 = vmatpush1.bf16.msra.mxu1 %v13354_v31  ;;  %v6449_v51 = vand.u32 4294901760, %v6357_v19  ;;  %v6452_v8 = vand.u32 4294901760, %v6359_v2 }
 0xc63   :  { %15384 = vst [vmem:[#allocation25_spill] sm:$0xff] %v13359_v35  ;;  %15385 = vst [vmem:[#allocation113_spill] sm:$0xff] %v13361_v56  ;;  %5109 = vmatprep.mubr.f32.mxu0 %v5108_v59  ;;  %v13374_v38 = vsub.f32 %v4958_v10, %v13361_v56  ;;  %v13377_v25 = vand.u32 4294901760, %v13365_v62  ;;  %9915 = vmatprep.subr.bf16.mxu1 %v15355_v60  ;;  %v13386_v59 = vmul.f32 %v10561_v4, %v15391_v15  ;;  %v15398_v15 = vld [vmem:[#allocation28_spill] sm:$0xff] }
 0xc64   :  { %15387 = vst [vmem:[#allocation77_spill] sm:$0xff] %v13365_v62  ;;  %5115 = vmatmul.mubr.f32.gmra.mrb[54].mxu0 %v5114_v50  ;;  %v13383_v26 = vsub.f32 %v13356_v9, %v15019_v33  ;;  %v13390_v10 = vmul.f32 %v13257_v17, %v15393_v28  ;;  %v6361_v53 = vpop.permute.xlu1 %6360  ;;  %v15395_v31 = vand.u32 4294901760, %v13359_v35  ;;  %v13404_v4 = vpack.c.bf16 %v6449_v51, %v6446_v57 }
 0xc65   :  { %15389 = vst [vmem:[#allocation29_spill] sm:$0xff] %v13374_v38  ;;  %15390 = vst [vmem:[#allocation114_spill] sm:$0xff] %v13377_v25  ;;  %v13392_v43 = vpop.permute.xlu0 %6362  ;;  %v15030_v22 = vand.u32 4294901760, %v13374_v38  ;;  %v13402_v33 = vsub.f32 %v13365_v62, %v13377_v25  ;;  %9719 = vmatpush1.bf16.msra.mxu0 %v15398_v15  ;;  %v13407_v17 = vsub.f32 %v6357_v19, %v6449_v51  ;;  %v4961_v56 = vsel %vm4873_vm6, %v13386_v59, 0  ;;  %v15403_v19 = vld [vmem:[#allocation17_spill] sm:$0xff]  ;;  %v15404_v51 = vld [vmem:[#allocation99_spill] sm:$0xff] }
 0xc66   :  { %15392 = vst [vmem:[#allocation78_spill] sm:$0xff] %v13386_v59  ;;  %15394 = vst [vmem:[#allocation79_spill] sm:$0xff] %v13390_v10  ;;  %v13397_v50 = vsub.f32 %v13359_v35, %v15395_v31  ;;  %v13409_v28 = vsub.f32 %v6359_v2, %v6452_v8  ;;  %9721 = vmatprep.subr.bf16.mxu0 %v15401_v40  ;;  %v10563_v31 = vpop.eup %10562  ;;  %v13418_v57 = vand.u32 4294901760, %v4961_v56  ;;  %9917 = vmatpush1.bf16.msra.mxu1 %v13404_v4 }
 0xc67   :  { %15396 = vst [vmem:[#allocation115_spill] sm:$0xff] %v13402_v33  ;;  %15397 = vst [vmem:[#allocation116_spill] sm:$0xff] %v13404_v4  ;;  %v5123_v16 = vsub.f32 %v13374_v38, %v15030_v22  ;;  %v13423_v2 = vsub.f32 %v15404_v51, %v15403_v19  ;;  %v13430_v25 = vand.u32 4294901760, %v13390_v10  ;;  %9918 = vmatprep.subr.bf16.mxu1 %v15355_v60  ;;  %v15407_v4 = vand.u32 4294901760, %v13402_v33 }
 0xc68   :  { %15399 = vst [vmem:[#allocation28_spill] sm:$0xff] %v13407_v17  ;;  %15400 = vst [vmem:[#allocation117_spill] sm:$0xff] %v13409_v28  ;;  %v6365_v22 = vpop.permute.xlu1 %6364  ;;  %v10565_v62 = vpop.eup %10564  ;;  %v13437_v19 = vsub.f32 %v4961_v56, %v13418_v57  ;;  %v6455_v15 = vand.u32 4294901760, %v6361_v53  ;;  %v15410_v40 = vand.u32 4294901760, %v13407_v17  ;;  %v15411_v7 = vand.u32 4294901760, %v13409_v28 }
 0xc69   :  { %15402 = vst [vmem:[#allocation32_spill] sm:$0xff] %v13418_v57  ;;  %15405 = vst [vmem:[#allocation99_spill] sm:$0xff] %v13423_v2  ;;  %v5124_v38 = vand.u32 4294901760, %v5123_v16  ;;  %v5129_v51 = vsub.f32 %v13402_v33, %v15407_v4  ;;  %9723 = vmatpush1.bf16.msra.mxu0 %v15409_v32  ;;  %v13452_v16 = vsub.f32 %v13390_v10, %v13430_v25  ;;  %v6458_v56 = vand.u32 4294901760, %v13392_v43  ;;  %v6367_v4 = vpop.permute.xlu0 %6366  ;;  %v15413_v33 = vld [vmem:[#allocation35_spill] sm:$0xff] }
 0xc6a   :  { %15406 = vst [vmem:[#allocation118_spill] sm:$0xff] %v13430_v25  ;;  %15408 = vst [vmem:[#allocation119_spill] sm:$0xff] %v13437_v19  ;;  %v13443_v59 = vsub.f32 %v13407_v17, %v15410_v40  ;;  %v13448_v47 = vsub.f32 %v13409_v28, %v15411_v7  ;;  %9725 = vmatprep.subr.bf16.mxu0 %v15413_v33  ;;  %v15056_v57 = vand.u32 4294901760, %v13437_v19  ;;  %v15417_v7 = vld [vmem:[#allocation100_spill] sm:$0xff]  ;;  %v6461_v33 = vand.u32 4294901760, %v6365_v22 }
 0xc6b   :  { %15412 = vst [vmem:[#allocation31_spill] sm:$0xff] %v13452_v16  ;;  %5125 = vmatprep.mubr.f32.mxu0 %v5124_v38  ;;  %v5130_v32 = vand.u32 4294901760, %v5129_v51  ;;  %v13457_v40 = vpack.c.bf16 %v6455_v15, %v6452_v8  ;;  %v13459_v36 = vsub.f32 %v6361_v53, %v6455_v15  ;;  %v13463_v37 = vsub.f32 %v15417_v7, %v15416_v12  ;;  %v15420_v15 = vld [vmem:[#allocation80_spill] sm:$0xff]  ;;  %v10650_v7 = vld [vmem:[%s14752_s3 + $0xe0] sm:$0x3] }
 0xc6c   :  { %v15057_v10 = vand.u32 4294901760, %v13452_v16  ;;  %v13467_v25 = vsub.f32 %v13392_v43, %v6458_v56  ;;  %v6369_v61 = vpop.permute.xlu1 %6368  ;;  %v5139_v38 = vsub.f32 %v13437_v19, %v15056_v57  ;;  %v13477_v51 = vmul.f32 %v10565_v62, %v15420_v15  ;;  %v15423_v53 = vld [vmem:[#allocation34_spill] sm:$0xff] }
 0xc6d   :  { %15414 = vst [vmem:[#allocation35_spill] sm:$0xff] %v13457_v40  ;;  %15415 = vst [vmem:[#allocation120_spill] sm:$0xff] %v13459_v36  ;;  %5131 = vmatmul.mubr.f32.gmra.mrb[56].mxu0 %v5130_v32  ;;  %9920 = vmatpush1.bf16.msra.mxu1 %v13457_v40  ;;  %v13487_v57 = vmul.f32 %v10650_v7, %v10563_v31  ;;  %v15424_v15 = vand.u32 4294901760, %v13459_v36  ;;  %v6464_v32 = vand.u32 4294901760, %v6367_v4  ;;  %v6371_v12 = vpop.permute.xlu0 %6370  ;;  %v6467_v19 = vand.u32 4294901760, %v6369_v61 }
 0xc6e   :  { %15418 = vst [vmem:[#allocation100_spill] sm:$0xff] %v13463_v37  ;;  %15419 = vst [vmem:[#allocation121_spill] sm:$0xff] %v13467_v25  ;;  %v5145_v43 = vsub.f32 %v13452_v16, %v15057_v10  ;;  %9727 = vmatpush1.bf16.msra.mxu0 %v15423_v53  ;;  %9921 = vmatprep.subr.bf16.mxu1 %v15355_v60  ;;  %v5140_v62 = vand.u32 4294901760, %v5139_v38  ;;  %v4964_v10 = vsel %vm4873_vm6, %v13477_v51, 0  ;;  %v15425_v31 = vand.u32 4294901760, %v13467_v25 }
 0xc6f   :  { %15421 = vst [vmem:[#allocation80_spill] sm:$0xff] %v13477_v51  ;;  %15422 = vst [vmem:[#allocation122_spill] sm:$0xff] %v13487_v57  ;;  %v13494_v8 = vsub.f32 %v13459_v36, %v15424_v15  ;;  %9729 = vmatprep.subr.bf16.mxu0 %v13067_v63  ;;  %v13504_v53 = vand.u32 4294901760, %v4964_v10  ;;  %v13507_v38 = vand.u32 4294901760, %v13487_v57  ;;  %v13509_v15 = vpack.c.bf16 %v6461_v33, %v6458_v56 }
 0xc70   :  { %v5146_v40 = vand.u32 4294901760, %v5145_v43  ;;  %v13502_v7 = vsub.f32 %v13467_v25, %v15425_v31  ;;  %5141 = vmatprep.mubr.f32.mxu0 %v5140_v62  ;;  %v13511_v16 = vsub.f32 %v6365_v22, %v6461_v33  ;;  %v13513_v51 = vsub.f32 %v6367_v4, %v6464_v32  ;;  %v6373_v36 = vpop.permute.xlu1 %6372 }
 0xc71   :  { %15426 = vst [vmem:[#allocation34_spill] sm:$0xff] %v13504_v53  ;;  %15427 = vst [vmem:[#allocation123_spill] sm:$0xff] %v13507_v38  ;;  %v13517_v43 = vsub.f32 %v4964_v10, %v13504_v53  ;;  %v13521_v31 = vsub.f32 %v13487_v57, %v13507_v38  ;;  %v15433_v62 = vand.u32 4294901760, %v13423_v2  ;;  %v6470_v33 = vand.u32 4294901760, %v6371_v12  ;;  %9923 = vmatpush1.bf16.msra.mxu1 %v13509_v15  ;;  %v15434_v10 = vld [vmem:[#allocation38_spill] sm:$0xff] }
 0xc72   :  { %15428 = vst [vmem:[#allocation124_spill] sm:$0xff] %v13509_v15  ;;  %15429 = vst [vmem:[#allocation125_spill] sm:$0xff] %v13511_v16  ;;  %5147 = vmatmul.mubr.f32.gmra.mrb[58].mxu0 %v5146_v40  ;;  %v15072_v22 = vand.u32 4294901760, %v13511_v16  ;;  %v15075_v40 = vand.u32 4294901760, %v13513_v51  ;;  %v13534_v38 = vpack.c.bf16 %v6467_v19, %v6464_v32  ;;  %v13536_v53 = vsub.f32 %v6369_v61, %v6467_v19 }
 0xc73   :  { %15430 = vst [vmem:[#allocation126_spill] sm:$0xff] %v13513_v51  ;;  %15431 = vst [vmem:[#allocation127_spill] sm:$0xff] %v13517_v43  ;;  %v5412_v56 = vsub.f32 %v13423_v2, %v15433_v62  ;;  %9731 = vmatpush1.bf16.msra.mxu0 %v15434_v10  ;;  %v15076_v63 = vand.u32 4294901760, %v13517_v43  ;;  %v15079_v57 = vand.u32 4294901760, %v13521_v31  ;;  %9924 = vmatprep.subr.bf16.mxu1 %v15355_v60  ;;  %v6473_v32 = vand.u32 4294901760, %v6373_v36 }
 0xc74   :  { %15432 = vst [vmem:[#allocation128_spill] sm:$0xff] %v13521_v31  ;;  %15435 = vst [vmem:[#allocation38_spill] sm:$0xff] %v13534_v38  ;;  %9733 = vmatprep.subr.bf16.mxu0 %v13086_v34  ;;  %v13543_v62 = vsub.f32 %v13511_v16, %v15072_v22  ;;  %v13548_v10 = vsub.f32 %v13513_v51, %v15075_v40  ;;  %v13550_v4 = vsub.f32 %v6371_v12, %v6470_v33 }
 0xc75   :  { %15436 = vst [vmem:[#allocation129_spill] sm:$0xff] %v13536_v53  ;;  %v5155_v61 = vsub.f32 %v13517_v43, %v15076_v63  ;;  %v5161_v34 = vsub.f32 %v13521_v31, %v15079_v57  ;;  %v15084_v19 = vand.u32 4294901760, %v13536_v53  ;;  %v13562_v40 = vpack.c.bf16 %v6473_v32, %v6470_v33  ;;  %9926 = vmatpush1.bf16.msra.mxu1 %v13534_v38  ;;  %v13584_v38 = vpop.permute.xlu0 %6374 }
 0xc76   :  { %15437 = vst [vmem:[#allocation130_spill] sm:$0xff] %v13550_v4  ;;  %v6720_v15 = vand.u32 4294901760, %v13550_v4  ;;  %v15439_v12 = vand.u32 4294901760, %v13463_v37  ;;  %v13574_v31 = vsub.f32 %v6373_v36, %v6473_v32  ;;  %9927 = vmatprep.subr.bf16.mxu1 %v15355_v60  ;;  %15441 = vst [vmem:[#allocation133_spill] sm:$0xff] %v13584_v38  ;;  %v6596_v32 = vand.u32 4294901760, %v13206_v58 }
 0xc77   :  { %15438 = vst [vmem:[#allocation131_spill] sm:$0xff] %v13562_v40  ;;  %9735 = vmatpush1.bf16.msra.mxu0 %v13094_v55  ;;  %v5156_v43 = vand.u32 4294901760, %v5155_v61  ;;  %v13572_v57 = vsub.f32 %v13536_v53, %v15084_v19  ;;  %v5162_v33 = vand.u32 4294901760, %v5161_v34  ;;  %v5413_v55 = vand.u32 4294901760, %v5412_v56 }
 0xc78   :  { %v5418_v63 = vsub.f32 %v13463_v37, %v15439_v12  ;;  %15440 = vst [vmem:[#allocation132_spill] sm:$0xff] %v13574_v31  ;;  %9737 = vmatprep.subr.bf16.mxu0 %v13100_v45  ;;  %v13579_v22 = vsub.f32 %v13550_v4, %v6720_v15  ;;  %v6727_v12 = vand.u32 4294901760, %v13574_v31  ;;  %v6610_v45 = vand.u32 4294901760, %v13236_v20 }
 0xc79   :  { %5157 = vmatprep.mubr.f32.mxu0 %v5156_v43  ;;  %9929 = vmatpush1.bf16.msra.mxu1 %v13562_v40  ;;  %v6603_v34 = vand.u32 4294901760, %v13241_v24  ;;  %v6617_v56 = vand.u32 4294901760, %v13280_v54  ;;  %v6624_v61 = vand.u32 4294901760, %v13285_v52  ;;  %v15443_v58 = vmov 0.0  }
 0xc7a   :  { %5163 = vmatmul.mubr.f32.gmra.mrb[60].mxu0 %v5162_v33  ;;  %v5419_v36 = vand.u32 4294901760, %v5418_v63  ;;  %v6728_v43 = vsub.f32 %v13574_v31, %v6727_v12  ;;  %v6631_v33 = vand.u32 4294901760, %v13306_v21  ;;  %v13597_v63 = vand.u32 4294901760, %v13584_v38  ;;  %6475 = vmatprep.subr.mxu1 %v15443_v58  ;;  %v15535_v58 = vld [vmem:[#allocation87_spill] sm:$0xff]  ;;  %v15537_v38 = vld [vmem:[#allocation90_spill] sm:$0xff] }
 0xc7b   :  { %5444 = vmatprep.mubr.f32.mxu0 %v13163_v42  ;;  %9739 = vmatpush1.bf16.msra.mxu0 %v13108_v1  ;;  %v6638_v20 = vand.u32 4294901760, %v13311_v0  ;;  %v6645_v24 = vand.u32 4294901760, %v13347_v30  ;;  %v6652_v19 = vand.u32 4294901760, %v13352_v39  ;;  %v6659_v1 = vand.u32 4294901760, %v13383_v26 }
 0xc7c   :  { %15442 = vst [vmem:[#allocation134_spill] sm:$0xff] %v13597_v63  ;;  %5414 = vmatprep.subr.mxu0 %v5413_v55  ;;  %v6666_v54 = vand.u32 4294901760, %v13397_v50  ;;  %v6673_v52 = vand.u32 4294901760, %v13443_v59  ;;  %v6680_v21 = vand.u32 4294901760, %v13448_v47  ;;  %v6687_v40 = vand.u32 4294901760, %v13494_v8 }
 0xc7d   :  { %6477 = vmatpush1.msra.mxu1 %v13597_v63  ;;  %v6694_v55 = vand.u32 4294901760, %v13502_v7  ;;  %v6701_v0 = vand.u32 4294901760, %v13543_v62  ;;  %v6708_v30 = vand.u32 4294901760, %v13548_v10  ;;  %v6715_v39 = vand.u32 4294901760, %v13572_v57 }
 0xc7e   :  { %v6722_v26 = vand.u32 4294901760, %v13579_v22  ;;  %v15444_v47 = vpack.c.bf16 %v12491_v5, %v12489_v23  ;;  %v15445_v59 = vand.u32 4294901760, %v13179_v27  ;;  %v15446_v50 = vand.u32 4294901760, %v13212_v46  ;;  %9930 = vmatprep.subr.bf16.mxu1 %v15355_v60  ;;  %v15520_v46 = vld [vmem:[#allocation123_spill] sm:$0xff] }
 0xc7f   :  { %5420 = vmatpush1.msra.mxu0 %v5419_v36  ;;  %v15448_v7 = vand.u32 4294901760, %v13208_v13  ;;  %v15449_v62 = vand.u32 4294901760, %v13249_v44  ;;  %v15451_v22 = vand.u32 4294901760, %v13251_v41  ;;  %v15452_v10 = vand.u32 4294901760, %v13269_v48  ;;  %v15464_v48 = vld [vmem:[#allocation24_spill] sm:$0xff]  ;;  %v15518_v44 = vld [vmem:[#allocation54_spill] sm:$0xff] }
 0xc80   :  { %5446 = vmatmul.mubr.f32.vlgmr.msra.gmra.mrb[50].mxu0 %v13156_v29  ;;  %9741 = vmatprep.subr.bf16.mxu0 %v15444_v47  ;;  %v13622_v8 = vpack.c.bf16 %v15446_v50, %v15445_v59  ;;  %v6729_v4 = vand.u32 4294901760, %v6728_v43  ;;  %v15454_v47 = vpack.c.bf16 %v12506_v18, %v12493_v3  ;;  %v15455_v59 = vand.u32 4294901760, %v13271_v6  ;;  %v15556_v60 = vld [vmem:[#allocation27_spill] sm:$0xff]  ;;  %v15577_v29 = vld [vmem:[#allocation14_spill] sm:$0xff] }
 0xc81   :  { %v13628_v57 = vpack.c.bf16 %v15449_v62, %v15448_v7  ;;  %v13634_v36 = vpack.c.bf16 %v15452_v10, %v15451_v22  ;;  %5452 = vmatprep.mubr.f32.mxu0 %v13198_v11  ;;  %v15456_v50 = vand.u32 4294901760, %v13320_v14  ;;  %v15458_v7 = vand.u32 4294901760, %v13322_v49  ;;  %v15573_v11 = vld [vmem:[#allocation67_spill] sm:$0xff] }
 0xc82   :  { %15447 = vst [vmem:[#allocation135_spill] sm:$0xff] %v13622_v8  ;;  %9743 = vmatpush1.bf16.msra.mxu0 %v15454_v47  ;;  %v15459_v62 = vand.u32 4294901760, %v13356_v9  ;;  %v15461_v43 = vand.u32 4294901760, %v13359_v35  ;;  %v15462_v22 = vand.u32 4294901760, %v13407_v17  ;;  %v15465_v47 = vld [vmem:[#allocation21_spill] sm:$0xff]  ;;  %v15467_v6 = vand.u32 4294901760, %v13409_v28 }
 0xc83   :  { %15450 = vst [vmem:[#allocation136_spill] sm:$0xff] %v13628_v57  ;;  %15453 = vst [vmem:[#allocation137_spill] sm:$0xff] %v13634_v36  ;;  %v13644_v31 = vpack.c.bf16 %v15456_v50, %v15455_v59  ;;  %v15466_v13 = vpack.c.bf16 %v15464_v48, %v15465_v47  ;;  %v15468_v59 = vld [vmem:[#allocation120_spill] sm:$0xff]  ;;  %v15471_v49 = vand.u32 4294901760, %v13467_v25  ;;  %v15474_v35 = vand.u32 4294901760, %v13513_v51  ;;  %v15513_v28 = vld [vmem:[#allocation34_spill] sm:$0xff] }
 0xc84   :  { %v13650_v41 = vpack.c.bf16 %v15459_v62, %v15458_v7  ;;  %v13656_v10 = vpack.c.bf16 %v15462_v22, %v15461_v43  ;;  %v15469_v50 = vand.u32 4294901760, %v15468_v59  ;;  %v15472_v7 = vand.u32 4294901760, %v13511_v16  ;;  %v15512_v16 = vld [vmem:[#allocation118_spill] sm:$0xff]  ;;  %v15552_v57 = vld [vmem:[#allocation12_spill] sm:$0xff]  ;;  %v15554_v8 = vld [vmem:[#allocation103_spill] sm:$0xff] }
 0xc85   :  { %15457 = vst [vmem:[#allocation138_spill] sm:$0xff] %v13644_v31  ;;  %9745 = vmatprep.subr.bf16.mxu0 %v15466_v13  ;;  %v15475_v43 = vand.u32 4294901760, %v13536_v53  ;;  %v13679_v17 = vpack.c.bf16 %v6727_v12, %v6720_v15  ;;  %v13682_v13 = vpack.c.bf16 %v6603_v34, %v6596_v32  ;;  %v13688_v25 = vpack.c.bf16 %v6645_v24, %v6638_v20  ;;  %v15487_v12 = vld [vmem:[#allocation19_spill] sm:$0xff]  ;;  %v15488_v32 = vld [vmem:[#allocation33_spill] sm:$0xff]  ;;  %v15489_v34 = vld [vmem:[#allocation30_spill] sm:$0xff] }
 0xc86   :  { %15460 = vst [vmem:[#allocation139_spill] sm:$0xff] %v13650_v41  ;;  %15463 = vst [vmem:[#allocation140_spill] sm:$0xff] %v13656_v10  ;;  %v13665_v14 = vpack.c.bf16 %v15469_v50, %v15467_v6  ;;  %v13671_v62 = vpack.c.bf16 %v15472_v7, %v15471_v49  ;;  %v13684_v6 = vpack.c.bf16 %v6617_v56, %v6610_v45  ;;  %v15482_v49 = vld [vmem:[#allocation82_spill] sm:$0xff]  ;;  %v15494_v20 = vld [vmem:[#allocation36_spill] sm:$0xff] }
 0xc87   :  { %v13677_v22 = vpack.c.bf16 %v15475_v43, %v15474_v35  ;;  %15477 = vst [vmem:[#allocation142_spill] sm:$0xff] %v13679_v17  ;;  %15478 = vst [vmem:[#allocation143_spill] sm:$0xff] %v13682_v13  ;;  %v13686_v50 = vpack.c.bf16 %v6631_v33, %v6624_v61  ;;  %5454 = vmatmul.mubr.f32.gmra.mrb[52].mxu0 %v15482_v49  ;;  %v13691_v7 = vpack.c.bf16 %v6659_v1, %v6652_v19  ;;  %v15493_v33 = vld [vmem:[#allocation8_spill] sm:$0xff]  ;;  %v15498_v1 = vld [vmem:[#allocation42_spill] sm:$0xff] }
 0xc88   :  { %15470 = vst [vmem:[#allocation24_spill] sm:$0xff] %v13665_v14  ;;  %15473 = vst [vmem:[#allocation21_spill] sm:$0xff] %v13671_v62  ;;  %v13693_v51 = vpack.c.bf16 %v6673_v52, %v6666_v54  ;;  %v13695_v35 = vpack.c.bf16 %v6687_v40, %v6680_v21  ;;  %v13697_v15 = vpack.c.bf16 %v6701_v0, %v6694_v55  ;;  %5460 = vmatprep.mubr.f32.mxu0 %v15487_v12  ;;  %v15496_v24 = vld [vmem:[#allocation104_spill] sm:$0xff]  ;;  %v15497_v40 = vld [vmem:[#allocation113_spill] sm:$0xff] }
 0xc89   :  { %15476 = vst [vmem:[#allocation141_spill] sm:$0xff] %v13677_v22  ;;  %15479 = vst [vmem:[#allocation144_spill] sm:$0xff] %v13684_v6  ;;  %v15490_v45 = vpack.c.bf16 %v15488_v32, %v15489_v34  ;;  %v13703_v61 = vpack.c.bf16 %v6715_v39, %v6708_v30  ;;  %v13705_v56 = vpack.c.bf16 %v6729_v4, %v6722_v26  ;;  %v15499_v54 = vld [vmem:[#allocation41_spill] sm:$0xff]  ;;  %v15502_v55 = vld [vmem:[#allocation43_spill] sm:$0xff] }
 0xc8a   :  { %15480 = vst [vmem:[#allocation145_spill] sm:$0xff] %v13686_v50  ;;  %15481 = vst [vmem:[#allocation146_spill] sm:$0xff] %v13688_v25  ;;  %v15495_v19 = vpack.c.bf16 %v15493_v33, %v15494_v20  ;;  %v15500_v52 = vpack.c.bf16 %v15498_v1, %v15499_v54  ;;  %v15501_v21 = vld [vmem:[#allocation45_spill] sm:$0xff]  ;;  %v15504_v30 = vld [vmem:[#allocation114_spill] sm:$0xff] }
 0xc8b   :  { %15483 = vst [vmem:[#allocation147_spill] sm:$0xff] %v13691_v7  ;;  %15484 = vst [vmem:[#allocation148_spill] sm:$0xff] %v13693_v51  ;;  %9747 = vmatpush1.bf16.msra.mxu0 %v15490_v45  ;;  %v15503_v0 = vpack.c.bf16 %v15501_v21, %v15502_v55  ;;  %v15505_v4 = vld [vmem:[#allocation32_spill] sm:$0xff]  ;;  %v15506_v39 = vld [vmem:[#allocation47_spill] sm:$0xff] }
 0xc8c   :  { %15485 = vst [vmem:[#allocation149_spill] sm:$0xff] %v13695_v35  ;;  %15486 = vst [vmem:[#allocation150_spill] sm:$0xff] %v13697_v15  ;;  %9749 = vmatprep.subr.bf16.mxu0 %v15495_v19  ;;  %5462 = vmatmul.mubr.f32.gmra.mrb[54].mxu0 %v15496_v24  ;;  %v15507_v26 = vld [vmem:[#allocation46_spill] sm:$0xff]  ;;  %v15509_v45 = vld [vmem:[#allocation49_spill] sm:$0xff] }
 0xc8d   :  { %15491 = vst [vmem:[#allocation33_spill] sm:$0xff] %v13703_v61  ;;  %15492 = vst [vmem:[#allocation30_spill] sm:$0xff] %v13705_v56  ;;  %5468 = vmatprep.mubr.f32.mxu0 %v15497_v40  ;;  %v15508_v43 = vpack.c.bf16 %v15506_v39, %v15507_v26  ;;  %v15510_v19 = vld [vmem:[#allocation48_spill] sm:$0xff]  ;;  %v15515_v59 = vld [vmem:[#allocation50_spill] sm:$0xff] }
 0xc8e   :  { %v15511_v53 = vpack.c.bf16 %v15509_v45, %v15510_v19  ;;  %v15521_v56 = vld [vmem:[#allocation57_spill] sm:$0xff]  ;;  %v15524_v15 = vld [vmem:[#allocation71_spill] sm:$0xff]  ;;  %v15526_v35 = vld [vmem:[#allocation58_spill] sm:$0xff] }
 0xc8f   :  { %9751 = vmatpush1.bf16.msra.mxu0 %v15500_v52  ;;  %v15514_v52 = vld [vmem:[#allocation51_spill] sm:$0xff]  ;;  %v15528_v7 = vld [vmem:[#allocation62_spill] sm:$0xff]  ;;  %v15529_v25 = vld [vmem:[#allocation61_spill] sm:$0xff] }
 0xc90   :  { %9753 = vmatprep.subr.bf16.mxu0 %v15503_v0  ;;  %5470 = vmatmul.mubr.f32.gmra.mrb[56].mxu0 %v15504_v30  ;;  %v15516_v9 = vpack.c.bf16 %v15514_v52, %v15515_v59  ;;  %v15517_v0 = vld [vmem:[#allocation55_spill] sm:$0xff]  ;;  %v15530_v50 = vpack.c.bf16 %v15528_v7, %v15529_v25  ;;  %v15532_v6 = vld [vmem:[#allocation64_spill] sm:$0xff]  ;;  %v15540_v22 = vld [vmem:[#allocation93_spill] sm:$0xff] }
 0xc91   :  { %5476 = vmatprep.mubr.f32.mxu0 %v15505_v4  ;;  %v15519_v27 = vpack.c.bf16 %v15517_v0, %v15518_v44  ;;  %v15541_v62 = vld [vmem:[#allocation92_spill] sm:$0xff]  ;;  %v15544_v10 = vld [vmem:[#allocation94_spill] sm:$0xff]  ;;  %v15547_v31 = vld [vmem:[#allocation97_spill] sm:$0xff] }
 0xc92   :  { %v15542_v14 = vpack.c.bf16 %v15540_v22, %v15541_v62  ;;  %v15561_v4 = vld [vmem:[#allocation44_spill] sm:$0xff]  ;;  %v15562_v30 = vld [vmem:[#allocation115_spill] sm:$0xff]  ;;  %v15565_v12 = vld [vmem:[#allocation53_spill] sm:$0xff] }
 0xc93   :  { %9755 = vmatpush1.bf16.msra.mxu0 %v15508_v43  ;;  %v15522_v43 = vld [vmem:[#allocation56_spill] sm:$0xff]  ;;  %v15563_v40 = vld [vmem:[#allocation119_spill] sm:$0xff] }
 0xc94   :  { %9757 = vmatprep.subr.bf16.mxu0 %v15511_v53  ;;  %5478 = vmatmul.mubr.f32.gmra.mrb[58].mxu0 %v15512_v16  ;;  %v15523_v61 = vpack.c.bf16 %v15521_v56, %v15522_v43  ;;  %v15525_v53 = vld [vmem:[#allocation60_spill] sm:$0xff]  ;;  %v15560_v16 = vld [vmem:[#allocation10_spill] sm:$0xff]  ;;  %v15566_v49 = vld [vmem:[#allocation31_spill] sm:$0xff] }
 0xc95   :  { %5484 = vmatprep.mubr.f32.mxu0 %v15513_v28  ;;  %v15527_v51 = vpack.c.bf16 %v15525_v53, %v15526_v35  ;;  %v15559_v28 = vld [vmem:[#allocation29_spill] sm:$0xff]  ;;  %v15564_v24 = vld [vmem:[#allocation52_spill] sm:$0xff] }
 0xc97   :  { %9759 = vmatpush1.bf16.msra.mxu0 %v15516_v9  ;;  %v15531_v9 = vld [vmem:[#allocation65_spill] sm:$0xff] }
 0xc98   :  { %9761 = vmatprep.subr.bf16.mxu0 %v15519_v27  ;;  %5486 = vmatmul.mubr.f32.gmra.mrb[60].mxu0 %v15520_v46  ;;  %v15533_v13 = vpack.c.bf16 %v15531_v9, %v15532_v6  ;;  %v15534_v27 = vld [vmem:[#allocation88_spill] sm:$0xff]  ;;  %v15558_v46 = vld [vmem:[#allocation109_spill] sm:$0xff] }
 0xc99   :  { %5642 = vmatprep.mubr.f32.mxu0 %v15524_v15  ;;  %v15536_v17 = vpack.c.bf16 %v15534_v27, %v15535_v58 }
 0xc9b   :  { %9763 = vmatpush1.bf16.msra.mxu0 %v15523_v61  ;;  %v15538_v61 = vld [vmem:[#allocation89_spill] sm:$0xff] }
 0xc9c   :  { %9765 = vmatprep.subr.bf16.mxu0 %v15527_v51  ;;  %v15539_v63 = vpack.c.bf16 %v15537_v38, %v15538_v61  ;;  %v15543_v51 = vld [vmem:[#allocation96_spill] sm:$0xff] }
 0xc9d   :  { %v15545_v41 = vpack.c.bf16 %v15543_v51, %v15544_v10 }
 0xc9f   :  { %9767 = vmatpush1.bf16.msra.mxu0 %v15530_v50  ;;  %v15546_v50 = vld [vmem:[#allocation98_spill] sm:$0xff] }
 0xca0   :  { %9769 = vmatprep.subr.bf16.mxu0 %v15533_v13  ;;  %v15548_v36 = vpack.c.bf16 %v15546_v50, %v15547_v31  ;;  %v15550_v13 = vld [vmem:[#allocation13_spill] sm:$0xff] }
 0xca3   :  { %9771 = vmatpush1.bf16.msra.mxu0 %v15536_v17  ;;  %v15549_v17 = vld [vmem:[#allocation11_spill] sm:$0xff] }
 0xca4   :  { %9773 = vmatprep.subr.bf16.mxu0 %v15539_v63  ;;  %v15551_v63 = vld [vmem:[#allocation102_spill] sm:$0xff] }
 0xca7   :  { %9775 = vmatpush1.bf16.msra.mxu0 %v15542_v14  ;;  %v15553_v14 = vld [vmem:[#allocation18_spill] sm:$0xff] }
 0xca8   :  { %9777 = vmatprep.subr.bf16.mxu0 %v15545_v41  ;;  %v15555_v41 = vld [vmem:[#allocation23_spill] sm:$0xff] }
 0xcab   :  { %9779 = vmatpush1.bf16.msra.mxu0 %v15548_v36  ;;  %v15557_v36 = vld [vmem:[#allocation39_spill] sm:$0xff] }
 0xcac   :  { %5614 = vmatprep.subr.mxu0 %v13423_v2 }
 0xcaf   :  { %5617 = vmatpush1.msra.mxu0 %v13463_v37  ;;  %v15580_v37 = vld [vmem:[#allocation16_spill] sm:$0xff] }
 0xcb0   :  { %5645 = vmatmul.mubr.f32.vlgmr.msra.gmra.mrb[50].mxu0 %v15549_v17  ;;  %9781 = vmatprep.subr.bf16.mxu0 %v15550_v13  ;;  %v15576_v13 = vld [vmem:[#allocation86_spill] sm:$0xff] }
 0xcb1   :  { %5652 = vmatprep.mubr.f32.mxu0 %v15551_v63  ;;  %9783 = vmatpush1.bf16.msra.mxu0 %v15552_v57  ;;  %v15570_v57 = vld [vmem:[#allocation128_spill] sm:$0xff] }
 0xcb2   :  { %9785 = vmatprep.subr.bf16.mxu0 %v15553_v14  ;;  %v15569_v14 = vld [vmem:[#allocation63_spill] sm:$0xff] }
 0xcb4   :  { %5655 = vmatmul.mubr.f32.gmra.mrb[52].mxu0 %v15554_v8 }
 0xcb5   :  { %5662 = vmatprep.mubr.f32.mxu0 %v15555_v41  ;;  %9787 = vmatpush1.bf16.msra.mxu0 %v15556_v60  ;;  %v15567_v60 = vld [vmem:[#allocation127_spill] sm:$0xff] }
 0xcb6   :  { %9789 = vmatprep.subr.bf16.mxu0 %v15557_v36  ;;  %v15568_v36 = vld [vmem:[#allocation59_spill] sm:$0xff] }
 0xcb8   :  { %5665 = vmatmul.mubr.f32.gmra.mrb[54].mxu0 %v15558_v46 }
 0xcb9   :  { %5672 = vmatprep.mubr.f32.mxu0 %v15559_v28  ;;  %9791 = vmatpush1.bf16.msra.mxu0 %v15560_v16  ;;  %v15571_v16 = vld [vmem:[#allocation66_spill] sm:$0xff] }
 0xcba   :  { %9793 = vmatprep.subr.bf16.mxu0 %v15561_v4  ;;  %v15572_v4 = vand.u32 4294901760, %v15524_v15  ;;  %v15582_v15 = vand.u32 4294901760, %v12489_v23  ;;  %v15590_v23 = vand.u32 4294901760, %v15551_v63 }
 0xcbc   :  { %5675 = vmatmul.mubr.f32.gmra.mrb[56].mxu0 %v15562_v30 }
 0xcbd   :  { %5682 = vmatprep.mubr.f32.mxu0 %v15563_v40  ;;  %9795 = vmatpush1.bf16.msra.mxu0 %v15564_v24  ;;  %v15574_v24 = vld [vmem:[#allocation68_spill] sm:$0xff] }
 0xcbe   :  { %9797 = vmatprep.subr.bf16.mxu0 %v15565_v12  ;;  %v15575_v12 = vld [vmem:[#allocation69_spill] sm:$0xff] }
 0xcc0   :  { %5685 = vmatmul.mubr.f32.gmra.mrb[58].mxu0 %v15566_v49 }
 0xcc1   :  { %5692 = vmatprep.mubr.f32.mxu0 %v15567_v60  ;;  %9799 = vmatpush1.bf16.msra.mxu0 %v15568_v36  ;;  %v15578_v36 = vld [vmem:[#allocation91_spill] sm:$0xff] }
 0xcc2   :  { %9801 = vmatprep.subr.bf16.mxu0 %v15569_v14  ;;  %v15579_v14 = vld [vmem:[#allocation95_spill] sm:$0xff] }
 0xcc4   :  { %5695 = vmatmul.mubr.f32.gmra.mrb[60].mxu0 %v15570_v57 }
 0xcc5   :  { %9803 = vmatpush1.bf16.msra.mxu0 %v15571_v16  ;;  %5810 = vmatprep.mubr.f32.mxu0 %v15572_v4  ;;  %v15581_v16 = vld [vmem:[#allocation17_spill] sm:$0xff]  ;;  %v15583_v4 = vand.u32 4294901760, %v12491_v5  ;;  %v15591_v5 = vand.u32 4294901760, %v15489_v34  ;;  %v15598_v34 = vand.u32 4294901760, %v15498_v1  ;;  %v15605_v1 = vand.u32 4294901760, %v15510_v19 }
 0xcc6   :  { %9805 = vmatprep.subr.bf16.mxu0 %v15573_v11  ;;  %v15612_v19 = vand.u32 4294901760, %v15517_v0  ;;  %v15619_v0 = vand.u32 4294901760, %v15570_v57  ;;  %v15625_v57 = vand.u32 4294901760, %v15534_v27  ;;  %v15632_v27 = vand.u32 4294901760, %v15547_v31  ;;  %v15642_v31 = vld [vmem:[#allocation18_spill] sm:$0xff] }
 0xcc7   :  { %v9820_v11 = vpack.c.bf16 %v15583_v4, %v15582_v15 }
 0xcc9   :  { %9807 = vmatpush1.bf16.msra.mxu0 %v15574_v24  ;;  %v15584_v24 = vand.u32 4294901760, %v12493_v3  ;;  %v15592_v3 = vand.u32 4294901760, %v15488_v32  ;;  %v15600_v32 = vand.u32 4294901760, %v15501_v21  ;;  %v15607_v21 = vand.u32 4294901760, %v15562_v30 }
 0xcca   :  { %9809 = vmatprep.subr.bf16.mxu0 %v15575_v12  ;;  %v15585_v12 = vand.u32 4294901760, %v12506_v18  ;;  %v15614_v30 = vand.u32 4294901760, %v15567_v60  ;;  %v15620_v60 = vand.u32 4294901760, %v15529_v25  ;;  %v15627_v25 = vand.u32 4294901760, %v15537_v38  ;;  %v15634_v38 = vld [vmem:[#allocation99_spill] sm:$0xff] }
 0xccb   :  { %v9826_v18 = vpack.c.bf16 %v15592_v3, %v15591_v5  ;;  %v15626_v3 = vand.u32 4294901760, %v15538_v61  ;;  %v15633_v61 = vand.u32 4294901760, %v15546_v50  ;;  %v15643_v50 = vld [vmem:[#allocation82_spill] sm:$0xff] }
 0xccd   :  { %9811 = vmatpush1.bf16.msra.mxu0 %v15576_v13  ;;  %v9822_v13 = vpack.c.bf16 %v15585_v12, %v15584_v24  ;;  %v15595_v12 = vand.u32 4294901760, %v15554_v8  ;;  %v15602_v8 = vand.u32 4294901760, %v15559_v28  ;;  %v15609_v28 = vand.u32 4294901760, %v15515_v59 }
 0xcce   :  { %9813 = vmatprep.subr.bf16.mxu0 %v15577_v29  ;;  %v15586_v29 = vand.u32 4294901760, %v15465_v47  ;;  %v15593_v47 = vand.u32 4294901760, %v15494_v20  ;;  %v15616_v59 = vand.u32 4294901760, %v15521_v56  ;;  %v15622_v56 = vand.u32 4294901760, %v15532_v6 }
 0xccf   :  { %v15629_v6 = vand.u32 4294901760, %v15540_v22 }
 0xcd1   :  { %9815 = vmatpush1.bf16.msra.mxu0 %v15578_v36  ;;  %v15587_v36 = vand.u32 4294901760, %v15464_v48 }
 0xcd2   :  { %9817 = vmatprep.subr.bf16.mxu0 %v15579_v14  ;;  %v15588_v14 = vld [vmem:[#allocation15_spill] sm:$0xff] }
 0xcd3   :  { %v9824_v2 = vpack.c.bf16 %v15587_v36, %v15586_v29  ;;  %v15594_v29 = vand.u32 4294901760, %v15493_v33  ;;  %v15601_v33 = vand.u32 4294901760, %v15558_v46  ;;  %v15608_v46 = vand.u32 4294901760, %v15563_v40 }
 0xcd4   :  { %v15615_v40 = vand.u32 4294901760, %v15522_v43 }
 0xcd5   :  { %9819 = vmatpush1.bf16.msra.mxu0 %v15580_v37  ;;  %v15589_v37 = vand.u32 4294901760, %v15549_v17  ;;  %v9828_v48 = vpack.c.bf16 %v15594_v29, %v15593_v47  ;;  %v15603_v17 = vand.u32 4294901760, %v15507_v26  ;;  %v15610_v26 = vand.u32 4294901760, %v15514_v52 }
 0xcd6   :  { %5782 = vmatprep.subr.mxu0 %v15581_v16  ;;  %v9842_v15 = vpack.c.bf16 %v15616_v59, %v15615_v40  ;;  %v15617_v52 = vand.u32 4294901760, %v15526_v35  ;;  %v15667_v40 = vld [vmem:[#allocation95_spill] sm:$0xff]  ;;  %v15668_v59 = vld [vmem:[#allocation16_spill] sm:$0xff] }
 0xcd9   :  { %5784 = vmatpush1.msra.mxu0 %v15588_v14 }
 0xcda   :  { %5814 = vmatmul.mubr.f32.vlgmr.msra.gmra.mrb[50].mxu0 %v15589_v37  ;;  %9821 = vmatprep.subr.bf16.mxu0 %v9820_v11  ;;  %v15596_v37 = vand.u32 4294901760, %v15555_v41  ;;  %v15597_v11 = vand.u32 4294901760, %v15499_v54  ;;  %v15604_v54 = vand.u32 4294901760, %v15506_v39  ;;  %v9838_v41 = vpack.c.bf16 %v15610_v26, %v15609_v28  ;;  %v15659_v28 = vld [vmem:[#allocation123_spill] sm:$0xff]  ;;  %v15660_v26 = vld [vmem:[#allocation66_spill] sm:$0xff] }
 0xcdb   :  { %5822 = vmatprep.mubr.f32.mxu0 %v15590_v23  ;;  %9823 = vmatpush1.bf16.msra.mxu0 %v9822_v13  ;;  %v15611_v39 = vand.u32 4294901760, %v15518_v44  ;;  %v15618_v44 = vand.u32 4294901760, %v15525_v53  ;;  %v15623_v23 = vand.u32 4294901760, %v15531_v9  ;;  %v15624_v53 = vand.u32 4294901760, %v15535_v58 }
 0xcdc   :  { %9825 = vmatprep.subr.bf16.mxu0 %v9824_v2  ;;  %v9830_v24 = vpack.c.bf16 %v15598_v34, %v15597_v11  ;;  %v15599_v2 = vand.u32 4294901760, %v15502_v55  ;;  %v9834_v13 = vpack.c.bf16 %v15604_v54, %v15603_v17  ;;  %v15606_v55 = vand.u32 4294901760, %v15509_v45  ;;  %v15641_v11 = vld [vmem:[#allocation12_spill] sm:$0xff]  ;;  %v15644_v34 = vld [vmem:[#allocation19_spill] sm:$0xff]  ;;  %v15651_v17 = vld [vmem:[#allocation114_spill] sm:$0xff] }
 0xcdd   :  { %v9840_v36 = vpack.c.bf16 %v15612_v19, %v15611_v39  ;;  %v15613_v45 = vand.u32 4294901760, %v15566_v49  ;;  %v9844_v4 = vpack.c.bf16 %v15618_v44, %v15617_v52  ;;  %v15621_v49 = vand.u32 4294901760, %v15528_v7  ;;  %v15652_v54 = vld [vmem:[#allocation32_spill] sm:$0xff]  ;;  %v15663_v19 = vld [vmem:[#allocation69_spill] sm:$0xff]  ;;  %v15674_v44 = vld [vmem:[#allocation139_spill] sm:$0xff] }
 0xcde   :  { %5826 = vmatmul.mubr.f32.gmra.mrb[52].mxu0 %v15595_v12  ;;  %v9832_v20 = vpack.c.bf16 %v15600_v32, %v15599_v2  ;;  %v9836_v63 = vpack.c.bf16 %v15606_v55, %v15605_v1  ;;  %v9848_v35 = vpack.c.bf16 %v15623_v23, %v15622_v56  ;;  %v9850_v5 = vpack.c.bf16 %v15625_v57, %v15624_v53  ;;  %v15646_v2 = vld [vmem:[#allocation39_spill] sm:$0xff]  ;;  %v15647_v32 = vld [vmem:[#allocation104_spill] sm:$0xff]  ;;  %v15654_v1 = vld [vmem:[#allocation53_spill] sm:$0xff] }
 0xcdf   :  { %5834 = vmatprep.mubr.f32.mxu0 %v15596_v37  ;;  %9827 = vmatpush1.bf16.msra.mxu0 %v9826_v18  ;;  %v9846_v43 = vpack.c.bf16 %v15621_v49, %v15620_v60  ;;  %v9852_v18 = vpack.c.bf16 %v15627_v25, %v15626_v3  ;;  %v15628_v7 = vand.u32 4294901760, %v15541_v62  ;;  %v15630_v9 = vand.u32 4294901760, %v15544_v10  ;;  %v15636_v62 = vld [vmem:[#allocation100_spill] sm:$0xff]  ;;  %v15639_v10 = vld [vmem:[#allocation13_spill] sm:$0xff]  ;;  %v15655_v55 = vld [vmem:[#allocation118_spill] sm:$0xff] }
 0xce0   :  { %9829 = vmatprep.subr.bf16.mxu0 %v9828_v48  ;;  %v15631_v58 = vand.u32 4294901760, %v15543_v51  ;;  %v9858_v48 = vpack.c.bf16 %v15633_v61, %v15632_v27  ;;  %v15635_v12 = vand.u32 4294901760, %v15634_v38  ;;  %v15637_v22 = vand.u32 4294901760, %v15636_v62  ;;  %v15638_v37 = vld [vmem:[#allocation40_spill] sm:$0xff]  ;;  %v15640_v51 = vld [vmem:[#allocation73_spill] sm:$0xff] }
 0xce1   :  { %v9854_v47 = vpack.c.bf16 %v15629_v6, %v15628_v7  ;;  %v15662_v39 = vld [vmem:[#allocation68_spill] sm:$0xff]  ;;  %v15677_v60 = vld [vmem:[#allocation21_spill] sm:$0xff]  ;;  %v15682_v53 = vmov 0.0  }
 0xce2   :  { %5838 = vmatmul.mubr.f32.gmra.mrb[54].mxu0 %v15601_v33  ;;  %v9856_v29 = vpack.c.bf16 %v15631_v58, %v15630_v9  ;;  %v15649_v33 = vld [vmem:[#allocation10_spill] sm:$0xff]  ;;  %v15671_v52 = vld [vmem:[#allocation136_spill] sm:$0xff]  ;;  %v15678_v49 = vld [vmem:[#allocation141_spill] sm:$0xff] }
 0xce3   :  { %5846 = vmatprep.mubr.f32.mxu0 %v15602_v8  ;;  %9831 = vmatpush1.bf16.msra.mxu0 %v9830_v24  ;;  %v15645_v24 = vld [vmem:[#allocation27_spill] sm:$0xff]  ;;  %v15650_v8 = vld [vmem:[#allocation44_spill] sm:$0xff]  ;;  %v15680_v56 = vld [vmem:[#allocation133_spill] sm:$0xff] }
 0xce4   :  { %9833 = vmatprep.subr.bf16.mxu0 %v9832_v20  ;;  %v15648_v20 = vld [vmem:[#allocation113_spill] sm:$0xff] }
 0xce6   :  { %5850 = vmatmul.mubr.f32.gmra.mrb[56].mxu0 %v15607_v21  ;;  %v15657_v21 = vld [vmem:[#allocation59_spill] sm:$0xff] }
 0xce7   :  { %5858 = vmatprep.mubr.f32.mxu0 %v15608_v46  ;;  %9835 = vmatpush1.bf16.msra.mxu0 %v9834_v13  ;;  %v15653_v13 = vld [vmem:[#allocation52_spill] sm:$0xff]  ;;  %v15658_v46 = vld [vmem:[#allocation63_spill] sm:$0xff] }
 0xce8   :  { %9837 = vmatprep.subr.bf16.mxu0 %v9836_v63  ;;  %v15656_v63 = vld [vmem:[#allocation34_spill] sm:$0xff] }
 0xcea   :  { %5862 = vmatmul.mubr.f32.gmra.mrb[58].mxu0 %v15613_v45  ;;  %v15665_v45 = vld [vmem:[#allocation14_spill] sm:$0xff] }
 0xceb   :  { %5870 = vmatprep.mubr.f32.mxu0 %v15614_v30  ;;  %9839 = vmatpush1.bf16.msra.mxu0 %v9838_v41  ;;  %v15661_v41 = vld [vmem:[#allocation67_spill] sm:$0xff] }
 0xcec   :  { %9841 = vmatprep.subr.bf16.mxu0 %v9840_v36  ;;  %v15664_v36 = vld [vmem:[#allocation86_spill] sm:$0xff]  ;;  %v15666_v30 = vld [vmem:[#allocation91_spill] sm:$0xff] }
 0xcee   :  { %5874 = vmatmul.mubr.f32.gmra.mrb[60].mxu0 %v15619_v0  ;;  %v15676_v0 = vld [vmem:[#allocation24_spill] sm:$0xff] }
 0xcef   :  { %9843 = vmatpush1.bf16.msra.mxu0 %v9842_v15  ;;  %6071 = vmatprep.mubr.f32.mxu0 %v13163_v42  ;;  %v15670_v15 = vld [vmem:[#allocation135_spill] sm:$0xff] }
 0xcf0   :  { %9845 = vmatprep.subr.bf16.mxu0 %v9844_v4  ;;  %v15675_v4 = vld [vmem:[#allocation140_spill] sm:$0xff] }
 0xcf3   :  { %9847 = vmatpush1.bf16.msra.mxu0 %v9846_v43  ;;  %v15679_v43 = vld [vmem:[#allocation134_spill] sm:$0xff] }
 0xcf4   :  { %9849 = vmatprep.subr.bf16.mxu0 %v9848_v35  ;;  %v13973_v23 = vsub.f32 %v15680_v56, %v15679_v43  ;;  %v15681_v35 = vld [vmem:[#allocation142_spill] sm:$0xff] }
 0xcf6   :  { %v6734_v57 = vand.u32 4294901760, %v13973_v23 }
 0xcf7   :  { %9851 = vmatpush1.bf16.msra.mxu0 %v9850_v5 }
 0xcf8   :  { %9853 = vmatprep.subr.bf16.mxu0 %v9852_v18 }
 0xcfb   :  { %9855 = vmatpush1.bf16.msra.mxu0 %v9854_v47 }
 0xcfc   :  { %9857 = vmatprep.subr.bf16.mxu0 %v9856_v29 }
 0xcff   :  { %9859 = vmatpush1.bf16.msra.mxu0 %v9858_v48 }
 0xd00   :  { %6043 = vmatprep.subr.mxu0 %v15635_v12 }
 0xd03   :  { %6047 = vmatpush1.msra.mxu0 %v15637_v22 }
 0xd04   :  { %6073 = vmatmul.mubr.f32.vlgmr.msra.gmra.mrb[50].mxu0 %v15638_v37  ;;  %9861 = vmatprep.subr.bf16.mxu0 %v15639_v10 }
 0xd05   :  { %6079 = vmatprep.mubr.f32.mxu0 %v15640_v51  ;;  %9863 = vmatpush1.bf16.msra.mxu0 %v15641_v11 }
 0xd06   :  { %9865 = vmatprep.subr.bf16.mxu0 %v15642_v31 }
 0xd08   :  { %6081 = vmatmul.mubr.f32.gmra.mrb[52].mxu0 %v15643_v50 }
 0xd09   :  { %6087 = vmatprep.mubr.f32.mxu0 %v15644_v34  ;;  %9867 = vmatpush1.bf16.msra.mxu0 %v15645_v24 }
 0xd0a   :  { %9869 = vmatprep.subr.bf16.mxu0 %v15646_v2 }
 0xd0c   :  { %6089 = vmatmul.mubr.f32.gmra.mrb[54].mxu0 %v15647_v32 }
 0xd0d   :  { %6095 = vmatprep.mubr.f32.mxu0 %v15648_v20  ;;  %9871 = vmatpush1.bf16.msra.mxu0 %v15649_v33 }
 0xd0e   :  { %9873 = vmatprep.subr.bf16.mxu0 %v15650_v8 }
 0xd10   :  { %6097 = vmatmul.mubr.f32.gmra.mrb[56].mxu0 %v15651_v17 }
 0xd11   :  { %6103 = vmatprep.mubr.f32.mxu0 %v15652_v54  ;;  %9875 = vmatpush1.bf16.msra.mxu0 %v15653_v13 }
 0xd12   :  { %9877 = vmatprep.subr.bf16.mxu0 %v15654_v1 }
 0xd14   :  { %6105 = vmatmul.mubr.f32.gmra.mrb[58].mxu0 %v15655_v55 }
 0xd15   :  { %6111 = vmatprep.mubr.f32.mxu0 %v15656_v63  ;;  %9879 = vmatpush1.bf16.msra.mxu0 %v15657_v21 }
 0xd16   :  { %9881 = vmatprep.subr.bf16.mxu0 %v15658_v46 }
 0xd18   :  { %6113 = vmatmul.mubr.f32.gmra.mrb[60].mxu0 %v15659_v28 }
 0xd19   :  { %9883 = vmatpush1.bf16.msra.mxu0 %v15660_v26  ;;  %6226 = vmatprep.mubr.f32.mxu0 %v13163_v42  ;;  %v15669_v42 = vmov 0.0|0.0   ;;  %v15685_v26 = vld [vmem:[#allocation81_spill] sm:$0xff] }
 0xd1a   :  { %9885 = vmatprep.subr.bf16.mxu0 %v15661_v41 }
 0xd1d   :  { %9887 = vmatpush1.bf16.msra.mxu0 %v15662_v39 }
 0xd1e   :  { %9889 = vmatprep.subr.bf16.mxu0 %v15663_v19 }
 0xd21   :  { %9891 = vmatpush1.bf16.msra.mxu0 %v15664_v36  ;;  %v15686_v36 = vld [vmem:[#allocation83_spill] sm:$0xff] }
 0xd22   :  { %9893 = vmatprep.subr.bf16.mxu0 %v15665_v45 }
 0xd25   :  { %9895 = vmatpush1.bf16.msra.mxu0 %v15666_v30 }
 0xd26   :  { %9897 = vmatprep.subr.bf16.mxu0 %v15667_v40 }
 0xd29   :  { %9899 = vmatpush1.bf16.msra.mxu0 %v15668_v59 }
 0xd2a   :  { %6200 = vmatprep.subr.mxu0 %v15581_v16  ;;  %v15672_v16 = vld [vmem:[#allocation137_spill] sm:$0xff] }
 0xd2d   :  { %6202 = vmatpush1.msra.mxu0 %v15588_v14  ;;  %v15673_v14 = vld [vmem:[#allocation138_spill] sm:$0xff] }
 0xd2e   :  { %6228 = vmatmul.mubr.f32.vlgmr.msra.gmra.mrb[50].mxu0 %v15638_v37  ;;  %10020 = vmatprep.subr.bf16.mxu0 %v15669_v42 }
 0xd2f   :  { %6234 = vmatprep.mubr.f32.mxu0 %v15640_v51  ;;  %10022 = vmatpush1.bf16.msra.mxu0 %v15670_v15 }
 0xd30   :  { %10023 = vmatprep.subr.bf16.mxu0 %v15669_v42 }
 0xd32   :  { %6236 = vmatmul.mubr.f32.gmra.mrb[52].mxu0 %v15643_v50  ;;  %v15683_v50 = vld [vmem:[#allocation37_spill] sm:$0xff] }
 0xd33   :  { %6242 = vmatprep.mubr.f32.mxu0 %v15644_v34  ;;  %10025 = vmatpush1.bf16.msra.mxu0 %v15671_v52 }
 0xd34   :  { %10026 = vmatprep.subr.bf16.mxu0 %v15669_v42 }
 0xd36   :  { %6244 = vmatmul.mubr.f32.gmra.mrb[54].mxu0 %v15647_v32  ;;  %v15684_v32 = vld [vmem:[#allocation9_spill] sm:$0xff] }
 0xd37   :  { %6250 = vmatprep.mubr.f32.mxu0 %v15648_v20  ;;  %10028 = vmatpush1.bf16.msra.mxu0 %v15672_v16 }
 0xd38   :  { %10029 = vmatprep.subr.bf16.mxu0 %v15669_v42 }
 0xd3a   :  { %6252 = vmatmul.mubr.f32.gmra.mrb[56].mxu0 %v15651_v17 }
 0xd3b   :  { %6258 = vmatprep.mubr.f32.mxu0 %v15652_v54  ;;  %10031 = vmatpush1.bf16.msra.mxu0 %v15673_v14 }
 0xd3c   :  { %10032 = vmatprep.subr.bf16.mxu0 %v15669_v42 }
 0xd3e   :  { %6260 = vmatmul.mubr.f32.gmra.mrb[58].mxu0 %v15655_v55 }
 0xd3f   :  { %6266 = vmatprep.mubr.f32.mxu0 %v15656_v63  ;;  %10034 = vmatpush1.bf16.msra.mxu0 %v15674_v44 }
 0xd40   :  { %10035 = vmatprep.subr.bf16.mxu0 %v15669_v42 }
 0xd42   :  { %6268 = vmatmul.mubr.f32.gmra.mrb[60].mxu0 %v15659_v28 }
 0xd43   :  { %10037 = vmatpush1.bf16.msra.mxu0 %v15675_v4 }
 0xd44   :  { %10038 = vmatprep.subr.bf16.mxu0 %v15669_v42 }
 0xd47   :  { %10040 = vmatpush1.bf16.msra.mxu0 %v15676_v0 }
 0xd48   :  { %10041 = vmatprep.subr.bf16.mxu0 %v15669_v42 }
 0xd4b   :  { %10043 = vmatpush1.bf16.msra.mxu0 %v15677_v60 }
 0xd4c   :  { %10044 = vmatprep.subr.bf16.mxu0 %v15669_v42 }
 0xd4f   :  { %10046 = vmatpush1.bf16.msra.mxu0 %v15678_v49  ;;  %v15687_v49 = vld [vmem:[#allocation72_spill] sm:$0xff] }
 0xd50   :  { %10047 = vmatprep.subr.bf16.mxu0 %v15669_v42 }
 0xd53   :  { %10049 = vmatpush1.bf16.msra.mxu0 %v15681_v35 }
 0xd54   :  { %7216 = vmatprep.subr.mxu0 %v15682_v53 }
 0xd57   :  { %7220 = vmatpush1.msra.mxu0 %v6734_v57 }
 0xe01   :  { %v6229_v5 = vpop.f32.mrb[50].mxu0 }
 0xe02   :  { %10566 = vrcp.f32 %v6229_v5  ;;  %v6231_v3 = vpop.f32.mrb[51].mxu0 }
 0xe03   :  { %10568 = vrcp.f32 %v6231_v3 }
 0xe05   :  { %v6237_v25 = vpop.f32.mrb[52].mxu0 }
 0xe06   :  { %10570 = vrcp.f32 %v6237_v25  ;;  %v6239_v18 = vpop.f32.mrb[53].mxu0 }
 0xe07   :  { %10572 = vrcp.f32 %v6239_v18 }
 0xe09   :  { %v6245_v7 = vpop.f32.mrb[54].mxu0 }
 0xe0a   :  { %10574 = vrcp.f32 %v6245_v7  ;;  %v6247_v6 = vpop.f32.mrb[55].mxu0 }
 0xe0b   :  { %10576 = vrcp.f32 %v6247_v6 }
 0xe0c   :  { %v10567_v47 = vpop.eup %10566 }
 0xe0d   :  { %v10569_v9 = vpop.eup %10568  ;;  %v6286_v58 = vmul.f32 %v10567_v47, %v6229_v5  ;;  %v6253_v29 = vpop.f32.mrb[56].mxu0 }
 0xe0e   :  { %v6287_v27 = vmul.f32 %v10569_v9, %v6231_v3  ;;  %10578 = vrcp.f32 %v6253_v29  ;;  %v6255_v61 = vpop.f32.mrb[57].mxu0 }
 0xe0f   :  { %v6298_v48 = vsub.f32 2.0, %v6286_v58  ;;  %10580 = vrcp.f32 %v6255_v61 }
 0xe10   :  { %v10571_v38 = vpop.eup %10570  ;;  %v6299_v12 = vsub.f32 2.0, %v6287_v27 }
 0xe11   :  { %v10573_v62 = vpop.eup %10572  ;;  %v6310_v22 = vmul.f32 %v10567_v47, %v6298_v48  ;;  %v6288_v37 = vmul.f32 %v10571_v38, %v6237_v25  ;;  %v6261_v10 = vpop.f32.mrb[58].mxu0 }
 0xe12   :  { %v6311_v51 = vmul.f32 %v10569_v9, %v6299_v12  ;;  %v6289_v11 = vmul.f32 %v10573_v62, %v6239_v18  ;;  %10582 = vrcp.f32 %v6261_v10  ;;  %v6263_v31 = vpop.f32.mrb[59].mxu0  ;;  %v15688_v18 = vld [vmem:[#allocation74_spill] sm:$0xff] }
 0xe13   :  { %v6322_v34 = vmul.f32 %v6310_v22, %v15683_v50  ;;  %v6300_v24 = vsub.f32 2.0, %v6288_v37  ;;  %10584 = vrcp.f32 %v6263_v31  ;;  %v15689_v37 = vld [vmem:[#allocation77_spill] sm:$0xff] }
 0xe14   :  { %v10575_v2 = vpop.eup %10574  ;;  %v6323_v20 = vmul.f32 %v6311_v51, %v15684_v32  ;;  %v6301_v33 = vsub.f32 2.0, %v6289_v11 }
 0xe15   :  { %v10577_v8 = vpop.eup %10576  ;;  %v13982_v17 = vand.u32 4294901760, %v6322_v34  ;;  %v6312_v54 = vmul.f32 %v10571_v38, %v6300_v24  ;;  %v6290_v13 = vmul.f32 %v10575_v2, %v6245_v7  ;;  %v6269_v1 = vpop.f32.mrb[60].mxu0  ;;  %v15690_v24 = vld [vmem:[#allocation22_spill] sm:$0xff] }
 0xe16   :  { %v6398_v55 = vsel %vm4873_vm6, %v6323_v20, 0  ;;  %v6313_v63 = vmul.f32 %v10573_v62, %v6301_v33  ;;  %v6291_v21 = vmul.f32 %v10577_v8, %v6247_v6  ;;  %10586 = vrcp.f32 %v6269_v1  ;;  %v6271_v46 = vpop.f32.mrb[61].mxu0 }
 0xe17   :  { %v13986_v28 = vsub.f32 %v6322_v34, %v13982_v17  ;;  %v6324_v41 = vmul.f32 %v6312_v54, %v15685_v26  ;;  %v6302_v39 = vsub.f32 2.0, %v6290_v13  ;;  %10588 = vrcp.f32 %v6271_v46 }
 0xe18   :  { %v10579_v19 = vpop.eup %10578  ;;  %v6325_v45 = vmul.f32 %v6313_v63, %v15686_v36  ;;  %v6303_v30 = vsub.f32 2.0, %v6291_v21  ;;  %v13990_v40 = vand.u32 4294901760, %v6398_v55 }
 0xe19   :  { %v10581_v59 = vpop.eup %10580  ;;  %v6508_v15 = vand.u32 4294901760, %v13986_v28  ;;  %v6314_v52 = vmul.f32 %v10575_v2, %v6302_v39  ;;  %v6292_v16 = vmul.f32 %v10579_v19, %v6253_v29  ;;  %v13993_v14 = vand.u32 4294901760, %v6324_v41  ;;  %v15691_v39 = vld [vmem:[#allocation79_spill] sm:$0xff] }
 0xe1a   :  { %v6401_v44 = vsel %vm4873_vm6, %v6325_v45, 0  ;;  %v6315_v4 = vmul.f32 %v10577_v8, %v6303_v30  ;;  %v6293_v0 = vmul.f32 %v10581_v59, %v6255_v61  ;;  %7244 = vmatprep.mubr.f32.mxu0 %v13990_v40  ;;  %v13998_v60 = vsub.f32 %v6398_v55, %v13990_v40  ;;  %v15692_v30 = vld [vmem:[#allocation78_spill] sm:$0xff] }
 0xe1b   :  { %v6326_v56 = vmul.f32 %v6314_v52, %v15687_v49  ;;  %v6304_v35 = vsub.f32 2.0, %v6292_v16  ;;  %7246 = vmatmul.mubr.f32.vlgmr.msra.gmra.mrb[62].mxu0 %v13982_v17  ;;  %v14002_v5 = vand.u32 4294901760, %v6401_v44  ;;  %v6509_v3 = vsub.f32 %v13986_v28, %v6508_v15  ;;  %v15693_v52 = vld [vmem:[#allocation143_spill] sm:$0xff] }
 0xe1c   :  { %v10583_v25 = vpop.eup %10582  ;;  %v6327_v7 = vmul.f32 %v6315_v4, %v15688_v18  ;;  %v6305_v6 = vsub.f32 2.0, %v6293_v0  ;;  %v6502_v47 = vand.u32 4294901760, %v13998_v60  ;;  %v14010_v9 = vsub.f32 %v6324_v41, %v13993_v14 }
 0xe1d   :  { %v10585_v58 = vpop.eup %10584  ;;  %v6316_v29 = vmul.f32 %v10579_v19, %v6304_v35  ;;  %v6294_v27 = vmul.f32 %v10583_v25, %v6261_v10  ;;  %7251 = vmatprep.mubr.f32.mxu0 %v14002_v5  ;;  %v6510_v61 = vand.u32 4294901760, %v6509_v3  ;;  %v14013_v48 = vand.u32 4294901760, %v6326_v56 }
 0xe1e   :  { %v6404_v38 = vsel %vm4873_vm6, %v6327_v7, 0  ;;  %v6317_v12 = vmul.f32 %v10581_v59, %v6305_v6  ;;  %v6295_v62 = vmul.f32 %v10585_v58, %v6263_v31  ;;  %v6503_v22 = vsub.f32 %v13998_v60, %v6502_v47  ;;  %v15694_v6 = vld [vmem:[#allocation122_spill] sm:$0xff] }
 0xe1f   :  { %v6328_v51 = vmul.f32 %v6316_v29, %v15689_v37  ;;  %v6306_v11 = vsub.f32 2.0, %v6294_v27  ;;  %7253 = vmatmul.mubr.f32.gmra.mrb[64].mxu0 %v13993_v14  ;;  %v14021_v50 = vand.u32 4294901760, %v6404_v38  ;;  %v14024_v10 = vsub.f32 %v6401_v44, %v14002_v5  ;;  %v15696_v37 = vld [vmem:[#allocation144_spill] sm:$0xff] }
 0xe20   :  { %v10587_v34 = vpop.eup %10586  ;;  %v6329_v2 = vmul.f32 %v6317_v12, %v15690_v24  ;;  %v6307_v32 = vsub.f32 2.0, %v6295_v62  ;;  %v6504_v20 = vand.u32 4294901760, %v6503_v22  ;;  %v6523_v31 = vand.u32 4294901760, %v14010_v9 }
 0xe21   :  { %v10589_v33 = vpop.eup %10588  ;;  %v6318_v8 = vmul.f32 %v10583_v25, %v6306_v11  ;;  %v6296_v54 = vmul.f32 %v10587_v34, %v6269_v1  ;;  %7258 = vmatprep.mubr.f32.mxu0 %v14021_v50  ;;  %v6517_v13 = vand.u32 4294901760, %v14024_v10  ;;  %v14030_v55 = vand.u32 4294901760, %v6328_v51 }
 0xe22   :  { %v6407_v63 = vsel %vm4873_vm6, %v6329_v2, 0  ;;  %v6319_v21 = vmul.f32 %v10585_v58, %v6307_v32  ;;  %v6297_v26 = vmul.f32 %v10589_v33, %v6271_v46  ;;  %6505 = vmatprep.mubr.f32.mxu1 %v6504_v20  ;;  %v6524_v41 = vsub.f32 %v14010_v9, %v6523_v31 }
 0xe23   :  { %v6330_v19 = vmul.f32 %v6318_v8, %v15691_v39  ;;  %v6308_v36 = vsub.f32 2.0, %v6296_v54  ;;  %6511 = vmatmul.mubr.f32.vlgmr.msra.gmra.mrb[24].mxu1 %v6510_v61  ;;  %7260 = vmatmul.mubr.f32.gmra.mrb[66].mxu0 %v14013_v48  ;;  %v6518_v1 = vsub.f32 %v14024_v10, %v6517_v13  ;;  %v14041_v45 = vand.u32 4294901760, %v6407_v63  ;;  %v15695_v61 = vld [vmem:[#allocation80_spill] sm:$0xff] }
 0xe24   :  { %v6331_v59 = vmul.f32 %v6319_v21, %v15692_v30  ;;  %v6309_v46 = vsub.f32 2.0, %v6297_v26  ;;  %9932 = vmatpush1.bf16.msra.mxu1 %v15693_v52  ;;  %v6525_v16 = vand.u32 4294901760, %v6524_v41  ;;  %v14046_v44 = vsub.f32 %v6404_v38, %v14021_v50 }
 0xe25   :  { %v6320_v4 = vmul.f32 %v10587_v34, %v6308_v36  ;;  %v6519_v0 = vand.u32 4294901760, %v6518_v1  ;;  %9933 = vmatprep.subr.bf16.mxu1 %v15669_v42  ;;  %7265 = vmatprep.mubr.f32.mxu0 %v14041_v45  ;;  %v14051_v49 = vsub.f32 %v6326_v56, %v14013_v48  ;;  %v14053_v35 = vand.u32 4294901760, %v6330_v19  ;;  %v15697_v36 = vld [vmem:[#allocation145_spill] sm:$0xff] }
 0xe26   :  { %v6410_v3 = vsel %vm4873_vm6, %v6331_v59, 0  ;;  %v6321_v25 = vmul.f32 %v10589_v33, %v6309_v46  ;;  %v6532_v18 = vand.u32 4294901760, %v14046_v44  ;;  %v14058_v7 = vsub.f32 %v6407_v63, %v14041_v45 }
 0xe27   :  { %v6332_v58 = vmul.f32 %v6320_v4, %v15694_v6  ;;  %6520 = vmatprep.mubr.f32.mxu1 %v6519_v0  ;;  %7267 = vmatmul.mubr.f32.gmra.mrb[68].mxu0 %v14030_v55  ;;  %v14062_v29 = vand.u32 4294901760, %v6410_v3  ;;  %v6538_v56 = vand.u32 4294901760, %v14051_v49  ;;  %v14066_v27 = vsub.f32 %v6328_v51, %v14030_v55  ;;  %v15699_v0 = vld [vmem:[#allocation146_spill] sm:$0xff] }
 0xe28   :  { %v6333_v38 = vmul.f32 %v6321_v25, %v15695_v61  ;;  %6526 = vmatmul.mubr.f32.gmra.mrb[26].mxu1 %v6525_v16  ;;  %v6533_v12 = vsub.f32 %v14046_v44, %v6532_v18  ;;  %v6547_v62 = vand.u32 4294901760, %v14058_v7  ;;  %v14074_v22 = vsub.f32 %v6330_v19, %v14053_v35 }
 0xe29   :  { %9935 = vmatpush1.bf16.msra.mxu1 %v15696_v37  ;;  %7272 = vmatprep.mubr.f32.mxu0 %v14062_v29  ;;  %v6539_v51 = vsub.f32 %v14051_v49, %v6538_v56  ;;  %v6553_v11 = vand.u32 4294901760, %v14066_v27  ;;  %v14082_v34 = vand.u32 4294901760, %v6332_v58  ;;  %v14085_v24 = vsub.f32 %v6410_v3, %v14062_v29  ;;  %v15703_v37 = vld [vmem:[#allocation150_spill] sm:$0xff] }
 0xe2a   :  { %v6413_v2 = vsel %vm4873_vm6, %v6333_v38, 0  ;;  %v6534_v32 = vand.u32 4294901760, %v6533_v12  ;;  %9936 = vmatprep.subr.bf16.mxu1 %v15669_v42  ;;  %v6548_v20 = vsub.f32 %v14058_v7, %v6547_v62  ;;  %v6568_v33 = vand.u32 4294901760, %v14074_v22  ;;  %v15701_v38 = vld [vmem:[#allocation148_spill] sm:$0xff]  ;;  %v15702_v12 = vld [vmem:[#allocation149_spill] sm:$0xff] }
 0xe2b   :  { %v6540_v8 = vand.u32 4294901760, %v6539_v51  ;;  %7274 = vmatmul.mubr.f32.gmra.mrb[70].mxu0 %v14053_v35  ;;  %v14094_v54 = vand.u32 4294901760, %v6413_v2  ;;  %v6554_v63 = vsub.f32 %v14066_v27, %v6553_v11  ;;  %v6562_v21 = vand.u32 4294901760, %v14085_v24  ;;  %v15704_v51 = vld [vmem:[#allocation33_spill] sm:$0xff] }
 0xe2c   :  { %6535 = vmatprep.mubr.f32.mxu1 %v6534_v32  ;;  %v6549_v26 = vand.u32 4294901760, %v6548_v20  ;;  %v14101_v41 = vsub.f32 %v6332_v58, %v14082_v34  ;;  %v6569_v1 = vsub.f32 %v14074_v22, %v6568_v33  ;;  %v15698_v16 = vmov 0   ;;  %v15700_v58 = vld [vmem:[#allocation147_spill] sm:$0xff]  ;;  %v15705_v32 = vld [vmem:[#allocation30_spill] sm:$0xff] }
 0xe2d   :  { %6541 = vmatmul.mubr.f32.gmra.mrb[28].mxu1 %v6540_v8  ;;  %7279 = vmatprep.mubr.f32.mxu0 %v14094_v54  ;;  %v6563_v39 = vsub.f32 %v14085_v24, %v6562_v21  ;;  %v14108_v19 = vsub.f32 %v6413_v2, %v14094_v54  ;;  %v6555_v30 = vand.u32 4294901760, %v6554_v63  ;;  %v6735_v2 = vsub.f32 %v13973_v23, %v6734_v57  ;;  %v15706_v8 = vld [vmem:[#allocation75_spill] sm:$0xff]  ;;  %v15707_v63 = vld [vmem:[#allocation70_spill] sm:$0xff] }
 0xe2e   :  { %9938 = vmatpush1.bf16.msra.mxu1 %v15697_v36  ;;  %6550 = vmatprep.mubr.f32.mxu1 %v6549_v26  ;;  %v6583_v52 = vand.u32 4294901760, %v14101_v41  ;;  %v6570_v3 = vand.u32 4294901760, %v6569_v1  ;;  %v15708_v26 = vpack.c.bf16 %v15706_v8, %v15707_v63  ;;  %v15709_v57 = vld [vmem:[#allocation106_spill] sm:$0xff]  ;;  %v15712_v1 = vld [vmem:[#allocation20_spill] sm:$0xff]  ;;  %v15730_v63 = vld [vmem:[#allocation129_spill] sm:$0xff] }
 0xe2f   :  { %9939 = vmatprep.subr.bf16.mxu1 %v15669_v42  ;;  %7281 = vmatmul.mubr.f32.gmra.mrb[72].mxu0 %v14082_v34  ;;  %v6564_v59 = vand.u32 4294901760, %v6563_v39  ;;  %v6577_v46 = vand.u32 4294901760, %v14108_v19  ;;  %v6736_v20 = vand.u32 4294901760, %v6735_v2  ;;  %v15710_v39 = vld [vmem:[#allocation84_spill] sm:$0xff] }
 0xe30   :  { %7585 = vmatprep.mubr.bf16.mxu0 %v15698_v16  ;;  %v6584_v6 = vsub.f32 %v14101_v41, %v6583_v52  ;;  %v15711_v36 = vpack.c.bf16 %v15709_v57, %v15710_v39  ;;  %v15733_v39 = vld [vmem:[#allocation132_spill] sm:$0xff] }
 0xe31   :  { %6556 = vmatmul.mubr.f32.gmra.mrb[30].mxu1 %v6555_v30  ;;  %v6578_v4 = vsub.f32 %v14108_v19, %v6577_v46  ;;  %v15713_v30 = vld [vmem:[#allocation107_spill] sm:$0xff] }
 0xe32   :  { %9941 = vmatpush1.bf16.msra.mxu1 %v15699_v0  ;;  %6565 = vmatprep.mubr.f32.mxu1 %v6564_v59  ;;  %v6585_v61 = vand.u32 4294901760, %v6584_v6  ;;  %v15714_v59 = vpack.c.bf16 %v15712_v1, %v15713_v30  ;;  %v15716_v0 = vld [vmem:[#allocation108_spill] sm:$0xff]  ;;  %v15736_v30 = vld [vmem:[#allocation85_spill] sm:$0xff] }
 0xe33   :  { %9942 = vmatprep.subr.bf16.mxu1 %v15669_v42  ;;  %v6579_v25 = vand.u32 4294901760, %v6578_v4  ;;  %v15715_v4 = vld [vmem:[#allocation111_spill] sm:$0xff]  ;;  %v15719_v6 = vld [vmem:[#allocation112_spill] sm:$0xff] }
 0xe35   :  { %6571 = vmatmul.mubr.f32.gmra.mrb[32].mxu1 %v6570_v3  ;;  %v15717_v3 = vpack.c.bf16 %v15715_v4, %v15716_v0  ;;  %v15739_v4 = vld [vmem:[#allocation110_spill] sm:$0xff]  ;;  %v15740_v0 = vld [vmem:[#allocation76_spill] sm:$0xff] }
 0xe36   :  { %9944 = vmatpush1.bf16.msra.mxu1 %v15700_v58  ;;  %6580 = vmatprep.mubr.f32.mxu1 %v6579_v25  ;;  %v15718_v25 = vld [vmem:[#allocation26_spill] sm:$0xff] }
 0xe37   :  { %9945 = vmatprep.subr.bf16.mxu1 %v15669_v42  ;;  %v15720_v58 = vpack.c.bf16 %v15718_v25, %v15719_v6  ;;  %v15742_v25 = vld [vmem:[#allocation35_spill] sm:$0xff]  ;;  %v15743_v6 = vld [vmem:[#allocation124_spill] sm:$0xff] }
 0xe39   :  { %6586 = vmatmul.mubr.f32.gmra.mrb[34].mxu1 %v6585_v61  ;;  %v15721_v61 = vld [vmem:[#allocation28_spill] sm:$0xff] }
 0xe3a   :  { %9947 = vmatpush1.bf16.msra.mxu1 %v15701_v38  ;;  %6761 = vmatprep.mubr.f32.mxu1 %v13990_v40  ;;  %v15722_v38 = vld [vmem:[#allocation25_spill] sm:$0xff] }
 0xe3b   :  { %9948 = vmatprep.subr.bf16.mxu1 %v15669_v42 }
 0xe3e   :  { %9950 = vmatpush1.bf16.msra.mxu1 %v15702_v12  ;;  %v15723_v12 = vpack.c.bf16 %v15721_v61, %v15722_v38  ;;  %v15745_v61 = vld [vmem:[#allocation131_spill] sm:$0xff] }
 0xe3f   :  { %9951 = vmatprep.subr.bf16.mxu1 %v15669_v42 }
 0xe42   :  { %9953 = vmatpush1.bf16.msra.mxu1 %v15703_v37  ;;  %v15724_v37 = vld [vmem:[#allocation120_spill] sm:$0xff] }
 0xe43   :  { %9954 = vmatprep.subr.bf16.mxu1 %v15669_v42 }
 0xe46   :  { %9956 = vmatpush1.bf16.msra.mxu1 %v15704_v51  ;;  %v15725_v51 = vld [vmem:[#allocation117_spill] sm:$0xff] }
 0xe47   :  { %9957 = vmatprep.subr.bf16.mxu1 %v15669_v42  ;;  %v15726_v2 = vpack.c.bf16 %v15724_v37, %v15725_v51 }
 0xe4a   :  { %9959 = vmatpush1.bf16.msra.mxu1 %v15705_v32  ;;  %v15727_v32 = vld [vmem:[#allocation125_spill] sm:$0xff] }
 0xe4b   :  { %6731 = vmatprep.subr.mxu1 %v15682_v53 }
 0xe4e   :  { %6737 = vmatpush1.msra.mxu1 %v6736_v20  ;;  %v15728_v20 = vld [vmem:[#allocation121_spill] sm:$0xff] }
 0xe4f   :  { %6763 = vmatmul.mubr.f32.vlgmr.msra.gmra.mrb[36].mxu1 %v13982_v17  ;;  %9960 = vmatprep.subr.bf16.mxu1 %v15669_v42  ;;  %v15729_v8 = vpack.c.bf16 %v15727_v32, %v15728_v20 }
 0xe50   :  { %6768 = vmatprep.mubr.f32.mxu1 %v14002_v5  ;;  %9962 = vmatpush1.bf16.msra.mxu1 %v15708_v26  ;;  %v15731_v26 = vld [vmem:[#allocation126_spill] sm:$0xff] }
 0xe51   :  { %9963 = vmatprep.subr.bf16.mxu1 %v15669_v42  ;;  %v15732_v57 = vpack.c.bf16 %v15730_v63, %v15731_v26 }
 0xe53   :  { %6770 = vmatmul.mubr.f32.gmra.mrb[38].mxu1 %v13993_v14 }
 0xe54   :  { %6775 = vmatprep.mubr.f32.mxu1 %v14021_v50  ;;  %9965 = vmatpush1.bf16.msra.mxu1 %v15711_v36  ;;  %v15734_v36 = vld [vmem:[#allocation130_spill] sm:$0xff] }
 0xe55   :  { %9966 = vmatprep.subr.bf16.mxu1 %v15669_v42  ;;  %v15735_v1 = vpack.c.bf16 %v15733_v39, %v15734_v36 }
 0xe57   :  { %6777 = vmatmul.mubr.f32.gmra.mrb[40].mxu1 %v14013_v48 }
 0xe58   :  { %6782 = vmatprep.mubr.f32.mxu1 %v14041_v45  ;;  %9968 = vmatpush1.bf16.msra.mxu1 %v15714_v59  ;;  %v15737_v59 = vld [vmem:[#allocation105_spill] sm:$0xff] }
 0xe59   :  { %9969 = vmatprep.subr.bf16.mxu1 %v15669_v42 }
 0xe5b   :  { %6784 = vmatmul.mubr.f32.gmra.mrb[42].mxu1 %v14030_v55 }
 0xe5c   :  { %6789 = vmatprep.mubr.f32.mxu1 %v14062_v29  ;;  %9971 = vmatpush1.bf16.msra.mxu1 %v15717_v3  ;;  %v15741_v3 = vld [vmem:[#allocation116_spill] sm:$0xff] }
 0xe5d   :  { %9972 = vmatprep.subr.bf16.mxu1 %v15669_v42 }
 0xe5f   :  { %6791 = vmatmul.mubr.f32.gmra.mrb[44].mxu1 %v14053_v35 }
 0xe60   :  { %6796 = vmatprep.mubr.f32.mxu1 %v14094_v54  ;;  %9974 = vmatpush1.bf16.msra.mxu1 %v15720_v58  ;;  %v15744_v58 = vld [vmem:[#allocation38_spill] sm:$0xff] }
 0xe61   :  { %9975 = vmatprep.subr.bf16.mxu1 %v15669_v42 }
 0xe63   :  { %6798 = vmatmul.mubr.f32.gmra.mrb[46].mxu1 %v14082_v34 }
 0xe64   :  { %9977 = vmatpush1.bf16.msra.mxu1 %v15723_v12  ;;  %6911 = vmatprep.mubr.f32.mxu1 %v13998_v60 }
 0xe65   :  { %9978 = vmatprep.subr.bf16.mxu1 %v15669_v42 }
 0xe68   :  { %9980 = vmatpush1.bf16.msra.mxu1 %v15726_v2 }
 0xe69   :  { %9981 = vmatprep.subr.bf16.mxu1 %v15669_v42 }
 0xe6c   :  { %9983 = vmatpush1.bf16.msra.mxu1 %v15729_v8 }
 0xe6d   :  { %9984 = vmatprep.subr.bf16.mxu1 %v15669_v42 }
 0xe70   :  { %9986 = vmatpush1.bf16.msra.mxu1 %v15732_v57 }
 0xe71   :  { %9987 = vmatprep.subr.bf16.mxu1 %v15669_v42 }
 0xe74   :  { %9989 = vmatpush1.bf16.msra.mxu1 %v15735_v1 }
 0xe75   :  { %6883 = vmatprep.subr.mxu1 %v15682_v53 }
 0xe78   :  { %6886 = vmatpush1.msra.mxu1 %v13973_v23  ;;  %v15738_v23 = vld [vmem:[#allocation101_spill] sm:$0xff] }
 0xe79   :  { %6914 = vmatmul.mubr.f32.vlgmr.msra.gmra.mrb[48].mxu1 %v13986_v28  ;;  %9990 = vmatprep.subr.bf16.mxu1 %v15669_v42 }
 0xe7a   :  { %6920 = vmatprep.mubr.f32.mxu1 %v14024_v10  ;;  %9992 = vmatpush1.bf16.msra.mxu1 %v15736_v30 }
 0xe7b   :  { %9993 = vmatprep.subr.bf16.mxu1 %v15669_v42 }
 0xe7d   :  { %6923 = vmatmul.mubr.f32.gmra.mrb[50].mxu1 %v14010_v9 }
 0xe7e   :  { %6929 = vmatprep.mubr.f32.mxu1 %v14046_v44  ;;  %9995 = vmatpush1.bf16.msra.mxu1 %v15737_v59 }
 0xe7f   :  { %9996 = vmatprep.subr.bf16.mxu1 %v15669_v42 }
 0xe81   :  { %6932 = vmatmul.mubr.f32.gmra.mrb[52].mxu1 %v14051_v49 }
 0xe82   :  { %6938 = vmatprep.mubr.f32.mxu1 %v14058_v7  ;;  %9998 = vmatpush1.bf16.msra.mxu1 %v15738_v23 }
 0xe83   :  { %9999 = vmatprep.subr.bf16.mxu1 %v15669_v42 }
 0xe85   :  { %6941 = vmatmul.mubr.f32.gmra.mrb[54].mxu1 %v14066_v27 }
 0xe86   :  { %6947 = vmatprep.mubr.f32.mxu1 %v14085_v24  ;;  %10001 = vmatpush1.bf16.msra.mxu1 %v15739_v4 }
 0xe87   :  { %10002 = vmatprep.subr.bf16.mxu1 %v15669_v42 }
 0xe89   :  { %6950 = vmatmul.mubr.f32.gmra.mrb[56].mxu1 %v14074_v22 }
 0xe8a   :  { %6956 = vmatprep.mubr.f32.mxu1 %v14108_v19  ;;  %10004 = vmatpush1.bf16.msra.mxu1 %v15740_v0 }
 0xe8b   :  { %10005 = vmatprep.subr.bf16.mxu1 %v15669_v42 }
 0xe8d   :  { %6959 = vmatmul.mubr.f32.gmra.mrb[58].mxu1 %v14101_v41 }
 0xe8e   :  { %10007 = vmatpush1.bf16.msra.mxu1 %v15741_v3  ;;  %7052 = vmatprep.mubr.f32.mxu1 %v6502_v47 }
 0xe8f   :  { %10008 = vmatprep.subr.bf16.mxu1 %v15669_v42 }
 0xe92   :  { %10010 = vmatpush1.bf16.msra.mxu1 %v15742_v25 }
 0xe93   :  { %10011 = vmatprep.subr.bf16.mxu1 %v15669_v42 }
 0xe96   :  { %10013 = vmatpush1.bf16.msra.mxu1 %v15743_v6 }
 0xe97   :  { %10014 = vmatprep.subr.bf16.mxu1 %v15669_v42 }
 0xe9a   :  { %10016 = vmatpush1.bf16.msra.mxu1 %v15744_v58 }
 0xe9b   :  { %10017 = vmatprep.subr.bf16.mxu1 %v15669_v42 }
 0xe9e   :  { %10019 = vmatpush1.bf16.msra.mxu1 %v15745_v61 }
 0xe9f   :  { %7024 = vmatprep.subr.mxu1 %v15682_v53 }
 0xea2   :  { %7026 = vmatpush1.msra.mxu1 %v15679_v43 }
 0xea3   :  { %7056 = vmatmul.mubr.f32.vlgmr.msra.gmra.mrb[60].mxu1 %v6508_v15  ;;  %10050 = vmatprep.subr.bf16.mxu1 %v15669_v42 }
 0xea4   :  { %7063 = vmatprep.mubr.f32.mxu1 %v6517_v13  ;;  %10052 = vmatpush1.bf16.msra.mxu1 %v15736_v30 }
 0xea5   :  { %10053 = vmatprep.subr.bf16.mxu1 %v15669_v42 }
 0xea7   :  { %7067 = vmatmul.mubr.f32.gmra.mrb[62].mxu1 %v6523_v31 }
 0xea8   :  { %7074 = vmatprep.mubr.f32.mxu1 %v6532_v18  ;;  %10055 = vmatpush1.bf16.msra.mxu1 %v15737_v59 }
 0xea9   :  { %10056 = vmatprep.subr.bf16.mxu1 %v15669_v42 }
 0xeab   :  { %7078 = vmatmul.mubr.f32.gmra.mrb[64].mxu1 %v6538_v56 }
 0xeac   :  { %7085 = vmatprep.mubr.f32.mxu1 %v6547_v62  ;;  %10058 = vmatpush1.bf16.msra.mxu1 %v15738_v23 }
 0xead   :  { %10059 = vmatprep.subr.bf16.mxu1 %v15669_v42 }
 0xeaf   :  { %7089 = vmatmul.mubr.f32.gmra.mrb[66].mxu1 %v6553_v11 }
 0xeb0   :  { %7096 = vmatprep.mubr.f32.mxu1 %v6562_v21  ;;  %10061 = vmatpush1.bf16.msra.mxu1 %v15739_v4 }
 0xeb1   :  { %10062 = vmatprep.subr.bf16.mxu1 %v15669_v42 }
 0xeb3   :  { %7100 = vmatmul.mubr.f32.gmra.mrb[68].mxu1 %v6568_v33 }
 0xeb4   :  { %7107 = vmatprep.mubr.f32.mxu1 %v6577_v46  ;;  %10064 = vmatpush1.bf16.msra.mxu1 %v15740_v0 }
 0xeb5   :  { %10065 = vmatprep.subr.bf16.mxu1 %v15669_v42 }
 0xeb7   :  { %7111 = vmatmul.mubr.f32.gmra.mrb[70].mxu1 %v6583_v52 }
 0xeb8   :  { %10067 = vmatpush1.bf16.msra.mxu1 %v15741_v3  ;;  %7372 = vmatprep.mubr.f32.mxu1 %v13990_v40 }
 0xeb9   :  { %10068 = vmatprep.subr.bf16.mxu1 %v15669_v42 }
 0xebc   :  { %10070 = vmatpush1.bf16.msra.mxu1 %v15742_v25 }
 0xebd   :  { %10071 = vmatprep.subr.bf16.mxu1 %v15669_v42 }
 0xec0   :  { %10073 = vmatpush1.bf16.msra.mxu1 %v15743_v6 }
 0xec1   :  { %10074 = vmatprep.subr.bf16.mxu1 %v15669_v42 }
 0xec4   :  { %10076 = vmatpush1.bf16.msra.mxu1 %v15744_v58 }
 0xec5   :  { %10077 = vmatprep.subr.bf16.mxu1 %v15669_v42 }
 0xec8   :  { %10079 = vmatpush1.bf16.msra.mxu1 %v15745_v61 }
 0xec9   :  { %7346 = vmatprep.subr.mxu1 %v15682_v53 }
 0xecc   :  { %7348 = vmatpush1.msra.mxu1 %v15679_v43 }
 0xecd   :  { %7374 = vmatmul.mubr.f32.vlgmr.msra.gmra.mrb[72].mxu1 %v13982_v17 }
 0xece   :  { %7379 = vmatprep.mubr.f32.mxu1 %v14002_v5 }
 0xed1   :  { %7381 = vmatmul.mubr.f32.gmra.mrb[74].mxu1 %v13993_v14 }
 0xed2   :  { %7386 = vmatprep.mubr.f32.mxu1 %v14021_v50 }
 0xed5   :  { %7388 = vmatmul.mubr.f32.gmra.mrb[76].mxu1 %v14013_v48 }
 0xed6   :  { %7393 = vmatprep.mubr.f32.mxu1 %v14041_v45 }
 0xed9   :  { %7395 = vmatmul.mubr.f32.gmra.mrb[78].mxu1 %v14030_v55 }
 0xeda   :  { %7400 = vmatprep.mubr.f32.mxu1 %v14062_v29 }
 0xedd   :  { %7402 = vmatmul.mubr.f32.gmra.mrb[80].mxu1 %v14053_v35 }
 0xede   :  { %7407 = vmatprep.mubr.f32.mxu1 %v14094_v54 }
 0xee1   :  { %7409 = vmatmul.mubr.f32.gmra.mrb[82].mxu1 %v14082_v34 }
 0xeee   :  { %v14288_v42 = vpop.f32.mrb[62].mxu0 }
 0xeef   :  { %v7249_v43 = vpop.f32.mrb[63].mxu0 }
 0xef2   :  { %v14290_v53 = vpop.f32.mrb[64].mxu0 }
 0xef3   :  { %v7256_v17 = vpop.f32.mrb[65].mxu0 }
 0xef6   :  { %v6512_v28 = vpop.f32.mrb[24].mxu1  ;;  %v14292_v40 = vpop.f32.mrb[66].mxu0 }
 0xef7   :  { %v6514_v15 = vpop.f32.mrb[25].mxu1  ;;  %v7263_v14 = vpop.f32.mrb[67].mxu0 }
 0xefa   :  { %v14294_v60 = vpop.f32.mrb[68].mxu0 }
 0xefb   :  { %v6527_v5 = vpop.f32.mrb[26].mxu1  ;;  %v7270_v47 = vpop.f32.mrb[69].mxu0 }
 0xefc   :  { %v6529_v9 = vpop.f32.mrb[27].mxu1 }
 0xefe   :  { %v14296_v48 = vpop.f32.mrb[70].mxu0 }
 0xeff   :  { %v7277_v50 = vpop.f32.mrb[71].mxu0 }
 0xf00   :  { %v6542_v10 = vpop.f32.mrb[28].mxu1 }
 0xf01   :  { %v6544_v31 = vpop.f32.mrb[29].mxu1 }
 0xf02   :  { %v14298_v13 = vpop.f32.mrb[72].mxu0 }
 0xf03   :  { %v7284_v55 = vpop.f32.mrb[73].mxu0 }
 0xf04   :  { %v6557_v45 = vpop.f32.mrb[30].mxu1 }
 0xf05   :  { %v6559_v44 = vpop.f32.mrb[31].mxu1 }
 0xf08   :  { %v6572_v49 = vpop.f32.mrb[32].mxu1 }
 0xf09   :  { %v6574_v35 = vpop.f32.mrb[33].mxu1 }
 0xf0c   :  { %v6587_v18 = vpop.f32.mrb[34].mxu1 }
 0xf0d   :  { %v6589_v7 = vpop.f32.mrb[35].mxu1 }
 0xf22   :  { %v6764_v29 = vpop.f32.mrb[36].mxu1 }
 0xf23   :  { %v6765_v56 = vadd.f32 %v6764_v29, %v6512_v28  ;;  %v6766_v27 = vpop.f32.mrb[37].mxu1 }
 0xf26   :  { %v6771_v62 = vpop.f32.mrb[38].mxu1 }
 0xf27   :  { %v6772_v22 = vadd.f32 %v6771_v62, %v6527_v5  ;;  %v6773_v11 = vpop.f32.mrb[39].mxu1 }
 0xf2a   :  { %v6778_v34 = vpop.f32.mrb[40].mxu1 }
 0xf2b   :  { %v6779_v24 = vadd.f32 %v6778_v34, %v6542_v10  ;;  %v6780_v33 = vpop.f32.mrb[41].mxu1 }
 0xf2c   :  { %v15747_v33 = vld [vmem:[#allocation2_spill] sm:$0xff] }
 0xf2e   :  { %v6785_v54 = vpop.f32.mrb[42].mxu1 }
 0xf2f   :  { %v6786_v21 = vadd.f32 %v6785_v54, %v6557_v45  ;;  %v6787_v41 = vpop.f32.mrb[43].mxu1 }
 0xf32   :  { %v6792_v19 = vpop.f32.mrb[44].mxu1 }
 0xf33   :  { %v6793_v46 = vadd.f32 %v6792_v19, %v6572_v49  ;;  %v6794_v52 = vpop.f32.mrb[45].mxu1  ;;  %v15748_v19 = vld [vmem:[#allocation4_spill] sm:$0xff] }
 0xf36   :  { %v6799_v38 = vpop.f32.mrb[46].mxu1 }
 0xf37   :  { %v6800_v12 = vadd.f32 %v6799_v38, %v6587_v18  ;;  %v6801_v37 = vpop.f32.mrb[47].mxu1 }
 0xf4c   :  { %v6915_v51 = vpop.f32.mrb[48].mxu1 }
 0xf4d   :  { %v6916_v2 = vadd.f32 %v6915_v51, %v6765_v56  ;;  %v6917_v32 = vpop.f32.mrb[49].mxu1  ;;  %v15749_v51 = vld [vmem:[#allocation5_spill] sm:$0xff] }
 0xf50   :  { %v6924_v20 = vpop.f32.mrb[50].mxu1 }
 0xf51   :  { %v6925_v8 = vadd.f32 %v6924_v20, %v6772_v22  ;;  %v6926_v63 = vpop.f32.mrb[51].mxu1  ;;  %v15746_v22 = vld [vmem:[#allocation3_spill] sm:$0xff] }
 0xf54   :  { %v6933_v26 = vpop.f32.mrb[52].mxu1 }
 0xf55   :  { %v6934_v57 = vadd.f32 %v6933_v26, %v6779_v24  ;;  %v6935_v39 = vpop.f32.mrb[53].mxu1  ;;  %v15750_v26 = vld [vmem:[#allocation6_spill] sm:$0xff] }
 0xf58   :  { %v6942_v36 = vpop.f32.mrb[54].mxu1 }
 0xf59   :  { %v6943_v1 = vadd.f32 %v6942_v36, %v6786_v21  ;;  %v6944_v30 = vpop.f32.mrb[55].mxu1 }
 0xf5c   :  { %v6951_v59 = vpop.f32.mrb[56].mxu1 }
 0xf5d   :  { %v6952_v23 = vadd.f32 %v6951_v59, %v6793_v46  ;;  %v6953_v4 = vpop.f32.mrb[57].mxu1  ;;  %v15752_v59 = vld [vmem:[#allocation7_spill] sm:$0xff] }
 0xf60   :  { %v6960_v0 = vpop.f32.mrb[58].mxu1 }
 0xf61   :  { %v6961_v3 = vadd.f32 %v6960_v0, %v6800_v12  ;;  %v6962_v25 = vpop.f32.mrb[59].mxu1 }
 0xf76   :  { %v7057_v6 = vpop.f32.mrb[60].mxu1 }
 0xf77   :  { %v7058_v58 = vadd.f32 %v7057_v6, %v6916_v2  ;;  %v7059_v61 = vpop.f32.mrb[61].mxu1 }
 0xf79   :  { %v7248_v43 = vadd.f32 %v14288_v42, %v7058_v58 }
 0xf7a   :  { %v7068_v17 = vpop.f32.mrb[62].mxu1 }
 0xf7b   :  { %v7069_v28 = vadd.f32 %v7068_v17, %v6925_v8  ;;  %v7070_v15 = vpop.f32.mrb[63].mxu1 }
 0xf7d   :  { %v7255_v14 = vadd.f32 %v14290_v53, %v7069_v28 }
 0xf7e   :  { %v7079_v5 = vpop.f32.mrb[64].mxu1 }
 0xf7f   :  { %v7080_v47 = vadd.f32 %v7079_v5, %v6934_v57  ;;  %v7081_v9 = vpop.f32.mrb[65].mxu1 }
 0xf81   :  { %v7262_v50 = vadd.f32 %v14292_v40, %v7080_v47 }
 0xf82   :  { %v7090_v10 = vpop.f32.mrb[66].mxu1 }
 0xf83   :  { %v7091_v31 = vadd.f32 %v7090_v10, %v6943_v1  ;;  %v7092_v55 = vpop.f32.mrb[67].mxu1 }
 0xf85   :  { %v7269_v45 = vadd.f32 %v14294_v60, %v7091_v31 }
 0xf86   :  { %v7101_v44 = vpop.f32.mrb[68].mxu1 }
 0xf87   :  { %v7102_v49 = vadd.f32 %v7101_v44, %v6952_v23  ;;  %v7103_v35 = vpop.f32.mrb[69].mxu1 }
 0xf89   :  { %v7276_v42 = vadd.f32 %v14296_v48, %v7102_v49 }
 0xf8a   :  { %v7112_v18 = vpop.f32.mrb[70].mxu1 }
 0xf8b   :  { %v7113_v7 = vadd.f32 %v7112_v18, %v6961_v3  ;;  %v7114_v29 = vpop.f32.mrb[71].mxu1 }
 0xf8d   :  { %v7283_v53 = vadd.f32 %v14298_v13, %v7113_v7 }
 0xfa0   :  { %v7375_v56 = vpop.f32.mrb[72].mxu1 }
 0xfa1   :  { %v7376_v27 = vadd.f32 %v7375_v56, %v7248_v43  ;;  %v7377_v62 = vpop.f32.mrb[73].mxu1 }
 0xfa3   :  { %v14307_v40 = vadd.f32 %v7376_v27, %v15746_v22  ;;  %v7517_v22 = vld [vmem:[%s14753_s1 + $0x10] sm:$0xff] }
 0xfa4   :  { %v7382_v11 = vpop.f32.mrb[74].mxu1 }
 0xfa5   :  { %v7383_v34 = vadd.f32 %v7382_v11, %v7255_v14  ;;  %v7384_v24 = vpop.f32.mrb[75].mxu1  ;;  %v7420_v60 = vsel %vm24_vm0, %v14307_v40, 0.0  ;;  %v7519_v11 = vld [vmem:[%s14753_s1 + $0x28] sm:$0xff] }
 0xfa6   :  { %7421 = vadd.xlane.f32.xlu1 %v7420_v60  ;;  %v7525_v24 = vpack.c.bf16 %v7519_v11, %v7517_v22  ;;  %v7518_v60 = vld [vmem:[%s14753_s1 + $0x20] sm:$0xff] }
 0xfa7   :  { %v14312_v48 = vadd.f32 %v7383_v34, %v15747_v33  ;;  %v7516_v34 = vld [vmem:[%s14753_s1 + $0x8] sm:$0xff] }
 0xfa8   :  { %v7389_v54 = vpop.f32.mrb[76].mxu1  ;;  %v7524_v33 = vpack.c.bf16 %v7518_v60, %v7516_v34  ;;  %7553 = vmatprep.subr.bf16.mxu0 %v7525_v24 }
 0xfa9   :  { %v7390_v21 = vadd.f32 %v7389_v54, %v7262_v50  ;;  %v7391_v41 = vpop.f32.mrb[77].mxu1  ;;  %v7423_v13 = vsel %vm24_vm0, %v14312_v48, 0.0  ;;  %v7521_v54 = vld [vmem:[%s14753_s1 + $0x40] sm:$0xff] }
 0xfaa   :  { %7424 = vadd.xlane.f32.xlu0 %v7423_v13  ;;  %7554 = vmatpush1.bf16.msra.mxu0 %v7524_v33  ;;  %v7520_v41 = vld [vmem:[%s14753_s1 + $0x38] sm:$0xff]  ;;  %v10491_v33 = vld [vmem:[%s14754_s2] sm:$0xff]  }
 0xfab   :  { %v14317_v46 = vadd.f32 %v7390_v21, %v15748_v19  ;;  %v7523_v21 = vld [vmem:[%s14753_s1 + $0x58] sm:$0xff]  ;;  %v7522_v19 = vld [vmem:[%s14753_s1 + $0x50] sm:$0xff] }
 0xfac   :  { %v7396_v52 = vpop.f32.mrb[78].mxu1  ;;  %v7527_v13 = vpack.c.bf16 %v7523_v21, %v7521_v54  ;;  %v10494_v54 = vld [vmem:[%s14754_s2 + $0x50] sm:$0xff]  }
 0xfad   :  { %v7397_v38 = vadd.f32 %v7396_v52, %v7269_v45  ;;  %v7398_v12 = vpop.f32.mrb[79].mxu1  ;;  %v7426_v37 = vsel %vm24_vm0, %v14317_v46, 0.0  ;;  %v7526_v52 = vpack.c.bf16 %v7522_v19, %v7520_v41  ;;  %v10495_v21 = vld [vmem:[%s14754_s2 + $0x10] sm:$0xff]   ;;  %v10496_v41 = vld [vmem:[%s14754_s2 + $0x58] sm:$0xff]   ;;  %v10498_v19 = vld [vmem:[%s14754_s2 + $0x60] sm:$0xff]  }
 0xfae   :  { %7427 = vadd.xlane.f32.xlu0 %v7426_v37  ;;  %7555 = vmatprep.subr.bf16.mxu0 %v7527_v13  ;;  %v10497_v13 = vld [vmem:[%s14754_s2 + $0x18] sm:$0xff]  }
 0xfaf   :  { %v14322_v2 = vadd.f32 %v7397_v38, %v15749_v51  ;;  %v10651_v38 = vld [vmem:[%s14752_s3] ss:$0 sm:$0xff]  ;;  %7556 = vmatpush1.bf16.msra.mxu0 %v7526_v52 }
 0xfb0   :  { %v7403_v32 = vpop.f32.mrb[80].mxu1  ;;  %v10499_v52 = vld [vmem:[%s14754_s2 + $0x20] sm:$0xff]  }
 0xfb1   :  { %v7404_v20 = vadd.f32 %v7403_v32, %v7276_v42  ;;  %v7405_v8 = vpop.f32.mrb[81].mxu1  ;;  %v7429_v63 = vsel %vm24_vm0, %v14322_v2, 0.0 }
 0xfb2   :  { %7430 = vadd.xlane.f32.xlu1 %v7429_v63 }
 0xfb3   :  { %v14327_v57 = vadd.f32 %v7404_v20, %v15750_v26 }
 0xfb4   :  { %v7410_v39 = vpop.f32.mrb[82].mxu1 }
 0xfb5   :  { %15751 = vst [vmem:[#allocation8_spill] sm:$0xff] %v14327_v57  ;;  %v7411_v36 = vadd.f32 %v7410_v39, %v7283_v53  ;;  %v7412_v1 = vpop.f32.mrb[83].mxu1  ;;  %v7432_v30 = vsel %vm24_vm0, %v14327_v57, 0.0 }
 0xfb6   :  { %7433 = vadd.xlane.f32.xlu0 %v7432_v30 }
 0xfb7   :  { %v14332_v23 = vadd.f32 %v7411_v36, %v15752_v59 }
 0xfb9   :  { %15753 = vst [vmem:[#allocation36_spill] sm:$0xff] %v14332_v23  ;;  %v7435_v4 = vsel %vm40_vm1, %v14332_v23, 0.0 }
 0xfba   :  { %7436 = vadd.xlane.f32.xlu1 %v7435_v4 }
0x1033   :  { %v7422_v0 = vpop.xlane.xlu1 %7421 }
0x1034   :  { %v7438_v3 = vmul.f32 0.03125, %v7422_v0 }
0x1036   :  { %v14337_v25 = vsub.f32 %v14307_v40, %v7438_v3 }
0x1037   :  { %v7425_v6 = vpop.xlane.xlu0 %7424 }
0x1038   :  { %v7439_v58 = vmul.f32 0.03125, %v7425_v6  ;;  %v7450_v61 = vmul.f32 %v14337_v25, %v14337_v25 }
0x103a   :  { %v14342_v43 = vsub.f32 %v14312_v48, %v7439_v58  ;;  %v7456_v17 = vsel %vm24_vm0, %v7450_v61, 0.0 }
0x103b   :  { %v7428_v28 = vpop.xlane.xlu0 %7427  ;;  %7457 = vadd.xlane.f32.xlu0 %v7456_v17 }
0x103c   :  { %v7440_v15 = vmul.f32 0.03125, %v7428_v28  ;;  %v7451_v14 = vmul.f32 %v14342_v43, %v14342_v43 }
0x103e   :  { %v14348_v5 = vsub.f32 %v14317_v46, %v7440_v15  ;;  %v7459_v47 = vsel %vm24_vm0, %v7451_v14, 0.0 }
0x103f   :  { %7460 = vadd.xlane.f32.xlu1 %v7459_v47  ;;  %v7431_v9 = vpop.xlane.xlu1 %7430 }
0x1040   :  { %v7441_v50 = vmul.f32 0.03125, %v7431_v9  ;;  %v7452_v10 = vmul.f32 %v14348_v5, %v14348_v5 }
0x1042   :  { %v14354_v31 = vsub.f32 %v14322_v2, %v7441_v50  ;;  %v7462_v55 = vsel %vm24_vm0, %v7452_v10, 0.0 }
0x1043   :  { %v7434_v45 = vpop.xlane.xlu0 %7433  ;;  %7463 = vadd.xlane.f32.xlu0 %v7462_v55 }
0x1044   :  { %v7442_v44 = vmul.f32 0.03125, %v7434_v45  ;;  %v7453_v49 = vmul.f32 %v14354_v31, %v14354_v31 }
0x1046   :  { %v14360_v35 = vsub.f32 %v14327_v57, %v7442_v44  ;;  %v7465_v42 = vsel %vm24_vm0, %v7453_v49, 0.0 }
0x1047   :  { %7466 = vadd.xlane.f32.xlu1 %v7465_v42  ;;  %v7437_v18 = vpop.xlane.xlu1 %7436 }
0x1048   :  { %v7443_v7 = vmul.f32 0.03125, %v7437_v18  ;;  %v7454_v29 = vmul.f32 %v14360_v35, %v14360_v35 }
0x104a   :  { %v14366_v53 = vsub.f32 %v14332_v23, %v7443_v7  ;;  %v7468_v56 = vsel %vm24_vm0, %v7454_v29, 0.0 }
0x104b   :  { %7469 = vadd.xlane.f32.xlu0 %v7468_v56 }
0x104c   :  { %v7455_v27 = vmul.f32 %v14366_v53, %v14366_v53 }
0x104e   :  { %v7471_v62 = vsel %vm40_vm1, %v7455_v27, 0.0 }
0x104f   :  { %7472 = vadd.xlane.f32.xlu1 %v7471_v62 }
0x1060   :  { %7507 = vrot.lane.b32.xlu1 %v10651_v38, %s10657_s29 }
0x1061   :  { %7498 = vrot.lane.b32.xlu0 %v10651_v38, %s10658_s30  ;;  %v10500_v38 = vld [vmem:[%s14754_s2 + $0x68] sm:$0xff]  }
0x10c8   :  { %v7458_v12 = vpop.xlane.xlu0 %7457 }
0x10c9   :  { %v7474_v37 = vmul.f32 0.03125, %v7458_v12  ;;  %v10501_v12 = vld [vmem:[%s14754_s2 + $0x28] sm:$0xff]  }
0x10cb   :  { %v7480_v51 = vadd.f32 1e-05, %v7474_v37  ;;  %v10502_v37 = vld [vmem:[%s14754_s2 + $0x70] sm:$0xff]  }
0x10cc   :  { %v7461_v32 = vpop.xlane.xlu1 %7460 }
0x10cd   :  { %v7475_v20 = vmul.f32 0.03125, %v7461_v32  ;;  %10590 = vrsqrt.f32 %v7480_v51  ;;  %v10503_v51 = vld [vmem:[%s14754_s2 + $0x30] sm:$0xff]   ;;  %v10504_v32 = vld [vmem:[%s14754_s2 + $0x78] sm:$0xff]  }
0x10cf   :  { %v7481_v8 = vadd.f32 1e-05, %v7475_v20  ;;  %v10505_v20 = vld [vmem:[%s14754_s2 + $0x38] sm:$0xff]  }
0x10d0   :  { %v7464_v63 = vpop.xlane.xlu0 %7463 }
0x10d1   :  { %10592 = vrsqrt.f32 %v7481_v8  ;;  %v7476_v26 = vmul.f32 0.03125, %v7464_v63  ;;  %v7534_v8 = vlaneseq }
0x10d3   :  { %v7482_v39 = vadd.f32 1e-05, %v7476_v26  ;;  %v7535_v63 = vshrl.u32 %v7534_v8, 7 }
0x10d4   :  { %v7467_v36 = vpop.xlane.xlu1 %7466 }
0x10d5   :  { %10594 = vrsqrt.f32 %v7482_v39  ;;  %v7477_v1 = vmul.f32 0.03125, %v7467_v36  ;;  %v7536_v26 = vsub.s32 0, %v7535_v63  ;;  %v8190_v39 = vld [vmem:[%s14752_s3 + $0x1] ss:$8 sm:$0x3]  ;;  %v7540_v36 = vsub.s32 1, %v7535_v63 }
0x10d7   :  { %v7483_v30 = vadd.f32 1e-05, %v7477_v1  ;;  %v10591_v0 = vpop.eup %10590  ;;  %v14461_v1 = vrot.slane %v8190_v39, %v7536_v26 }
0x10d8   :  { %v7470_v59 = vpop.xlane.xlu0 %7469  ;;  %v7492_v28 = vmul.f32 %v10591_v0, %v14337_v25 }
0x10d9   :  { %10596 = vrsqrt.f32 %v7483_v30  ;;  %v7478_v4 = vmul.f32 0.03125, %v7470_v59  ;;  %v14463_v30 = vrot.slane %v8190_v39, %v7540_v36 }
0x10db   :  { %v10593_v3 = vpop.eup %10592  ;;  %v7484_v6 = vadd.f32 1e-05, %v7478_v4 }
0x10dc   :  { %v7499_v58 = vpop.permute.xlu0 %7498  ;;  %v7493_v61 = vmul.f32 %v10593_v3, %v14342_v43  ;;  %v7473_v17 = vpop.xlane.xlu1 %7472 }
0x10dd   :  { %10598 = vrsqrt.f32 %v7484_v6  ;;  %v7479_v15 = vmul.f32 0.03125, %v7473_v17  ;;  %v7501_v9 = vmul.f32 %v7499_v58, %v7492_v28 }
0x10de   :  { %v7502_v14 = vmul.f32 %v7499_v58, %v7493_v61 }
0x10df   :  { %v10595_v47 = vpop.eup %10594  ;;  %v7485_v50 = vadd.f32 1e-05, %v7479_v15 }
0x10e0   :  { %v7494_v10 = vmul.f32 %v10595_v47, %v14348_v5  ;;  %v7508_v55 = vpop.permute.xlu1 %7507 }
0x10e1   :  { %10600 = vrsqrt.f32 %v7485_v50  ;;  %v7510_v45 = vadd.f32 %v7508_v55, %v7501_v9  ;;  %v7511_v44 = vadd.f32 %v7508_v55, %v7502_v14 }
0x10e2   :  { %v7503_v43 = vmul.f32 %v7499_v58, %v7494_v10 }
0x10e3   :  { %v10597_v49 = vpop.eup %10596  ;;  %v7528_v42 = vpack.c.bf16 %v7511_v44, %v7510_v45 }
0x10e4   :  { %v7495_v18 = vmul.f32 %v10597_v49, %v14354_v31  ;;  %v7512_v56 = vadd.f32 %v7508_v55, %v7503_v43 }
0x10e5   :  { %8191 = vmatmul.mubr.msk.bf16.vlgmr.msra.gmra.mrb[76].mxu0 %vm24_vm0, %v7528_v42 }
0x10e6   :  { %v7504_v7 = vmul.f32 %v7499_v58, %v7495_v18  ;;  %7595 = vmatprep.mubr.bf16.mxu0 %v15698_v16 }
0x10e7   :  { %v10599_v25 = vpop.eup %10598 }
0x10e8   :  { %v7496_v29 = vmul.f32 %v10599_v25, %v14360_v35  ;;  %v7513_v27 = vadd.f32 %v7508_v55, %v7504_v7  ;;  %v10490_v35 = vld [vmem:[%s14754_s2 + $0x40] sm:$0xff]  }
0x10e9   :  { %8528 = vmatprep.subr.bf16.mxu1 %v10490_v35 }
0x10ea   :  { %v7529_v5 = vpack.c.bf16 %v7513_v27, %v7512_v56  ;;  %v7505_v22 = vmul.f32 %v7499_v58, %v7496_v29  ;;  %8529 = vmatpush3.bf16.msra.mxu1 %v10491_v33 }
0x10eb   :  { %v10601_v62 = vpop.eup %10600 }
0x10ec   :  { %v7497_v11 = vmul.f32 %v10601_v62, %v14366_v53  ;;  %v7514_v31 = vadd.f32 %v7508_v55, %v7505_v22  ;;  %v10492_v53 = vld [vmem:[%s14754_s2 + $0x48] sm:$0xff]  }
0x10ed   :  { %8192 = vmatmul.mubr.msk.bf16.gmra.mrb[80].mxu0 %vm24_vm0, %v7529_v5  ;;  %8530 = vmatprep.subr.bf16.mxu1 %v10492_v53 }
0x10ee   :  { %v7506_v34 = vmul.f32 %v7499_v58, %v7497_v11  ;;  %7605 = vmatprep.mubr.bf16.mxu0 %v15698_v16  ;;  %v10493_v16 = vld [vmem:[%s14754_s2 + $0x8] sm:$0xff]  }
0x10ef   :  { %8531 = vmatpush3.bf16.msra.mxu1 %v10493_v16 }
0x10f0   :  { %v7515_v24 = vadd.f32 %v7508_v55, %v7506_v34  ;;  %8532 = vmatprep.subr.bf16.mxu1 %v10494_v54 }
0x10f2   :  { %v7530_v60 = vpack.c.bf16 %v7515_v24, %v7514_v31 }
0x10f3   :  { %8533 = vmatpush3.bf16.msra.mxu1 %v10495_v21 }
0x10f4   :  { %8534 = vmatprep.subr.bf16.mxu1 %v10496_v41 }
0x10f5   :  { %8193 = vmatmul.mubr.msk.bf16.gmra.mrb[84].mxu0 %vm24_vm0, %v7530_v60 }
0x10f7   :  { %8535 = vmatpush3.bf16.msra.mxu1 %v10497_v13 }
0x10f8   :  { %8536 = vmatprep.subr.bf16.mxu1 %v10498_v19 }
0x10fb   :  { %8537 = vmatpush3.bf16.msra.mxu1 %v10499_v52 }
0x10fc   :  { %8538 = vmatprep.subr.bf16.mxu1 %v10500_v38 }
0x10ff   :  { %8539 = vmatpush3.bf16.msra.mxu1 %v10501_v12 }
0x1100   :  { %8540 = vmatprep.subr.bf16.mxu1 %v10502_v37 }
0x1103   :  { %8541 = vmatpush3.bf16.msra.mxu1 %v10503_v51 }
0x1104   :  { %8542 = vmatprep.subr.bf16.mxu1 %v10504_v32 }
0x1107   :  { %8543 = vmatpush3.bf16.msra.mxu1 %v10505_v20 }
0x11b8   :  { %v7587_v59 = vpop.f32.mrb[76].mxu0 }
0x11b9   :  { %v7588_v4 = vadd.f32 %v7587_v59, %v14461_v1  ;;  %v7589_v0 = vpop.f32.mrb[77].mxu0 }
0x11ba   :  { %v7590_v3 = vadd.f32 %v7589_v0, %v14463_v30  ;;  %v7591_v6 = vpop.f32.mrb[78].mxu0 }
0x11bb   :  { %v14467_v58 = vmul.f32 0.70710677, %v7588_v4  ;;  %v7592_v61 = vadd.f32 %v7591_v6, %v14461_v1  ;;  %v7593_v17 = vpop.f32.mrb[79].mxu0  ;;  %v14509_v19 = vmul.f32 0.5, %v7588_v4 }
0x11bc   :  { %v14470_v28 = vmul.f32 0.70710677, %v7590_v3  ;;  %v14476_v47 = vadd.f32 %v7593_v17, %v14463_v30  ;;  %v14512_v52 = vmul.f32 0.5, %v7590_v3 }
0x11bd   :  { %v7664_v15 = vand.u32 2147483647, %v14467_v58  ;;  %v14473_v14 = vmul.f32 0.70710677, %v7592_v61  ;;  %vm7640_vm8 = vcmp.ge.f32.partialorder %v14467_v58, 0.0  ;;  %v14517_v32 = vmul.f32 0.5, %v7592_v61 }
0x11be   :  { %v7665_v9 = vand.u32 2147483647, %v14470_v28  ;;  %v14481_v44 = vmul.f32 0.70710677, %v14476_v47  ;;  %vm7641_vm9 = vcmp.ge.f32.partialorder %v14470_v28, 0.0 }
0x11bf   :  { %v7676_v50 = vmul.f32 0.3275911, %v7664_v15  ;;  %v7666_v55 = vand.u32 2147483647, %v14473_v14  ;;  %v7856_v29 = vsub.f32 0.0, %v7664_v15  ;;  %vm7642_vm10 = vcmp.ge.f32.partialorder %v14473_v14, 0.0 }
0x11c0   :  { %v7677_v10 = vmul.f32 0.3275911, %v7665_v9  ;;  %v7597_v49 = vpop.f32.mrb[80].mxu0  ;;  %v7667_v7 = vand.u32 2147483647, %v14481_v44  ;;  %v7857_v24 = vsub.f32 0.0, %v7665_v9 }
0x11c1   :  { %v7688_v45 = vadd.f32 1.0, %v7676_v50  ;;  %v7678_v18 = vmul.f32 0.3275911, %v7666_v55  ;;  %v7599_v43 = vpop.f32.mrb[81].mxu0  ;;  %v14485_v62 = vadd.f32 %v7597_v49, %v14461_v1  ;;  %v7868_v31 = vmul.f32 %v7856_v29, %v7664_v15 }
0x11c2   :  { %v7689_v42 = vadd.f32 1.0, %v7677_v10  ;;  %v7601_v25 = vpop.f32.mrb[82].mxu0  ;;  %v7679_v5 = vmul.f32 0.3275911, %v7667_v7  ;;  %v14488_v22 = vadd.f32 %v7599_v43, %v14463_v30  ;;  %v7858_v33 = vsub.f32 0.0, %v7666_v55 }
0x11c3   :  { %10602 = vrcp.f32 %v7688_v45  ;;  %v7690_v56 = vadd.f32 1.0, %v7678_v18  ;;  %v7603_v27 = vpop.f32.mrb[83].mxu0  ;;  %v14491_v34 = vadd.f32 %v7601_v25, %v14461_v1  ;;  %v14494_v60 = vmul.f32 0.70710677, %v14485_v62 }
0x11c4   :  { %10604 = vrcp.f32 %v7689_v42  ;;  %v7691_v11 = vadd.f32 1.0, %v7679_v5  ;;  %v14499_v53 = vmul.f32 0.70710677, %v14488_v22  ;;  %v7859_v54 = vsub.f32 0.0, %v7667_v7 }
0x11c5   :  { %10606 = vrcp.f32 %v7690_v56  ;;  %v7668_v21 = vand.u32 2147483647, %v14494_v60  ;;  %v14505_v41 = vmul.f32 0.70710677, %v14491_v34  ;;  %v7880_v37 = vmul.f32 1.442695, %v7868_v31 }
0x11c6   :  { %10608 = vrcp.f32 %v7691_v11  ;;  %v7669_v38 = vand.u32 2147483647, %v14499_v53  ;;  %v7869_v51 = vmul.f32 %v7857_v24, %v7665_v9  ;;  %v7870_v63 = vmul.f32 %v7858_v33, %v7666_v55 }
0x11c7   :  { %v7680_v20 = vmul.f32 0.3275911, %v7668_v21  ;;  %v7860_v26 = vsub.f32 0.0, %v7668_v21  ;;  %v14520_v36 = vand.u32 2147483647, %v14505_v41  ;;  %v7871_v0 = vmul.f32 %v7859_v54, %v7667_v7 }
0x11c8   :  { %v14496_v35 = vpop.f32.mrb[84].mxu0  ;;  %v7681_v39 = vmul.f32 0.3275911, %v7669_v38  ;;  %v7861_v6 = vsub.f32 0.0, %v7669_v38  ;;  %v14524_v61 = vadd.f32 %v7603_v27, %v14463_v30  ;;  %v7882_v10 = vmul.f32 1.442695, %v7869_v51 }
0x11c9   :  { %v14501_v16 = vpop.f32.mrb[85].mxu0  ;;  %v7692_v3 = vadd.f32 1.0, %v7680_v20  ;;  %v7682_v50 = vmul.f32 0.3275911, %v14520_v36  ;;  %v7872_v18 = vmul.f32 %v7860_v26, %v7668_v21  ;;  %v7884_v27 = vmul.f32 1.442695, %v7870_v63 }
0x11ca   :  { %v14507_v13 = vpop.f32.mrb[86].mxu0  ;;  %v7693_v15 = vadd.f32 1.0, %v7681_v39  ;;  %v7873_v7 = vmul.f32 %v7861_v6, %v7669_v38  ;;  %v7886_v5 = vmul.f32 1.442695, %v7871_v0  ;;  %v14534_v31 = vmul.f32 0.70710677, %v14524_v61 }
0x11cb   :  { %v14515_v12 = vpop.f32.mrb[87].mxu0  ;;  %10610 = vrcp.f32 %v7692_v3  ;;  %v15116_v21 = vmov -1.0   ;;  %v7862_v6 = vsub.f32 0.0, %v14520_v36  ;;  %vm7643_vm11 = vcmp.ge.f32.partialorder %v14481_v44, 0.0 }
0x11cc   :  { %10612 = vrcp.f32 %v7693_v15  ;;  %v7890_v63 = vmul.f32 1.442695, %v7873_v7  ;;  %v14552_v58 = vand.u32 2147483647, %v14534_v31  ;;  %v14567_v7 = vadd.f32 %v14496_v35, %v14461_v1 }
0x11cd   :  { %v10603_v8 = vpop.eup %10602  ;;  %10614 = vpow2.f32 %v7880_v37  ;;  %v7888_v37 = vmul.f32 1.442695, %v7872_v18  ;;  %vm7644_vm12 = vcmp.ge.f32.partialorder %v14494_v60, 0.0  ;;  %vm7646_vm13 = vcmp.ge.f32.partialorder %v14505_v41, 0.0 }
0x11ce   :  { %v10605_v59 = vpop.eup %10604  ;;  %v7712_v4 = vmul.f32 %v10603_v8, %v7688_v45  ;;  %v14527_v45 = vadd.f32 1.0, %v7682_v50  ;;  %v7683_v28 = vmul.f32 0.3275911, %v14552_v58  ;;  %vm7645_vm14 = vcmp.ge.f32.partialorder %v14499_v53, 0.0 }
0x11cf   :  { %v7713_v17 = vmul.f32 %v10605_v59, %v7689_v42  ;;  %v10607_v55 = vpop.eup %10606  ;;  %vm7647_vm15 = vcmp.ge.f32.partialorder %v14534_v31, 0.0 }
0x11d0   :  { %v7724_v9 = vsub.f32 2.0, %v7712_v4  ;;  %v7714_v42 = vmul.f32 %v10607_v55, %v7690_v56  ;;  %v10609_v25 = vpop.eup %10608  ;;  %10616 = vrcp.f32 %v14527_v45  ;;  %v14541_v56 = vsel %vm7640_vm8, 1.0, %v15116_v21 }
0x11d1   :  { %v7725_v49 = vsub.f32 2.0, %v7713_v17  ;;  %v7715_v54 = vmul.f32 %v10609_v25, %v7691_v11  ;;  %10618 = vpow2.f32 %v7882_v10  ;;  %v14549_v11 = vsel %vm7641_vm9, 1.0, %v15116_v21 }
0x11d2   :  { %v14529_v43 = vmul.f32 %v10603_v8, %v7724_v9  ;;  %v7726_v33 = vsub.f32 2.0, %v7714_v42  ;;  %10620 = vpow2.f32 %v7884_v27  ;;  %v14563_v42 = vadd.f32 1.0, %v7683_v28 }
0x11d3   :  { %v14531_v29 = vmul.f32 %v10605_v59, %v7725_v49  ;;  %v7727_v8 = vsub.f32 2.0, %v7715_v54  ;;  %10622 = vpow2.f32 %v7886_v5 }
0x11d4   :  { %v7748_v24 = vmul.f32 1.0614054, %v14529_v43  ;;  %v14544_v20 = vmul.f32 %v10607_v55, %v7726_v33  ;;  %10624 = vpow2.f32 %v7888_v37  ;;  %v7874_v37 = vmul.f32 %v7862_v6, %v14520_v36 }
0x11d5   :  { %v7749_v38 = vmul.f32 1.0614054, %v14531_v29  ;;  %v14556_v4 = vmul.f32 %v10609_v25, %v7727_v8  ;;  %v10611_v17 = vpop.eup %10610  ;;  %10626 = vpow2.f32 %v7890_v63 }
0x11d6   :  { %v7760_v51 = vadd.f32 -1.4531521, %v7748_v24  ;;  %v7750_v59 = vmul.f32 1.0614054, %v14544_v20  ;;  %v10613_v55 = vpop.eup %10612  ;;  %v7716_v18 = vmul.f32 %v10611_v17, %v7692_v3  ;;  %10628 = vrcp.f32 %v14563_v42 }
0x11d7   :  { %v7761_v26 = vadd.f32 -1.4531521, %v7749_v38  ;;  %v7751_v10 = vmul.f32 1.0614054, %v14556_v4  ;;  %v10615_v25 = vpop.eup %10614  ;;  %v7717_v33 = vmul.f32 %v10613_v55, %v7693_v15  ;;  %v14579_v15 = vmul.f32 0.70710677, %v14567_v7 }
0x11d8   :  { %v7772_v39 = vmul.f32 %v7760_v51, %v14529_v43  ;;  %v7762_v9 = vadd.f32 -1.4531521, %v7750_v59  ;;  %v7728_v38 = vsub.f32 2.0, %v7716_v18 }
0x11d9   :  { %v7773_v0 = vmul.f32 %v7761_v26, %v14531_v29  ;;  %v7763_v24 = vadd.f32 -1.4531521, %v7751_v10  ;;  %v7729_v63 = vsub.f32 2.0, %v7717_v33  ;;  %vm7648_vm2 = vcmp.ge.f32.partialorder %v14579_v15, 0.0 }
0x11da   :  { %v7784_v50 = vadd.f32 1.4214138, %v7772_v39  ;;  %v7774_v5 = vmul.f32 %v7762_v9, %v14544_v20  ;;  %v10617_v3 = vpop.eup %10616  ;;  %v14575_v59 = vmul.f32 %v10611_v17, %v7728_v38  ;;  %v7892_v17 = vmul.f32 1.442695, %v7874_v37 }
0x11db   :  { %v7785_v49 = vadd.f32 1.4214138, %v7773_v0  ;;  %v7775_v35 = vmul.f32 %v7763_v24, %v14556_v4  ;;  %v10619_v26 = vpop.eup %10618  ;;  %v7718_v0 = vmul.f32 %v10617_v3, %v14527_v45 }
0x11dc   :  { %v7796_v27 = vmul.f32 %v7784_v50, %v14529_v43  ;;  %v7786_v8 = vadd.f32 1.4214138, %v7774_v5  ;;  %v14583_v50 = vmul.f32 %v10613_v55, %v7729_v63  ;;  %v10621_v9 = vpop.eup %10620  ;;  %10630 = vpow2.f32 %v7892_v17 }
0x11dd   :  { %v7797_v54 = vmul.f32 %v7785_v49, %v14531_v29  ;;  %v7787_v6 = vadd.f32 1.4214138, %v7775_v35  ;;  %v7752_v49 = vmul.f32 1.0614054, %v14575_v59  ;;  %v7730_v18 = vsub.f32 2.0, %v7718_v0 }
0x11de   :  { %v7808_v51 = vadd.f32 -0.28449672, %v7796_v27  ;;  %v7798_v36 = vmul.f32 %v7786_v8, %v14544_v20  ;;  %v10623_v27 = vpop.eup %10622  ;;  %v7753_v33 = vmul.f32 1.0614054, %v14583_v50  ;;  %v14594_v8 = vand.u32 2147483647, %v14579_v15 }
0x11df   :  { %v7809_v39 = vadd.f32 -0.28449672, %v7797_v54  ;;  %v7799_v24 = vmul.f32 %v7787_v6, %v14556_v4  ;;  %v14589_v54 = vpop.eup %10624  ;;  %v14591_v55 = vmul.f32 %v10617_v3, %v7730_v18 }
0x11e0   :  { %v7820_v28 = vmul.f32 %v7808_v51, %v14529_v43  ;;  %v7810_v45 = vadd.f32 -0.28449672, %v7798_v36  ;;  %v7764_v51 = vadd.f32 -1.4531521, %v7752_v49  ;;  %v14596_v35 = vpop.eup %10626  ;;  %v7765_v0 = vadd.f32 -1.4531521, %v7753_v33 }
0x11e1   :  { %v7821_v10 = vmul.f32 %v7809_v39, %v14531_v29  ;;  %v7811_v39 = vadd.f32 -0.28449672, %v7799_v24  ;;  %v7754_v3 = vmul.f32 1.0614054, %v14591_v55  ;;  %v7684_v14 = vmul.f32 0.3275911, %v14594_v8 }
0x11e2   :  { %v7832_v5 = vadd.f32 0.2548296, %v7820_v28  ;;  %v7822_v63 = vmul.f32 %v7810_v45, %v14544_v20  ;;  %v7654_v28 = vsel %vm7642_vm10, 1.0, %v15116_v21  ;;  %v7776_v36 = vmul.f32 %v7764_v51, %v14575_v59 }
0x11e3   :  { %v7833_v38 = vadd.f32 0.2548296, %v7821_v10  ;;  %v7823_v49 = vmul.f32 %v7811_v39, %v14556_v4  ;;  %v7777_v18 = vmul.f32 %v7765_v0, %v14583_v50  ;;  %v7766_v24 = vadd.f32 -1.4531521, %v7754_v3 }
0x11e4   :  { %v7844_v37 = vmul.f32 %v7832_v5, %v14529_v43  ;;  %v7834_v10 = vadd.f32 0.2548296, %v7822_v63  ;;  %v10629_v43 = vpop.eup %10628  ;;  %v7788_v45 = vadd.f32 1.4214138, %v7776_v36  ;;  %v7696_v23 = vadd.f32 1.0, %v7684_v14 }
0x11e5   :  { %v7845_v5 = vmul.f32 %v7833_v38, %v14531_v29  ;;  %v7835_v21 = vadd.f32 0.2548296, %v7823_v49  ;;  %v7789_v17 = vadd.f32 1.4214138, %v7777_v18  ;;  %v7719_v63 = vmul.f32 %v10629_v43, %v14563_v42 }
0x11e6   :  { %v7904_v6 = vmul.f32 %v10615_v25, %v7844_v37  ;;  %v7846_v51 = vmul.f32 %v7834_v10, %v14544_v20  ;;  %v7800_v25 = vmul.f32 %v7788_v45, %v14575_v59  ;;  %v7778_v37 = vmul.f32 %v7766_v24, %v14591_v55 }
0x11e7   :  { %v7863_v29 = vsub.f32 0.0, %v14552_v58  ;;  %v7847_v0 = vmul.f32 %v7835_v21, %v14556_v4  ;;  %v7801_v36 = vmul.f32 %v7789_v17, %v14583_v50  ;;  %v7905_v20 = vmul.f32 %v10619_v26, %v7845_v5  ;;  %v10631_v5 = vpop.eup %10630 }
0x11e8   :  { %v7916_v33 = vsub.f32 1.0, %v7904_v6  ;;  %v7906_v39 = vmul.f32 %v10621_v9, %v7846_v51  ;;  %v7812_v3 = vadd.f32 -0.28449672, %v7800_v25  ;;  %v7790_v6 = vadd.f32 1.4214138, %v7778_v37 }
0x11e9   :  { %v7731_v10 = vsub.f32 2.0, %v7719_v63  ;;  %v7907_v18 = vmul.f32 %v10623_v27, %v7847_v0  ;;  %v7813_v45 = vadd.f32 -0.28449672, %v7801_v36  ;;  %v7917_v17 = vsub.f32 1.0, %v7905_v20 }
0x11ea   :  { %v7928_v38 = vmul.f32 %v7916_v33, %v14541_v56  ;;  %v7918_v49 = vsub.f32 1.0, %v7906_v39  ;;  %v7824_v24 = vmul.f32 %v7812_v3, %v14575_v59  ;;  %v7802_v42 = vmul.f32 %v7790_v6, %v14591_v55 }
0x11eb   :  { %v14621_v57 = vmul.f32 %v10629_v43, %v7731_v10  ;;  %v7875_v56 = vmul.f32 %v7863_v29, %v14552_v58  ;;  %v7919_v4 = vsub.f32 1.0, %v7907_v18  ;;  %v7825_v26 = vmul.f32 %v7813_v45, %v14583_v50 }
0x11ec   :  { %v7940_v9 = vadd.f32 1.0, %v7928_v38  ;;  %v7930_v21 = vmul.f32 %v7918_v49, %v7654_v28  ;;  %v7836_v33 = vadd.f32 0.2548296, %v7824_v24  ;;  %v7814_v51 = vadd.f32 -0.28449672, %v7802_v42 }
0x11ed   :  { %v7755_v27 = vmul.f32 1.0614054, %v14621_v57  ;;  %10632 = vrcp.f32 %v7696_v23  ;;  %v14628_v25 = vadd.f32 %v14501_v16, %v14463_v30  ;;  %v7837_v58 = vadd.f32 0.2548296, %v7825_v26 }
0x11ee   :  { %v7942_v14 = vadd.f32 1.0, %v7930_v21  ;;  %v7848_v43 = vmul.f32 %v7836_v33, %v14575_v59  ;;  %v7826_v28 = vmul.f32 %v7814_v51, %v14591_v55  ;;  %v14633_v63 = vmul.f32 %v7940_v9, %v14509_v19 }
0x11ef   :  { %v7767_v37 = vadd.f32 -1.4531521, %v7755_v27  ;;  %v15754_v38 = vmov -1.0   ;;  %v7894_v0 = vmul.f32 1.442695, %v7875_v56  ;;  %v7929_v3 = vmul.f32 %v7917_v17, %v14549_v11 }
0x11f0   :  { %v14636_v29 = vmul.f32 %v7942_v14, %v14517_v32  ;;  %v7655_v39 = vsel %vm7643_vm11, 1.0, %v15754_v38  ;;  %v7908_v16 = vmul.f32 %v14589_v54, %v7848_v43  ;;  %v7838_v20 = vadd.f32 0.2548296, %v7826_v28 }
0x11f1   :  { %v7931_v36 = vmul.f32 %v7919_v4, %v7655_v39  ;;  %v7779_v59 = vmul.f32 %v7767_v37, %v14621_v57  ;;  %v7656_v32 = vsel %vm7644_vm12, 1.0, %v15754_v38  ;;  %v14650_v6 = vmul.f32 0.70710677, %v14628_v25 }
0x11f2   :  { %v7964_v19 = vpack.c.bf16 %v14636_v29, %v14633_v63  ;;  %v7920_v44 = vsub.f32 1.0, %v7908_v16  ;;  %v7849_v10 = vmul.f32 %v7837_v58, %v14583_v50  ;;  %v7850_v54 = vmul.f32 %v7838_v20, %v14591_v55 }
0x11f3   :  { %v7791_v49 = vadd.f32 1.4214138, %v7779_v59  ;;  %10634 = vpow2.f32 %v7894_v0  ;;  %v14656_v11 = vand.u32 2147483647, %v14650_v6  ;;  %v14660_v18 = vadd.f32 %v14507_v13, %v14461_v1 }
0x11f4   :  { %v7943_v60 = vadd.f32 1.0, %v7931_v36  ;;  %v7932_v45 = vmul.f32 %v7920_v44, %v7656_v32  ;;  %v7910_v24 = vmul.f32 %v10631_v5, %v7850_v54  ;;  %v7941_v56 = vadd.f32 1.0, %v7929_v3 }
0x11f5   :  { %v7803_v42 = vmul.f32 %v7791_v49, %v14621_v57  ;;  %v7619_v50 = vmul.f32 0.5, %v14476_v47  ;;  %v7620_v55 = vmul.f32 0.5, %v14485_v62  ;;  %v7685_v41 = vmul.f32 0.3275911, %v14656_v11 }
0x11f6   :  { %v7909_v9 = vmul.f32 %v14596_v35, %v7849_v10  ;;  %v7658_v21 = vsel %vm7646_vm13, 1.0, %v15754_v38  ;;  %v7922_v4 = vsub.f32 1.0, %v7910_v24  ;;  %v7944_v13 = vadd.f32 1.0, %v7932_v45 }
0x11f7   :  { %v7815_v26 = vadd.f32 -0.28449672, %v7803_v42  ;;  %v10633_v1 = vpop.eup %10632  ;;  %v7697_v33 = vadd.f32 1.0, %v7685_v41  ;;  %v14669_v5 = vmul.f32 0.70710677, %v14660_v18  ;;  %v14673_v51 = vadd.f32 %v14515_v12, %v14463_v30 }
0x11f8   :  { %v7955_v47 = vmul.f32 %v7943_v60, %v7619_v50  ;;  %v7934_v62 = vmul.f32 %v7922_v4, %v7658_v21  ;;  %v7720_v17 = vmul.f32 %v10633_v1, %v7696_v23  ;;  %v7953_v35 = vmul.f32 %v7941_v56, %v14512_v52 }
0x11f9   :  { %v7827_v27 = vmul.f32 %v7815_v26, %v14621_v57  ;;  %v7622_v14 = vmul.f32 0.5, %v14491_v34  ;;  %10636 = vrcp.f32 %v7697_v33  ;;  %v7921_v43 = vsub.f32 1.0, %v7909_v9 }
0x11fa   :  { %v7946_v58 = vadd.f32 1.0, %v7934_v62  ;;  %v7732_v37 = vsub.f32 2.0, %v7720_v17  ;;  %v7956_v63 = vmul.f32 %v7944_v13, %v7620_v55  ;;  %v14680_v30 = vand.u32 2147483647, %v14669_v5 }
0x11fb   :  { %v7839_v28 = vadd.f32 0.2548296, %v7827_v27  ;;  %v14683_v12 = vmul.f32 0.70710677, %v14673_v51  ;;  %v7965_v53 = vpack.c.bf16 %v7955_v47, %v7953_v35  ;;  %v7657_v34 = vsel %vm7645_vm14, 1.0, %v15754_v38 }
0x11fc   :  { %v7958_v29 = vmul.f32 %v7946_v58, %v7622_v14  ;;  %v14686_v52 = vmul.f32 %v10633_v1, %v7732_v37  ;;  %v7686_v0 = vmul.f32 0.3275911, %v14680_v30  ;;  %v7933_v16 = vmul.f32 %v7921_v43, %v7657_v34 }
0x11fd   :  { %v7851_v23 = vmul.f32 %v7839_v28, %v14621_v57  ;;  %v10635_v39 = vpop.eup %10634  ;;  %v7675_v36 = vand.u32 2147483647, %v14683_v12  ;;  %8131 = vmatprep.mubr.bf16.mxu1 %v7965_v53  ;;  %v7659_v54 = vsel %vm7647_vm15, 1.0, %v15754_v38  ;;  %v7621_v42 = vmul.f32 0.5, %v14488_v22 }
0x11fe   :  { %v7756_v59 = vmul.f32 1.0614054, %v14686_v52  ;;  %v7966_v3 = vpack.c.bf16 %v7958_v29, %v7956_v63  ;;  %v7698_v32 = vadd.f32 1.0, %v7686_v0  ;;  %8132 = vmatmul.mubr.bf16.vlgmr.msra.gmra.mrb[84].mxu1 %v7964_v19  ;;  %v7945_v31 = vadd.f32 1.0, %v7933_v16 }
0x11ff   :  { %v7911_v20 = vmul.f32 %v10635_v39, %v7851_v23  ;;  %v7687_v57 = vmul.f32 0.3275911, %v7675_v36  ;;  %v7623_v56 = vmul.f32 0.5, %v14524_v61  ;;  %v7864_v19 = vsub.f32 0.0, %v14594_v8 }
0x1200   :  { %v7768_v10 = vadd.f32 -1.4531521, %v7756_v59  ;;  %10638 = vrcp.f32 %v7698_v32  ;;  %v7957_v9 = vmul.f32 %v7945_v31, %v7621_v42  ;;  %v7865_v26 = vsub.f32 0.0, %v14656_v11 }
0x1201   :  { %v7923_v44 = vsub.f32 1.0, %v7911_v20  ;;  %v7699_v49 = vadd.f32 1.0, %v7687_v57  ;;  %v7876_v62 = vmul.f32 %v7864_v19, %v14594_v8  ;;  %v7866_v43 = vsub.f32 0.0, %v14680_v30 }
0x1202   :  { %v7780_v45 = vmul.f32 %v7768_v10, %v14686_v52  ;;  %v7877_v27 = vmul.f32 %v7865_v26, %v14656_v11  ;;  %v7867_v39 = vsub.f32 0.0, %v7675_v36  ;;  %vm7649_vm3 = vcmp.ge.f32.partialorder %v14650_v6, 0.0 }
0x1203   :  { %v7935_v60 = vmul.f32 %v7923_v44, %v7659_v54  ;;  %v10637_v24 = vpop.eup %10636  ;;  %10640 = vrcp.f32 %v7699_v49  ;;  %v7896_v14 = vmul.f32 1.442695, %v7876_v62  ;;  %v7878_v11 = vmul.f32 %v7866_v43, %v14680_v30 }
0x1204   :  { %v7792_v55 = vadd.f32 1.4214138, %v7780_v45  ;;  %v7721_v41 = vmul.f32 %v10637_v24, %v7697_v33  ;;  %v7898_v63 = vmul.f32 1.442695, %v7877_v27  ;;  %v7879_v57 = vmul.f32 %v7867_v39, %v7675_v36 }
0x1205   :  { %v7947_v50 = vadd.f32 1.0, %v7935_v60  ;;  %10642 = vpow2.f32 %v7896_v14  ;;  %v7900_v44 = vmul.f32 1.442695, %v7878_v11  ;;  %v7660_v27 = vsel %vm7648_vm2, 1.0, %v15754_v38 }
0x1206   :  { %v7733_v4 = vsub.f32 2.0, %v7721_v41  ;;  %v7804_v1 = vmul.f32 %v7792_v55, %v14686_v52  ;;  %10644 = vpow2.f32 %v7898_v63  ;;  %v7902_v42 = vmul.f32 1.442695, %v7879_v57 }
0x1207   :  { %v7959_v21 = vmul.f32 %v7947_v50, %v7623_v56  ;;  %10646 = vpow2.f32 %v7900_v44  ;;  %vm7650_vm4 = vcmp.ge.f32.partialorder %v14669_v5, 0.0  ;;  %vm7651_vm5 = vcmp.ge.f32.partialorder %v14683_v12, 0.0 }
0x1208   :  { %v7745_v13 = vmul.f32 %v10637_v24, %v7733_v4  ;;  %v7816_v33 = vadd.f32 -0.28449672, %v7804_v1  ;;  %10648 = vpow2.f32 %v7902_v42  ;;  %v7663_v39 = vsel %vm7651_vm5, 1.0, %v15754_v38 }
0x1209   :  { %v7967_v47 = vpack.c.bf16 %v7959_v21, %v7957_v9 }
0x120a   :  { %v7757_v22 = vmul.f32 1.0614054, %v7745_v13  ;;  %v10639_v61 = vpop.eup %10638  ;;  %v7828_v23 = vmul.f32 %v7816_v33, %v14686_v52 }
0x120b   :  { %8139 = vmatprep.mubr.bf16.mxu1 %v7967_v47  ;;  %v7722_v35 = vmul.f32 %v10639_v61, %v7698_v32 }
0x120c   :  { %8140 = vmatmul.mubr.bf16.gmra.mrb[88].mxu1 %v7966_v3  ;;  %v7769_v17 = vadd.f32 -1.4531521, %v7757_v22  ;;  %v7840_v59 = vadd.f32 0.2548296, %v7828_v23 }
0x120d   :  { %v10641_v58 = vpop.eup %10640  ;;  %v7734_v37 = vsub.f32 2.0, %v7722_v35 }
0x120e   :  { %v7781_v28 = vmul.f32 %v7769_v17, %v7745_v13  ;;  %v7723_v29 = vmul.f32 %v10641_v58, %v7699_v49  ;;  %v7852_v60 = vmul.f32 %v7840_v59, %v14686_v52  ;;  %v7627_v59 = vmul.f32 0.5, %v14673_v51 }
0x120f   :  { %v7746_v53 = vmul.f32 %v10639_v61, %v7734_v37  ;;  %v10643_v50 = vpop.eup %10642  ;;  %v7662_v37 = vsel %vm7650_vm4, 1.0, %v15754_v38 }
0x1210   :  { %v7793_v8 = vadd.f32 1.4214138, %v7781_v28  ;;  %v7735_v34 = vsub.f32 2.0, %v7723_v29  ;;  %v7912_v19 = vmul.f32 %v10643_v50, %v7852_v60  ;;  %v10645_v36 = vpop.eup %10644 }
0x1211   :  { %v7758_v16 = vmul.f32 1.0614054, %v7746_v53  ;;  %v10647_v61 = vpop.eup %10646 }
0x1212   :  { %v7805_v0 = vmul.f32 %v7793_v8, %v7745_v13  ;;  %v7747_v20 = vmul.f32 %v10641_v58, %v7735_v34  ;;  %v7924_v52 = vsub.f32 1.0, %v7912_v19  ;;  %v10649_v43 = vpop.eup %10648  ;;  %v7661_v58 = vsel %vm7649_vm3, 1.0, %v15754_v38  ;;  %v8002_v38 = vld [vmem:[%s14752_s3 + $0x8] ss:$0 sm:$0xff] }
0x1213   :  { %v7770_v32 = vadd.f32 -1.4531521, %v7758_v16  ;;  %v7624_v8 = vmul.f32 0.5, %v14567_v7 }
0x1214   :  { %v7817_v3 = vadd.f32 -0.28449672, %v7805_v0  ;;  %v7759_v10 = vmul.f32 1.0614054, %v7747_v20  ;;  %v7936_v17 = vmul.f32 %v7924_v52, %v7660_v27  ;;  %v15755_v52 = vld [vmem:[#allocation8_spill] sm:$0xff] }
0x1215   :  { %v7782_v49 = vmul.f32 %v7770_v32, %v7746_v53 }
0x1216   :  { %v7829_v54 = vmul.f32 %v7817_v3, %v7745_v13  ;;  %v7771_v31 = vadd.f32 -1.4531521, %v7759_v10  ;;  %v7948_v29 = vadd.f32 1.0, %v7936_v17 }
0x1217   :  { %v7794_v24 = vadd.f32 1.4214138, %v7782_v49 }
0x1218   :  { %v7841_v45 = vadd.f32 0.2548296, %v7829_v54  ;;  %v7783_v30 = vmul.f32 %v7771_v31, %v7747_v20  ;;  %v7960_v0 = vmul.f32 %v7948_v29, %v7624_v8 }
0x1219   :  { %v7806_v56 = vmul.f32 %v7794_v24, %v7746_v53 }
0x121a   :  { %v7853_v55 = vmul.f32 %v7841_v45, %v7745_v13  ;;  %v7795_v41 = vadd.f32 1.4214138, %v7783_v30 }
0x121b   :  { %v7818_v9 = vadd.f32 -0.28449672, %v7806_v56 }
0x121c   :  { %v7807_v21 = vmul.f32 %v7795_v41, %v7747_v20  ;;  %v7913_v26 = vmul.f32 %v10645_v36, %v7853_v55 }
0x121d   :  { %v7830_v4 = vmul.f32 %v7818_v9, %v7746_v53 }
0x121e   :  { %v7819_v1 = vadd.f32 -0.28449672, %v7807_v21  ;;  %v7925_v13 = vsub.f32 1.0, %v7913_v26 }
0x121f   :  { %v7842_v47 = vadd.f32 0.2548296, %v7830_v4 }
0x1220   :  { %v7831_v62 = vmul.f32 %v7819_v1, %v7747_v20  ;;  %v7937_v28 = vmul.f32 %v7925_v13, %v7661_v58 }
0x1221   :  { %v7854_v22 = vmul.f32 %v7842_v47, %v7746_v53  ;;  %v7626_v53 = vmul.f32 0.5, %v14660_v18 }
0x1222   :  { %v7843_v33 = vadd.f32 0.2548296, %v7831_v62  ;;  %v7949_v11 = vadd.f32 1.0, %v7937_v28 }
0x1223   :  { %v7914_v35 = vmul.f32 %v10647_v61, %v7854_v22 }
0x1224   :  { %v7855_v14 = vmul.f32 %v7843_v33, %v7747_v20  ;;  %v7625_v20 = vmul.f32 0.5, %v14628_v25 }
0x1225   :  { %v7926_v15 = vsub.f32 1.0, %v7914_v35 }
0x1226   :  { %v7915_v63 = vmul.f32 %v10649_v43, %v7855_v14  ;;  %v7961_v32 = vmul.f32 %v7949_v11, %v7625_v20 }
0x1227   :  { %v7938_v23 = vmul.f32 %v7926_v15, %v7662_v37 }
0x1228   :  { %v7927_v6 = vsub.f32 1.0, %v7915_v63 }
0x1229   :  { %v7950_v5 = vadd.f32 1.0, %v7938_v23 }
0x122a   :  { %v7939_v34 = vmul.f32 %v7927_v6, %v7663_v39 }
0x122b   :  { %v7962_v16 = vmul.f32 %v7950_v5, %v7626_v53 }
0x122c   :  { %v7951_v12 = vadd.f32 1.0, %v7939_v34 }
0x122d   :  { %v7968_v3 = vpack.c.bf16 %v7962_v16, %v7960_v0 }
0x122e   :  { %v7963_v57 = vmul.f32 %v7951_v12, %v7627_v59 }
0x1230   :  { %v7969_v44 = vpack.c.bf16 %v7963_v57, %v7961_v32 }
0x1232   :  { %8147 = vmatprep.mubr.bf16.mxu1 %v7969_v44 }
0x1233   :  { %8148 = vmatmul.mubr.bf16.gmra.mrb[92].mxu1 %v7968_v3 }
0x12d1   :  { %v8544_v7 = vpop.f32.mrb[84].mxu1 }
0x12d2   :  { %v8545_v18 = vpop.f32.mrb[85].mxu1 }
0x12d3   :  { %v8546_v10 = vadd.f32 %v8545_v18, %v8544_v7  ;;  %v8547_v54 = vpop.f32.mrb[86].mxu1 }
0x12d4   :  { %v8548_v49 = vpop.f32.mrb[87].mxu1 }
0x12d5   :  { %v8134_v31 = vadd.f32 %v8546_v10, %v8002_v38  ;;  %v8549_v25 = vadd.f32 %v8548_v49, %v8547_v54 }
0x12d7   :  { %v8156_v51 = vadd.f32 %v8134_v31, %v14307_v40  ;;  %v8137_v60 = vadd.f32 %v8549_v25, %v8002_v38 }
0x12d9   :  { %8162 = vst.msk [vmem:[%s14755_s4] sm:$0xff] %vm24_vm0, %v8156_v51  ;;  %v8157_v45 = vadd.f32 %v8137_v60, %v14312_v48 }
0x12db   :  { %8163 = vst.msk [vmem:[%s14755_s4 + $0x8] sm:$0xff] %vm24_vm0, %v8157_v45 }
0x12df   :  { %v8550_v24 = vpop.f32.mrb[88].mxu1 }
0x12e0   :  { %v8551_v42 = vpop.f32.mrb[89].mxu1 }
0x12e1   :  { %v8552_v30 = vadd.f32 %v8551_v42, %v8550_v24  ;;  %v8553_v56 = vpop.f32.mrb[90].mxu1 }
0x12e2   :  { %v8554_v50 = vpop.f32.mrb[91].mxu1 }
0x12e3   :  { %v8142_v55 = vadd.f32 %v8552_v30, %v8002_v38  ;;  %v8555_v40 = vadd.f32 %v8554_v50, %v8553_v56 }
0x12e5   :  { %v8158_v41 = vadd.f32 %v8142_v55, %v14317_v46  ;;  %v8145_v19 = vadd.f32 %v8555_v40, %v8002_v38 }
0x12e7   :  { %8164 = vst.msk [vmem:[%s14755_s4 + $0x10] sm:$0xff] %vm24_vm0, %v8158_v41  ;;  %v8159_v48 = vadd.f32 %v8145_v19, %v14322_v2  ;;  %v15756_v2 = vld [vmem:[#allocation36_spill] sm:$0xff] }
0x12e9   :  { %8165 = vst.msk [vmem:[%s14755_s4 + $0x18] sm:$0xff] %vm24_vm0, %v8159_v48 }
0x1306   :  { %v8556_v9 = vpop.f32.mrb[92].mxu1 }
0x1307   :  { %v8557_v36 = vpop.f32.mrb[93].mxu1 }
0x1308   :  { %v8558_v21 = vadd.f32 %v8557_v36, %v8556_v9  ;;  %v8559_v4 = vpop.f32.mrb[94].mxu1 }
0x1309   :  { %v8560_v26 = vpop.f32.mrb[95].mxu1 }
0x130a   :  { %v8150_v1 = vadd.f32 %v8558_v21, %v8002_v38  ;;  %v8561_v46 = vadd.f32 %v8560_v26, %v8559_v4 }
0x130c   :  { %v8160_v47 = vadd.f32 %v8150_v1, %v15755_v52  ;;  %v8153_v62 = vadd.f32 %v8561_v46, %v8002_v38 }
0x130e   :  { %8166 = vst.msk [vmem:[%s14755_s4 + $0x20] sm:$0xff] %vm24_vm0, %v8160_v47  ;;  %v8161_v22 = vadd.f32 %v8153_v62, %v15756_v2 }
0x1310   :  { %8167 = vst.msk [vmem:[%s14755_s4 + $0x28] sm:$0x3] %vm40_vm1, %v8161_v22 }

</bundles_post_ra>
